<compile_context>
chip_gen: v7x
topology: tpu7x:2x2x1
jax: 0.10.0
libtpu: 0.0.40
codegen_flags: <defaults>
</compile_context>

<pallas_src>
import functools
import math

import numpy as np
import jax
import jax.numpy as jnp
from jax.experimental import pallas as pl
from jax.experimental.pallas import tpu as pltpu

CFG = [64, 64, 'M', 128, 128, 'M', 256, 256, 256, 'M',
       512, 512, 512, 'M', 512, 512, 512, 'M']
BN_EPS = 1e-5
COUT_TILE = 256      # Cout tile for the 512-wide layers (2.25 MiB bf16 weight block)
FC3_PAD = 128        # lane-dense fc3 output, sliced back to num_classes outside


def _pf_rows(h, w):
    # "padded-flat" layout: spatial zero pad of 1, rows flattened (h, w)-major,
    # plus one extra zero row at each end so every 3x3 tap is one contiguous slice.
    return (h + 2) * (w + 2) + 2


# ---------------------------------------------------------------------------
# Fused conv3x3 + BN(eval) + ReLU (+ optional 2x2 maxpool) kernel
# ---------------------------------------------------------------------------
def _conv_kernel(x_ref, w_ref, scale_ref, shift_ref, *rest, H, W, pool, final):
    """One image x one Cout tile.

    x_ref  : (1, (H+2)*(W+2)+2, Cin)  bf16  padded-flat input (zeros at pad rows)
    w_ref  : (9, Cin, TC)             bf16  tap-major weights
    scale_ref / shift_ref : (1, TC)   f32   folded BatchNorm affine
    output : padded-flat layout for the next conv layer, or dense (Ho*Wo, TC)
             rows when `final` (feeds the classifier).
    """
    Wp = W + 2
    M = H * Wp
    tc = w_ref.shape[-1]
    if pool:
        o_ref, y_scr = rest
    else:
        mask_ref, o_ref = rest

    acc = jnp.zeros((M, tc), jnp.float32)
    for di in range(3):
        for dj in range(3):
            xt = x_ref[0, pl.ds(di * Wp + dj, M), :]          # (M, Cin)  bf16
            wt = w_ref[di * 3 + dj]                           # (Cin, TC) bf16
            acc = acc + jnp.dot(xt, wt, preferred_element_type=jnp.float32)

    y = acc * scale_ref[...] + shift_ref[...]                 # folded BN (eval)
    y = jnp.maximum(y, 0.0)                                   # ReLU

    if not pool:
        # Zero the W-border columns (they are the zero padding the next conv
        # reads) and drop the result straight into padded-flat form.
        y = y * mask_ref[...]
        zeros = jnp.zeros((Wp + 1, tc), o_ref.dtype)
        o_ref[0, pl.ds(0, Wp + 1), :] = zeros
        o_ref[0, pl.ds(Wp + 1, M), :] = y.astype(o_ref.dtype)
        o_ref[0, pl.ds(Wp + 1 + M, Wp + 1), :] = zeros
    else:
        # 2x2 / stride-2 maxpool fused into the epilogue, written straight into
        # the next layer's padded-flat layout (or densely when final).
        y_scr[...] = y
        Ho, Wo = H // 2, W // 2
        Wop = Wo + 2
        if not final:
            o_ref[...] = jnp.zeros(o_ref.shape, o_ref.dtype)
        for i in range(Ho):
            r0 = 2 * i * Wp
            a = y_scr[pl.ds(r0 + 1, Wo, stride=2), :]
            b = y_scr[pl.ds(r0 + 2, Wo, stride=2), :]
            c = y_scr[pl.ds(r0 + Wp + 1, Wo, stride=2), :]
            d = y_scr[pl.ds(r0 + Wp + 2, Wo, stride=2), :]
            p = jnp.maximum(jnp.maximum(a, b), jnp.maximum(c, d))
            dst = i * Wo if final else (i + 1) * Wop + 2
            o_ref[0, pl.ds(dst, Wo), :] = p.astype(o_ref.dtype)


def conv_bn_relu_pool(x_pf, w, scale, shift, mask, *, H, W, pool, final):
    N, rows_in, cin = x_pf.shape
    cout = w.shape[-1]
    Wp = W + 2
    M = H * Wp
    assert rows_in == _pf_rows(H, W)
    Ho, Wo = (H // 2, W // 2) if pool else (H, W)
    rows_out = Ho * Wo if final else _pf_rows(Ho, Wo)
    tc = min(cout, COUT_TILE)
    # Cout tiles outer, batch inner: the weight block is reused across the inner
    # batch iterations (no redundant weight DMA).
    grid = (cout // tc, N)

    in_specs = [
        pl.BlockSpec((1, rows_in, cin), lambda j, n: (n, 0, 0)),
        pl.BlockSpec((9, cin, tc), lambda j, n: (0, 0, j)),
        pl.BlockSpec((1, tc), lambda j, n: (0, j)),
        pl.BlockSpec((1, tc), lambda j, n: (0, j)),
    ]
    args = [x_pf, w, scale, shift]
    scratch = []
    if pool:
        scratch.append(pltpu.VMEM((M, tc), jnp.float32))
    else:
        in_specs.append(pl.BlockSpec((M, 1), lambda j, n: (0, 0)))
        args.append(mask)

    return pl.pallas_call(
        functools.partial(_conv_kernel, H=H, W=W, pool=pool, final=final),
        out_shape=jax.ShapeDtypeStruct((N, rows_out, cout), jnp.bfloat16),
        grid=grid,
        in_specs=in_specs,
        out_specs=pl.BlockSpec((1, rows_out, tc), lambda j, n: (n, 0, j)),
        scratch_shapes=scratch,
        compiler_params=pltpu.CompilerParams(
            dimension_semantics=("parallel", "parallel")),
    )(*args)


# ---------------------------------------------------------------------------
# Fused classifier: Linear-ReLU-[Dropout]-Linear-ReLU-Linear in one kernel
# ---------------------------------------------------------------------------
def _classifier_kernel(x_ref, w1_ref, b1_ref, w2_ref, b2_ref, w3_ref, b3_ref,
                       o_ref):
    h = jnp.dot(x_ref[...], w1_ref[...], preferred_element_type=jnp.float32)
    h = jnp.maximum(h + b1_ref[...], 0.0).astype(jnp.bfloat16)
    # TODO(synk): Dropout(0.5) is the identity in this eval-mode forward.
    h = jnp.dot(h, w2_ref[...], preferred_element_type=jnp.float32)
    h = jnp.maximum(h + b2_ref[...], 0.0).astype(jnp.bfloat16)
    y = jnp.dot(h, w3_ref[...], preferred_element_type=jnp.float32)
    o_ref[...] = y + b3_ref[...]


def classifier(x, w1, b1, w2, b2, w3, b3, num_classes):
    N = x.shape[0]
    n_pad = w3.shape[1]

    def spec(a):
        return pl.BlockSpec(a.shape, lambda i, _nd=a.ndim: (0,) * _nd)

    out = pl.pallas_call(
        _classifier_kernel,
        out_shape=jax.ShapeDtypeStruct((N, n_pad), jnp.float32),
        grid=(1,),
        in_specs=[spec(x), spec(w1), spec(b1), spec(w2), spec(b2),
                  spec(w3), spec(b3)],
        out_specs=pl.BlockSpec((N, n_pad), lambda i: (0, 0)),
    )(x, w1, b1, w2, b2, w3, b3)
    return out[:, :num_classes]


# ---------------------------------------------------------------------------
# Parameters (PyTorch-equivalent init) and forward pass
# ---------------------------------------------------------------------------
def make_params(key, num_classes=10):
    num_conv = sum(1 for v in CFG if v != 'M')
    keys = jax.random.split(key, num_conv + 3)
    last_conv = max(i for i, v in enumerate(CFG) if v != 'M')
    ki = 0
    convs = []
    in_c = 3
    H = 32
    for idx, v in enumerate(CFG):
        if v == 'M':
            H //= 2
            continue
        pool = idx + 1 < len(CFG) and CFG[idx + 1] == 'M'
        # Conv2d init: w ~ N(0, sqrt(2 / (3*3*out_channels))), bias = 0
        std = math.sqrt(2.0 / (3 * 3 * v))
        w = std * jax.random.normal(keys[ki], (v, in_c, 3, 3), jnp.float32)
        ki += 1
        bias = jnp.zeros((v,), jnp.float32)
        # BatchNorm2d (eval): gamma=1, beta=0, running_mean=0, running_var=1
        gamma = jnp.ones((v,), jnp.float32)
        beta = jnp.zeros((v,), jnp.float32)
        mean = jnp.zeros((v,), jnp.float32)
        var = jnp.ones((v,), jnp.float32)
        scale = gamma / jnp.sqrt(var + BN_EPS)
        shift = beta + (bias - mean) * scale
        cin_pad = ((in_c + 7) // 8) * 8            # pad Cin=3 -> 8 for layer 1
        wt = jnp.transpose(w, (2, 3, 1, 0))        # (kh, kw, cin, cout)
        if cin_pad != in_c:
            wt = jnp.pad(wt, ((0, 0), (0, 0), (0, cin_pad - in_c), (0, 0)))
        wt = wt.reshape(9, cin_pad, v).astype(jnp.bfloat16)
        if pool:
            mask = None
        else:
            wcol = np.arange(H * (H + 2)) % (H + 2)
            mask = jnp.asarray(((wcol >= 1) & (wcol <= H))
                               .astype(np.float32).reshape(-1, 1))
        convs.append(dict(w=wt, scale=scale.reshape(1, v),
                          shift=shift.reshape(1, v), mask=mask,
                          H=H, W=H, cin=cin_pad, cout=v,
                          pool=pool, final=(idx == last_conv)))
        in_c = v

    # Linear init: w ~ N(0, 0.01), bias = 0 (stored transposed [in, out], bf16)
    fc1_w = (0.01 * jax.random.normal(keys[ki], (512, 512), jnp.float32)).T
    ki += 1
    fc2_w = (0.01 * jax.random.normal(keys[ki], (512, 512), jnp.float32)).T
    ki += 1
    w3 = 0.01 * jax.random.normal(keys[ki], (num_classes, 512), jnp.float32)
    ki += 1
    fc3_w = jnp.zeros((512, FC3_PAD), jnp.float32).at[:, :num_classes].set(w3.T)
    return {
        'convs': convs,
        'fc1_w': fc1_w.astype(jnp.bfloat16),
        'fc1_b': jnp.zeros((1, 512), jnp.float32),
        'fc2_w': fc2_w.astype(jnp.bfloat16),
        'fc2_b': jnp.zeros((1, 512), jnp.float32),
        'fc3_w': fc3_w.astype(jnp.bfloat16),
        'fc3_b': jnp.zeros((1, FC3_PAD), jnp.float32),
        'num_classes': num_classes,
    }


def vgg_forward(params, x_nchw):
    # PyTorch input is NCHW; the kernels work on NHWC / padded-flat layouts.
    x = jnp.transpose(x_nchw, (0, 2, 3, 1)).astype(jnp.float32)
    N, H, W, C = x.shape
    cin0 = params['convs'][0]['cin']
    if cin0 != C:
        x = jnp.pad(x, ((0, 0), (0, 0), (0, 0), (0, cin0 - C)))
    xp = jnp.pad(x, ((0, 0), (1, 1), (1, 1), (0, 0)))
    x_pf = jnp.pad(xp.reshape(N, (H + 2) * (W + 2), cin0),
                   ((0, 0), (1, 1), (0, 0))).astype(jnp.bfloat16)

    for layer in params['convs']:
        x_pf = conv_bn_relu_pool(x_pf, layer['w'], layer['scale'],
                                 layer['shift'], layer['mask'],
                                 H=layer['H'], W=layer['W'],
                                 pool=layer['pool'], final=layer['final'])

    # After 5 max-pools on 32x32 the final layer emits (N, 1, 512); flattening
    # matches torch's x.view(N, -1) because spatial is 1x1.
    feat = x_pf.reshape(N, -1)
    return classifier(feat, params['fc1_w'], params['fc1_b'],
                      params['fc2_w'], params['fc2_b'],
                      params['fc3_w'], params['fc3_b'],
                      params['num_classes'])


if __name__ == "__main__":
    root = jax.random.PRNGKey(0)
    k_params, k_input = jax.random.split(root)
    params = make_params(k_params, num_classes=10)
    # 32x32 input is required so the 5 max-pools leave 1x1x512 = 512 features
    # for the classifier (exactly what the PyTorch module assumes).
    x = jax.random.normal(k_input, (2, 3, 32, 32), jnp.float32)
    logits = vgg_forward(params, x)
    jax.block_until_ready(logits)
    assert logits.shape == (2, 10) and logits.dtype == jnp.float32
    print("KERNEL_OK")
</pallas_src>

<mosaic_0001>
module attributes {stable_mosaic.version = 11 : i64} {
  func.func @_conv_kernel(%arg0: i32, %arg1: i32, %arg2: memref<1x1158x8xbf16, #tpu.memory_space<vmem>>, %arg3: memref<9x8x64xbf16, #tpu.memory_space<vmem>>, %arg4: memref<1x64xf32, #tpu.memory_space<vmem>>, %arg5: memref<1x64xf32, #tpu.memory_space<vmem>>, %arg6: memref<1088x1xf32, #tpu.memory_space<vmem>>, %arg7: memref<1x1158x64xbf16, #tpu.memory_space<vmem>>) attributes {dimension_semantics = [#tpu.dimension_semantics<parallel>, #tpu.dimension_semantics<parallel>], iteration_bounds = array<i64: 1, 2>, scalar_prefetch = 0 : i64, scratch_operands = 0 : i64, tpu.core_type = #tpu.core_type<tc>, window_params = [{transform_indices = @transform_0, window_bounds = array<i64: 1, 1158, 8>}, {transform_indices = @transform_1, window_bounds = array<i64: 9, 8, 64>}, {transform_indices = @transform_2, window_bounds = array<i64: 1, 64>}, {transform_indices = @transform_3, window_bounds = array<i64: 1, 64>}, {pipeline_mode = #tpu.pipeline_mode<synchronous>, transform_indices = @transform_4, window_bounds = array<i64: 1088, 1>}, {transform_indices = @transform_5, window_bounds = array<i64: 1, 1158, 64>}]} {
    %cst = arith.constant 0.000000e+00 : f32
    %0 = vector.broadcast %cst : f32 to vector<1088x64xf32>
    %c0 = arith.constant 0 : index
    %c0_0 = arith.constant 0 : index
    %c0_1 = arith.constant 0 : index
    %1 = vector.load %arg2[%c0, %c0_0, %c0_1] : memref<1x1158x8xbf16, #tpu.memory_space<vmem>>, vector<1x1088x8xbf16>
    %2 = vector.shape_cast %1 : vector<1x1088x8xbf16> to vector<1088x8xbf16>
    %c0_2 = arith.constant 0 : index
    %c0_3 = arith.constant 0 : index
    %c0_4 = arith.constant 0 : index
    %3 = vector.load %arg3[%c0_2, %c0_3, %c0_4] : memref<9x8x64xbf16, #tpu.memory_space<vmem>>, vector<1x8x64xbf16>
    %4 = vector.shape_cast %3 : vector<1x8x64xbf16> to vector<8x64xbf16>
    %cst_5 = arith.constant dense<0.000000e+00> : vector<1088x64xf32>
    %5 = tpu.matmul %2, %4, %cst_5 {dimension_numbers = #tpu.dot_dimension_numbers<[1], [0], [0], [1], [0, 0, 1, 1], [], []>} : vector<1088x8xbf16>, vector<8x64xbf16>, vector<1088x64xf32> -> vector<1088x64xf32>
    %6 = arith.addf %0, %5 : vector<1088x64xf32>
    %c0_6 = arith.constant 0 : index
    %c1 = arith.constant 1 : index
    %c0_7 = arith.constant 0 : index
    %7 = vector.load %arg2[%c0_6, %c1, %c0_7] : memref<1x1158x8xbf16, #tpu.memory_space<vmem>>, vector<1x1088x8xbf16>
    %8 = vector.shape_cast %7 : vector<1x1088x8xbf16> to vector<1088x8xbf16>
    %c1_8 = arith.constant 1 : index
    %c0_9 = arith.constant 0 : index
    %c0_10 = arith.constant 0 : index
    %9 = vector.load %arg3[%c1_8, %c0_9, %c0_10] : memref<9x8x64xbf16, #tpu.memory_space<vmem>>, vector<1x8x64xbf16>
    %10 = vector.shape_cast %9 : vector<1x8x64xbf16> to vector<8x64xbf16>
    %cst_11 = arith.constant dense<0.000000e+00> : vector<1088x64xf32>
    %11 = tpu.matmul %8, %10, %cst_11 {dimension_numbers = #tpu.dot_dimension_numbers<[1], [0], [0], [1], [0, 0, 1, 1], [], []>} : vector<1088x8xbf16>, vector<8x64xbf16>, vector<1088x64xf32> -> vector<1088x64xf32>
    %12 = arith.addf %6, %11 : vector<1088x64xf32>
    %c0_12 = arith.constant 0 : index
    %c2 = arith.constant 2 : index
    %c0_13 = arith.constant 0 : index
    %13 = vector.load %arg2[%c0_12, %c2, %c0_13] : memref<1x1158x8xbf16, #tpu.memory_space<vmem>>, vector<1x1088x8xbf16>
    %14 = vector.shape_cast %13 : vector<1x1088x8xbf16> to vector<1088x8xbf16>
    %c2_14 = arith.constant 2 : index
    %c0_15 = arith.constant 0 : index
    %c0_16 = arith.constant 0 : index
    %15 = vector.load %arg3[%c2_14, %c0_15, %c0_16] : memref<9x8x64xbf16, #tpu.memory_space<vmem>>, vector<1x8x64xbf16>
    %16 = vector.shape_cast %15 : vector<1x8x64xbf16> to vector<8x64xbf16>
    %cst_17 = arith.constant dense<0.000000e+00> : vector<1088x64xf32>
    %17 = tpu.matmul %14, %16, %cst_17 {dimension_numbers = #tpu.dot_dimension_numbers<[1], [0], [0], [1], [0, 0, 1, 1], [], []>} : vector<1088x8xbf16>, vector<8x64xbf16>, vector<1088x64xf32> -> vector<1088x64xf32>
    %18 = arith.addf %12, %17 : vector<1088x64xf32>
    %c0_18 = arith.constant 0 : index
    %c34 = arith.constant 34 : index
    %c0_19 = arith.constant 0 : index
    %19 = vector.load %arg2[%c0_18, %c34, %c0_19] : memref<1x1158x8xbf16, #tpu.memory_space<vmem>>, vector<1x1088x8xbf16>
    %20 = vector.shape_cast %19 : vector<1x1088x8xbf16> to vector<1088x8xbf16>
    %c3 = arith.constant 3 : index
    %c0_20 = arith.constant 0 : index
    %c0_21 = arith.constant 0 : index
    %21 = vector.load %arg3[%c3, %c0_20, %c0_21] : memref<9x8x64xbf16, #tpu.memory_space<vmem>>, vector<1x8x64xbf16>
    %22 = vector.shape_cast %21 : vector<1x8x64xbf16> to vector<8x64xbf16>
    %cst_22 = arith.constant dense<0.000000e+00> : vector<1088x64xf32>
    %23 = tpu.matmul %20, %22, %cst_22 {dimension_numbers = #tpu.dot_dimension_numbers<[1], [0], [0], [1], [0, 0, 1, 1], [], []>} : vector<1088x8xbf16>, vector<8x64xbf16>, vector<1088x64xf32> -> vector<1088x64xf32>
    %24 = arith.addf %18, %23 : vector<1088x64xf32>
    %c0_23 = arith.constant 0 : index
    %c35 = arith.constant 35 : index
    %c0_24 = arith.constant 0 : index
    %25 = vector.load %arg2[%c0_23, %c35, %c0_24] : memref<1x1158x8xbf16, #tpu.memory_space<vmem>>, vector<1x1088x8xbf16>
    %26 = vector.shape_cast %25 : vector<1x1088x8xbf16> to vector<1088x8xbf16>
    %c4 = arith.constant 4 : index
    %c0_25 = arith.constant 0 : index
    %c0_26 = arith.constant 0 : index
    %27 = vector.load %arg3[%c4, %c0_25, %c0_26] : memref<9x8x64xbf16, #tpu.memory_space<vmem>>, vector<1x8x64xbf16>
    %28 = vector.shape_cast %27 : vector<1x8x64xbf16> to vector<8x64xbf16>
    %cst_27 = arith.constant dense<0.000000e+00> : vector<1088x64xf32>
    %29 = tpu.matmul %26, %28, %cst_27 {dimension_numbers = #tpu.dot_dimension_numbers<[1], [0], [0], [1], [0, 0, 1, 1], [], []>} : vector<1088x8xbf16>, vector<8x64xbf16>, vector<1088x64xf32> -> vector<1088x64xf32>
    %30 = arith.addf %24, %29 : vector<1088x64xf32>
    %c0_28 = arith.constant 0 : index
    %c36 = arith.constant 36 : index
    %c0_29 = arith.constant 0 : index
    %31 = vector.load %arg2[%c0_28, %c36, %c0_29] : memref<1x1158x8xbf16, #tpu.memory_space<vmem>>, vector<1x1088x8xbf16>
    %32 = vector.shape_cast %31 : vector<1x1088x8xbf16> to vector<1088x8xbf16>
    %c5 = arith.constant 5 : index
    %c0_30 = arith.constant 0 : index
    %c0_31 = arith.constant 0 : index
    %33 = vector.load %arg3[%c5, %c0_30, %c0_31] : memref<9x8x64xbf16, #tpu.memory_space<vmem>>, vector<1x8x64xbf16>
    %34 = vector.shape_cast %33 : vector<1x8x64xbf16> to vector<8x64xbf16>
    %cst_32 = arith.constant dense<0.000000e+00> : vector<1088x64xf32>
    %35 = tpu.matmul %32, %34, %cst_32 {dimension_numbers = #tpu.dot_dimension_numbers<[1], [0], [0], [1], [0, 0, 1, 1], [], []>} : vector<1088x8xbf16>, vector<8x64xbf16>, vector<1088x64xf32> -> vector<1088x64xf32>
    %36 = arith.addf %30, %35 : vector<1088x64xf32>
    %c0_33 = arith.constant 0 : index
    %c68 = arith.constant 68 : index
    %c0_34 = arith.constant 0 : index
    %37 = vector.load %arg2[%c0_33, %c68, %c0_34] : memref<1x1158x8xbf16, #tpu.memory_space<vmem>>, vector<1x1088x8xbf16>
    %38 = vector.shape_cast %37 : vector<1x1088x8xbf16> to vector<1088x8xbf16>
    %c6 = arith.constant 6 : index
    %c0_35 = arith.constant 0 : index
    %c0_36 = arith.constant 0 : index
    %39 = vector.load %arg3[%c6, %c0_35, %c0_36] : memref<9x8x64xbf16, #tpu.memory_space<vmem>>, vector<1x8x64xbf16>
    %40 = vector.shape_cast %39 : vector<1x8x64xbf16> to vector<8x64xbf16>
    %cst_37 = arith.constant dense<0.000000e+00> : vector<1088x64xf32>
    %41 = tpu.matmul %38, %40, %cst_37 {dimension_numbers = #tpu.dot_dimension_numbers<[1], [0], [0], [1], [0, 0, 1, 1], [], []>} : vector<1088x8xbf16>, vector<8x64xbf16>, vector<1088x64xf32> -> vector<1088x64xf32>
    %42 = arith.addf %36, %41 : vector<1088x64xf32>
    %c0_38 = arith.constant 0 : index
    %c69 = arith.constant 69 : index
    %c0_39 = arith.constant 0 : index
    %43 = vector.load %arg2[%c0_38, %c69, %c0_39] : memref<1x1158x8xbf16, #tpu.memory_space<vmem>>, vector<1x1088x8xbf16>
    %44 = vector.shape_cast %43 : vector<1x1088x8xbf16> to vector<1088x8xbf16>
    %c7 = arith.constant 7 : index
    %c0_40 = arith.constant 0 : index
    %c0_41 = arith.constant 0 : index
    %45 = vector.load %arg3[%c7, %c0_40, %c0_41] : memref<9x8x64xbf16, #tpu.memory_space<vmem>>, vector<1x8x64xbf16>
    %46 = vector.shape_cast %45 : vector<1x8x64xbf16> to vector<8x64xbf16>
    %cst_42 = arith.constant dense<0.000000e+00> : vector<1088x64xf32>
    %47 = tpu.matmul %44, %46, %cst_42 {dimension_numbers = #tpu.dot_dimension_numbers<[1], [0], [0], [1], [0, 0, 1, 1], [], []>} : vector<1088x8xbf16>, vector<8x64xbf16>, vector<1088x64xf32> -> vector<1088x64xf32>
    %48 = arith.addf %42, %47 : vector<1088x64xf32>
    %c0_43 = arith.constant 0 : index
    %c70 = arith.constant 70 : index
    %c0_44 = arith.constant 0 : index
    %49 = vector.load %arg2[%c0_43, %c70, %c0_44] : memref<1x1158x8xbf16, #tpu.memory_space<vmem>>, vector<1x1088x8xbf16>
    %50 = vector.shape_cast %49 : vector<1x1088x8xbf16> to vector<1088x8xbf16>
    %c8 = arith.constant 8 : index
    %c0_45 = arith.constant 0 : index
    %c0_46 = arith.constant 0 : index
    %51 = vector.load %arg3[%c8, %c0_45, %c0_46] : memref<9x8x64xbf16, #tpu.memory_space<vmem>>, vector<1x8x64xbf16>
    %52 = vector.shape_cast %51 : vector<1x8x64xbf16> to vector<8x64xbf16>
    %cst_47 = arith.constant dense<0.000000e+00> : vector<1088x64xf32>
    %53 = tpu.matmul %50, %52, %cst_47 {dimension_numbers = #tpu.dot_dimension_numbers<[1], [0], [0], [1], [0, 0, 1, 1], [], []>} : vector<1088x8xbf16>, vector<8x64xbf16>, vector<1088x64xf32> -> vector<1088x64xf32>
    %54 = arith.addf %48, %53 : vector<1088x64xf32>
    %c0_48 = arith.constant 0 : index
    %c0_49 = arith.constant 0 : index
    %55 = vector.load %arg4[%c0_48, %c0_49] : memref<1x64xf32, #tpu.memory_space<vmem>>, vector<1x64xf32>
    %56 = vector.broadcast %55 : vector<1x64xf32> to vector<1088x64xf32>
    %57 = arith.mulf %54, %56 : vector<1088x64xf32>
    %c0_50 = arith.constant 0 : index
    %c0_51 = arith.constant 0 : index
    %58 = vector.load %arg5[%c0_50, %c0_51] : memref<1x64xf32, #tpu.memory_space<vmem>>, vector<1x64xf32>
    %59 = vector.broadcast %58 : vector<1x64xf32> to vector<1088x64xf32>
    %60 = arith.addf %57, %59 : vector<1088x64xf32>
    %cst_52 = arith.constant 0.000000e+00 : f32
    %61 = vector.broadcast %cst_52 : f32 to vector<1088x64xf32>
    %62 = arith.maximumf %60, %61 : vector<1088x64xf32>
    %c0_53 = arith.constant 0 : index
    %c0_54 = arith.constant 0 : index
    %63 = vector.load %arg6[%c0_53, %c0_54] : memref<1088x1xf32, #tpu.memory_space<vmem>>, vector<1088x1xf32>
    %64 = vector.broadcast %63 : vector<1088x1xf32> to vector<1088x64xf32>
    %65 = arith.mulf %62, %64 : vector<1088x64xf32>
    %cst_55 = arith.constant 0.000000e+00 : bf16
    %66 = vector.broadcast %cst_55 : bf16 to vector<35x64xbf16>
    %c0_56 = arith.constant 0 : index
    %c0_57 = arith.constant 0 : index
    %c0_58 = arith.constant 0 : index
    %67 = vector.load %arg7[%c0_56, %c0_57, %c0_58] : memref<1x1158x64xbf16, #tpu.memory_space<vmem>>, vector<1x35x64xbf16>
    %68 = vector.shape_cast %67 : vector<1x35x64xbf16> to vector<35x64xbf16>
    %69 = vector.shape_cast %66 : vector<35x64xbf16> to vector<1x35x64xbf16>
    tpu.vector_store %arg7[%c0_56, %c0_57, %c0_58], %69 {strides = array<i32>} : memref<1x1158x64xbf16, #tpu.memory_space<vmem>>, vector<1x35x64xbf16>,
    %70 = arith.truncf %65 : vector<1088x64xf32> to vector<1088x64xbf16>
    %c0_59 = arith.constant 0 : index
    %c35_60 = arith.constant 35 : index
    %c0_61 = arith.constant 0 : index
    %71 = vector.load %arg7[%c0_59, %c35_60, %c0_61] : memref<1x1158x64xbf16, #tpu.memory_space<vmem>>, vector<1x1088x64xbf16>
    %72 = vector.shape_cast %71 : vector<1x1088x64xbf16> to vector<1088x64xbf16>
    %73 = vector.shape_cast %70 : vector<1088x64xbf16> to vector<1x1088x64xbf16>
    tpu.vector_store %arg7[%c0_59, %c35_60, %c0_61], %73 {strides = array<i32>} : memref<1x1158x64xbf16, #tpu.memory_space<vmem>>, vector<1x1088x64xbf16>,
    %c0_62 = arith.constant 0 : index
    %c1123 = arith.constant 1123 : index
    %c0_63 = arith.constant 0 : index
    %74 = vector.load %arg7[%c0_62, %c1123, %c0_63] : memref<1x1158x64xbf16, #tpu.memory_space<vmem>>, vector<1x35x64xbf16>
    %75 = vector.shape_cast %74 : vector<1x35x64xbf16> to vector<35x64xbf16>
    %76 = vector.shape_cast %66 : vector<35x64xbf16> to vector<1x35x64xbf16>
    tpu.vector_store %arg7[%c0_62, %c1123, %c0_63], %76 {strides = array<i32>} : memref<1x1158x64xbf16, #tpu.memory_space<vmem>>, vector<1x35x64xbf16>,
    return
  }
  func.func @transform_0(%arg0: i32, %arg1: i32) -> (i32, i32, i32) {
    %c0_i32 = arith.constant 0 : i32
    %c0_i32_0 = arith.constant 0 : i32
    %c0_i32_1 = arith.constant 0 : i32
    return %arg1, %c0_i32, %c0_i32_0 : i32, i32, i32
  }
  func.func @transform_1(%arg0: i32, %arg1: i32) -> (i32, i32, i32) {
    %c0_i32 = arith.constant 0 : i32
    %c0_i32_0 = arith.constant 0 : i32
    %c0_i32_1 = arith.constant 0 : i32
    return %c0_i32, %c0_i32_0, %arg0 : i32, i32, i32
  }
  func.func @transform_2(%arg0: i32, %arg1: i32) -> (i32, i32) {
    %c0_i32 = arith.constant 0 : i32
    %c0_i32_0 = arith.constant 0 : i32
    return %c0_i32, %arg0 : i32, i32
  }
  func.func @transform_3(%arg0: i32, %arg1: i32) -> (i32, i32) {
    %c0_i32 = arith.constant 0 : i32
    %c0_i32_0 = arith.constant 0 : i32
    return %c0_i32, %arg0 : i32, i32
  }
  func.func @transform_4(%arg0: i32, %arg1: i32) -> (i32, i32) {
    %c0_i32 = arith.constant 0 : i32
    %c0_i32_0 = arith.constant 0 : i32
    %c0_i32_1 = arith.constant 0 : i32
    return %c0_i32, %c0_i32_0 : i32, i32
  }
  func.func @transform_5(%arg0: i32, %arg1: i32) -> (i32, i32, i32) {
    %c0_i32 = arith.constant 0 : i32
    %c0_i32_0 = arith.constant 0 : i32
    return %arg1, %c0_i32, %arg0 : i32, i32, i32
  }
}

</mosaic_0001>

<bundles_post_ra>
// kernel: tpu_custom_call.1
= control target key start
LH: loop header
LB: loop body
LE: loop exit
PB: predicated region body
PF: predicated region fallthrough
CT: control target
= control target key end

     0   :  { %s20446_s18 = smov 0   ;;  %s20448_s19 = smov 0   ;;  %s25248_s0 = inlined_call_operand.vmem [shape: bf16[2,1158,8], index: 0, kind: input, shape index: {}]   ;;  %s25249_s1 = inlined_call_operand.vmem [shape: bf16[9,8,64], index: 1, kind: input, shape index: {}]   ;;  %s25250_s2 = inlined_call_operand.vmem [shape: f32[1,64], index: 2, kind: input, shape index: {}]   ;;  %s25251_s3 = inlined_call_operand.vmem [shape: f32[1,64], index: 3, kind: input, shape index: {}]   ;;  %s25252_s4 = inlined_call_operand.vmem [shape: f32[1088,1], index: 4, kind: input, shape index: {}]   ;;  %s25253_s5 = inlined_call_operand.vmem [shape: bf16[2,1158,64], index: 5, kind: output, shape index: {}]  }
   0x1   :  { %s20450_s20 = smov 0  }
   0x2 LB: > { %s24_s21 = sadd.s32 1, %s20409_s19  ;;  %p15756_p0 = scmp.ge.s32.totalorder %s20413_s20, 1  ;;  %s20413_s20 = sphi %s20450_s20, %s15_s20   ;;  %s20409_s19 = sphi %s20448_s19, %s25651_s19   ;;  %s20405_s18 = sphi %s20446_s18, %s25650_s18  }
   0x3   : > { %p25_p1 = scmp.ge.s32.totalorder %s24_s21, 2  ;;  %p226_p2 = scmp.lt.s32.totalorder %s20413_s20, 3 }
   0x5   : > { %s25653_s21 = smov (%p25_p1, %s24_s21), 0  ;;  %p227_p3 = pnand %p15756_p0, %p226_p2 }
   0x7   : > { %230 = sbr.rel (%p227_p3) target bundleno = 1665 (0x681), region = 40 }
   0xe   : > { %v15759_v0 = vld [vmem:[%s25249_s1 + $0x4] sm:$0xf]  ;;  %vm1528_vm0 = vcmask 1043456   ;;  %v16173_v1 = vld [vmem:[%s25249_s1 + $0x10] sm:$0xf]  ;;  %p267_p4 = scmp.lt.s32.totalorder %s20405_s18, 1 }
   0xf   : > { %19820 = vmatprep.subr.msk.bf16.mxu1 %vm1528_vm0, %v15759_v0  ;;  %19824 = vmatprep.subr.msk.bf16.mxu0 %vm1528_vm0, %v16173_v1  ;;  %v1530_v2 = vsel %vm1528_vm0, %v15759_v0, 0  ;;  %v20474_v3 = vsel %vm1528_vm0, %v16173_v1, 0  ;;  %v427_v4 = vld [vmem:[%s25249_s1] sm:$0xf]  ;;  %v16243_v5 = vld [vmem:[%s25249_s1 + $0x14] sm:$0xf] }
  0x10   : > { %25278 = vst [vmem:[#allocation2_spill] sm:$0xff] %v20474_v3  ;;  %17489 = vmatpush3.bf16.msra.mxu1 %v1530_v2  ;;  %18041 = vmatpush3.bf16.msra.mxu0 %v20474_v3  ;;  %s25655_s18 = smov (!%p267_p4, %s20405_s18), 1  ;;  %vm774_vm1 = vsmask.f32 7424  ;;  %vm1323_vm2 = vcmask 64512   ;;  %v2246_v6 = vsel %vm1528_vm0, %v427_v4, 0 }
  0x11   : > { %19821 = vmatprep.subr.msk.bf16.mxu1 %vm1528_vm0, %v427_v4  ;;  %s19830_s30 = smul.u32 580, %s25655_s18  ;;  %19826 = vmatprep.subr.msk.bf16.mxu0 %vm1528_vm0, %v16243_v5  ;;  %vm5434_vm3 = vsmask.f32 6400  ;;  %v20503_v12 = vsel %vm1528_vm0, %v16243_v5, 0  ;;  %vm6981_vm4 = vcmask 1045504   ;;  %vm2831_vm5 = vcmask 1046528  }
  0x12   : > { %vm13563_vm6 = vcmask 519168   ;;  %vm15630_vm7 = vcmask 518144   ;;  %vm9584_vm8 = vsmask.f32 5376  ;;  %vm11131_vm9 = vcmask 1044480  }
  0x13   : > { %s20493_s8 = scalar_lea.vmem %s25248_s0, %s19830_s30  ;;  %s21698_s27 = scalar_lea.vmem %s25253_s5, %s19830_s30  ;;  %vm13568_vm10 = vcmask 517120   ;;  %vm13569_vm11 = vsmask.f32 1280  ;;  %vm15480_vm13 = vcmask 519169   ;;  %vm15481_vm14 = vsmask.f32 7942 }
  0x14   : > { %v291_v7 = vld [vmem:[%s20493_s8] sm:$0xf]  ;;  %v292_v8 = vld [vmem:[%s20493_s8 + $0x4] sm:$0xf]  ;;  %v19859_v10 = vld [vmem:[%s20493_s8 + $0x8] sm:$0xff]  }
  0x15   : > { %v20498_v9 = vcombine.low %v291_v7, %v292_v8  ;;  %v3889_v11 = vld [vmem:[%s20493_s8 + $0x10] sm:$0xe]  ;;  %v3890_v13 = vld [vmem:[%s20493_s8 + $0x14] sm:$0xf]  ;;  %v783_v16 = vshll.u32 %v19859_v10, 16  ;;  %v787_v17 = vshrl.u32 %v19859_v10, 16  ;;  %vm22924_vm12 = vmand %vm13568_vm10, %vm13569_vm11 }
  0x16   : > { %v19861_v18 = vld [vmem:[%s20493_s8 + $0x18] sm:$0xff]   ;;  %v19862_v19 = vld [vmem:[%s20493_s8 + $0x10] sm:$0xff]   ;;  %v20510_v20 = vcombine.low %v3889_v11, %v3890_v13  ;;  %v19863_v28 = vld [vmem:[%s20493_s8 + $0x20] sm:$0xff]   ;;  %vm13982_vm15 = vsmask.f32 5392 }
  0x17   : > { %v776_v14 = vshrl.u32 %v20498_v9, 16  ;;  %v778_v15 = vshll.u32 %v20498_v9, 16  ;;  %v785_v22 = vrot.slane %v783_v16, 1  ;;  %v5444_v23 = vshrl.u32 %v19861_v18, 16  ;;  %v19864_v33 = vld [vmem:[%s20493_s8 + $0x18] sm:$0xff]   ;;  %v19865_v34 = vld [vmem:[%s20493_s8 + $0x28] sm:$0xff]  }
  0x18   : > { %25279 = vst [vmem:[#allocation3_spill] sm:$0xff] %v20510_v20  ;;  %v5447_v24 = vshll.u32 %v19861_v18, 16  ;;  %v5436_v25 = vshrl.u32 %v20510_v20, 16  ;;  %v5439_v26 = vshll.u32 %v20510_v20, 16  ;;  %v791_v27 = vshll.u32 %v19862_v19, 16  ;;  %v19866_v47 = vld [vmem:[%s20493_s8 + $0x20] sm:$0xff]  }
  0x19   : > { %v780_v21 = vrot.slane %v778_v15, 1  ;;  %v789_v30 = vor.u32 %v787_v17, %v785_v22  ;;  %v5446_v31 = vrot.slane %v5444_v23, 1  ;;  %v5453_v38 = vshrl.u32 %v19863_v28, 16  ;;  %v19867_v48 = vld [vmem:[%s20493_s8 + $0x30] sm:$0xff]   ;;  %v19868_v53 = vld [vmem:[%s20493_s8 + $0x28] sm:$0xff]   ;;  %v19869_v58 = vld [vmem:[%s20493_s8 + $0x38] sm:$0xff]  }
  0x1a   : > { %v5449_v32 = vrot.slane %v5447_v24, 2  ;;  %v5438_v35 = vrot.slane %v5436_v25, 1  ;;  %v5441_v36 = vrot.slane %v5439_v26, 2  ;;  %v793_v37 = vrot.slane %v791_v27, 1  ;;  %v19870_v63 = vld [vmem:[%s20493_s8 + $0x30] sm:$0xff]   ;;  %v19871_v15 = vld [vmem:[%s20493_s8 + $0x40] sm:$0xff]  }
  0x1b   : > { %v781_v29 = vor.u32 %v780_v21, %v776_v14  ;;  %v5456_v41 = vshll.u32 %v19863_v28, 16  ;;  %v795_v42 = vshrl.u32 %v19862_v19, 16  ;;  %v5455_v45 = vrot.slane %v5453_v38, 1  ;;  %v19872_v25 = vld [vmem:[%s20493_s8 + $0x38] sm:$0xff]   ;;  %v19874_v38 = vld [vmem:[%s20493_s8 + $0x40] sm:$0xff]  }
  0x1c   : > { %v5450_v40 = vor.u32 %v5449_v32, %v5446_v31  ;;  %v5442_v43 = vor.u32 %v5441_v36, %v5438_v35  ;;  %v794_v44 = vsel %vm774_vm1, %v789_v30, %v793_v37  ;;  %v799_v46 = vshll.u32 %v19864_v33, 16 }
  0x1d   : > { %v786_v39 = vsel %vm774_vm1, %v781_v29, %v785_v22  ;;  %v5458_v49 = vrot.slane %v5456_v41, 2  ;;  %v797_v50 = vor.u32 %v795_v42, %v793_v37  ;;  %v5462_v51 = vshrl.u32 %v19865_v34, 16 }
  0x1e   : > { %17490 = vmatprep.mubr.msk.bf16.mxu1 %vm1323_vm2, %v786_v39  ;;  %v5465_v52 = vshll.u32 %v19865_v34, 16  ;;  %v5451_v54 = vsel %vm5434_vm3, %v5442_v43, %v5450_v40  ;;  %v801_v55 = vrot.slane %v799_v46, 1  ;;  %v803_v56 = vshrl.u32 %v19864_v33, 16  ;;  %v19873_v33 = vld [vmem:[%s20493_s8 + $0x48] sm:$0xff]   ;;  %v19875_v46 = vld [vmem:[%s20493_s8 + $0x50] sm:$0xff]  }
  0x1f   : > { %17491 = vmatmul.mubr.msk.bf16.vlgmr.msra.gmra.mrb[0].mxu1 %vm1323_vm2, %v794_v44  ;;  %v807_v57 = vshll.u32 %v19866_v47, 16  ;;  %18042 = vmatprep.mubr.msk.bf16.mxu0 %vm1323_vm2, %v5451_v54  ;;  %v5459_v59 = vor.u32 %v5458_v49, %v5455_v45  ;;  %v5464_v60 = vrot.slane %v5462_v51, 1  ;;  %v5471_v62 = vshrl.u32 %v19867_v48, 16 }
  0x20   : > { %17627 = vmatpush3.bf16.msra.mxu1 %v2246_v6  ;;  %v5467_v61 = vrot.slane %v5465_v52, 2  ;;  %v802_v0 = vsel %vm774_vm1, %v797_v50, %v801_v55  ;;  %v805_v1 = vor.u32 %v803_v56, %v801_v55  ;;  %v5474_v4 = vshll.u32 %v19867_v48, 16  ;;  %v19877_v55 = vld [vmem:[%s20493_s8 + $0x58] sm:$0xff]  }
  0x21   : > { %v809_v2 = vrot.slane %v807_v57, 1  ;;  %v5460_v5 = vsel %vm5434_vm3, %v5450_v40, %v5459_v59  ;;  %17494 = vmatprep.mubr.msk.bf16.mxu1 %vm1323_vm2, %v802_v0  ;;  %v5473_v7 = vrot.slane %v5471_v62, 1  ;;  %v811_v8 = vshrl.u32 %v19866_v47, 16  ;;  %v19876_v47 = vld [vmem:[%s20493_s8 + $0x48] sm:$0xff]  }
  0x22   : > { %v5468_v6 = vor.u32 %v5467_v61, %v5464_v60  ;;  %18043 = vmatmul.mubr.msk.bf16.vlgmr.msra.gmra.mrb[0].mxu0 %vm1323_vm2, %v5460_v5  ;;  %v5476_v11 = vrot.slane %v5474_v4, 2  ;;  %v815_v13 = vshll.u32 %v19868_v53, 16  ;;  %v5480_v14 = vshrl.u32 %v19869_v58, 16 }
  0x23   : > { %v810_v10 = vsel %vm774_vm1, %v805_v1, %v809_v2  ;;  %18179 = vmatpush3.bf16.msra.mxu0 %v20503_v12  ;;  %v813_v17 = vor.u32 %v811_v8, %v809_v2  ;;  %v5483_v18 = vshll.u32 %v19869_v58, 16  ;;  %v819_v19 = vshrl.u32 %v19868_v53, 16  ;;  %v19879_v2 = vld [vmem:[%s20493_s8 + $0x60] sm:$0xff]  }
  0x24   : > { %v5469_v16 = vsel %vm5434_vm3, %v5459_v59, %v5468_v6  ;;  %v5477_v21 = vor.u32 %v5476_v11, %v5473_v7  ;;  %v817_v22 = vrot.slane %v815_v13, 1  ;;  %v5482_v23 = vrot.slane %v5480_v14, 1  ;;  %v19880_v13 = vld [vmem:[%s20493_s8 + $0x58] sm:$0xff]  }
  0x25   : > { %18046 = vmatprep.mubr.msk.bf16.mxu0 %vm1323_vm2, %v5469_v16  ;;  %v823_v24 = vshll.u32 %v19870_v63, 16  ;;  %v5485_v26 = vrot.slane %v5483_v18, 2  ;;  %v5489_v27 = vshrl.u32 %v19871_v15, 16  ;;  %v5492_v28 = vshll.u32 %v19871_v15, 16  ;;  %v19881_v18 = vld [vmem:[%s20493_s8 + $0x68] sm:$0xff]  }
  0x26   : > { %v827_v12 = vshrl.u32 %v19870_v63, 16  ;;  %v5478_v29 = vsel %vm5434_vm3, %v5468_v6, %v5477_v21  ;;  %v818_v30 = vsel %vm774_vm1, %v813_v17, %v817_v22  ;;  %v821_v31 = vor.u32 %v819_v19, %v817_v22  ;;  %v19878_v63 = vld [vmem:[%s20493_s8 + $0x50] sm:$0xff]  }
  0x27   : > { %17495 = vmatmul.mubr.msk.bf16.gmra.mrb[4].mxu1 %vm1323_vm2, %v810_v10  ;;  %v825_v32 = vrot.slane %v823_v24, 1  ;;  %v5486_v34 = vor.u32 %v5485_v26, %v5482_v23  ;;  %v5491_v35 = vrot.slane %v5489_v27, 1  ;;  %v5494_v36 = vrot.slane %v5492_v28, 2  ;;  %v19882_v28 = vld [vmem:[%s20493_s8 + $0x60] sm:$0xff]  }
  0x28   : > { %17498 = vmatprep.mubr.msk.bf16.mxu1 %vm1323_vm2, %v818_v30  ;;  %v831_v37 = vshll.u32 %v19872_v25, 16  ;;  %v5498_v40 = vshrl.u32 %v19873_v33, 16  ;;  %v5501_v41 = vshll.u32 %v19873_v33, 16  ;;  %v835_v45 = vshrl.u32 %v19872_v25, 16 }
  0x29   : > { %v829_v39 = vor.u32 %v827_v12, %v825_v32  ;;  %v5487_v42 = vsel %vm5434_vm3, %v5477_v21, %v5486_v34  ;;  %v826_v43 = vsel %vm774_vm1, %v821_v31, %v825_v32  ;;  %v839_v50 = vshll.u32 %v19874_v38, 16  ;;  %v19883_v12 = vld [vmem:[%s20493_s8 + $0x70] sm:$0xff]   ;;  %v19884_v31 = vld [vmem:[%s20493_s8 + $0x68] sm:$0xff]  }
  0x2a   : > { %v833_v44 = vrot.slane %v831_v37, 1  ;;  %18047 = vmatmul.mubr.msk.bf16.gmra.mrb[4].mxu0 %vm1323_vm2, %v5478_v29  ;;  %v5500_v48 = vrot.slane %v5498_v40, 1  ;;  %v5503_v49 = vrot.slane %v5501_v41, 2  ;;  %v843_v51 = vshrl.u32 %v19874_v38, 16  ;;  %v19885_v40 = vld [vmem:[%s20493_s8 + $0x78] sm:$0xff]  }
  0x2b   : > { %18050 = vmatprep.mubr.msk.bf16.mxu0 %vm1323_vm2, %v5487_v42  ;;  %v5495_v52 = vor.u32 %v5494_v36, %v5491_v35  ;;  %v5507_v54 = vshrl.u32 %v19875_v46, 16  ;;  %v841_v57 = vrot.slane %v839_v50, 1  ;;  %v5510_v58 = vshll.u32 %v19875_v46, 16  ;;  %v19887_v50 = vld [vmem:[%s20493_s8 + $0x80] sm:$0xff]  }
  0x2c   : > { %v834_v53 = vsel %vm774_vm1, %v829_v39, %v833_v44  ;;  %v5504_v56 = vor.u32 %v5503_v49, %v5500_v48  ;;  %v847_v59 = vshll.u32 %v19876_v47, 16  ;;  %v5516_v61 = vshrl.u32 %v19877_v55, 16  ;;  %v19886_v49 = vld [vmem:[%s20493_s8 + $0x70] sm:$0xff]  }
  0x2d   : > { %v5509_v60 = vrot.slane %v5507_v54, 1  ;;  %v5519_v62 = vshll.u32 %v19877_v55, 16  ;;  %v837_v0 = vor.u32 %v835_v45, %v833_v44  ;;  %v5512_v1 = vrot.slane %v5510_v58, 2 }
  0x2e   : > { %v5496_v4 = vsel %vm5434_vm3, %v5486_v34, %v5495_v52  ;;  %v845_v5 = vor.u32 %v843_v51, %v841_v57  ;;  %v849_v6 = vrot.slane %v847_v59, 1  ;;  %v5505_v7 = vsel %vm5434_vm3, %v5495_v52, %v5504_v56 }
  0x2f   : > { %17499 = vmatmul.mubr.msk.bf16.gmra.mrb[8].mxu1 %vm1323_vm2, %v826_v43  ;;  %v5518_v8 = vrot.slane %v5516_v61, 1  ;;  %v5521_v10 = vrot.slane %v5519_v62, 2  ;;  %v855_v11 = vshll.u32 %v19878_v63, 16  ;;  %v842_v14 = vsel %vm774_vm1, %v837_v0, %v841_v57  ;;  %v19888_v62 = vld [vmem:[%s20493_s8 + $0x78] sm:$0xff]  }
  0x30   : > { %17502 = vmatprep.mubr.msk.bf16.mxu1 %vm1323_vm2, %v834_v53  ;;  %v5513_v15 = vor.u32 %v5512_v1, %v5509_v60  ;;  %v851_v16 = vshrl.u32 %v19876_v47, 16  ;;  %v5525_v17 = vshrl.u32 %v19879_v2, 16  ;;  %v850_v19 = vsel %vm774_vm1, %v845_v5, %v849_v6 }
  0x31   : > { %v5528_v21 = vshll.u32 %v19879_v2, 16  ;;  %v859_v22 = vshrl.u32 %v19878_v63, 16  ;;  %v863_v23 = vshll.u32 %v19880_v13, 16  ;;  %v5522_v24 = vor.u32 %v5521_v10, %v5518_v8 }
  0x32   : > { %18051 = vmatmul.mubr.msk.bf16.gmra.mrb[8].mxu0 %vm1323_vm2, %v5496_v4  ;;  %v5534_v25 = vshrl.u32 %v19881_v18, 16  ;;  %v5537_v26 = vshll.u32 %v19881_v18, 16  ;;  %v857_v27 = vrot.slane %v855_v11, 1  ;;  %v853_v29 = vor.u32 %v851_v16, %v849_v6  ;;  %v19889_v4 = vld [vmem:[%s20493_s8 + $0x88] sm:$0xff]  }
  0x33   : > { %18054 = vmatprep.mubr.msk.bf16.mxu0 %vm1323_vm2, %v5505_v7  ;;  %v5527_v30 = vrot.slane %v5525_v17, 1  ;;  %v5514_v32 = vsel %vm5434_vm3, %v5504_v56, %v5513_v15  ;;  %v5530_v33 = vrot.slane %v5528_v21, 2  ;;  %v865_v35 = vrot.slane %v863_v23, 1  ;;  %v19891_v23 = vld [vmem:[%s20493_s8 + $0x90] sm:$0xff]  }
  0x34   : > { %v861_v34 = vor.u32 %v859_v22, %v857_v27  ;;  %v5523_v36 = vsel %vm5434_vm3, %v5513_v15, %v5522_v24  ;;  %v5536_v37 = vrot.slane %v5534_v25, 1  ;;  %v5539_v38 = vrot.slane %v5537_v26, 2  ;;  %v19890_v22 = vld [vmem:[%s20493_s8 + $0x80] sm:$0xff]  }
  0x35   : > { %v867_v39 = vshrl.u32 %v19880_v13, 16  ;;  %v871_v41 = vshll.u32 %v19882_v28, 16  ;;  %v5543_v42 = vshrl.u32 %v19883_v12, 16  ;;  %v858_v43 = vsel %vm774_vm1, %v853_v29, %v857_v27 }
  0x36   : > { %v5546_v44 = vshll.u32 %v19883_v12, 16  ;;  %v879_v45 = vshll.u32 %v19884_v31, 16  ;;  %v5531_v46 = vor.u32 %v5530_v33, %v5527_v30  ;;  %v866_v47 = vsel %vm774_vm1, %v861_v34, %v865_v35 }
  0x37   : > { %17503 = vmatmul.mubr.msk.bf16.gmra.mrb[12].mxu1 %vm1323_vm2, %v842_v14  ;;  %v875_v48 = vshrl.u32 %v19882_v28, 16  ;;  %v5540_v51 = vor.u32 %v5539_v38, %v5536_v37  ;;  %v5552_v52 = vshrl.u32 %v19885_v40, 16  ;;  %v5555_v53 = vshll.u32 %v19885_v40, 16  ;;  %v19893_v28 = vld [vmem:[%s20493_s8 + $0x98] sm:$0xff]  }
  0x38   : > { %17506 = vmatprep.mubr.msk.bf16.mxu1 %vm1323_vm2, %v850_v19  ;;  %v873_v54 = vrot.slane %v871_v41, 1  ;;  %v5545_v55 = vrot.slane %v5543_v42, 1  ;;  %v869_v56 = vor.u32 %v867_v39, %v865_v35  ;;  %v5548_v57 = vrot.slane %v5546_v44, 2 }
  0x39   : > { %v881_v58 = vrot.slane %v879_v45, 1  ;;  %v5532_v59 = vsel %vm5434_vm3, %v5522_v24, %v5531_v46  ;;  %v887_v61 = vshll.u32 %v19886_v49, 16  ;;  %v5541_v63 = vsel %vm5434_vm3, %v5531_v46, %v5540_v51  ;;  %v19892_v24 = vld [vmem:[%s20493_s8 + $0x88] sm:$0xff]   ;;  %v19895_v45 = vld [vmem:[%s20493_s8 + $0xa0] sm:$0xff]  }
  0x3a   : > { %18055 = vmatmul.mubr.msk.bf16.gmra.mrb[12].mxu0 %vm1323_vm2, %v5514_v32  ;;  %v877_v60 = vor.u32 %v875_v48, %v873_v54  ;;  %v5554_v0 = vrot.slane %v5552_v52, 1  ;;  %v5557_v1 = vrot.slane %v5555_v53, 2  ;;  %v5561_v2 = vshrl.u32 %v19887_v50, 16  ;;  %v19896_v53 = vld [vmem:[%s20493_s8 + $0x98] sm:$0xff]  }
  0x3b   : > { %18058 = vmatprep.mubr.msk.bf16.mxu0 %vm1323_vm2, %v5523_v36  ;;  %v883_v5 = vshrl.u32 %v19884_v31, 16  ;;  %v5564_v6 = vshll.u32 %v19887_v50, 16  ;;  %v874_v7 = vsel %vm774_vm1, %v869_v56, %v873_v54  ;;  %v5549_v8 = vor.u32 %v5548_v57, %v5545_v55  ;;  %v19897_v56 = vld [vmem:[%s20493_s8 + $0xa8] sm:$0xff]  }
  0x3c   : > { %v882_v10 = vsel %vm774_vm1, %v877_v60, %v881_v58  ;;  %v889_v11 = vrot.slane %v887_v61, 1  ;;  %v891_v13 = vshrl.u32 %v19886_v49, 16  ;;  %v895_v14 = vshll.u32 %v19888_v62, 16 }
  0x3d   : > { %v5558_v15 = vor.u32 %v5557_v1, %v5554_v0  ;;  %v5563_v16 = vrot.slane %v5561_v2, 1  ;;  %v5570_v17 = vshrl.u32 %v19889_v4, 16  ;;  %v5573_v18 = vshll.u32 %v19889_v4, 16 }
  0x3e   : > { %v885_v19 = vor.u32 %v883_v5, %v881_v58  ;;  %v5566_v21 = vrot.slane %v5564_v6, 2  ;;  %v5550_v25 = vsel %vm5434_vm3, %v5540_v51, %v5549_v8  ;;  %v893_v26 = vor.u32 %v891_v13, %v889_v11  ;;  %v19899_v13 = vld [vmem:[%s20493_s8 + $0xb0] sm:$0xff]  }
  0x3f   : > { %17507 = vmatmul.mubr.msk.bf16.gmra.mrb[16].mxu1 %vm1323_vm2, %v858_v43  ;;  %v897_v27 = vrot.slane %v895_v14, 1  ;;  %v5559_v12 = vsel %vm5434_vm3, %v5549_v8, %v5558_v15  ;;  %v5572_v29 = vrot.slane %v5570_v17, 1  ;;  %v5575_v30 = vrot.slane %v5573_v18, 2  ;;  %v19894_v43 = vld [vmem:[%s20493_s8 + $0x90] sm:$0xff]   ;;  %v19900_v17 = vld [vmem:[%s20493_s8 + $0xa8] sm:$0xff]  }
  0x40   : > { %17510 = vmatprep.mubr.msk.bf16.mxu1 %vm1323_vm2, %v866_v47  ;;  %v890_v31 = vsel %vm774_vm1, %v885_v19, %v889_v11  ;;  %v5567_v32 = vor.u32 %v5566_v21, %v5563_v16  ;;  %v903_v33 = vshll.u32 %v19890_v22, 16  ;;  %v899_v34 = vshrl.u32 %v19888_v62, 16 }
  0x41   : > { %v5579_v35 = vshrl.u32 %v19891_v23, 16  ;;  %v5582_v36 = vshll.u32 %v19891_v23, 16  ;;  %v907_v37 = vshrl.u32 %v19890_v22, 16  ;;  %v898_v38 = vsel %vm774_vm1, %v893_v26, %v897_v27  ;;  %v19901_v22 = vld [vmem:[%s20493_s8 + $0xb8] sm:$0xff]  }
  0x42   : > { %18059 = vmatmul.mubr.msk.bf16.gmra.mrb[16].mxu0 %vm1323_vm2, %v5532_v59  ;;  %v911_v39 = vshll.u32 %v19892_v24, 16  ;;  %v5588_v40 = vshrl.u32 %v19893_v28, 16  ;;  %v5576_v41 = vor.u32 %v5575_v30, %v5572_v29  ;;  %v5591_v42 = vshll.u32 %v19893_v28, 16 }
  0x43   : > { %18062 = vmatprep.mubr.msk.bf16.mxu0 %vm1323_vm2, %v5541_v63  ;;  %v905_v44 = vrot.slane %v903_v33, 1  ;;  %v5568_v46 = vsel %vm5434_vm3, %v5558_v15, %v5567_v32  ;;  %v901_v47 = vor.u32 %v899_v34, %v897_v27  ;;  %v5581_v48 = vrot.slane %v5579_v35, 1  ;;  %v19902_v35 = vld [vmem:[%s20493_s8 + $0xb0] sm:$0xff]  }
  0x44   : > { %v5584_v49 = vrot.slane %v5582_v36, 2  ;;  %v913_v51 = vrot.slane %v911_v39, 1  ;;  %v5590_v52 = vrot.slane %v5588_v40, 1  ;;  %v5577_v54 = vsel %vm5434_vm3, %v5567_v32, %v5576_v41 }
  0x45   : > { %v909_v50 = vor.u32 %v907_v37, %v905_v44  ;;  %v5593_v55 = vrot.slane %v5591_v42, 2  ;;  %v915_v57 = vshrl.u32 %v19892_v24, 16  ;;  %v919_v58 = vshll.u32 %v19894_v43, 16 }
  0x46   : > { %v5597_v59 = vshrl.u32 %v19895_v45, 16  ;;  %v906_v60 = vsel %vm774_vm1, %v901_v47, %v905_v44  ;;  %v5600_v61 = vshll.u32 %v19895_v45, 16  ;;  %v5585_v62 = vor.u32 %v5584_v49, %v5581_v48  ;;  %v19905_v47 = vld [vmem:[%s20493_s8 + $0xc8] sm:$0xff]  }
  0x47   : > { %17511 = vmatmul.mubr.msk.bf16.gmra.mrb[20].mxu1 %vm1323_vm2, %v874_v7  ;;  %v914_v63 = vsel %vm774_vm1, %v909_v50, %v913_v51  ;;  %v923_v0 = vshrl.u32 %v19894_v43, 16  ;;  %v927_v1 = vshll.u32 %v19896_v53, 16  ;;  %v5594_v2 = vor.u32 %v5593_v55, %v5590_v52  ;;  %v19904_v43 = vld [vmem:[%s20493_s8 + $0xb8] sm:$0xff]  }
  0x48   : > { %17514 = vmatprep.mubr.msk.bf16.mxu1 %vm1323_vm2, %v882_v10  ;;  %v5606_v4 = vshrl.u32 %v19897_v56, 16  ;;  %v5609_v5 = vshll.u32 %v19897_v56, 16  ;;  %v917_v6 = vor.u32 %v915_v57, %v913_v51  ;;  %v921_v7 = vrot.slane %v919_v58, 1  ;;  %v19898_v10 = vld [vmem:[%s20493_s8 + $0xa0] sm:$0xff]  }
  0x49   : > { %v5599_v8 = vrot.slane %v5597_v59, 1  ;;  %v5602_v11 = vrot.slane %v5600_v61, 2  ;;  %v5586_v14 = vsel %vm5434_vm3, %v5576_v41, %v5585_v62  ;;  %v929_v16 = vrot.slane %v927_v1, 1  ;;  %v19906_v61 = vld [vmem:[%s20493_s8 + $0xc0] sm:$0xff]  }
  0x4a   : > { %18063 = vmatmul.mubr.msk.bf16.gmra.mrb[20].mxu0 %vm1323_vm2, %v5550_v25  ;;  %v925_v15 = vor.u32 %v923_v0, %v921_v7  ;;  %v5595_v18 = vsel %vm5434_vm3, %v5585_v62, %v5594_v2  ;;  %v5608_v19 = vrot.slane %v5606_v4, 1  ;;  %v5611_v21 = vrot.slane %v5609_v5, 2  ;;  %v19907_v62 = vld [vmem:[%s20493_s8 + $0xd0] sm:$0xff]  }
  0x4b   : > { %18066 = vmatprep.mubr.msk.bf16.mxu0 %vm1323_vm2, %v5559_v12  ;;  %v922_v23 = vsel %vm774_vm1, %v917_v6, %v921_v7  ;;  %v935_v24 = vshll.u32 %v19898_v10, 16  ;;  %v5603_v25 = vor.u32 %v5602_v11, %v5599_v8  ;;  %v931_v26 = vshrl.u32 %v19896_v53, 16  ;;  %v19908_v6 = vld [vmem:[%s20493_s8 + $0xc8] sm:$0xff]   ;;  %v19909_v11 = vld [vmem:[%s20493_s8 + $0xd8] sm:$0xff]  }
  0x4c   : > { %v5615_v27 = vshrl.u32 %v19899_v13, 16  ;;  %v5618_v28 = vshll.u32 %v19899_v13, 16  ;;  %v930_v12 = vsel %vm774_vm1, %v925_v15, %v929_v16  ;;  %v939_v29 = vshrl.u32 %v19898_v10, 16 }
  0x4d   : > { %v943_v30 = vshll.u32 %v19900_v17, 16  ;;  %v5624_v32 = vshrl.u32 %v19901_v22, 16  ;;  %v5627_v33 = vshll.u32 %v19901_v22, 16  ;;  %v937_v34 = vrot.slane %v935_v24, 1 }
  0x4e   : > { %v5604_v36 = vsel %vm5434_vm3, %v5594_v2, %v5603_v25  ;;  %v933_v37 = vor.u32 %v931_v26, %v929_v16  ;;  %v5617_v39 = vrot.slane %v5615_v27, 1  ;;  %v5620_v40 = vrot.slane %v5618_v28, 2  ;;  %v19910_v28 = vld [vmem:[%s20493_s8 + $0xd0] sm:$0xff]  }
  0x4f   : > { %17515 = vmatmul.mubr.msk.bf16.gmra.mrb[24].mxu1 %vm1323_vm2, %v890_v31  ;;  %v5612_v31 = vor.u32 %v5611_v21, %v5608_v19  ;;  %v941_v41 = vor.u32 %v939_v29, %v937_v34  ;;  %v945_v42 = vrot.slane %v943_v30, 1  ;;  %v5626_v45 = vrot.slane %v5624_v32, 1 }
  0x50   : > { %17518 = vmatprep.mubr.msk.bf16.mxu1 %vm1323_vm2, %v898_v38  ;;  %v19903_v38 = vld [vmem:[%s20493_s8 + $0xc0] sm:$0xff]   ;;  %v951_v48 = vshll.u32 %v19902_v35, 16  ;;  %v938_v49 = vsel %vm774_vm1, %v933_v37, %v937_v34  ;;  %v947_v50 = vshrl.u32 %v19900_v17, 16  ;;  %v5621_v53 = vor.u32 %v5620_v40, %v5617_v39 }
  0x51   : > { %v5613_v44 = vsel %vm5434_vm3, %v5603_v25, %v5612_v31  ;;  %v5633_v51 = vshrl.u32 %v19903_v38, 16  ;;  %v5636_v52 = vshll.u32 %v19903_v38, 16  ;;  %v955_v55 = vshrl.u32 %v19902_v35, 16  ;;  %v19913_v35 = vld [vmem:[%s20493_s8 + $0xe8] sm:$0xff]  }
  0x52   : > { %18067 = vmatmul.mubr.msk.bf16.gmra.mrb[24].mxu0 %vm1323_vm2, %v5568_v46  ;;  %v5629_v46 = vrot.slane %v5627_v33, 2  ;;  %v959_v56 = vshll.u32 %v19904_v43, 16  ;;  %v5642_v58 = vshrl.u32 %v19905_v47, 16  ;;  %v5645_v59 = vshll.u32 %v19905_v47, 16 }
  0x53   : > { %18070 = vmatprep.mubr.msk.bf16.mxu0 %vm1323_vm2, %v5577_v54  ;;  %v946_v54 = vsel %vm774_vm1, %v941_v41, %v945_v42  ;;  %v5635_v0 = vrot.slane %v5633_v51, 1  ;;  %v5638_v1 = vrot.slane %v5636_v52, 2  ;;  %v5622_v2 = vsel %vm5434_vm3, %v5612_v31, %v5621_v53  ;;  %v19912_v31 = vld [vmem:[%s20493_s8 + $0xd8] sm:$0xff]   ;;  %v19914_v52 = vld [vmem:[%s20493_s8 + $0xe0] sm:$0xff]  }
  0x54   : > { %v5630_v57 = vor.u32 %v5629_v46, %v5626_v45  ;;  %v961_v5 = vrot.slane %v959_v56, 1  ;;  %v5644_v8 = vrot.slane %v5642_v58, 1  ;;  %v5647_v10 = vrot.slane %v5645_v59, 2 }
  0x55   : > { %v967_v13 = vshll.u32 %v19906_v61, 16  ;;  %v963_v16 = vshrl.u32 %v19904_v43, 16  ;;  %v5654_v17 = vshll.u32 %v19907_v62, 16  ;;  %v971_v21 = vshrl.u32 %v19906_v61, 16 }
  0x56   : > { %v5631_v7 = vsel %vm5434_vm3, %v5621_v53, %v5630_v57  ;;  %v975_v22 = vshll.u32 %v19908_v6, 16  ;;  %v5660_v24 = vshrl.u32 %v19909_v11, 16  ;;  %v5663_v25 = vshll.u32 %v19909_v11, 16  ;;  %v19915_v53 = vld [vmem:[%s20493_s8 + $0xf0] sm:$0xff]  }
  0x57   : > { %17519 = vmatmul.mubr.msk.bf16.gmra.mrb[28].mxu1 %vm1323_vm2, %v906_v60  ;;  %v953_v60 = vrot.slane %v951_v48, 1  ;;  %v969_v26 = vrot.slane %v967_v13, 1  ;;  %v965_v29 = vor.u32 %v963_v16, %v961_v5  ;;  %v5656_v30 = vrot.slane %v5654_v17, 2 }
  0x58   : > { %17522 = vmatprep.mubr.msk.bf16.mxu1 %vm1323_vm2, %v914_v63  ;;  %v949_v63 = vor.u32 %v947_v50, %v945_v42  ;;  %v977_v34 = vrot.slane %v975_v22, 1  ;;  %v5662_v37 = vrot.slane %v5660_v24, 1  ;;  %v5665_v38 = vrot.slane %v5663_v25, 2  ;;  %v19918_v22 = vld [vmem:[%s20493_s8 + $0xf0] sm:$0xff]  }
  0x59   : > { %v957_v4 = vor.u32 %v955_v55, %v953_v60  ;;  %v973_v33 = vor.u32 %v971_v21, %v969_v26  ;;  %v979_v39 = vshrl.u32 %v19908_v6, 16  ;;  %v983_v40 = vshll.u32 %v19910_v28, 16 }
  0x5a   : > { %18071 = vmatmul.mubr.msk.bf16.gmra.mrb[28].mxu0 %vm1323_vm2, %v5586_v14  ;;  %v5651_v14 = vshrl.u32 %v19907_v62, 16  ;;  %v954_v15 = vsel %vm774_vm1, %v949_v63, %v953_v60  ;;  %v970_v42 = vsel %vm774_vm1, %v965_v29, %v969_v26  ;;  %v987_v47 = vshrl.u32 %v19910_v28, 16  ;;  %v19916_v62 = vld [vmem:[%s20493_s8 + $0xe8] sm:$0xff]  }
  0x5b   : > { %18074 = vmatprep.mubr.msk.bf16.mxu0 %vm1323_vm2, %v5595_v18  ;;  %v5639_v18 = vor.u32 %v5638_v1, %v5635_v0  ;;  %v962_v19 = vsel %vm774_vm1, %v957_v4, %v961_v5  ;;  %v978_v46 = vsel %vm774_vm1, %v973_v33, %v977_v34  ;;  %v5678_v48 = vshrl.u32 %v19913_v35, 16  ;;  %v19917_v1 = vld [vmem:[%s20493_s8 + $0xf8] sm:$0xff]   ;;  %v19921_v28 = vld [vmem:[%s20493_s8 + $0x108] sm:$0xff]  }
  0x5c   : > { %v5653_v27 = vrot.slane %v5651_v14, 1  ;;  %v5681_v50 = vshll.u32 %v19913_v35, 16  ;;  %v985_v51 = vrot.slane %v983_v40, 1  ;;  %v981_v55 = vor.u32 %v979_v39, %v977_v34 }
  0x5d   : > { %v5640_v32 = vsel %vm5434_vm3, %v5630_v57, %v5639_v18  ;;  %v5680_v61 = vrot.slane %v5678_v48, 1  ;;  %v999_v4 = vshll.u32 %v19914_v52, 16  ;;  %v5687_v5 = vshrl.u32 %v19915_v53, 16  ;;  %v19923_v48 = vld [vmem:[%s20493_s8 + $0x110] sm:$0xff]  }
  0x5e   : > { %v5657_v45 = vor.u32 %v5656_v30, %v5653_v27  ;;  %v989_v60 = vor.u32 %v987_v47, %v985_v51  ;;  %v5683_v0 = vrot.slane %v5681_v50, 2  ;;  %v5690_v6 = vshll.u32 %v19915_v53, 16  ;;  %v19920_v27 = vld [vmem:[%s20493_s8 + $0xf8] sm:$0xff]   ;;  %v19924_v53 = vld [vmem:[%s20493_s8 + $0x108] sm:$0xff]  }
  0x5f   : > { %17523 = vmatmul.mubr.msk.bf16.gmra.mrb[32].mxu1 %vm1323_vm2, %v922_v23  ;;  %v5648_v23 = vor.u32 %v5647_v10, %v5644_v8  ;;  %v1003_v11 = vshrl.u32 %v19914_v52, 16  ;;  %v1007_v13 = vshll.u32 %v19916_v62, 16  ;;  %v5699_v16 = vshll.u32 %v19917_v1, 16 }
  0x60   : > { %17526 = vmatprep.mubr.msk.bf16.mxu1 %vm1323_vm2, %v930_v12  ;;  %v19911_v12 = vld [vmem:[%s20493_s8 + $0xe0] sm:$0xff]   ;;  %v5684_v14 = vor.u32 %v5683_v0, %v5680_v61  ;;  %v5692_v21 = vrot.slane %v5690_v6, 2  ;;  %v1015_v33 = vshll.u32 %v19918_v22, 16  ;;  %v1011_v34 = vshrl.u32 %v19916_v62, 16 }
  0x61   : > { %v5669_v41 = vshrl.u32 %v19911_v12, 16  ;;  %v5672_v43 = vshll.u32 %v19911_v12, 16  ;;  %v5658_v59 = vsel %vm5434_vm3, %v5648_v23, %v5657_v45  ;;  %v1009_v26 = vrot.slane %v1007_v13, 1 }
  0x62   : > { %18075 = vmatmul.mubr.msk.bf16.gmra.mrb[32].mxu0 %vm1323_vm2, %v5604_v36  ;;  %v5649_v36 = vsel %vm5434_vm3, %v5639_v18, %v5648_v23  ;;  %v1001_v18 = vrot.slane %v999_v4, 1  ;;  %v19919_v23 = vld [vmem:[%s20493_s8 + $0x100] sm:$0xff]   ;;  %v5701_v30 = vrot.slane %v5699_v16, 2  ;;  %v1023_v39 = vshll.u32 %v19920_v27, 16 }
  0x63   : > { %18078 = vmatprep.mubr.msk.bf16.mxu0 %vm1323_vm2, %v5613_v44  ;;  %v991_v44 = vshll.u32 %v19912_v31, 16  ;;  %v5671_v56 = vrot.slane %v5669_v41, 1  ;;  %v5674_v57 = vrot.slane %v5672_v43, 2  ;;  %v5705_v35 = vshrl.u32 %v19919_v23, 16 }
  0x64   : > { %v1005_v25 = vor.u32 %v1003_v11, %v1001_v18  ;;  %v5714_v40 = vshrl.u32 %v19921_v28, 16  ;;  %v1017_v43 = vrot.slane %v1015_v33, 1  ;;  %v5723_v61 = vshrl.u32 %v19923_v48, 16  ;;  %v6975_v33 = vld [vmem:[%s20493_s8 + $0x10] sm:$0xc] }
  0x65   : > { %v993_v58 = vrot.slane %v991_v44, 1  ;;  %v5675_v8 = vor.u32 %v5674_v57, %v5671_v56  ;;  %v19922_v44 = vld [vmem:[%s20493_s8 + $0x100] sm:$0xff]   ;;  %v5707_v47 = vrot.slane %v5705_v35, 1  ;;  %v19925_v57 = vld [vmem:[%s20493_s8 + $0x118] sm:$0xff]   ;;  %v5726_v62 = vshll.u32 %v19923_v48, 16 }
  0x66   : > { %v5716_v52 = vrot.slane %v5714_v40, 1  ;;  %v5735_v6 = vshll.u32 %v19925_v57, 16  ;;  %v5725_v11 = vrot.slane %v5723_v61, 1 }
  0x67   : > { %17527 = vmatmul.mubr.msk.bf16.gmra.mrb[36].mxu1 %vm1323_vm2, %v938_v49  ;;  %v5666_v49 = vor.u32 %v5665_v38, %v5662_v37  ;;  %v994_v10 = vsel %vm774_vm1, %v989_v60, %v993_v58  ;;  %v5685_v12 = vsel %vm5434_vm3, %v5675_v8, %v5684_v14  ;;  %v1019_v37 = vshrl.u32 %v19918_v22, 16 }
  0x68   : > { %17530 = vmatprep.mubr.msk.bf16.mxu1 %vm1323_vm2, %v946_v54  ;;  %v20666_v54 = vld [vmem:[%s25249_s1 + $0x18] sm:$0xf]  ;;  %v1010_v38 = vsel %vm774_vm1, %v1005_v25, %v1009_v26  ;;  %v5728_v13 = vrot.slane %v5726_v62, 2  ;;  %v5737_v22 = vrot.slane %v5735_v6, 2 }
  0x69   : > { %19827 = vmatprep.subr.msk.bf16.mxu0 %vm1528_vm0, %v20666_v54  ;;  %v5667_v63 = vsel %vm5434_vm3, %v5657_v45, %v5666_v49  ;;  %v5676_v24 = vsel %vm5434_vm3, %v5666_v49, %v5675_v8  ;;  %v1021_v50 = vor.u32 %v1019_v37, %v1017_v43  ;;  %v19926_v8 = vld [vmem:[%s20493_s8 + $0x110] sm:$0xff]   ;;  %v19933_v62 = vld [vmem:[%s20493_s8 + $0x138] sm:$0xff]  }
  0x6a   : > { %18079 = vmatmul.mubr.msk.bf16.gmra.mrb[36].mxu0 %vm1323_vm2, %v5622_v2  ;;  %v995_v2 = vshrl.u32 %v19912_v31, 16 }
  0x6b   : > { %18082 = vmatprep.mubr.msk.bf16.mxu0 %vm1323_vm2, %v5631_v7  ;;  %v986_v7 = vsel %vm774_vm1, %v981_v55, %v985_v51  ;;  %v1025_v51 = vrot.slane %v1023_v39, 1 }
  0x6c   : > { %v997_v17 = vor.u32 %v995_v2, %v993_v58  ;;  %v1027_v58 = vshrl.u32 %v19920_v27, 16  ;;  %v1039_v2 = vshll.u32 %v19924_v53, 16 }
  0x6d   : > { %v1026_v0 = vsel %vm774_vm1, %v1021_v50, %v1025_v51 }
  0x6e   : > { %v1002_v31 = vsel %vm774_vm1, %v997_v17, %v1001_v18  ;;  %v1041_v17 = vrot.slane %v1039_v2, 1  ;;  %v19928_v18 = vld [vmem:[%s20493_s8 + $0x118] sm:$0xff]  }
  0x6f   : > { %17531 = vmatmul.mubr.msk.bf16.gmra.mrb[40].mxu1 %vm1323_vm2, %v954_v15  ;;  %v5696_v15 = vshrl.u32 %v19917_v1, 16  ;;  %v1035_v1 = vshrl.u32 %v19922_v44, 16 }
  0x70   : > { %17534 = vmatprep.mubr.msk.bf16.mxu1 %vm1323_vm2, %v962_v19  ;;  %v5689_v19 = vrot.slane %v5687_v5, 1  ;;  %v5732_v5 = vshrl.u32 %v19925_v57, 16  ;;  %v19932_v57 = vld [vmem:[%s20493_s8 + $0x130] sm:$0xff]  }
  0x71   : > { %v5698_v29 = vrot.slane %v5696_v15, 1 }
  0x72   : > { %18083 = vmatmul.mubr.msk.bf16.gmra.mrb[40].mxu0 %vm1323_vm2, %v5640_v32  ;;  %v5693_v32 = vor.u32 %v5692_v21, %v5689_v19  ;;  %v5734_v21 = vrot.slane %v5732_v5, 1 }
  0x73   : > { %18086 = vmatprep.mubr.msk.bf16.mxu0 %vm1323_vm2, %v5649_v36  ;;  %v5708_v36 = vshll.u32 %v19919_v23, 16  ;;  %v5702_v41 = vor.u32 %v5701_v30, %v5698_v29  ;;  %v1043_v23 = vshrl.u32 %v19924_v53, 16  ;;  %v1051_v29 = vshrl.u32 %v19926_v8, 16  ;;  %v20070_v53 = vld [vmem:[%s20493_s8 + $0x18] sm:$0xff]  }
  0x74   : > { %v5694_v45 = vsel %vm5434_vm3, %v5684_v14, %v5693_v32  ;;  %v19927_v14 = vld [vmem:[%s20493_s8 + $0x120] sm:$0xff]   ;;  %v1055_v30 = vshll.u32 %v19928_v18, 16 }
  0x75   : > { %v5710_v49 = vrot.slane %v5708_v36, 2  ;;  %v5703_v55 = vsel %vm5434_vm3, %v5693_v32, %v5702_v41  ;;  %v5741_v27 = vshrl.u32 %v19927_v14, 16  ;;  %v1045_v36 = vor.u32 %v1043_v23, %v1041_v17 }
  0x76   : > { %v1057_v40 = vrot.slane %v1055_v30, 1  ;;  %v20074_v30 = vld [vmem:[%s20493_s8 + $0x38] sm:$0xff]  }
  0x77   : > { %17535 = vmatmul.mubr.msk.bf16.gmra.mrb[44].mxu1 %vm1323_vm2, %v970_v42  ;;  %v5717_v42 = vshll.u32 %v19921_v28, 16  ;;  %v5744_v28 = vshll.u32 %v19927_v14, 16  ;;  %v5743_v37 = vrot.slane %v5741_v27, 1  ;;  %v19934_v14 = vld [vmem:[%s20493_s8 + $0x140] sm:$0xff]   ;;  %v1091_v27 = vshrl.u32 %v19933_v62, 16 }
  0x78   : > { %17538 = vmatprep.mubr.msk.bf16.mxu1 %vm1323_vm2, %v978_v46  ;;  %v1013_v46 = vor.u32 %v1011_v34, %v1009_v26  ;;  %v5729_v26 = vor.u32 %v5728_v13, %v5725_v11  ;;  %v19930_v34 = vld [vmem:[%s20493_s8 + $0x120] sm:$0xff]   ;;  %v1095_v23 = vshll.u32 %v19934_v14, 16 }
  0x79   : > { %v5719_v56 = vrot.slane %v5717_v42, 2  ;;  %v1067_v50 = vshrl.u32 %v19930_v34, 16 }
  0x7a   : > { %18087 = vmatmul.mubr.msk.bf16.gmra.mrb[44].mxu0 %vm1323_vm2, %v5658_v59  ;;  %v1031_v59 = vshll.u32 %v19922_v44, 16  ;;  %v1018_v60 = vsel %vm774_vm1, %v1013_v46, %v1017_v43  ;;  %v20069_v43 = vld [vmem:[%s20493_s8 + $0x14] sm:$0xf] }
  0x7b   : > { %18090 = vmatprep.mubr.msk.bf16.mxu0 %vm1323_vm2, %v5667_v63  ;;  %v5711_v63 = vor.u32 %v5710_v49, %v5707_v47  ;;  %v5720_v4 = vor.u32 %v5719_v56, %v5716_v52  ;;  %v16244_v44 = vcombine.low %v6975_v33, %v20069_v43  ;;  %v1059_v47 = vshrl.u32 %v19928_v18, 16  ;;  %v19936_v33 = vld [vmem:[%s20493_s8 + $0x150] sm:$0xff]  }
  0x7d   : > { %v5712_v15 = vsel %vm5434_vm3, %v5702_v41, %v5711_v63  ;;  %v5721_v19 = vsel %vm5434_vm3, %v5711_v63, %v5720_v4  ;;  %v5730_v35 = vsel %vm5434_vm3, %v5720_v4, %v5729_v26  ;;  %v19931_v41 = vld [vmem:[%s20493_s8 + $0x128] sm:$0xff]   ;;  %v6982_v52 = vrot.slane %v16244_v44, 2  ;;  %v20071_v4 = vld [vmem:[%s20493_s8 + $0x20] sm:$0xff]  }
  0x7e   : > { %v1075_v2 = vshrl.u32 %v19931_v41, 16  ;;  %v6985_v5 = vrot.slane %v20071_v4, 2  ;;  %v20075_v44 = vld [vmem:[%s20493_s8 + $0x40] sm:$0xff]  }
  0x7f   : > { %17539 = vmatmul.mubr.msk.bf16.gmra.mrb[48].mxu1 %vm1323_vm2, %v986_v7  ;;  %v1033_v7 = vrot.slane %v1031_v59, 1 }
  0x80   : > { %17542 = vmatprep.mubr.msk.bf16.mxu1 %vm1323_vm2, %v994_v10  ;;  %v1029_v10 = vor.u32 %v1027_v58, %v1025_v51  ;;  %v1071_v51 = vshll.u32 %v19931_v41, 16  ;;  %v1061_v58 = vor.u32 %v1059_v47, %v1057_v40  ;;  %v19938_v41 = vld [vmem:[%s20493_s8 + $0x160] sm:$0xff]   ;;  %v1115_v47 = vshrl.u32 %v19936_v33, 16 }
  0x81   : > { %v1037_v16 = vor.u32 %v1035_v1, %v1033_v7  ;;  %v1131_v4 = vshrl.u32 %v19938_v41, 16 }
  0x82   : > { %18091 = vmatmul.mubr.msk.bf16.gmra.mrb[48].mxu0 %vm1323_vm2, %v5676_v24  ;;  %v1047_v24 = vshll.u32 %v19926_v8, 16  ;;  %v1034_v25 = vsel %vm774_vm1, %v1029_v10, %v1033_v7  ;;  %v1073_v61 = vrot.slane %v1071_v51, 1  ;;  %v1083_v7 = vshrl.u32 %v19932_v57, 16  ;;  %v20072_v10 = vld [vmem:[%s20493_s8 + $0x28] sm:$0xff]  }
  0x83   : > { %18094 = vmatprep.mubr.msk.bf16.mxu0 %vm1323_vm2, %v5685_v12  ;;  %v1042_v12 = vsel %vm774_vm1, %v1037_v16, %v1041_v17  ;;  %v1087_v8 = vshll.u32 %v19933_v62, 16  ;;  %v6987_v11 = vrot.slane %v20072_v10, 2  ;;  %v20076_v51 = vld [vmem:[%s20493_s8 + $0x48] sm:$0xff]  }
  0x84   : > { %v1049_v32 = vrot.slane %v1047_v24, 1 }
  0x85   : > { %v1089_v18 = vrot.slane %v1087_v8, 1  ;;  %v20079_v8 = vld [vmem:[%s20493_s8 + $0x60] sm:$0xff]  }
  0x86   : > { %v1053_v39 = vor.u32 %v1051_v29, %v1049_v32  ;;  %v1050_v46 = vsel %vm774_vm1, %v1045_v36, %v1049_v32  ;;  %v1097_v32 = vrot.slane %v1095_v23, 1  ;;  %v7001_v10 = vrot.slane %v20079_v8, 2  ;;  %v19943_v23 = vld [vmem:[%s20493_s8 + $0x188] sm:$0xff]  }
  0x87   : > { %17543 = vmatmul.mubr.msk.bf16.gmra.mrb[52].mxu1 %vm1323_vm2, %v1002_v31  ;;  %v5738_v31 = vor.u32 %v5737_v22, %v5734_v21  ;;  %v8863_v21 = vsel %vm1528_vm0, %v20666_v54, 0  ;;  %v6988_v22 = vsel %vm6981_vm4, %v6985_v5, %v6987_v11 }
  0x88   : > { %17546 = vmatprep.mubr.msk.bf16.mxu1 %vm1323_vm2, %v1010_v38  ;;  %v5746_v38 = vrot.slane %v5744_v28, 2  ;;  %v1058_v49 = vsel %vm774_vm1, %v1053_v39, %v1057_v40  ;;  %v20756_v28 = vld [vmem:[%s25249_s1 + $0x8] sm:$0xf]  ;;  %v1111_v40 = vshll.u32 %v19936_v33, 16 }
  0x89   : > { %v5739_v42 = vsel %vm5434_vm3, %v5729_v26, %v5738_v31  ;;  %19822 = vmatprep.subr.msk.bf16.mxu1 %vm1528_vm0, %v20756_v28 }
  0x8a   : > { %18095 = vmatmul.mubr.msk.bf16.gmra.mrb[52].mxu0 %vm1323_vm2, %v5694_v45  ;;  %v1063_v45 = vshll.u32 %v19930_v34, 16  ;;  %v20725_v48 = vor.u32 %v5746_v38, %v5743_v37  ;;  %v1093_v34 = vor.u32 %v1091_v27, %v1089_v18  ;;  %v19937_v38 = vld [vmem:[%s20493_s8 + $0x158] sm:$0xff]  }
  0x8b   : > { %18098 = vmatprep.mubr.msk.bf16.mxu0 %vm1323_vm2, %v5703_v55  ;;  %v6983_v55 = vrot.slane %v20070_v53, 2  ;;  %v20077_v53 = vld [vmem:[%s20493_s8 + $0x50] sm:$0xff]  }
  0x8c   : > { %25280 = vst [vmem:[#allocation4_spill] sm:$0xff] %v20725_v48  ;;  %v1065_v56 = vrot.slane %v1063_v45, 1  ;;  %v5748_v59 = vsel %vm5434_vm3, %v5738_v31, %v20725_v48  ;;  %v6991_v31 = vrot.slane %v20074_v30, 2  ;;  %v6993_v45 = vrot.slane %v20075_v44, 2  ;;  %v20082_v44 = vld [vmem:[%s20493_s8 + $0x78] sm:$0xff]  }
  0x8d   : > { %v6984_v63 = vsel %vm6981_vm4, %v6982_v52, %v6983_v55  ;;  %v6986_v16 = vsel %vm6981_vm4, %v6983_v55, %v6985_v5  ;;  %v6995_v52 = vrot.slane %v20076_v51, 2  ;;  %v6997_v55 = vrot.slane %v20077_v53, 2  ;;  %v21330_v48 = vld [vmem:[%s20493_s8 + $0x58] sm:$0xff]  }
  0x8e   : > { %v1066_v1 = vsel %vm774_vm1, %v1061_v58, %v1065_v56  ;;  %25286 = vst [vmem:[#allocation10_spill] sm:$0xff] %v21330_v48  ;;  %v8534_v20 = vrot.slane %v21330_v48, 2 }
  0x8f   : > { %17547 = vmatmul.mubr.msk.bf16.gmra.mrb[56].mxu1 %vm1323_vm2, %v1018_v60  ;;  %v1069_v60 = vor.u32 %v1067_v50, %v1065_v56  ;;  %v19939_v50 = vld [vmem:[%s20493_s8 + $0x168] sm:$0xff]   ;;  %v1113_v56 = vrot.slane %v1111_v40, 1 }
  0x90   : > { %17550 = vmatprep.mubr.msk.bf16.mxu1 %vm1323_vm2, %v1026_v0  ;;  %v1079_v0 = vshll.u32 %v19932_v57, 16  ;;  %v1127_v57 = vshll.u32 %v19938_v41, 16  ;;  %v1135_v62 = vshll.u32 %v19939_v50, 16 }
  0x91   : > { %v1074_v6 = vsel %vm774_vm1, %v1069_v60, %v1073_v61  ;;  %v1117_v60 = vor.u32 %v1115_v47, %v1113_v56 }
  0x92   : > { %18099 = vmatmul.mubr.msk.bf16.gmra.mrb[56].mxu0 %vm1323_vm2, %v5712_v15  ;;  %v1081_v13 = vrot.slane %v1079_v0, 1  ;;  %v1077_v15 = vor.u32 %v1075_v2, %v1073_v61  ;;  %v19940_v0 = vld [vmem:[%s20493_s8 + $0x170] sm:$0xff]   ;;  %v1123_v2 = vshrl.u32 %v19937_v38, 16 }
  0x93   : > { %18102 = vmatprep.mubr.msk.bf16.mxu0 %vm1323_vm2, %v5721_v19  ;;  %v19935_v19 = vld [vmem:[%s20493_s8 + $0x148] sm:$0xff]  }
  0x94   : > { %v1085_v17 = vor.u32 %v1083_v7, %v1081_v13  ;;  %v1082_v24 = vsel %vm774_vm1, %v1077_v15, %v1081_v13  ;;  %v1103_v29 = vshll.u32 %v19935_v19, 16  ;;  %v1107_v43 = vshrl.u32 %v19935_v19, 16 }
  0x95   : > { %v1129_v13 = vrot.slane %v1127_v57, 1  ;;  %v1143_v19 = vshll.u32 %v19940_v0, 16 }
  0x96   : > { %v1090_v54 = vsel %vm774_vm1, %v1085_v17, %v1089_v18  ;;  %v1105_v37 = vrot.slane %v1103_v29, 1  ;;  %v1139_v18 = vshrl.u32 %v19939_v50, 16  ;;  %v20081_v29 = vld [vmem:[%s20493_s8 + $0x70] sm:$0xff]  }
  0x97   : > { %17551 = vmatmul.mubr.msk.bf16.gmra.mrb[60].mxu1 %vm1323_vm2, %v1034_v25  ;;  %v20073_v25 = vld [vmem:[%s20493_s8 + $0x30] sm:$0xff]   ;;  %v1133_v17 = vor.u32 %v1131_v4, %v1129_v13  ;;  %v7005_v30 = vrot.slane %v20081_v29, 2 }
  0x98   : > { %17554 = vmatprep.mubr.msk.bf16.mxu1 %vm1323_vm2, %v1042_v12  ;;  %v6989_v26 = vrot.slane %v20073_v25, 2  ;;  %v1099_v12 = vshrl.u32 %v19934_v14, 16  ;;  %v1109_v58 = vor.u32 %v1107_v43, %v1105_v37  ;;  %v1137_v14 = vrot.slane %v1135_v62, 1  ;;  %v20085_v4 = vld [vmem:[%s20493_s8 + $0x90] sm:$0xff]  }
  0x99   : > { %v1147_v25 = vshrl.u32 %v19940_v0, 16 }
  0x9a   : > { %18103 = vmatmul.mubr.msk.bf16.gmra.mrb[60].mxu0 %vm1323_vm2, %v5730_v35  ;;  %v6990_v35 = vsel %vm6981_vm4, %v6987_v11, %v6989_v26  ;;  %v1101_v36 = vor.u32 %v1099_v12, %v1097_v32  ;;  %v6992_v39 = vsel %vm6981_vm4, %v6989_v26, %v6991_v31  ;;  %v19941_v11 = vld [vmem:[%s20493_s8 + $0x178] sm:$0xff]   ;;  %v1138_v27 = vsel %vm774_vm1, %v1133_v17, %v1137_v14 }
  0x9b   : > { %18106 = vmatprep.mubr.msk.bf16.mxu0 %vm1323_vm2, %v5739_v42  ;;  %v1098_v42 = vsel %vm774_vm1, %v1093_v34, %v1097_v32  ;;  %v1151_v26 = vshll.u32 %v19941_v11, 16  ;;  %v1141_v33 = vor.u32 %v1139_v18, %v1137_v14  ;;  %v1155_v41 = vshrl.u32 %v19941_v11, 16 }
  0x9f   : > { %17555 = vmatmul.mubr.msk.bf16.gmra.mrb[64].mxu1 %vm1323_vm2, %v1050_v46  ;;  %v1106_v46 = vsel %vm774_vm1, %v1101_v36, %v1105_v37  ;;  %v1153_v36 = vrot.slane %v1151_v26, 1  ;;  %v1167_v37 = vshll.u32 %v19943_v23, 16  ;;  %v19949_v26 = vld [vmem:[%s20493_s8 + $0x1b8] sm:$0xff]  }
  0xa0   : > { %17558 = vmatprep.mubr.msk.bf16.mxu1 %vm1323_vm2, %v1058_v49  ;;  %v1119_v49 = vshll.u32 %v19937_v38, 16 }
  0xa1   : > { %v1169_v51 = vrot.slane %v1167_v37, 1 }
  0xa2   : > { %18107 = vmatmul.mubr.msk.bf16.gmra.mrb[64].mxu0 %vm1323_vm2, %v5748_v59  ;;  %v6994_v59 = vsel %vm6981_vm4, %v6991_v31, %v6993_v45  ;;  %v1121_v61 = vrot.slane %v1119_v49, 1  ;;  %v1145_v31 = vrot.slane %v1143_v19, 1  ;;  %v19945_v49 = vld [vmem:[%s20493_s8 + $0x198] sm:$0xff]  }
  0xa3   : > { %18180 = vmatprep.mubr.msk.bf16.mxu0 %vm1323_vm2, %v6984_v63  ;;  %v6996_v63 = vsel %vm6981_vm4, %v6993_v45, %v6995_v52  ;;  %v7007_v45 = vrot.slane %v20082_v44, 2  ;;  %v1187_v18 = vshrl.u32 %v19945_v49, 16 }
  0xa4   : > { %v1122_v5 = vsel %vm774_vm1, %v1117_v60, %v1121_v61  ;;  %v1125_v15 = vor.u32 %v1123_v2, %v1121_v61  ;;  %v1146_v40 = vsel %vm774_vm1, %v1141_v33, %v1145_v31  ;;  %v19947_v60 = vld [vmem:[%s20493_s8 + $0x1a8] sm:$0xff]   ;;  %v19950_v33 = vld [vmem:[%s20493_s8 + $0x1c0] sm:$0xff]  }
  0xa5   : > { %v1199_v14 = vshll.u32 %v19947_v60, 16 }
  0xa7   : > { %17559 = vmatmul.mubr.msk.bf16.gmra.mrb[68].mxu1 %vm1323_vm2, %v1066_v1  ;;  %v1114_v1 = vsel %vm774_vm1, %v1109_v58, %v1113_v56  ;;  %v1171_v56 = vshrl.u32 %v19943_v23, 16  ;;  %v19946_v58 = vld [vmem:[%s20493_s8 + $0x1a0] sm:$0xff]  }
  0xa8   : > { %17562 = vmatprep.mubr.msk.bf16.mxu1 %vm1323_vm2, %v1074_v6  ;;  %v20078_v6 = vld [vmem:[%s20493_s8 + $0x58] sm:$0xff]   ;;  %v1195_v19 = vshrl.u32 %v19946_v58, 16 }
  0xa9   : > { %v6999_v7 = vrot.slane %v20078_v6, 2  ;;  %v1173_v8 = vor.u32 %v1171_v56, %v1169_v51  ;;  %v1219_v56 = vshrl.u32 %v19949_v26, 16 }
  0xaa   : > { %18181 = vmatmul.mubr.msk.bf16.vlgmr.msra.gmra.mrb[0].mxu0 %vm1323_vm2, %v6986_v16  ;;  %v6998_v16 = vsel %vm6981_vm4, %v6995_v52, %v6997_v55  ;;  %v1157_v52 = vor.u32 %v1155_v41, %v1153_v36 }
  0xab   : > { %18317 = vmatpush3.bf16.msra.mxu0 %v8863_v21  ;;  %18184 = vmatprep.mubr.msk.bf16.mxu0 %vm1323_vm2, %v6988_v22  ;;  %v19942_v21 = vld [vmem:[%s20493_s8 + $0x180] sm:$0xff]   ;;  %v7000_v22 = vsel %vm6981_vm4, %v6997_v55, %v6999_v7  ;;  %v7002_v34 = vsel %vm6981_vm4, %v6999_v7, %v7001_v10  ;;  %v1191_v7 = vshll.u32 %v19946_v58, 16 }
  0xac   : > { %v1159_v32 = vshll.u32 %v19942_v21, 16 }
  0xae   : > { %v1161_v50 = vrot.slane %v1159_v32, 1 }
  0xaf   : > { %17563 = vmatmul.mubr.msk.bf16.gmra.mrb[72].mxu1 %vm1323_vm2, %v1082_v24  ;;  %v1130_v24 = vsel %vm774_vm1, %v1125_v15, %v1129_v13 }
  0xb0   : > { %17566 = vmatprep.mubr.msk.bf16.mxu1 %vm1323_vm2, %v1090_v54  ;;  %v20080_v54 = vld [vmem:[%s20493_s8 + $0x68] sm:$0xff]   ;;  %v1162_v61 = vsel %vm774_vm1, %v1157_v52, %v1161_v50 }
  0xb1   : > { %v7003_v12 = vrot.slane %v20080_v54, 2  ;;  %v1201_v54 = vrot.slane %v1199_v14, 1 }
  0xb2   : > { %18185 = vmatmul.mubr.msk.bf16.gmra.mrb[4].mxu0 %vm1323_vm2, %v6990_v35  ;;  %v1149_v35 = vor.u32 %v1147_v25, %v1145_v31  ;;  %v1203_v31 = vshrl.u32 %v19947_v60, 16 }
  0xb3   : > { %18188 = vmatprep.mubr.msk.bf16.mxu0 %vm1323_vm2, %v6992_v39  ;;  %v7004_v38 = vsel %vm6981_vm4, %v7001_v10, %v7003_v12  ;;  %v19944_v39 = vld [vmem:[%s20493_s8 + $0x190] sm:$0xff]   ;;  %v7006_v53 = vsel %vm6981_vm4, %v7003_v12, %v7005_v30 }
  0xb4   : > { %v1154_v43 = vsel %vm774_vm1, %v1149_v35, %v1153_v36  ;;  %v1175_v57 = vshll.u32 %v19944_v39, 16  ;;  %v1179_v62 = vshrl.u32 %v19944_v39, 16  ;;  %v19951_v35 = vld [vmem:[%s20493_s8 + $0x1c8] sm:$0xff]  }
  0xb6   : > { %v1177_v6 = vrot.slane %v1175_v57, 1  ;;  %v1227_v57 = vshrl.u32 %v19950_v33, 16 }
  0xb7   : > { %17567 = vmatmul.mubr.msk.bf16.gmra.mrb[76].mxu1 %vm1323_vm2, %v1098_v42  ;;  %v1163_v42 = vshrl.u32 %v19942_v21, 16 }
  0xb8   : > { %17570 = vmatprep.mubr.msk.bf16.mxu1 %vm1323_vm2, %v1106_v46  ;;  %v20083_v46 = vld [vmem:[%s20493_s8 + $0x80] sm:$0xff]   ;;  %v1181_v11 = vor.u32 %v1179_v62, %v1177_v6  ;;  %v1178_v17 = vsel %vm774_vm1, %v1173_v8, %v1177_v6  ;;  %v1235_v6 = vshrl.u32 %v19951_v35, 16 }
  0xb9   : > { %v7009_v47 = vrot.slane %v20083_v46, 2  ;;  %v1165_v55 = vor.u32 %v1163_v42, %v1161_v50  ;;  %v20089_v42 = vld [vmem:[%s20493_s8 + $0xb0] sm:$0xff]   ;;  %v1205_v46 = vor.u32 %v1203_v31, %v1201_v54 }
  0xba   : > { %18189 = vmatmul.mubr.msk.bf16.gmra.mrb[8].mxu0 %vm1323_vm2, %v6994_v59  ;;  %v7008_v59 = vsel %vm6981_vm4, %v7005_v30, %v7007_v45 }
  0xbb   : > { %18192 = vmatprep.mubr.msk.bf16.mxu0 %vm1323_vm2, %v6996_v63  ;;  %v1183_v63 = vshll.u32 %v19945_v49, 16  ;;  %v1170_v0 = vsel %vm774_vm1, %v1165_v55, %v1169_v51  ;;  %v7010_v10 = vsel %vm6981_vm4, %v7007_v45, %v7009_v47  ;;  %v1223_v45 = vshll.u32 %v19950_v33, 16  ;;  %v20094_v33 = vld [vmem:[%s20493_s8 + $0xd8] sm:$0xff]  }
  0xbc   : > { %v1231_v51 = vshll.u32 %v19951_v35, 16 }
  0xbd   : > { %v1185_v13 = vrot.slane %v1183_v63, 1  ;;  %v20864_v63 = vld [vmem:[%s20493_s8 + $0x1d8] sm:$0xff]  }
  0xbe   : > { %v1247_v14 = vshll.u32 %v20864_v63, 16 }
  0xbf   : > { %17571 = vmatmul.mubr.msk.bf16.gmra.mrb[80].mxu1 %vm1323_vm2, %v1114_v1  ;;  %v20084_v1 = vld [vmem:[%s20493_s8 + $0x88] sm:$0xff]   ;;  %v1186_v21 = vsel %vm774_vm1, %v1181_v11, %v1185_v13  ;;  %v1189_v12 = vor.u32 %v1187_v18, %v1185_v13  ;;  %v20093_v18 = vld [vmem:[%s20493_s8 + $0xd0] sm:$0xff]  }
  0xc0   : > { %17574 = vmatprep.mubr.msk.bf16.mxu1 %vm1323_vm2, %v1122_v5  ;;  %v7011_v2 = vrot.slane %v20084_v1, 2  ;;  %v7013_v5 = vrot.slane %v20085_v4, 2  ;;  %v1233_v1 = vrot.slane %v1231_v51, 1 }
  0xc2   : > { %18193 = vmatmul.mubr.msk.bf16.gmra.mrb[12].mxu0 %vm1323_vm2, %v6998_v16  ;;  %v7012_v15 = vsel %vm6981_vm4, %v7009_v47, %v7011_v2  ;;  %v19948_v16 = vld [vmem:[%s20493_s8 + $0x1b0] sm:$0xff]   ;;  %v7014_v29 = vsel %vm6981_vm4, %v7011_v2, %v7013_v5 }
  0xc3   : > { %18196 = vmatprep.mubr.msk.bf16.mxu0 %vm1323_vm2, %v7000_v22  ;;  %v20086_v22 = vld [vmem:[%s20493_s8 + $0x98] sm:$0xff]   ;;  %v1207_v32 = vshll.u32 %v19948_v16, 16  ;;  %v1211_v37 = vshrl.u32 %v19948_v16, 16  ;;  %v20092_v16 = vld [vmem:[%s20493_s8 + $0xc8] sm:$0xff]  }
  0xc4   : > { %v7015_v23 = vrot.slane %v20086_v22, 2 }
  0xc5   : > { %v1209_v44 = vrot.slane %v1207_v32, 1 }
  0xc7   : > { %17575 = vmatmul.mubr.msk.bf16.gmra.mrb[84].mxu1 %vm1323_vm2, %v1130_v24  ;;  %v20087_v24 = vld [vmem:[%s20493_s8 + $0xa0] sm:$0xff]   ;;  %v1213_v49 = vor.u32 %v1211_v37, %v1209_v44  ;;  %v1210_v55 = vsel %vm774_vm1, %v1205_v46, %v1209_v44 }
  0xc8   : > { %17578 = vmatprep.mubr.msk.bf16.mxu1 %vm1323_vm2, %v1138_v27  ;;  %v7017_v25 = vrot.slane %v20087_v24, 2  ;;  %v1193_v27 = vrot.slane %v1191_v7, 1  ;;  %v1237_v24 = vor.u32 %v1235_v6, %v1233_v1  ;;  %v20095_v46 = vld [vmem:[%s20493_s8 + $0xe0] sm:$0xff]  }
  0xca   : > { %18197 = vmatmul.mubr.msk.bf16.gmra.mrb[16].mxu0 %vm1323_vm2, %v7002_v34  ;;  %v1197_v30 = vor.u32 %v1195_v19, %v1193_v27  ;;  %v7016_v34 = vsel %vm6981_vm4, %v7013_v5, %v7015_v23  ;;  %v1194_v36 = vsel %vm774_vm1, %v1189_v12, %v1193_v27  ;;  %v7018_v47 = vsel %vm6981_vm4, %v7015_v23, %v7017_v25 }
  0xcb   : > { %18200 = vmatprep.mubr.msk.bf16.mxu0 %vm1323_vm2, %v7004_v38  ;;  %v1215_v38 = vshll.u32 %v19949_v26, 16  ;;  %v7029_v19 = vrot.slane %v20093_v18, 2  ;;  %v1251_v23 = vshrl.u32 %v20864_v63, 16  ;;  %v1249_v27 = vrot.slane %v1247_v14, 1 }
  0xcc   : > { %v1202_v39 = vsel %vm774_vm1, %v1197_v30, %v1201_v54 }
  0xcd   : > { %v1217_v50 = vrot.slane %v1215_v38, 1  ;;  %v1253_v37 = vor.u32 %v1251_v23, %v1249_v27  ;;  %v20945_v23 = vld [vmem:[%s20493_s8 + $0x218] sm:$0xff]  }
  0xcf   : > { %17579 = vmatmul.mubr.msk.bf16.gmra.mrb[88].mxu1 %vm1323_vm2, %v1146_v40  ;;  %v20088_v40 = vld [vmem:[%s20493_s8 + $0xa8] sm:$0xff]   ;;  %v1218_v58 = vsel %vm774_vm1, %v1213_v49, %v1217_v50  ;;  %v1221_v2 = vor.u32 %v1219_v56, %v1217_v50 }
  0xd0   : > { %17582 = vmatprep.mubr.msk.bf16.mxu1 %vm1323_vm2, %v1154_v43  ;;  %v7019_v41 = vrot.slane %v20088_v40, 2  ;;  %v7021_v43 = vrot.slane %v20089_v42, 2 }
  0xd2   : > { %18201 = vmatmul.mubr.msk.bf16.gmra.mrb[20].mxu0 %vm1323_vm2, %v7006_v53  ;;  %v7020_v52 = vsel %vm6981_vm4, %v7017_v25, %v7019_v41  ;;  %v20855_v53 = vld [vmem:[%s20493_s8 + $0x1d0] sm:$0xff]   ;;  %v7022_v4 = vsel %vm6981_vm4, %v7019_v41, %v7021_v43  ;;  %v20905_v41 = vld [vmem:[%s20493_s8 + $0x1f8] sm:$0xff]  }
  0xd3   : > { %18204 = vmatprep.mubr.msk.bf16.mxu0 %vm1323_vm2, %v7008_v59  ;;  %v20090_v59 = vld [vmem:[%s20493_s8 + $0xb8] sm:$0xff]   ;;  %v1239_v7 = vshll.u32 %v20855_v53, 16  ;;  %v1243_v13 = vshrl.u32 %v20855_v53, 16  ;;  %v1279_v51 = vshll.u32 %v20905_v41, 16 }
  0xd4   : > { %v7023_v60 = vrot.slane %v20090_v59, 2 }
  0xd5   : > { %v1241_v22 = vrot.slane %v1239_v7, 1 }
  0xd6   : > { %v7024_v8 = vsel %vm6981_vm4, %v7021_v43, %v7023_v60 }
  0xd7   : > { %17583 = vmatmul.mubr.msk.bf16.gmra.mrb[92].mxu1 %vm1323_vm2, %v1162_v61  ;;  %v20091_v61 = vld [vmem:[%s20493_s8 + $0xc0] sm:$0xff]   ;;  %v1245_v26 = vor.u32 %v1243_v13, %v1241_v22  ;;  %v20098_v13 = vld [vmem:[%s20493_s8 + $0xf8] sm:$0xff]  }
  0xd8   : > { %17586 = vmatprep.mubr.msk.bf16.mxu1 %vm1323_vm2, %v1170_v0  ;;  %v7025_v62 = vrot.slane %v20091_v61, 2  ;;  %v1225_v0 = vrot.slane %v1223_v45, 1  ;;  %v1281_v61 = vrot.slane %v1279_v51, 1  ;;  %v7039_v14 = vrot.slane %v20098_v13, 2  ;;  %v20991_v13 = vld [vmem:[%s20493_s8 + $0x8] sm:$0xff]  }
  0xd9   : > { %v1250_v32 = vsel %vm774_vm1, %v1245_v26, %v1249_v27 }
  0xda   : > { %18205 = vmatmul.mubr.msk.bf16.gmra.mrb[24].mxu0 %vm1323_vm2, %v7010_v10  ;;  %v1229_v5 = vor.u32 %v1227_v57, %v1225_v0  ;;  %v20872_v10 = vld [vmem:[%s20493_s8 + $0x1e0] sm:$0xff]   ;;  %v1226_v11 = vsel %vm774_vm1, %v1221_v2, %v1225_v0  ;;  %v7026_v25 = vsel %vm6981_vm4, %v7023_v60, %v7025_v62 }
  0xdb   : > { %18208 = vmatprep.mubr.msk.bf16.mxu0 %vm1323_vm2, %v7012_v15  ;;  %v1255_v54 = vshll.u32 %v20872_v10, 16  ;;  %v1259_v30 = vshrl.u32 %v20872_v10, 16  ;;  %v20920_v57 = vld [vmem:[%s20493_s8 + $0x200] sm:$0xff]  }
  0xdc   : > { %v1234_v15 = vsel %vm774_vm1, %v1229_v5, %v1233_v1  ;;  %v1287_v1 = vshll.u32 %v20920_v57, 16  ;;  %v20097_v5 = vld [vmem:[%s20493_s8 + $0xf0] sm:$0xff]  }
  0xdd   : > { %v1257_v35 = vrot.slane %v1255_v54, 1  ;;  %v7037_v6 = vrot.slane %v20097_v5, 2  ;;  %v20099_v54 = vld [vmem:[%s20493_s8 + $0x100] sm:$0xff]  }
  0xdf   : > { %17587 = vmatmul.mubr.msk.bf16.gmra.mrb[96].mxu1 %vm1323_vm2, %v1178_v17  ;;  %v7027_v17 = vrot.slane %v20092_v16, 2  ;;  %v1258_v44 = vsel %vm774_vm1, %v1253_v37, %v1257_v35  ;;  %v20940_v16 = vld [vmem:[%s20493_s8 + $0x210] sm:$0xff]   ;;  %v19962_v37 = vld [vmem:[%s20493_s8 + $0x220] ss:$0 sps:$4 sm:$0x11]  }
  0xe0   : > { %17590 = vmatprep.mubr.msk.bf16.mxu1 %vm1323_vm2, %v1186_v21  ;;  %v20883_v21 = vld [vmem:[%s20493_s8 + $0x1e8] sm:$0xff]  }
  0xe1   : > { %v7028_v12 = vsel %vm6981_vm4, %v7025_v62, %v7027_v17  ;;  %v1263_v31 = vshll.u32 %v20883_v21, 16  ;;  %v7030_v38 = vsel %vm6981_vm4, %v7027_v17, %v7029_v19  ;;  %v1267_v45 = vshrl.u32 %v20883_v21, 16  ;;  %v20925_v62 = vld [vmem:[%s20493_s8 + $0x208] sm:$0xff]  }
  0xe2   : > { %18209 = vmatmul.mubr.msk.bf16.gmra.mrb[28].mxu0 %vm1323_vm2, %v7014_v29  ;;  %v1242_v29 = vsel %vm774_vm1, %v1237_v24, %v1241_v22  ;;  %v7040_v24 = vsel %vm6981_vm4, %v7037_v6, %v7039_v14  ;;  %v1299_v27 = vshrl.u32 %v20925_v62, 16 }
  0xe3   : > { %18212 = vmatprep.mubr.msk.bf16.mxu0 %vm1323_vm2, %v7016_v34  ;;  %v7031_v34 = vrot.slane %v20094_v33, 2  ;;  %v1265_v40 = vrot.slane %v1263_v31, 1  ;;  %v1311_v31 = vshll.u32 %v20945_v23, 16 }
  0xe5   : > { %v7032_v42 = vsel %vm6981_vm4, %v7029_v19, %v7031_v34 }
  0xe7   : > { %17591 = vmatmul.mubr.msk.bf16.gmra.mrb[100].mxu1 %vm1323_vm2, %v1194_v36  ;;  %v20900_v36 = vld [vmem:[%s20493_s8 + $0x1f0] sm:$0xff]  }
  0xe8   : > { %17594 = vmatprep.mubr.msk.bf16.mxu1 %vm1323_vm2, %v1202_v39  ;;  %v1261_v39 = vor.u32 %v1259_v30, %v1257_v35  ;;  %v1271_v43 = vshll.u32 %v20900_v36, 16  ;;  %v1275_v50 = vshrl.u32 %v20900_v36, 16  ;;  %v1307_v30 = vshrl.u32 %v20940_v16, 16 }
  0xea   : > { %18213 = vmatmul.mubr.msk.bf16.gmra.mrb[32].mxu0 %vm1323_vm2, %v7018_v47  ;;  %v7033_v47 = vrot.slane %v20095_v46, 2  ;;  %v1266_v49 = vsel %vm774_vm1, %v1261_v39, %v1265_v40  ;;  %v1273_v56 = vrot.slane %v1271_v43, 1  ;;  %v20101_v46 = vld [vmem:[%s20493_s8 + $0x110] sm:$0xff]  }
  0xeb   : > { %18216 = vmatprep.mubr.msk.bf16.mxu0 %vm1323_vm2, %v7020_v52  ;;  %v20096_v52 = vld [vmem:[%s20493_s8 + $0xe8] sm:$0xff]  }
  0xec   : > { %v7034_v59 = vsel %vm6981_vm4, %v7031_v34, %v7033_v47  ;;  %v1277_v60 = vor.u32 %v1275_v50, %v1273_v56  ;;  %v20102_v50 = vld [vmem:[%s20493_s8 + $0x118] sm:$0xff]  }
  0xed   : > { %v7047_v51 = vrot.slane %v20102_v50, 2  ;;  %v21062_v50 = vld [vmem:[%s20493_s8 + $0x48] sm:$0xff]  }
  0xee   : > { %v1282_v7 = vsel %vm774_vm1, %v1277_v60, %v1281_v61 }
  0xef   : > { %17595 = vmatmul.mubr.msk.bf16.gmra.mrb[104].mxu1 %vm1323_vm2, %v1210_v55  ;;  %v7035_v55 = vrot.slane %v20096_v52, 2 }
  0xf0   : > { %17598 = vmatprep.mubr.msk.bf16.mxu1 %vm1323_vm2, %v1218_v58  ;;  %v1269_v58 = vor.u32 %v1267_v45, %v1265_v40  ;;  %v1313_v40 = vrot.slane %v1311_v31, 1  ;;  %v1319_v45 = vshll.u32 %v19962_v37, 16  ;;  %v21030_v31 = vld [vmem:[%s20493_s8 + $0x28] sm:$0xff]  }
  0xf1   : > { %v7036_v0 = vsel %vm6981_vm4, %v7033_v47, %v7035_v55  ;;  %v7038_v18 = vsel %vm6981_vm4, %v7035_v55, %v7037_v6  ;;  %v7045_v47 = vrot.slane %v20101_v46, 2  ;;  %v19965_v6 = vld [vmem:[%s20493_s8 + $0x138] sm:$0xff]   ;;  %v19971_v37 = vld [vmem:[%s20493_s8 + $0x168] sm:$0xff]  }
  0xf2   : > { %18217 = vmatmul.mubr.msk.bf16.gmra.mrb[36].mxu0 %vm1323_vm2, %v7022_v4  ;;  %v1274_v2 = vsel %vm774_vm1, %v1269_v58, %v1273_v56  ;;  %v1283_v4 = vshrl.u32 %v20905_v41, 16  ;;  %v1321_v55 = vrot.slane %v1319_v45, 1  ;;  %v19973_v46 = vld [vmem:[%s20493_s8 + $0x178] sm:$0xff]  }
  0xf3   : > { %18220 = vmatprep.mubr.msk.bf16.mxu0 %vm1323_vm2, %v7024_v8  ;;  %v1291_v8 = vshrl.u32 %v20920_v57, 16  ;;  %v7048_v58 = vsel %vm6981_vm4, %v7045_v47, %v7047_v51 }
  0xf4   : > { %v1285_v17 = vor.u32 %v1283_v4, %v1281_v61  ;;  %v20103_v61 = vld [vmem:[%s20493_s8 + $0x120] sm:$0xff]   ;;  %v19964_v4 = vld [vmem:[%s20493_s8 + $0x130] sm:$0xff]  }
  0xf7   : > { %17599 = vmatmul.mubr.msk.bf16.gmra.mrb[108].mxu1 %vm1323_vm2, %v1226_v11  ;;  %v1295_v11 = vshll.u32 %v20925_v62, 16 }
  0xf8   : > { %17602 = vmatprep.mubr.msk.bf16.mxu1 %vm1323_vm2, %v1234_v15  ;;  %v1289_v15 = vrot.slane %v1287_v1, 1 }
  0xf9   : > { %v1297_v22 = vrot.slane %v1295_v11, 1  ;;  %v7055_v11 = vrot.slane %v19965_v6, 2 }
  0xfa   : > { %18221 = vmatmul.mubr.msk.bf16.gmra.mrb[40].mxu0 %vm1323_vm2, %v7026_v25  ;;  %v1293_v19 = vor.u32 %v1291_v8, %v1289_v15  ;;  %v1303_v25 = vshll.u32 %v20940_v16, 16  ;;  %v1290_v26 = vsel %vm774_vm1, %v1285_v17, %v1289_v15  ;;  %v7053_v8 = vrot.slane %v19964_v4, 2  ;;  %v19966_v15 = vld [vmem:[%s20493_s8 + $0x140] sm:$0xff]   ;;  %v19967_v17 = vld [vmem:[%s20493_s8 + $0x148] sm:$0xff]  }
  0xfb   : > { %18224 = vmatprep.mubr.msk.bf16.mxu0 %vm1323_vm2, %v7028_v12  ;;  %v7041_v12 = vrot.slane %v20099_v54, 2  ;;  %v1301_v35 = vor.u32 %v1299_v27, %v1297_v22  ;;  %v19968_v27 = vld [vmem:[%s20493_s8 + $0x150] sm:$0xff]  }
  0xfc   : > { %v1305_v34 = vrot.slane %v1303_v25, 1  ;;  %v21019_v25 = vld [vmem:[%s20493_s8 + $0x20] sm:$0xff]  }
  0xfe   : > { %v1309_v39 = vor.u32 %v1307_v30, %v1305_v34  ;;  %v1306_v43 = vsel %vm774_vm1, %v1301_v35, %v1305_v34  ;;  %v19970_v34 = vld [vmem:[%s20493_s8 + $0x160] sm:$0xff]  }
  0xff   : > { %17603 = vmatmul.mubr.msk.bf16.gmra.mrb[112].mxu1 %vm1323_vm2, %v1242_v29  ;;  %v1298_v29 = vsel %vm774_vm1, %v1293_v19, %v1297_v22  ;;  %v21009_v19 = vld [vmem:[%s25249_s1 + $0x1c] sm:$0xf]  ;;  %v7059_v22 = vrot.slane %v19967_v17, 2  ;;  %v19979_v17 = vld [vmem:[%s20493_s8 + $0x1a8] sm:$0xff]  }
 0x100   : > { %17606 = vmatprep.mubr.msk.bf16.mxu1 %vm1323_vm2, %v1250_v32  ;;  %v20100_v32 = vld [vmem:[%s20493_s8 + $0x108] sm:$0xff]   ;;  %19828 = vmatprep.subr.msk.bf16.mxu0 %vm1528_vm0, %v21009_v19 }
 0x101   : > { %v7043_v33 = vrot.slane %v20100_v32, 2  ;;  %v21035_v32 = vld [vmem:[%s20493_s8 + $0x30] sm:$0xff]  }
 0x102   : > { %18225 = vmatmul.mubr.msk.bf16.gmra.mrb[44].mxu0 %vm1323_vm2, %v7030_v38  ;;  %v7042_v38 = vsel %vm6981_vm4, %v7039_v14, %v7041_v12 }
 0x103   : > { %18228 = vmatprep.mubr.msk.bf16.mxu0 %vm1323_vm2, %v7032_v42  ;;  %v7044_v42 = vsel %vm6981_vm4, %v7041_v12, %v7043_v33  ;;  %v7046_v56 = vsel %vm6981_vm4, %v7043_v33, %v7045_v47  ;;  %v19969_v12 = vld [vmem:[%s20493_s8 + $0x158] sm:$0xff]  }
 0x104   : > { %v7063_v30 = vrot.slane %v19969_v12, 2  ;;  %v19980_v12 = vld [vmem:[%s20493_s8 + $0x1b0] sm:$0xff]  }
 0x107   : > { %17607 = vmatmul.mubr.msk.bf16.gmra.mrb[116].mxu1 %vm1323_vm2, %v1258_v44  ;;  %v1315_v44 = vshrl.u32 %v20945_v23, 16 }
 0x108   : > { %17610 = vmatprep.mubr.msk.bf16.mxu1 %vm1323_vm2, %v1266_v49  ;;  %v1314_v49 = vsel %vm774_vm1, %v1309_v39, %v1313_v40  ;;  %v7067_v39 = vrot.slane %v19971_v37, 2  ;;  %v21131_v37 = vld [vmem:[%s20493_s8 + $0x90] sm:$0xff]  }
 0x109   : > { %v1317_v52 = vor.u32 %v1315_v44, %v1313_v40  ;;  %v21046_v40 = vld [vmem:[%s20493_s8 + $0x38] sm:$0xff]   ;;  %v19972_v44 = vld [vmem:[%s20493_s8 + $0x170] sm:$0xff]  }
 0x10a   : > { %18229 = vmatmul.mubr.msk.bf16.gmra.mrb[48].mxu0 %vm1323_vm2, %v7034_v59  ;;  %v19963_v59 = vld [vmem:[%s20493_s8 + $0x128] sm:$0xff]   ;;  %v7069_v47 = vrot.slane %v19972_v44, 2 }
 0x10b   : > { %18232 = vmatprep.mubr.msk.bf16.mxu0 %vm1323_vm2, %v7036_v0  ;;  %v1322_v60 = vsel %vm774_vm1, %v1317_v52, %v1321_v55  ;;  %v7049_v0 = vrot.slane %v20103_v61, 2  ;;  %v7051_v1 = vrot.slane %v19963_v59, 2  ;;  %v19974_v55 = vld [vmem:[%s20493_s8 + $0x180] sm:$0xff]   ;;  %v21078_v61 = vld [vmem:[%s20493_s8 + $0x58] sm:$0xff]   ;;  %v19983_v44 = vld [vmem:[%s20493_s8 + $0x1c8] sm:$0xff]  }
 0x10c   : > { %v7070_v52 = vsel %vm6981_vm4, %v7067_v39, %v7069_v47  ;;  %v7073_v59 = vrot.slane %v19974_v55, 2  ;;  %v19984_v55 = vld [vmem:[%s20493_s8 + $0x1d0] sm:$0xff]   ;;  %vm23435_vm1 = vmor %vm13569_vm11, %vm13982_vm15 }
 0x10d   : > { %v7052_v5 = vsel %vm6981_vm4, %v7049_v0, %v7051_v1  ;;  %v7054_v14 = vsel %vm6981_vm4, %v7051_v1, %v7053_v8 }
 0x10f   : > { %17611 = vmatmul.mubr.msk.bf16.gmra.mrb[120].mxu1 %vm1323_vm2, %v1274_v2  ;;  %v7050_v2 = vsel %vm6981_vm4, %v7047_v51, %v7049_v0  ;;  %v21067_v51 = vld [vmem:[%s20493_s8 + $0x50] sm:$0xff]   ;;  %v21083_v0 = vld [vmem:[%s20493_s8 + $0x60] sm:$0xff]  }
 0x110   : > { %17614 = vmatprep.mubr.msk.bf16.mxu1 %vm1323_vm2, %v1282_v7  ;;  %v3174_v7 = vsel %vm1528_vm0, %v20756_v28, 0  ;;  %v7056_v28 = vsel %vm6981_vm4, %v7053_v8, %v7055_v11  ;;  %v21094_v8 = vld [vmem:[%s20493_s8 + $0x68] sm:$0xff]  }
 0x112   : > { %18233 = vmatmul.mubr.msk.bf16.gmra.mrb[52].mxu0 %vm1323_vm2, %v7038_v18  ;;  %v7057_v18 = vrot.slane %v19966_v15, 2  ;;  %v19978_v15 = vld [vmem:[%s20493_s8 + $0x1a0] sm:$0xff]  }
 0x113   : > { %18236 = vmatprep.mubr.msk.bf16.mxu0 %vm1323_vm2, %v7040_v24  ;;  %v21014_v24 = vld [vmem:[%s20493_s8 + $0x18] sm:$0xff]  }
 0x114   : > { %v7060_v54 = vsel %vm6981_vm4, %v7057_v18, %v7059_v22 }
 0x117   : > { %17615 = vmatmul.mubr.msk.bf16.gmra.mrb[124].mxu1 %vm1323_vm2, %v1290_v26  ;;  %v7058_v26 = vsel %vm6981_vm4, %v7055_v11, %v7057_v18  ;;  %v21099_v11 = vld [vmem:[%s20493_s8 + $0x70] sm:$0xff]   ;;  %v7081_v18 = vrot.slane %v19978_v15, 2 }
 0x118   : > { %17618 = vmatprep.mubr.msk.bf16.mxu1 %vm1323_vm2, %v1298_v29  ;;  %v7061_v29 = vrot.slane %v19968_v27, 2  ;;  %v21115_v27 = vld [vmem:[%s20493_s8 + $0x80] sm:$0xff]  }
 0x11a   : > { %18237 = vmatmul.mubr.msk.bf16.gmra.mrb[56].mxu0 %vm1323_vm2, %v7042_v38  ;;  %v7062_v33 = vsel %vm6981_vm4, %v7059_v22, %v7061_v29  ;;  %v7064_v35 = vsel %vm6981_vm4, %v7061_v29, %v7063_v30  ;;  %v7065_v38 = vrot.slane %v19970_v34, 2  ;;  %v7083_v22 = vrot.slane %v19979_v17, 2  ;;  %v21179_v17 = vld [vmem:[%s20493_s8 + $0xc0] sm:$0xff]  }
 0x11b   : > { %18240 = vmatprep.mubr.msk.bf16.mxu0 %vm1323_vm2, %v7044_v42  ;;  %v21051_v42 = vld [vmem:[%s20493_s8 + $0x40] sm:$0xff]  }
 0x11c   : > { %v7068_v45 = vsel %vm6981_vm4, %v7065_v38, %v7067_v39  ;;  %v7084_v29 = vsel %vm6981_vm4, %v7081_v18, %v7083_v22  ;;  %v19982_v39 = vld [vmem:[%s20493_s8 + $0x1c0] sm:$0xff]  }
 0x11f   : > { %17619 = vmatmul.mubr.msk.bf16.gmra.mrb[128].mxu1 %vm1323_vm2, %v1306_v43  ;;  %v7066_v43 = vsel %vm6981_vm4, %v7063_v30, %v7065_v38  ;;  %v19981_v30 = vld [vmem:[%s20493_s8 + $0x1b8] sm:$0xff]  }
 0x120   : > { %17622 = vmatprep.mubr.msk.bf16.mxu1 %vm1323_vm2, %v1314_v49  ;;  %v7071_v49 = vrot.slane %v19973_v46, 2  ;;  %v7087_v34 = vrot.slane %v19981_v30, 2  ;;  %v7091_v46 = vrot.slane %v19983_v44, 2  ;;  %v19991_v44 = vld [vmem:[%s20493_s8 + $0x208] sm:$0xff]  }
 0x122   : > { %18241 = vmatmul.mubr.msk.bf16.gmra.mrb[60].mxu0 %vm1323_vm2, %v7046_v56  ;;  %v7072_v56 = vsel %vm6981_vm4, %v7069_v47, %v7071_v49  ;;  %v7074_v1 = vsel %vm6981_vm4, %v7071_v49, %v7073_v59  ;;  %v21142_v47 = vld [vmem:[%s20493_s8 + $0x98] sm:$0xff]   ;;  %v21147_v49 = vld [vmem:[%s20493_s8 + $0xa0] sm:$0xff]  }
 0x123   : > { %18244 = vmatprep.mubr.msk.bf16.mxu0 %vm1323_vm2, %v7048_v58  ;;  %v19975_v58 = vld [vmem:[%s20493_s8 + $0x188] sm:$0xff]  }
 0x127   : > { %17623 = vmatmul.mubr.msk.bf16.gmra.mrb[132].mxu1 %vm1323_vm2, %v1322_v60  ;;  %v7075_v60 = vrot.slane %v19975_v58, 2  ;;  %v19985_v58 = vld [vmem:[%s20493_s8 + $0x1d8] sm:$0xff]  }
 0x128   : > { %17628 = vmatprep.mubr.msk.bf16.mxu1 %vm1323_vm2, %v20498_v9  ;;  %v20996_v9 = vld [vmem:[%s20493_s8 + $0x10] sm:$0xff]  }
 0x129   : > { %v7076_v4 = vsel %vm6981_vm4, %v7073_v59, %v7075_v60  ;;  %v7093_v59 = vrot.slane %v19984_v55, 2  ;;  %v21211_v55 = vld [vmem:[%s20493_s8 + $0xe0] sm:$0xff]  }
 0x12a   : > { %18245 = vmatmul.mubr.msk.bf16.gmra.mrb[64].mxu0 %vm1323_vm2, %v7050_v2  ;;  %v19976_v2 = vld [vmem:[%s20493_s8 + $0x190] sm:$0xff]  }
 0x12b   : > { %18248 = vmatprep.mubr.msk.bf16.mxu0 %vm1323_vm2, %v7052_v5  ;;  %v19977_v5 = vld [vmem:[%s20493_s8 + $0x198] sm:$0xff]   ;;  %v7077_v6 = vrot.slane %v19976_v2, 2  ;;  %v21163_v2 = vld [vmem:[%s20493_s8 + $0xb0] sm:$0xff]  }
 0x12f   : > { %17629 = vmatmul.mubr.msk.bf16.vlgmr.msra.gmra.mrb[0].mxu1 %vm1323_vm2, %v20991_v13 }
 0x130   : > { %17765 = vmatpush3.bf16.msra.mxu1 %v3174_v7  ;;  %17632 = vmatprep.mubr.msk.bf16.mxu1 %vm1323_vm2, %v20996_v9  ;;  %v7079_v7 = vrot.slane %v19977_v5, 2  ;;  %v19986_v5 = vld [vmem:[%s20493_s8 + $0x1e0] sm:$0xff]  }
 0x132   : > { %18249 = vmatmul.mubr.msk.bf16.gmra.mrb[68].mxu0 %vm1323_vm2, %v7054_v14  ;;  %v7078_v14 = vsel %vm6981_vm4, %v7075_v60, %v7077_v6  ;;  %v7095_v60 = vrot.slane %v19985_v58, 2  ;;  %v19992_v58 = vld [vmem:[%s20493_s8 + $0x210] sm:$0xff]  }
 0x133   : > { %18252 = vmatprep.mubr.msk.bf16.mxu0 %vm1323_vm2, %v7056_v28  ;;  %v7080_v28 = vsel %vm6981_vm4, %v7077_v6, %v7079_v7 }
 0x134   : > { %v7096_v6 = vsel %vm6981_vm4, %v7093_v59, %v7095_v60 }
 0x137   : > { %17633 = vmatmul.mubr.msk.bf16.gmra.mrb[4].mxu1 %vm1323_vm2, %v21014_v24 }
 0x138   : > { %17636 = vmatprep.mubr.msk.bf16.mxu1 %vm1323_vm2, %v21019_v25 }
 0x13a   : > { %18253 = vmatmul.mubr.msk.bf16.gmra.mrb[72].mxu0 %vm1323_vm2, %v7058_v26  ;;  %v21110_v26 = vld [vmem:[%s20493_s8 + $0x78] sm:$0xff]  }
 0x13b   : > { %18256 = vmatprep.mubr.msk.bf16.mxu0 %vm1323_vm2, %v7060_v54  ;;  %v7082_v54 = vsel %vm6981_vm4, %v7079_v7, %v7081_v18  ;;  %v19987_v7 = vld [vmem:[%s20493_s8 + $0x1e8] sm:$0xff]  }
 0x13c   : > { %v7099_v15 = vrot.slane %v19987_v7, 2  ;;  %v21227_v7 = vld [vmem:[%s20493_s8 + $0xf0] sm:$0xff]  }
 0x13f   : > { %17637 = vmatmul.mubr.msk.bf16.gmra.mrb[8].mxu1 %vm1323_vm2, %v21030_v31 }
 0x140   : > { %17640 = vmatprep.mubr.msk.bf16.mxu1 %vm1323_vm2, %v21035_v32 }
 0x142   : > { %18257 = vmatmul.mubr.msk.bf16.gmra.mrb[76].mxu0 %vm1323_vm2, %v7062_v33  ;;  %v7085_v33 = vrot.slane %v19980_v12, 2  ;;  %v19989_v12 = vld [vmem:[%s20493_s8 + $0x1f8] sm:$0xff]  }
 0x143   : > { %18260 = vmatprep.mubr.msk.bf16.mxu0 %vm1323_vm2, %v7064_v35  ;;  %v21126_v35 = vld [vmem:[%s20493_s8 + $0x88] sm:$0xff]   ;;  %v7103_v30 = vrot.slane %v19989_v12, 2 }
 0x144   : > { %v7086_v38 = vsel %vm6981_vm4, %v7083_v22, %v7085_v33  ;;  %v19988_v22 = vld [vmem:[%s20493_s8 + $0x1f0] sm:$0xff]  }
 0x147   : > { %17641 = vmatmul.mubr.msk.bf16.gmra.mrb[12].mxu1 %vm1323_vm2, %v21046_v40 }
 0x148   : > { %17644 = vmatprep.mubr.msk.bf16.mxu1 %vm1323_vm2, %v21051_v42 }
 0x14a   : > { %18261 = vmatmul.mubr.msk.bf16.gmra.mrb[80].mxu0 %vm1323_vm2, %v7066_v43  ;;  %v7088_v43 = vsel %vm6981_vm4, %v7085_v33, %v7087_v34  ;;  %v21190_v33 = vld [vmem:[%s20493_s8 + $0xc8] sm:$0xff]  }
 0x14b   : > { %18264 = vmatprep.mubr.msk.bf16.mxu0 %vm1323_vm2, %v7068_v45  ;;  %v7089_v45 = vrot.slane %v19982_v39, 2  ;;  %v19990_v39 = vld [vmem:[%s20493_s8 + $0x200] sm:$0xff]  }
 0x14f   : > { %17645 = vmatmul.mubr.msk.bf16.gmra.mrb[16].mxu1 %vm1323_vm2, %v21062_v50 }
 0x150   : > { %17648 = vmatprep.mubr.msk.bf16.mxu1 %vm1323_vm2, %v21067_v51 }
 0x152   : > { %18265 = vmatmul.mubr.msk.bf16.gmra.mrb[84].mxu0 %vm1323_vm2, %v7070_v52  ;;  %v7090_v52 = vsel %vm6981_vm4, %v7087_v34, %v7089_v45  ;;  %v21195_v34 = vld [vmem:[%s20493_s8 + $0xd0] sm:$0xff]  }
 0x153   : > { %18268 = vmatprep.mubr.msk.bf16.mxu0 %vm1323_vm2, %v7072_v56  ;;  %v7092_v56 = vsel %vm6981_vm4, %v7089_v45, %v7091_v46  ;;  %v7105_v45 = vrot.slane %v19990_v39, 2  ;;  %v21245_v39 = vld [vmem:[%s20493_s8 + $0x100] sm:$0xff]  }
 0x157   : > { %17649 = vmatmul.mubr.msk.bf16.gmra.mrb[20].mxu1 %vm1323_vm2, %v21078_v61 }
 0x158   : > { %17652 = vmatprep.mubr.msk.bf16.mxu1 %vm1323_vm2, %v21083_v0 }
 0x15a   : > { %18269 = vmatmul.mubr.msk.bf16.gmra.mrb[88].mxu0 %vm1323_vm2, %v7074_v1  ;;  %v21158_v1 = vld [vmem:[%s20493_s8 + $0xa8] sm:$0xff]  }
 0x15b   : > { %18272 = vmatprep.mubr.msk.bf16.mxu0 %vm1323_vm2, %v7076_v4  ;;  %v7094_v4 = vsel %vm6981_vm4, %v7091_v46, %v7093_v59  ;;  %v7107_v46 = vrot.slane %v19991_v44, 2  ;;  %v19996_v44 = vld [vmem:[%s20493_s8 + $0x230] ss:$0 sps:$4 sm:$0x33]  }
 0x15d   : > { %v7108_v59 = vsel %vm6981_vm4, %v7105_v45, %v7107_v46 }
 0x15f   : > { %17653 = vmatmul.mubr.msk.bf16.gmra.mrb[24].mxu1 %vm1323_vm2, %v21094_v8 }
 0x160   : > { %17656 = vmatprep.mubr.msk.bf16.mxu1 %vm1323_vm2, %v21099_v11 }
 0x162   : > { %18273 = vmatmul.mubr.msk.bf16.gmra.mrb[92].mxu0 %vm1323_vm2, %v7078_v14  ;;  %v7097_v14 = vrot.slane %v19986_v5, 2 }
 0x163   : > { %18276 = vmatprep.mubr.msk.bf16.mxu0 %vm1323_vm2, %v7080_v28  ;;  %v21174_v28 = vld [vmem:[%s20493_s8 + $0xb8] sm:$0xff]  }
 0x164   : > { %v7098_v18 = vsel %vm6981_vm4, %v7095_v60, %v7097_v14  ;;  %v19993_v60 = vld [vmem:[%s20493_s8 + $0x218] sm:$0xff]  }
 0x165   : > { %v7111_v5 = vrot.slane %v19993_v60, 2 }
 0x167   : > { %17657 = vmatmul.mubr.msk.bf16.gmra.mrb[28].mxu1 %vm1323_vm2, %v21110_v26 }
 0x168   : > { %17660 = vmatprep.mubr.msk.bf16.mxu1 %vm1323_vm2, %v21115_v27 }
 0x16a   : > { %18277 = vmatmul.mubr.msk.bf16.gmra.mrb[96].mxu0 %vm1323_vm2, %v7082_v54  ;;  %v7100_v54 = vsel %vm6981_vm4, %v7097_v14, %v7099_v15 }
 0x16b   : > { %18280 = vmatprep.mubr.msk.bf16.mxu0 %vm1323_vm2, %v7084_v29  ;;  %v7101_v29 = vrot.slane %v19988_v22, 2  ;;  %v19995_v22 = vld [vmem:[%s20493_s8 + $0x228] sm:$0xff]  }
 0x16c   : > { %v7115_v12 = vrot.slane %v19995_v22, 2  ;;  %v21277_v22 = vld [vmem:[%s20493_s8 + $0x38] sm:$0xff]  }
 0x16f   : > { %17661 = vmatmul.mubr.msk.bf16.gmra.mrb[32].mxu1 %vm1323_vm2, %v21126_v35 }
 0x170   : > { %17664 = vmatprep.mubr.msk.bf16.mxu1 %vm1323_vm2, %v21131_v37 }
 0x172   : > { %18281 = vmatmul.mubr.msk.bf16.gmra.mrb[100].mxu0 %vm1323_vm2, %v7086_v38  ;;  %v7102_v38 = vsel %vm6981_vm4, %v7099_v15, %v7101_v29  ;;  %v19994_v15 = vld [vmem:[%s20493_s8 + $0x220] sm:$0xff]  }
 0x173   : > { %18284 = vmatprep.mubr.msk.bf16.mxu0 %vm1323_vm2, %v7088_v43  ;;  %v7104_v43 = vsel %vm6981_vm4, %v7101_v29, %v7103_v30  ;;  %v21238_v29 = vld [vmem:[%s20493_s8 + $0xf8] sm:$0xff]  }
 0x177   : > { %17665 = vmatmul.mubr.msk.bf16.gmra.mrb[36].mxu1 %vm1323_vm2, %v21142_v47 }
 0x178   : > { %17668 = vmatprep.mubr.msk.bf16.mxu1 %vm1323_vm2, %v21147_v49 }
 0x17a   : > { %18285 = vmatmul.mubr.msk.bf16.gmra.mrb[104].mxu0 %vm1323_vm2, %v7090_v52  ;;  %v21206_v52 = vld [vmem:[%s20493_s8 + $0xd8] sm:$0xff]  }
 0x17b   : > { %18288 = vmatprep.mubr.msk.bf16.mxu0 %vm1323_vm2, %v7092_v56  ;;  %v7106_v56 = vsel %vm6981_vm4, %v7103_v30, %v7105_v45  ;;  %v8039_v30 = vld [vmem:[%s20493_s8 + $0x20] sm:$0xc] }
 0x17f   : > { %17669 = vmatmul.mubr.msk.bf16.gmra.mrb[40].mxu1 %vm1323_vm2, %v21158_v1 }
 0x180   : > { %17672 = vmatprep.mubr.msk.bf16.mxu1 %vm1323_vm2, %v21163_v2 }
 0x182   : > { %18289 = vmatmul.mubr.msk.bf16.gmra.mrb[108].mxu0 %vm1323_vm2, %v7094_v4  ;;  %v7109_v4 = vrot.slane %v19992_v58, 2  ;;  %v7117_v58 = vrot.slane %v19996_v44, 2  ;;  %v21295_v44 = vld [vmem:[%s20493_s8 + $0x40] sm:$0xff]  }
 0x183   : > { %18292 = vmatprep.mubr.msk.bf16.mxu0 %vm1323_vm2, %v7096_v6  ;;  %v21222_v6 = vld [vmem:[%s20493_s8 + $0xe8] sm:$0xff]   ;;  %25281 = vst [vmem:[#allocation5_spill] sm:$0xff] %v21295_v44 }
 0x184   : > { %v7110_v14 = vsel %vm6981_vm4, %v7107_v46, %v7109_v4 }
 0x187   : > { %17673 = vmatmul.mubr.msk.bf16.gmra.mrb[44].mxu1 %vm1323_vm2, %v21174_v28 }
 0x188   : > { %17676 = vmatprep.mubr.msk.bf16.mxu1 %vm1323_vm2, %v21179_v17 }
 0x18a   : > { %18293 = vmatmul.mubr.msk.bf16.gmra.mrb[112].mxu0 %vm1323_vm2, %v7098_v18  ;;  %v7112_v18 = vsel %vm6981_vm4, %v7109_v4, %v7111_v5  ;;  %v21262_v4 = vld [vmem:[%s20493_s8 + $0x108] sm:$0xff]  }
 0x18b   : > { %18296 = vmatprep.mubr.msk.bf16.mxu0 %vm1323_vm2, %v7100_v54  ;;  %v7113_v54 = vrot.slane %v19994_v15, 2  ;;  %v21273_v15 = vld [vmem:[%s20493_s8 + $0x30] sm:$0xff]  }
 0x18d   : > { %v7116_v45 = vsel %vm6981_vm4, %v7113_v54, %v7115_v12 }
 0x18f   : > { %17677 = vmatmul.mubr.msk.bf16.gmra.mrb[48].mxu1 %vm1323_vm2, %v21190_v33 }
 0x190   : > { %17680 = vmatprep.mubr.msk.bf16.mxu1 %vm1323_vm2, %v21195_v34 }
 0x192   : > { %18297 = vmatmul.mubr.msk.bf16.gmra.mrb[116].mxu0 %vm1323_vm2, %v7102_v38  ;;  %v8040_v38 = vld [vmem:[%s20493_s8 + $0x24] sm:$0xf] }
 0x193   : > { %18300 = vmatprep.mubr.msk.bf16.mxu0 %vm1323_vm2, %v7104_v43  ;;  %v7114_v43 = vsel %vm6981_vm4, %v7111_v5, %v7113_v54  ;;  %v21252_v46 = vcombine.low %v8039_v30, %v8040_v38  ;;  %v21267_v5 = vld [vmem:[%s20493_s8 + $0x110] sm:$0xff]   ;;  %v8524_v54 = vrot.slane %v21273_v15, 2  ;;  %v8526_v30 = vrot.slane %v21277_v22, 2  ;;  %v21284_v38 = vld [vmem:[%s20493_s8 + $0x118] sm:$0xff]  }
 0x197   : > { %17681 = vmatmul.mubr.msk.bf16.gmra.mrb[52].mxu1 %vm1323_vm2, %v21206_v52 }
 0x198   : > { %17684 = vmatprep.mubr.msk.bf16.mxu1 %vm1323_vm2, %v21211_v55 }
 0x19a   : > { %18301 = vmatmul.mubr.msk.bf16.gmra.mrb[120].mxu0 %vm1323_vm2, %v7106_v56  ;;  %v21255_v56 = vld [vmem:[%s20493_s8 + $0x28] sm:$0xff]  }
 0x19b   : > { %18304 = vmatprep.mubr.msk.bf16.mxu0 %vm1323_vm2, %v7108_v59  ;;  %v8521_v59 = vrot.slane %v21252_v46, 2  ;;  %v8522_v60 = vrot.slane %v21255_v56, 2 }
 0x19f   : > { %17685 = vmatmul.mubr.msk.bf16.gmra.mrb[56].mxu1 %vm1323_vm2, %v21222_v6 }
 0x1a0   : > { %17688 = vmatprep.mubr.msk.bf16.mxu1 %vm1323_vm2, %v21227_v7 }
 0x1a2   : > { %18305 = vmatmul.mubr.msk.bf16.gmra.mrb[124].mxu0 %vm1323_vm2, %v7110_v14  ;;  %v7118_v14 = vsel %vm6981_vm4, %v7115_v12, %v7117_v58  ;;  %v21289_v12 = vld [vmem:[%s20493_s8 + $0x120] sm:$0xff]   ;;  %v8527_v58 = vsel %vm6981_vm4, %v8524_v54, %v8526_v30 }
 0x1a3   : > { %18308 = vmatprep.mubr.msk.bf16.mxu0 %vm1323_vm2, %v7112_v18  ;;  %v8523_v18 = vsel %vm6981_vm4, %v8521_v59, %v8522_v60  ;;  %v21301_v59 = vld [vmem:[%s20493_s8 + $0x48] sm:$0xff]  }
 0x1a4   : > { %25282 = vst [vmem:[#allocation6_spill] sm:$0xff] %v21301_v59 }
 0x1a7   : > { %17689 = vmatmul.mubr.msk.bf16.gmra.mrb[60].mxu1 %vm1323_vm2, %v21238_v29 }
 0x1a8   : > { %17692 = vmatprep.mubr.msk.bf16.mxu1 %vm1323_vm2, %v21245_v39 }
 0x1aa   : > { %18309 = vmatmul.mubr.msk.bf16.gmra.mrb[128].mxu0 %vm1323_vm2, %v7114_v43  ;;  %v8525_v43 = vsel %vm6981_vm4, %v8522_v60, %v8524_v54  ;;  %v8528_v60 = vrot.slane %v21295_v44, 2  ;;  %v21320_v54 = vld [vmem:[%s20493_s8 + $0x130] sm:$0xff]   ;;  %v20010_v44 = vld [vmem:[%s20493_s8 + $0x88] sm:$0xff]  }
 0x1ab   : > { %18312 = vmatprep.mubr.msk.bf16.mxu0 %vm1323_vm2, %v7116_v45  ;;  %v10410_v45 = vsel %vm1528_vm0, %v21009_v19, 0  ;;  %v8530_v19 = vrot.slane %v21301_v59, 2  ;;  %25284 = vst [vmem:[#allocation8_spill] sm:$0xff] %v21320_v54  ;;  %v21375_v59 = vld [vmem:[%s20493_s8 + $0x158] sm:$0xff]  }
 0x1ac   : > { %25293 = vst [vmem:[#allocation17_spill] sm:$0xff] %v21375_v59 }
 0x1af   : > { %17693 = vmatmul.mubr.msk.bf16.gmra.mrb[64].mxu1 %vm1323_vm2, %v21262_v4 }
 0x1b0   : > { %17696 = vmatprep.mubr.msk.bf16.mxu1 %vm1323_vm2, %v21267_v5 }
 0x1b2   : > { %18313 = vmatmul.mubr.msk.bf16.gmra.mrb[132].mxu0 %vm1323_vm2, %v7118_v14  ;;  %v21307_v14 = vld [vmem:[%s25249_s1 + $0xc] sm:$0xf] }
 0x1b3   : > { %18318 = vmatprep.mubr.msk.bf16.mxu0 %vm1323_vm2, %v8523_v18  ;;  %19823 = vmatprep.subr.msk.bf16.mxu1 %vm1528_vm0, %v21307_v14  ;;  %v21315_v18 = vld [vmem:[%s20493_s8 + $0x128] sm:$0xff]  }
 0x1b4   : > { %25283 = vst [vmem:[#allocation7_spill] sm:$0xff] %v21315_v18 }
 0x1b7   : > { %17697 = vmatmul.mubr.msk.bf16.gmra.mrb[68].mxu1 %vm1323_vm2, %v21284_v38 }
 0x1b8   : > { %17700 = vmatprep.mubr.msk.bf16.mxu1 %vm1323_vm2, %v21289_v12 }
 0x1ba   : > { %18319 = vmatmul.mubr.msk.bf16.vlgmr.msra.gmra.mrb[0].mxu0 %vm1323_vm2, %v8525_v43  ;;  %v8529_v43 = vsel %vm6981_vm4, %v8526_v30, %v8528_v60  ;;  %v21342_v30 = vld [vmem:[%s20493_s8 + $0x140] sm:$0xff]  }
 0x1bb   : > { %18455 = vmatpush3.bf16.msra.mxu0 %v10410_v45  ;;  %18322 = vmatprep.mubr.msk.bf16.mxu0 %vm1323_vm2, %v8527_v58  ;;  %v21326_v45 = vld [vmem:[%s20493_s8 + $0x50] sm:$0xff]   ;;  %v8531_v58 = vsel %vm6981_vm4, %v8528_v60, %v8530_v19  ;;  %25288 = vst [vmem:[#allocation12_spill] sm:$0xff] %v21342_v30 }
 0x1bc   : > { %25285 = vst [vmem:[#allocation9_spill] sm:$0xff] %v21326_v45  ;;  %v8532_v3 = vrot.slane %v21326_v45, 2  ;;  %v21352_v45 = vld [vmem:[%s20493_s8 + $0x68] sm:$0xff]  }
 0x1bd   : > { %25290 = vst [vmem:[#allocation14_spill] sm:$0xff] %v21352_v45 }
 0x1be   : > { %v8533_v60 = vsel %vm6981_vm4, %v8530_v19, %v8532_v3  ;;  %v21364_v19 = vld [vmem:[%s20493_s8 + $0x150] sm:$0xff]  }
 0x1bf   : > { %17701 = vmatmul.mubr.msk.bf16.gmra.mrb[72].mxu1 %vm1323_vm2, %v21315_v18  ;;  %25292 = vst [vmem:[#allocation16_spill] sm:$0xff] %v21364_v19  ;;  %v20022_v18 = vld [vmem:[%s20493_s8 + $0xe8] sm:$0xff]  }
 0x1c0   : > { %17704 = vmatprep.mubr.msk.bf16.mxu1 %vm1323_vm2, %v21320_v54  ;;  %v21337_v54 = vld [vmem:[%s20493_s8 + $0x138] sm:$0xff]  }
 0x1c1   : > { %25287 = vst [vmem:[#allocation11_spill] sm:$0xff] %v21337_v54 }
 0x1c2   : > { %18323 = vmatmul.mubr.msk.bf16.gmra.mrb[4].mxu0 %vm1323_vm2, %v8529_v43  ;;  %v21348_v43 = vld [vmem:[%s20493_s8 + $0x60] sm:$0xff]  }
 0x1c3   : > { %18326 = vmatprep.mubr.msk.bf16.mxu0 %vm1323_vm2, %v8531_v58  ;;  %25289 = vst [vmem:[#allocation13_spill] sm:$0xff] %v21348_v43  ;;  %v8535_v58 = vsel %vm6981_vm4, %v8532_v3, %v8534_v20  ;;  %v8536_v48 = vrot.slane %v21348_v43, 2  ;;  %v20008_v43 = vld [vmem:[%s20493_s8 + $0x78] sm:$0xff]  }
 0x1c5   : > { %v8537_v3 = vsel %vm6981_vm4, %v8534_v20, %v8536_v48 }
 0x1c7   : > { %17705 = vmatmul.mubr.msk.bf16.gmra.mrb[76].mxu1 %vm1323_vm2, %v21337_v54  ;;  %v8538_v54 = vrot.slane %v21352_v45, 2 }
 0x1c8   : > { %17708 = vmatprep.mubr.msk.bf16.mxu1 %vm1323_vm2, %v21342_v30  ;;  %v21359_v30 = vld [vmem:[%s20493_s8 + $0x148] sm:$0xff]  }
 0x1c9   : > { %25291 = vst [vmem:[#allocation15_spill] sm:$0xff] %v21359_v30 }
 0x1ca   : > { %18327 = vmatmul.mubr.msk.bf16.gmra.mrb[8].mxu0 %vm1323_vm2, %v8533_v60  ;;  %v20007_v60 = vld [vmem:[%s20493_s8 + $0x70] sm:$0xff]  }
 0x1cb   : > { %18330 = vmatprep.mubr.msk.bf16.mxu0 %vm1323_vm2, %v8535_v58  ;;  %v8539_v58 = vsel %vm6981_vm4, %v8536_v48, %v8538_v54  ;;  %v8540_v45 = vrot.slane %v20007_v60, 2  ;;  %v20009_v48 = vld [vmem:[%s20493_s8 + $0x80] sm:$0xff]   ;;  %v8546_v60 = vrot.slane %v20010_v44, 2 }
 0x1cd   : > { %v8541_v20 = vsel %vm6981_vm4, %v8538_v54, %v8540_v45 }
 0x1cf   : > { %17709 = vmatmul.mubr.msk.bf16.gmra.mrb[80].mxu1 %vm1323_vm2, %v21359_v30  ;;  %v8542_v30 = vrot.slane %v20008_v43, 2  ;;  %v8544_v43 = vrot.slane %v20009_v48, 2 }
 0x1d0   : > { %17712 = vmatprep.mubr.msk.bf16.mxu1 %vm1323_vm2, %v21364_v19  ;;  %v20147_v19 = vld [vmem:[%s20493_s8 + $0x160] sm:$0xff]  }
 0x1d1   : > { %v8545_v54 = vsel %vm6981_vm4, %v8542_v30, %v8544_v43 }
 0x1d2   : > { %18331 = vmatmul.mubr.msk.bf16.gmra.mrb[12].mxu0 %vm1323_vm2, %v8537_v3  ;;  %v8543_v3 = vsel %vm6981_vm4, %v8540_v45, %v8542_v30  ;;  %v20011_v45 = vld [vmem:[%s20493_s8 + $0x90] sm:$0xff]  }
 0x1d3   : > { %18334 = vmatprep.mubr.msk.bf16.mxu0 %vm1323_vm2, %v8539_v58  ;;  %v20148_v58 = vld [vmem:[%s20493_s8 + $0x168] sm:$0xff]   ;;  %v8548_v44 = vrot.slane %v20011_v45, 2 }
 0x1d5   : > { %v8549_v30 = vsel %vm6981_vm4, %v8546_v60, %v8548_v44 }
 0x1d7   : > { %17713 = vmatmul.mubr.msk.bf16.gmra.mrb[84].mxu1 %vm1323_vm2, %v21375_v59  ;;  %v8547_v59 = vsel %vm6981_vm4, %v8544_v43, %v8546_v60  ;;  %v20013_v43 = vld [vmem:[%s20493_s8 + $0xa0] sm:$0xff]  }
 0x1d8   : > { %17716 = vmatprep.mubr.msk.bf16.mxu1 %vm1323_vm2, %v20147_v19  ;;  %v20149_v19 = vld [vmem:[%s20493_s8 + $0x170] sm:$0xff]  }
 0x1da   : > { %18335 = vmatmul.mubr.msk.bf16.gmra.mrb[16].mxu0 %vm1323_vm2, %v8541_v20  ;;  %v20012_v20 = vld [vmem:[%s20493_s8 + $0x98] sm:$0xff]  }
 0x1db   : > { %18338 = vmatprep.mubr.msk.bf16.mxu0 %vm1323_vm2, %v8543_v3  ;;  %v8550_v48 = vrot.slane %v20012_v20, 2  ;;  %v20150_v3 = vld [vmem:[%s20493_s8 + $0x178] sm:$0xff]   ;;  %v20152_v20 = vld [vmem:[%s20493_s8 + $0x188] sm:$0xff]  }
 0x1df   : > { %17717 = vmatmul.mubr.msk.bf16.gmra.mrb[88].mxu1 %vm1323_vm2, %v20148_v58  ;;  %v20151_v58 = vld [vmem:[%s20493_s8 + $0x180] sm:$0xff]  }
 0x1e0   : > { %17720 = vmatprep.mubr.msk.bf16.mxu1 %vm1323_vm2, %v20149_v19  ;;  %v8551_v19 = vsel %vm6981_vm4, %v8548_v44, %v8550_v48  ;;  %v20015_v44 = vld [vmem:[%s20493_s8 + $0xb0] sm:$0xff]  }
 0x1e2   : > { %18339 = vmatmul.mubr.msk.bf16.gmra.mrb[20].mxu0 %vm1323_vm2, %v8545_v54  ;;  %v20014_v54 = vld [vmem:[%s20493_s8 + $0xa8] sm:$0xff]  }
 0x1e3   : > { %18342 = vmatprep.mubr.msk.bf16.mxu0 %vm1323_vm2, %v8547_v59  ;;  %v8552_v59 = vrot.slane %v20013_v43, 2  ;;  %v8554_v45 = vrot.slane %v20014_v54, 2  ;;  %v8556_v43 = vrot.slane %v20015_v44, 2  ;;  %v20154_v54 = vld [vmem:[%s20493_s8 + $0x198] sm:$0xff]  }
 0x1e5   : > { %v8553_v60 = vsel %vm6981_vm4, %v8550_v48, %v8552_v59  ;;  %v8557_v48 = vsel %vm6981_vm4, %v8554_v45, %v8556_v43 }
 0x1e7   : > { %17721 = vmatmul.mubr.msk.bf16.gmra.mrb[92].mxu1 %vm1323_vm2, %v20150_v3  ;;  %v20153_v3 = vld [vmem:[%s20493_s8 + $0x190] sm:$0xff]  }
 0x1e8   : > { %17724 = vmatprep.mubr.msk.bf16.mxu1 %vm1323_vm2, %v20151_v58  ;;  %v8555_v58 = vsel %vm6981_vm4, %v8552_v59, %v8554_v45  ;;  %v20017_v59 = vld [vmem:[%s20493_s8 + $0xc0] sm:$0xff]  }
 0x1e9   : > { %v8560_v44 = vrot.slane %v20017_v59, 2 }
 0x1ea   : > { %18343 = vmatmul.mubr.msk.bf16.gmra.mrb[24].mxu0 %vm1323_vm2, %v8549_v30  ;;  %v20016_v30 = vld [vmem:[%s20493_s8 + $0xb8] sm:$0xff]  }
 0x1eb   : > { %18346 = vmatprep.mubr.msk.bf16.mxu0 %vm1323_vm2, %v8551_v19  ;;  %v8558_v19 = vrot.slane %v20016_v30, 2  ;;  %v20156_v30 = vld [vmem:[%s20493_s8 + $0x1a8] sm:$0xff]  }
 0x1ed   : > { %v8561_v45 = vsel %vm6981_vm4, %v8558_v19, %v8560_v44 }
 0x1ef   : > { %17725 = vmatmul.mubr.msk.bf16.gmra.mrb[96].mxu1 %vm1323_vm2, %v20152_v20  ;;  %v20155_v20 = vld [vmem:[%s20493_s8 + $0x1a0] sm:$0xff]  }
 0x1f0   : > { %17728 = vmatprep.mubr.msk.bf16.mxu1 %vm1323_vm2, %v20153_v3  ;;  %v8559_v3 = vsel %vm6981_vm4, %v8556_v43, %v8558_v19  ;;  %v20019_v43 = vld [vmem:[%s20493_s8 + $0xd0] sm:$0xff]  }
 0x1f1   : > { %v8564_v59 = vrot.slane %v20019_v43, 2  ;;  %v8570_v43 = vrot.slane %v20022_v18, 2 }
 0x1f2   : > { %18347 = vmatmul.mubr.msk.bf16.gmra.mrb[28].mxu0 %vm1323_vm2, %v8553_v60  ;;  %v20018_v60 = vld [vmem:[%s20493_s8 + $0xc8] sm:$0xff]  }
 0x1f3   : > { %18350 = vmatprep.mubr.msk.bf16.mxu0 %vm1323_vm2, %v8555_v58  ;;  %v8562_v58 = vrot.slane %v20018_v60, 2  ;;  %v20158_v60 = vld [vmem:[%s20493_s8 + $0x1b8] sm:$0xff]  }
 0x1f5   : > { %v8565_v19 = vsel %vm6981_vm4, %v8562_v58, %v8564_v59 }
 0x1f7   : > { %17729 = vmatmul.mubr.msk.bf16.gmra.mrb[100].mxu1 %vm1323_vm2, %v20154_v54  ;;  %v20157_v54 = vld [vmem:[%s20493_s8 + $0x1b0] sm:$0xff]  }
 0x1f8   : > { %17732 = vmatprep.mubr.msk.bf16.mxu1 %vm1323_vm2, %v20155_v20  ;;  %v8563_v20 = vsel %vm6981_vm4, %v8560_v44, %v8562_v58 }
 0x1fa   : > { %18351 = vmatmul.mubr.msk.bf16.gmra.mrb[32].mxu0 %vm1323_vm2, %v8557_v48  ;;  %v20020_v48 = vld [vmem:[%s20493_s8 + $0xd8] sm:$0xff]  }
 0x1fb   : > { %18354 = vmatprep.mubr.msk.bf16.mxu0 %vm1323_vm2, %v8559_v3  ;;  %v8566_v3 = vrot.slane %v20020_v48, 2  ;;  %v20023_v48 = vld [vmem:[%s20493_s8 + $0xf0] sm:$0xff]  }
 0x1fd   : > { %v8567_v44 = vsel %vm6981_vm4, %v8564_v59, %v8566_v3 }
 0x1ff   : > { %17733 = vmatmul.mubr.msk.bf16.gmra.mrb[104].mxu1 %vm1323_vm2, %v20156_v30  ;;  %v20159_v30 = vld [vmem:[%s20493_s8 + $0x1c0] sm:$0xff]  }
 0x200   : > { %17736 = vmatprep.mubr.msk.bf16.mxu1 %vm1323_vm2, %v20157_v54  ;;  %v20021_v54 = vld [vmem:[%s20493_s8 + $0xe0] sm:$0xff]  }
 0x202   : > { %18355 = vmatmul.mubr.msk.bf16.gmra.mrb[36].mxu0 %vm1323_vm2, %v8561_v45  ;;  %v8568_v45 = vrot.slane %v20021_v54, 2  ;;  %v20026_v54 = vld [vmem:[%s20493_s8 + $0x108] sm:$0xff]  }
 0x203   : > { %18358 = vmatprep.mubr.msk.bf16.mxu0 %vm1323_vm2, %v8563_v20  ;;  %v20160_v20 = vld [vmem:[%s20493_s8 + $0x1c8] sm:$0xff]  }
 0x204   : > { %v8569_v58 = vsel %vm6981_vm4, %v8566_v3, %v8568_v45  ;;  %v8571_v59 = vsel %vm6981_vm4, %v8568_v45, %v8570_v43  ;;  %v20025_v3 = vld [vmem:[%s20493_s8 + $0x100] sm:$0xff]   ;;  %v8578_v45 = vrot.slane %v20026_v54, 2 }
 0x207   : > { %17737 = vmatmul.mubr.msk.bf16.gmra.mrb[108].mxu1 %vm1323_vm2, %v20158_v60  ;;  %v20024_v60 = vld [vmem:[%s20493_s8 + $0xf8] sm:$0xff]  }
 0x208   : > { %17740 = vmatprep.mubr.msk.bf16.mxu1 %vm1323_vm2, %v20159_v30  ;;  %v8572_v30 = vrot.slane %v20023_v48, 2  ;;  %v8574_v18 = vrot.slane %v20024_v60, 2  ;;  %v20030_v60 = vld [vmem:[%s20493_s8 + $0x128] sm:$0xff]  }
 0x20a   : > { %18359 = vmatmul.mubr.msk.bf16.gmra.mrb[40].mxu0 %vm1323_vm2, %v8565_v19  ;;  %v8575_v19 = vsel %vm6981_vm4, %v8572_v30, %v8574_v18 }
 0x20b   : > { %18362 = vmatprep.mubr.msk.bf16.mxu0 %vm1323_vm2, %v8567_v44  ;;  %v8576_v44 = vrot.slane %v20025_v3, 2 }
 0x20f   : > { %17741 = vmatmul.mubr.msk.bf16.gmra.mrb[112].mxu1 %vm1323_vm2, %v20160_v20  ;;  %v20028_v20 = vld [vmem:[%s20493_s8 + $0x118] sm:$0xff]  }
 0x210   : > { %17744 = vmatprep.mubr.msk.bf16.mxu1 %vm1323_vm2, %v20855_v53  ;;  %v8573_v53 = vsel %vm6981_vm4, %v8570_v43, %v8572_v30  ;;  %v8579_v43 = vsel %vm6981_vm4, %v8576_v44, %v8578_v45  ;;  %v8582_v48 = vrot.slane %v20028_v20, 2  ;;  %v2825_v30 = vld [vmem:[%s20493_s8] sm:$0xe] }
 0x211   : > { %v20034_v20 = vld [vmem:[%s20493_s8 + $0x140] sm:$0xff]  }
 0x212   : > { %18363 = vmatmul.mubr.msk.bf16.gmra.mrb[44].mxu0 %vm1323_vm2, %v8569_v58 }
 0x213   : > { %18366 = vmatprep.mubr.msk.bf16.mxu0 %vm1323_vm2, %v8571_v59 }
 0x217   : > { %17745 = vmatmul.mubr.msk.bf16.gmra.mrb[116].mxu1 %vm1323_vm2, %v20864_v63  ;;  %v8577_v63 = vsel %vm6981_vm4, %v8574_v18, %v8576_v44  ;;  %v2833_v44 = vrot.slane %v20991_v13, 1  ;;  %v2835_v13 = vrot.slane %v20996_v9, 1  ;;  %v8592_v9 = vrot.slane %v20034_v20, 2 }
 0x218   : > { %17748 = vmatprep.mubr.msk.bf16.mxu1 %vm1323_vm2, %v20872_v10  ;;  %v20027_v10 = vld [vmem:[%s20493_s8 + $0x110] sm:$0xff]  }
 0x219   : > { %v8580_v58 = vrot.slane %v20027_v10, 2 }
 0x21a   : > { %18367 = vmatmul.mubr.msk.bf16.gmra.mrb[48].mxu0 %vm1323_vm2, %v8573_v53  ;;  %v20161_v53 = vld [vmem:[%s20493_s8 + $0x4] sm:$0xf] }
 0x21b   : > { %18370 = vmatprep.mubr.msk.bf16.mxu0 %vm1323_vm2, %v8575_v19  ;;  %v8583_v59 = vsel %vm6981_vm4, %v8580_v58, %v8582_v48  ;;  %v15966_v3 = vcombine.low %v2825_v30, %v20161_v53  ;;  %v20031_v19 = vld [vmem:[%s20493_s8 + $0x130] sm:$0xff]   ;;  %v2841_v53 = vrot.slane %v21030_v31, 1 }
 0x21d   : > { %v2832_v54 = vrot.slane %v15966_v3, 1 }
 0x21f   : > { %17749 = vmatmul.mubr.msk.bf16.gmra.mrb[120].mxu1 %vm1323_vm2, %v20883_v21  ;;  %v8581_v21 = vsel %vm6981_vm4, %v8578_v45, %v8580_v58  ;;  %v2834_v10 = vsel %vm2831_vm5, %v2832_v54, %v2833_v44  ;;  %v2837_v58 = vrot.slane %v21014_v24, 1  ;;  %v2839_v24 = vrot.slane %v21019_v25, 1 }
 0x220   : > { %17752 = vmatprep.mubr.msk.bf16.mxu1 %vm1323_vm2, %v20900_v36  ;;  %v20029_v36 = vld [vmem:[%s20493_s8 + $0x120] sm:$0xff]  }
 0x221   : > { %v8584_v18 = vrot.slane %v20029_v36, 2  ;;  %v2836_v36 = vsel %vm2831_vm5, %v2833_v44, %v2835_v13  ;;  %v2840_v25 = vsel %vm2831_vm5, %v2837_v58, %v2839_v24  ;;  %v2842_v31 = vsel %vm2831_vm5, %v2839_v24, %v2841_v53 }
 0x222   : > { %18371 = vmatmul.mubr.msk.bf16.gmra.mrb[52].mxu0 %vm1323_vm2, %v8577_v63  ;;  %v20033_v63 = vld [vmem:[%s20493_s8 + $0x138] sm:$0xff]   ;;  %v2843_v44 = vrot.slane %v21035_v32, 1 }
 0x223   : > { %18374 = vmatprep.mubr.msk.bf16.mxu0 %vm1323_vm2, %v8579_v43 }
 0x227   : > { %17753 = vmatmul.mubr.msk.bf16.gmra.mrb[124].mxu1 %vm1323_vm2, %v20905_v41  ;;  %v8586_v41 = vrot.slane %v20030_v60, 2 }
 0x228   : > { %17756 = vmatprep.mubr.msk.bf16.mxu1 %vm1323_vm2, %v20920_v57  ;;  %v8585_v57 = vsel %vm6981_vm4, %v8582_v48, %v8584_v18 }
 0x229   : > { %v8587_v45 = vsel %vm6981_vm4, %v8584_v18, %v8586_v41  ;;  %v20036_v18 = vld [vmem:[%s20493_s8 + $0x150] sm:$0xff]  }
 0x22a   : > { %18375 = vmatmul.mubr.msk.bf16.gmra.mrb[56].mxu0 %vm1323_vm2, %v8581_v21  ;;  %v20035_v21 = vld [vmem:[%s20493_s8 + $0x148] sm:$0xff]  }
 0x22b   : > { %18378 = vmatprep.mubr.msk.bf16.mxu0 %vm1323_vm2, %v8583_v59  ;;  %v2838_v59 = vsel %vm2831_vm5, %v2835_v13, %v2837_v58  ;;  %v8594_v60 = vrot.slane %v20035_v21, 2  ;;  %v2844_v13 = vsel %vm2831_vm5, %v2841_v53, %v2843_v44  ;;  %v2849_v21 = vrot.slane %v21062_v50, 1 }
 0x22c   : > { %v2851_v50 = vrot.slane %v21067_v51, 1 }
 0x22d   : > { %v8595_v3 = vsel %vm6981_vm4, %v8592_v9, %v8594_v60 }
 0x22f   : > { %17757 = vmatmul.mubr.msk.bf16.gmra.mrb[128].mxu1 %vm1323_vm2, %v20925_v62  ;;  %v8588_v62 = vrot.slane %v20031_v19, 2  ;;  %v21535_v19 = vld [vmem:[%s25249_s1 + $0x20] sm:$0xf] }
 0x230   : > { %17760 = vmatprep.mubr.msk.bf16.mxu1 %vm1323_vm2, %v20940_v16  ;;  %v8590_v16 = vrot.slane %v20033_v63, 2  ;;  %19829 = vmatprep.subr.msk.bf16.mxu0 %vm1528_vm0, %v21535_v19  ;;  %v20038_v63 = vld [vmem:[%s20493_s8 + $0x160] sm:$0xff]  }
 0x231   : > { %v8589_v43 = vsel %vm6981_vm4, %v8586_v41, %v8588_v62  ;;  %v20037_v41 = vld [vmem:[%s20493_s8 + $0x158] sm:$0xff]  }
 0x232   : > { %18379 = vmatmul.mubr.msk.bf16.gmra.mrb[60].mxu0 %vm1323_vm2, %v8585_v57  ;;  %v8591_v48 = vsel %vm6981_vm4, %v8588_v62, %v8590_v16  ;;  %v8593_v30 = vsel %vm6981_vm4, %v8590_v16, %v8592_v9  ;;  %v8596_v57 = vrot.slane %v20036_v18, 2  ;;  %v8598_v54 = vrot.slane %v20037_v41, 2  ;;  %v20039_v16 = vld [vmem:[%s20493_s8 + $0x168] sm:$0xff]  }
 0x233   : > { %18382 = vmatprep.mubr.msk.bf16.mxu0 %vm1323_vm2, %v8587_v45  ;;  %v2845_v62 = vrot.slane %v21046_v40, 1  ;;  %v8602_v32 = vrot.slane %v20039_v16, 2  ;;  %v2847_v40 = vrot.slane %v21051_v42, 1  ;;  %v2853_v18 = vrot.slane %v21078_v61, 1 }
 0x234   : > { %v8597_v45 = vsel %vm6981_vm4, %v8594_v60, %v8596_v57  ;;  %v2855_v61 = vrot.slane %v21083_v0, 1 }
 0x235   : > { %v2846_v20 = vsel %vm2831_vm5, %v2843_v44, %v2845_v62  ;;  %v2848_v9 = vsel %vm2831_vm5, %v2845_v62, %v2847_v40  ;;  %v2850_v60 = vsel %vm2831_vm5, %v2847_v40, %v2849_v21 }
 0x237   : > { %17761 = vmatmul.mubr.msk.bf16.gmra.mrb[132].mxu1 %vm1323_vm2, %v20945_v23  ;;  %v4713_v23 = vsel %vm1528_vm0, %v21307_v14, 0  ;;  %v20162_v14 = vld [vmem:[%s25249_s1 + $0x10] sm:$0xf] }
 0x238   : > { %17766 = vmatprep.mubr.msk.bf16.mxu1 %vm1323_vm2, %v2834_v10  ;;  %v8599_v10 = vsel %vm6981_vm4, %v8596_v57, %v8598_v54 }
 0x23a   : > { %18383 = vmatmul.mubr.msk.bf16.gmra.mrb[64].mxu0 %vm1323_vm2, %v8589_v43  ;;  %v8600_v43 = vrot.slane %v20038_v63, 2  ;;  %v2856_v63 = vsel %vm2831_vm5, %v2853_v18, %v2855_v61 }
 0x23b   : > { %18386 = vmatprep.mubr.msk.bf16.mxu0 %vm1323_vm2, %v8591_v48  ;;  %v20040_v48 = vld [vmem:[%s20493_s8 + $0x170] sm:$0xff]  }
 0x23c   : > { %v8601_v58 = vsel %vm6981_vm4, %v8598_v54, %v8600_v43  ;;  %v2857_v54 = vrot.slane %v21094_v8, 1  ;;  %v2859_v8 = vrot.slane %v21099_v11, 1 }
 0x23e   : > { %v2860_v40 = vsel %vm2831_vm5, %v2857_v54, %v2859_v8 }
 0x23f   : > { %17767 = vmatmul.mubr.msk.bf16.vlgmr.msra.gmra.mrb[0].mxu1 %vm1323_vm2, %v2836_v36  ;;  %v8603_v36 = vsel %vm6981_vm4, %v8600_v43, %v8602_v32  ;;  %v2861_v43 = vrot.slane %v21110_v26, 1  ;;  %v2863_v26 = vrot.slane %v21115_v27, 1 }
 0x240   : > { %17903 = vmatpush3.bf16.msra.mxu1 %v4713_v23  ;;  %17770 = vmatprep.mubr.msk.bf16.mxu1 %vm1323_vm2, %v2838_v59  ;;  %v20041_v23 = vld [vmem:[%s20493_s8 + $0x178] sm:$0xff]   ;;  %v8604_v59 = vrot.slane %v20040_v48, 2 }
 0x241   : > { %19825 = vmatprep.subr.msk.bf16.mxu1 %vm1528_vm0, %v20162_v14  ;;  %v8606_v42 = vrot.slane %v20041_v23, 2  ;;  %v20043_v14 = vld [vmem:[%s20493_s8 + $0x188] sm:$0xff]   ;;  %v2862_v48 = vsel %vm2831_vm5, %v2859_v8, %v2861_v43  ;;  %v2865_v23 = vrot.slane %v21126_v35, 1  ;;  %v2867_v35 = vrot.slane %v21131_v37, 1 }
 0x242   : > { %18387 = vmatmul.mubr.msk.bf16.gmra.mrb[68].mxu0 %vm1323_vm2, %v8593_v30  ;;  %v8605_v24 = vsel %vm6981_vm4, %v8602_v32, %v8604_v59  ;;  %v20042_v30 = vld [vmem:[%s20493_s8 + $0x180] sm:$0xff]   ;;  %v8610_v51 = vrot.slane %v20043_v14, 2  ;;  %v20047_v32 = vld [vmem:[%s20493_s8 + $0x1a8] sm:$0xff]  }
 0x243   : > { %18390 = vmatprep.mubr.msk.bf16.mxu0 %vm1323_vm2, %v8595_v3  ;;  %v8607_v53 = vsel %vm6981_vm4, %v8604_v59, %v8606_v42  ;;  %v2852_v3 = vsel %vm2831_vm5, %v2849_v21, %v2851_v50  ;;  %v8608_v41 = vrot.slane %v20042_v30, 2  ;;  %v8618_v11 = vrot.slane %v20047_v32, 2  ;;  %v20049_v59 = vld [vmem:[%s20493_s8 + $0x1b8] sm:$0xff]   ;;  %v20050_v30 = vld [vmem:[%s20493_s8 + $0x1c0] sm:$0xff]   ;;  %v20051_v14 = vld [vmem:[%s20493_s8 + $0x1c8] sm:$0xff]  }
 0x244   : > { %v8622_v27 = vrot.slane %v20049_v59, 2  ;;  %v8626_v37 = vrot.slane %v20051_v14, 2  ;;  %v2885_v59 = vrot.slane %v21206_v52, 1  ;;  %v2887_v52 = vrot.slane %v21211_v55, 1  ;;  %v20061_v14 = vld [vmem:[%s20493_s8 + $0x218] sm:$0xff]  }
 0x245   : > { %v8609_v57 = vsel %vm6981_vm4, %v8606_v42, %v8608_v41  ;;  %v8611_v44 = vsel %vm6981_vm4, %v8608_v41, %v8610_v51  ;;  %v8624_v41 = vrot.slane %v20050_v30, 2  ;;  %v20060_v30 = vld [vmem:[%s20493_s8 + $0x210] sm:$0xff]  }
 0x247   : > { %17771 = vmatmul.mubr.msk.bf16.gmra.mrb[4].mxu1 %vm1323_vm2, %v2840_v25  ;;  %v2854_v25 = vsel %vm2831_vm5, %v2851_v50, %v2853_v18  ;;  %v2866_v50 = vsel %vm2831_vm5, %v2863_v26, %v2865_v23  ;;  %v2869_v18 = vrot.slane %v21142_v47, 1  ;;  %v2871_v47 = vrot.slane %v21147_v49, 1 }
 0x248   : > { %17774 = vmatprep.mubr.msk.bf16.mxu1 %vm1323_vm2, %v2842_v31  ;;  %v20044_v31 = vld [vmem:[%s20493_s8 + $0x190] sm:$0xff]  }
 0x249   : > { %v8612_v62 = vrot.slane %v20044_v31, 2  ;;  %v8627_v31 = vsel %vm6981_vm4, %v8624_v41, %v8626_v37 }
 0x24a   : > { %18391 = vmatmul.mubr.msk.bf16.gmra.mrb[72].mxu0 %vm1323_vm2, %v8597_v45  ;;  %v20045_v45 = vld [vmem:[%s20493_s8 + $0x198] sm:$0xff]  }
 0x24b   : > { %18394 = vmatprep.mubr.msk.bf16.mxu0 %vm1323_vm2, %v8599_v10  ;;  %v2858_v10 = vsel %vm2831_vm5, %v2855_v61, %v2857_v54  ;;  %v8614_v0 = vrot.slane %v20045_v45, 2  ;;  %v8613_v16 = vsel %vm6981_vm4, %v8610_v51, %v8612_v62  ;;  %v8625_v51 = vsel %vm6981_vm4, %v8622_v27, %v8624_v41  ;;  %v20052_v61 = vld [vmem:[%s20493_s8 + $0x1d0] sm:$0xff]   ;;  %v20053_v54 = vld [vmem:[%s20493_s8 + $0x1d8] sm:$0xff]  }
 0x24c   : > { %v8628_v45 = vrot.slane %v20052_v61, 2  ;;  %v8630_v49 = vrot.slane %v20053_v54, 2  ;;  %v8644_v41 = vrot.slane %v20060_v30, 2  ;;  %v12619_v30 = vld [vmem:[%s25252_s4 + $0x40] sm:$0xff] }
 0x24e   : > { %v8631_v8 = vsel %vm6981_vm4, %v8628_v45, %v8630_v49 }
 0x24f   : > { %17775 = vmatmul.mubr.msk.bf16.gmra.mrb[8].mxu1 %vm1323_vm2, %v2844_v13  ;;  %v20046_v13 = vld [vmem:[%s20493_s8 + $0x1a0] sm:$0xff]  }
 0x250   : > { %17778 = vmatprep.mubr.msk.bf16.mxu1 %vm1323_vm2, %v2846_v20  ;;  %v8615_v20 = vsel %vm6981_vm4, %v8612_v62, %v8614_v0  ;;  %v8629_v62 = vsel %vm6981_vm4, %v8626_v37, %v8628_v45  ;;  %v20415_v45 = vmov 0  }
 0x251   : > { %19857 = vset.pattern.permute.xlu1 %v20415_v45  ;;  %13564 = vst.msk [vmem:[%s21698_s27] sm:$0xf] %vm13563_vm6, %v20415_v45  ;;  %13565 = vst.msk [vmem:[%s21698_s27 + $0x4] sm:$0xf] %vm13563_vm6, %v20415_v45  ;;  %19856 = vset.pattern.permute.xlu0 %v20415_v45 }
 0x252   : > { %18395 = vmatmul.mubr.msk.bf16.gmra.mrb[76].mxu0 %vm1323_vm2, %v8601_v58  ;;  %v8616_v58 = vrot.slane %v20046_v13, 2  ;;  %13566 = vst.msk [vmem:[%s21698_s27 + $0x8] sm:$0xf] %vm13563_vm6, %v20415_v45  ;;  %13567 = vst.msk [vmem:[%s21698_s27 + $0xc] sm:$0xf] %vm13563_vm6, %v20415_v45 }
 0x253   : > { %18398 = vmatprep.mubr.msk.bf16.mxu0 %vm1323_vm2, %v8603_v36  ;;  %v20048_v36 = vld [vmem:[%s20493_s8 + $0x1b0] sm:$0xff]   ;;  %15627 = vst.msk [vmem:[%s21698_s27 + $0x234] sm:$0xf] %vm13563_vm6, %v20415_v45  ;;  %15628 = vst.msk [vmem:[%s21698_s27 + $0x238] sm:$0xf] %vm13563_vm6, %v20415_v45 }
 0x254   : > { %v8617_v21 = vsel %vm6981_vm4, %v8614_v0, %v8616_v58  ;;  %v8620_v42 = vrot.slane %v20048_v36, 2  ;;  %v2877_v0 = vrot.slane %v21174_v28, 1  ;;  %v2879_v28 = vrot.slane %v21179_v17, 1  ;;  %15629 = vst.msk [vmem:[%s21698_s27 + $0x23c] sm:$0xf] %vm13563_vm6, %v20415_v45 }
 0x255   : > { %15631 = vst.msk [vmem:[%s21698_s27 + $0x240] sm:$0x7] %vm15630_vm7, %v20415_v45  ;;  %v12624_v45 = vld [vmem:[%s25252_s4 + $0x68] sm:$0xff] }
 0x257   : > { %17779 = vmatmul.mubr.msk.bf16.gmra.mrb[12].mxu1 %vm1323_vm2, %v2848_v9  ;;  %v8619_v9 = vsel %vm6981_vm4, %v8616_v58, %v8618_v11  ;;  %v2881_v58 = vrot.slane %v21190_v33, 1  ;;  %v2883_v33 = vrot.slane %v21195_v34, 1 }
 0x258   : > { %17782 = vmatprep.mubr.msk.bf16.mxu1 %vm1323_vm2, %v2850_v60  ;;  %v2864_v60 = vsel %vm2831_vm5, %v2861_v43, %v2863_v26  ;;  %v2880_v26 = vsel %vm2831_vm5, %v2877_v0, %v2879_v28 }
 0x259   : > { %v2882_v36 = vsel %vm2831_vm5, %v2879_v28, %v2881_v58  ;;  %v9589_v28 = vshll.u32 %v21252_v46, 16 }
 0x25a   : > { %18399 = vmatmul.mubr.msk.bf16.gmra.mrb[80].mxu0 %vm1323_vm2, %v8605_v24  ;;  %v8621_v24 = vsel %vm6981_vm4, %v8618_v11, %v8620_v42  ;;  %v20057_v11 = vld [vmem:[%s20493_s8 + $0x1f8] sm:$0xff]  }
 0x25b   : > { %18402 = vmatprep.mubr.msk.bf16.mxu0 %vm1323_vm2, %v8607_v53  ;;  %v8623_v53 = vsel %vm6981_vm4, %v8620_v42, %v8622_v27  ;;  %v8638_v17 = vrot.slane %v20057_v11, 2  ;;  %v20059_v42 = vld [vmem:[%s20493_s8 + $0x208] sm:$0xff]   ;;  %v2899_v11 = vrot.slane %v21267_v5, 1  ;;  %v12618_v5 = vld [vmem:[%s25252_s4 + $0x38] sm:$0xff] }
 0x25c   : > { %v8642_v34 = vrot.slane %v20059_v42, 2  ;;  %v9603_v42 = vshrl.u32 %v21273_v15, 16 }
 0x25e   : > { %v8645_v37 = vsel %vm6981_vm4, %v8642_v34, %v8644_v41 }
 0x25f   : > { %17783 = vmatmul.mubr.msk.bf16.gmra.mrb[16].mxu1 %vm1323_vm2, %v2852_v3  ;;  %v2868_v3 = vsel %vm2831_vm5, %v2865_v23, %v2867_v35 }
 0x260   : > { %17786 = vmatprep.mubr.msk.bf16.mxu1 %vm1323_vm2, %v2854_v25  ;;  %v2870_v25 = vsel %vm2831_vm5, %v2867_v35, %v2869_v18  ;;  %v2886_v35 = vsel %vm2831_vm5, %v2883_v33, %v2885_v59 }
 0x262   : > { %18403 = vmatmul.mubr.msk.bf16.gmra.mrb[84].mxu0 %vm1323_vm2, %v8609_v57  ;;  %v2873_v57 = vrot.slane %v21158_v1, 1  ;;  %v2875_v1 = vrot.slane %v21163_v2, 1 }
 0x263   : > { %18406 = vmatprep.mubr.msk.bf16.mxu0 %vm1323_vm2, %v8611_v44  ;;  %v2872_v44 = vsel %vm2831_vm5, %v2869_v18, %v2871_v47  ;;  %v2889_v18 = vrot.slane %v21222_v6, 1  ;;  %v2891_v6 = vrot.slane %v21227_v7, 1  ;;  %v12613_v7 = vld [vmem:[%s25252_s4 + $0x10] sm:$0xff] }
 0x264   : > { %v2876_v13 = vsel %vm2831_vm5, %v2873_v57, %v2875_v1  ;;  %12759 = vperm.xlu1 %19857, %v12613_v7  }
 0x265   : > { %v2890_v55 = vsel %vm2831_vm5, %v2887_v52, %v2889_v18 }
 0x267   : > { %17787 = vmatmul.mubr.msk.bf16.gmra.mrb[20].mxu1 %vm1323_vm2, %v2856_v63  ;;  %v2874_v63 = vsel %vm2831_vm5, %v2871_v47, %v2873_v57  ;;  %v20062_v47 = vld [vmem:[%s20493_s8 + $0x220] sm:$0xff]   ;;  %v20063_v57 = vld [vmem:[%s20493_s8 + $0x228] sm:$0xff]  }
 0x268   : > { %17790 = vmatprep.mubr.msk.bf16.mxu1 %vm1323_vm2, %v2858_v10  ;;  %v20054_v10 = vld [vmem:[%s20493_s8 + $0x1e0] sm:$0xff]   ;;  %v8648_v54 = vrot.slane %v20062_v47, 2 }
 0x269   : > { %v8632_v43 = vrot.slane %v20054_v10, 2  ;;  %v2897_v10 = vrot.slane %v21262_v4, 1 }
 0x26a   : > { %18407 = vmatmul.mubr.msk.bf16.gmra.mrb[88].mxu0 %vm1323_vm2, %v8613_v16  ;;  %v20055_v16 = vld [vmem:[%s20493_s8 + $0x1e8] sm:$0xff]  }
 0x26b   : > { %18410 = vmatprep.mubr.msk.bf16.mxu0 %vm1323_vm2, %v8615_v20  ;;  %v2878_v20 = vsel %vm2831_vm5, %v2875_v1, %v2877_v0  ;;  %v8634_v2 = vrot.slane %v20055_v16, 2  ;;  %v8633_v32 = vsel %vm6981_vm4, %v8630_v49, %v8632_v43  ;;  %v2895_v49 = vrot.slane %v21245_v39, 1  ;;  %v20065_v0 = vld [vmem:[%s20493_s8 + $0x238] sm:$0xff]   ;;  %v12612_v39 = vld [vmem:[%s25252_s4 + $0x8] sm:$0xff] }
 0x26d   : > { %v2898_v4 = vsel %vm2831_vm5, %v2895_v49, %v2897_v10 }
 0x26f   : > { %17791 = vmatmul.mubr.msk.bf16.gmra.mrb[24].mxu1 %vm1323_vm2, %v2860_v40  ;;  %v20056_v40 = vld [vmem:[%s20493_s8 + $0x1f0] sm:$0xff]  }
 0x270   : > { %17794 = vmatprep.mubr.msk.bf16.mxu1 %vm1323_vm2, %v2862_v48  ;;  %v8635_v48 = vsel %vm6981_vm4, %v8632_v43, %v8634_v2 }
 0x272   : > { %18411 = vmatmul.mubr.msk.bf16.gmra.mrb[92].mxu0 %vm1323_vm2, %v8617_v21  ;;  %v8636_v21 = vrot.slane %v20056_v40, 2  ;;  %v9597_v40 = vshll.u32 %v21255_v56, 16 }
 0x273   : > { %18414 = vmatprep.mubr.msk.bf16.mxu0 %vm1323_vm2, %v8619_v9  ;;  %v20058_v9 = vld [vmem:[%s20493_s8 + $0x200] sm:$0xff]  }
 0x274   : > { %v8637_v23 = vsel %vm6981_vm4, %v8634_v2, %v8636_v21  ;;  %v8640_v27 = vrot.slane %v20058_v9, 2  ;;  %v9586_v2 = vshrl.u32 %v21252_v46, 16  ;;  %v2900_v9 = vsel %vm2831_vm5, %v2897_v10, %v2899_v11 }
 0x277   : > { %17795 = vmatmul.mubr.msk.bf16.gmra.mrb[28].mxu1 %vm1323_vm2, %v2864_v60  ;;  %v8639_v60 = vsel %vm6981_vm4, %v8636_v21, %v8638_v17  ;;  %v2901_v21 = vrot.slane %v21284_v38, 1 }
 0x278   : > { %17798 = vmatprep.mubr.msk.bf16.mxu1 %vm1323_vm2, %v2866_v50  ;;  %v2884_v50 = vsel %vm2831_vm5, %v2881_v58, %v2883_v33  ;;  %v12616_v58 = vld [vmem:[%s25252_s4 + $0x28] sm:$0xff] }
 0x27a   : > { %18415 = vmatmul.mubr.msk.bf16.gmra.mrb[96].mxu0 %vm1323_vm2, %v8621_v24  ;;  %v8641_v24 = vsel %vm6981_vm4, %v8638_v17, %v8640_v27  ;;  %v9591_v17 = vrot.slane %v9589_v28, 3  ;;  %v12625_v28 = vld [vmem:[%s25252_s4 + $0x70] sm:$0xff] }
 0x27b   : > { %18418 = vmatprep.mubr.msk.bf16.mxu0 %vm1323_vm2, %v8623_v53  ;;  %v8643_v53 = vsel %vm6981_vm4, %v8640_v27, %v8642_v34  ;;  %v9612_v34 = vshrl.u32 %v21277_v22, 16 }
 0x27f   : > { %17799 = vmatmul.mubr.msk.bf16.gmra.mrb[32].mxu1 %vm1323_vm2, %v2868_v3  ;;  %v2888_v3 = vsel %vm2831_vm5, %v2885_v59, %v2887_v52  ;;  %v12617_v59 = vld [vmem:[%s25252_s4 + $0x30] sm:$0xff]  ;;  %v9615_v52 = vshll.u32 %v21277_v22, 16 }
 0x280   : > { %17802 = vmatprep.mubr.msk.bf16.mxu1 %vm1323_vm2, %v2870_v25  ;;  %v8646_v25 = vrot.slane %v20061_v14, 2  ;;  %v25294_v14 = vld [vmem:[#allocation7_spill] sm:$0xff] }
 0x282   : > { %18419 = vmatmul.mubr.msk.bf16.gmra.mrb[100].mxu0 %vm1323_vm2, %v8625_v51  ;;  %v2893_v51 = vrot.slane %v21238_v29, 1  ;;  %v8647_v61 = vsel %vm6981_vm4, %v8644_v41, %v8646_v25  ;;  %v12611_v29 = vld [vmem:[%s25252_s4] sm:$0xff]  ;;  %v8649_v1 = vsel %vm6981_vm4, %v8646_v25, %v8648_v54  ;;  %v9617_v25 = vrot.slane %v9615_v52, 3 }
 0x283   : > { %18422 = vmatprep.mubr.msk.bf16.mxu0 %vm1323_vm2, %v8627_v31  ;;  %v2892_v31 = vsel %vm2831_vm5, %v2889_v18, %v2891_v6  ;;  %12749 = vperm.xlu0 %19856, %v12611_v29   ;;  %v25296_v29 = vld [vmem:[#allocation6_spill] sm:$0xff] }
 0x284   : > { %v2896_v16 = vsel %vm2831_vm5, %v2893_v51, %v2895_v49  ;;  %v25297_v49 = vld [vmem:[#allocation8_spill] sm:$0xff] }
 0x287   : > { %17803 = vmatmul.mubr.msk.bf16.gmra.mrb[36].mxu1 %vm1323_vm2, %v2872_v44  ;;  %v2894_v44 = vsel %vm2831_vm5, %v2891_v6, %v2893_v51  ;;  %12754 = vperm.xlu0 %19856, %v12612_v39  }
 0x288   : > { %17806 = vmatprep.mubr.msk.bf16.mxu1 %vm1323_vm2, %v2874_v63  ;;  %v8650_v63 = vrot.slane %v20063_v57, 2 }
 0x28a   : > { %18423 = vmatmul.mubr.msk.bf16.gmra.mrb[104].mxu0 %vm1323_vm2, %v8629_v62  ;;  %v20064_v62 = vld [vmem:[%s20493_s8 + $0x230] sm:$0xff]  }
 0x28b   : > { %18426 = vmatprep.mubr.msk.bf16.mxu0 %vm1323_vm2, %v8631_v8  ;;  %v8651_v8 = vsel %vm6981_vm4, %v8648_v54, %v8650_v63  ;;  %v8652_v43 = vrot.slane %v20064_v62, 2  ;;  %v9630_v54 = vshrl.u32 %v25296_v29, 16 }
 0x28d   : > { %v8653_v46 = vsel %vm6981_vm4, %v8650_v63, %v8652_v43  ;;  %v12623_v63 = vld [vmem:[%s25252_s4 + $0x60] sm:$0xff] }
 0x28f   : > { %17807 = vmatmul.mubr.msk.bf16.gmra.mrb[40].mxu1 %vm1323_vm2, %v2876_v13  ;;  %v12614_v13 = vld [vmem:[%s25252_s4 + $0x18] sm:$0xff] }
 0x290   : > { %17810 = vmatprep.mubr.msk.bf16.mxu1 %vm1323_vm2, %v2878_v20  ;;  %v8654_v20 = vrot.slane %v20065_v0, 2  ;;  %12764 = vperm.xlu1 %19857, %v12614_v13   ;;  %v11474_v13 = vsel %vm1528_vm0, %v21535_v19, 0  ;;  %vm23426_vm0 = vmand %vm15480_vm13, %vm15481_vm14 }
 0x292   : > { %18427 = vmatmul.mubr.msk.bf16.gmra.mrb[108].mxu0 %vm1323_vm2, %v8633_v32  ;;  %v9594_v32 = vshrl.u32 %v21255_v56, 16  ;;  %v20066_v56 = vld [vmem:[%s20493_s8 + $0x240] ss:$0 sps:$4 sm:$0x33]  }
 0x293   : > { %18430 = vmatprep.mubr.msk.bf16.mxu0 %vm1323_vm2, %v8635_v48  ;;  %v12615_v48 = vld [vmem:[%s25252_s4 + $0x20] sm:$0xff]  ;;  %v8656_v38 = vrot.slane %v20066_v56, 2 }
 0x294   : > { %12774 = vperm.xlu1 %19857, %v12616_v58   ;;  %v9596_v33 = vrot.slane %v9594_v32, 2  ;;  %12769 = vperm.xlu0 %19856, %v12615_v48  }
 0x295   : > { %v8657_v18 = vsel %vm6981_vm4, %v8654_v20, %v8656_v38 }
 0x297   : > { %17811 = vmatmul.mubr.msk.bf16.gmra.mrb[44].mxu1 %vm1323_vm2, %v2880_v26  ;;  %v8655_v26 = vsel %vm6981_vm4, %v8652_v43, %v8654_v20  ;;  %v9632_v43 = vrot.slane %v9630_v54, 2  ;;  %v12634_v54 = vld [vmem:[%s25252_s4 + $0xb8] sm:$0xff] }
 0x298   : > { %17814 = vmatprep.mubr.msk.bf16.mxu1 %vm1323_vm2, %v2882_v36  ;;  %v9588_v36 = vrot.slane %v9586_v2, 2  ;;  %12784 = vperm.xlu1 %19857, %v12618_v5   ;;  %v12626_v2 = vld [vmem:[%s25252_s4 + $0x78] sm:$0xff] }
 0x299   : > { %12779 = vperm.xlu0 %19856, %v12617_v59   ;;  %v25302_v59 = vld [vmem:[#allocation15_spill] sm:$0xff] }
 0x29a   : > { %18431 = vmatmul.mubr.msk.bf16.gmra.mrb[112].mxu0 %vm1323_vm2, %v8637_v23  ;;  %v9599_v23 = vrot.slane %v9597_v40, 3  ;;  %v9592_v27 = vor.u32 %v9591_v17, %v9588_v36  ;;  %v25299_v40 = vld [vmem:[#allocation9_spill] sm:$0xff]  ;;  %v12627_v36 = vld [vmem:[%s25252_s4 + $0x80] sm:$0xff]  ;;  %v25301_v17 = vld [vmem:[#allocation12_spill] sm:$0xff]  ;;  %v2913_v38 = vrot.slane %v25302_v59, 1 }
 0x29b   : > { %18434 = vmatprep.mubr.msk.bf16.mxu0 %vm1323_vm2, %v8639_v60  ;;  %v2902_v60 = vsel %vm2831_vm5, %v2899_v11, %v2901_v21  ;;  %v9639_v58 = vshrl.u32 %v25299_v40, 16  ;;  %v9642_v48 = vshll.u32 %v25299_v40, 16 }
 0x29d   : > { %12789 = vperm.xlu0 %19856, %v12619_v30   ;;  %v9644_v5 = vrot.slane %v9642_v48, 3  ;;  %v25303_v30 = vld [vmem:[#allocation13_spill] sm:$0xff] }
 0x29f   : > { %17815 = vmatmul.mubr.msk.bf16.gmra.mrb[48].mxu1 %vm1323_vm2, %v2884_v50  ;;  %v9606_v50 = vshll.u32 %v21273_v15, 16  ;;  %v2903_v15 = vrot.slane %v21289_v12, 1  ;;  %v12622_v12 = vld [vmem:[%s25252_s4 + $0x58] sm:$0xff] }
 0x2a0   : > { %17818 = vmatprep.mubr.msk.bf16.mxu1 %vm1323_vm2, %v2886_v35  ;;  %v9600_v35 = vor.u32 %v9599_v23, %v9596_v33  ;;  %v2911_v33 = vrot.slane %v25301_v17, 1 }
 0x2a1   : > { %v9608_v22 = vrot.slane %v9606_v50, 3  ;;  %v2904_v6 = vsel %vm2831_vm5, %v2901_v21, %v2903_v15  ;;  %v12628_v21 = vld [vmem:[%s25252_s4 + $0x88] sm:$0xff] }
 0x2a2   : > { %18435 = vmatmul.mubr.msk.bf16.gmra.mrb[116].mxu0 %vm1323_vm2, %v8641_v24  ;;  %v12620_v24 = vld [vmem:[%s25252_s4 + $0x48] sm:$0xff]  ;;  %v9601_v41 = vsel %vm9584_vm8, %v9592_v27, %v9600_v35 }
 0x2a3   : > { %18438 = vmatprep.mubr.msk.bf16.mxu0 %vm1323_vm2, %v8643_v53  ;;  %v9605_v53 = vrot.slane %v9603_v42, 2  ;;  %12794 = vperm.xlu1 %19857, %v12620_v24   ;;  %v2914_v24 = vsel %vm2831_vm5, %v2911_v33, %v2913_v38 }
 0x2a5   : > { %v9609_v47 = vor.u32 %v9608_v22, %v9605_v53  ;;  %v25304_v22 = vld [vmem:[#allocation14_spill] sm:$0xff] }
 0x2a7   : > { %17819 = vmatmul.mubr.msk.bf16.gmra.mrb[52].mxu1 %vm1323_vm2, %v2888_v3  ;;  %v2905_v3 = vrot.slane %v25294_v14, 1  ;;  %12804 = vperm.xlu1 %19857, %v12622_v12   ;;  %v9610_v62 = vsel %vm9584_vm8, %v9600_v35, %v9609_v47  ;;  %v12630_v35 = vld [vmem:[%s25252_s4 + $0x98] sm:$0xff]  ;;  %v9666_v14 = vshrl.u32 %v25304_v22, 16 }
 0x2a8   : > { %17822 = vmatprep.mubr.msk.bf16.mxu1 %vm1323_vm2, %v2890_v55  ;;  %v9614_v55 = vrot.slane %v9612_v34, 2  ;;  %v12629_v34 = vld [vmem:[%s25252_s4 + $0x90] sm:$0xff] }
 0x2a9   : > { %v2906_v51 = vsel %vm2831_vm5, %v2903_v15, %v2905_v3  ;;  %v9657_v15 = vshrl.u32 %v25303_v30, 16 }
 0x2aa   : > { %18439 = vmatmul.mubr.msk.bf16.gmra.mrb[120].mxu0 %vm1323_vm2, %v8645_v37  ;;  %v12621_v37 = vld [vmem:[%s25252_s4 + $0x50] sm:$0xff]  ;;  %v9618_v7 = vor.u32 %v9617_v25, %v9614_v55  ;;  %v12631_v55 = vld [vmem:[%s25252_s4 + $0xa0] sm:$0xff] }
 0x2ab   : > { %18442 = vmatprep.mubr.msk.bf16.mxu0 %vm1323_vm2, %v8647_v61  ;;  %v25295_v61 = vld [vmem:[#allocation5_spill] sm:$0xff]  ;;  %12799 = vperm.xlu0 %19856, %v12621_v37   ;;  %v25305_v25 = vld [vmem:[#allocation16_spill] sm:$0xff]  ;;  %v9659_v37 = vrot.slane %v9657_v15, 2 }
 0x2ac   : > { %v9621_v57 = vshrl.u32 %v25295_v61, 16  ;;  %12814 = vperm.xlu1 %19857, %v12624_v45   ;;  %v9619_v39 = vsel %vm9584_vm8, %v9609_v47, %v9618_v7 }
 0x2ae   : > { %v9623_v10 = vrot.slane %v9621_v57, 2 }
 0x2af   : > { %17823 = vmatmul.mubr.msk.bf16.gmra.mrb[56].mxu1 %vm1323_vm2, %v2892_v31  ;;  %v9624_v31 = vshll.u32 %v25295_v61, 16  ;;  %12809 = vperm.xlu0 %19856, %v12623_v63  }
 0x2b0   : > { %17826 = vmatprep.mubr.msk.bf16.mxu1 %vm1323_vm2, %v2894_v44  ;;  %v9633_v44 = vshll.u32 %v25296_v29, 16  ;;  %12824 = vperm.xlu1 %19857, %v12626_v2  }
 0x2b1   : > { %v9626_v0 = vrot.slane %v9624_v31, 3  ;;  %v9668_v31 = vrot.slane %v9666_v14, 2  ;;  %v12641_v14 = vld [vmem:[%s25252_s4 + $0xf0] sm:$0xff] }
 0x2b2   : > { %18443 = vmatmul.mubr.msk.bf16.gmra.mrb[124].mxu0 %vm1323_vm2, %v8649_v1  ;;  %v2907_v1 = vrot.slane %v25297_v49, 1  ;;  %v20163_v49 = vld [vmem:[%s20493_s8 + $0x70] sm:$0xff]  }
 0x2b3   : > { %18446 = vmatprep.mubr.msk.bf16.mxu0 %vm1323_vm2, %v8651_v8  ;;  %v25298_v8 = vld [vmem:[#allocation11_spill] sm:$0xff]  ;;  %v9627_v19 = vor.u32 %v9626_v0, %v9623_v10  ;;  %12819 = vperm.xlu0 %19856, %v12625_v28   ;;  %v20164_v0 = vld [vmem:[%s20493_s8 + $0x78] sm:$0xff]  }
 0x2b4   : > { %v2908_v20 = vsel %vm2831_vm5, %v2905_v3, %v2907_v1  ;;  %12834 = vperm.xlu1 %19857, %v12628_v21   ;;  %v9669_v3 = vshll.u32 %v25304_v22, 16  ;;  %v12642_v22 = vld [vmem:[%s25252_s4 + $0xf8] sm:$0xff] }
 0x2b5   : > { %v9628_v23 = vsel %vm9584_vm8, %v9618_v7, %v9627_v19 }
 0x2b6   : > { %v9671_v7 = vrot.slane %v9669_v3, 3 }
 0x2b7   : > { %17827 = vmatmul.mubr.msk.bf16.gmra.mrb[60].mxu1 %vm1323_vm2, %v2896_v16  ;;  %v2909_v16 = vrot.slane %v25298_v8, 1  ;;  %12829 = vperm.xlu0 %19856, %v12627_v36   ;;  %v9684_v8 = vshrl.u32 %v20164_v0, 16  ;;  %v20167_v36 = vld [vmem:[%s20493_s8 + $0x80] sm:$0xff]  }
 0x2b8   : > { %17830 = vmatprep.mubr.msk.bf16.mxu1 %vm1323_vm2, %v2898_v4  ;;  %v9635_v4 = vrot.slane %v9633_v44, 3  ;;  %12844 = vperm.xlu1 %19857, %v12630_v35   ;;  %v12633_v44 = vld [vmem:[%s25252_s4 + $0xb0] sm:$0xff]  ;;  %v9672_v10 = vor.u32 %v9671_v7, %v9668_v31  ;;  %v9693_v17 = vshrl.u32 %v20167_v36, 16  ;;  %v20173_v31 = vld [vmem:[%s20493_s8 + $0x180] sm:$0xff]  }
 0x2b9   : > { %v2910_v32 = vsel %vm2831_vm5, %v2907_v1, %v2909_v16  ;;  %v2912_v27 = vsel %vm2831_vm5, %v2909_v16, %v2911_v33  ;;  %v9675_v1 = vshrl.u32 %v20163_v49, 16  ;;  %v9687_v16 = vshll.u32 %v20164_v0, 16  ;;  %v12646_v0 = vld [vmem:[%s25252_s4 + $0x118] sm:$0xff] }
 0x2ba   : > { %18447 = vmatmul.mubr.msk.bf16.gmra.mrb[128].mxu0 %vm1323_vm2, %v8653_v46  ;;  %v9636_v11 = vor.u32 %v9635_v4, %v9632_v43  ;;  %v25300_v46 = vld [vmem:[#allocation10_spill] sm:$0xff]  ;;  %v9696_v33 = vshll.u32 %v20167_v36, 16  ;;  %v9695_v35 = vrot.slane %v9693_v17, 2  ;;  %v2927_v7 = vrot.slane %v20173_v31, 1 }
 0x2bb   : > { %18450 = vmatprep.mubr.msk.bf16.mxu0 %vm1323_vm2, %v8655_v26  ;;  %v9648_v26 = vshrl.u32 %v25300_v46, 16  ;;  %v9651_v56 = vshll.u32 %v25300_v46, 16  ;;  %12839 = vperm.xlu0 %19856, %v12629_v34   ;;  %v20165_v43 = vld [vmem:[%s20493_s8 + $0x160] sm:$0xff]   ;;  %v9677_v2 = vrot.slane %v9675_v1, 2  ;;  %v9689_v48 = vrot.slane %v9687_v16, 3  ;;  %v12638_v46 = vld [vmem:[%s25252_s4 + $0xd8] sm:$0xff] }
 0x2bc   : > { %v2919_v4 = vrot.slane %v20165_v43, 1  ;;  %v9698_v34 = vrot.slane %v9696_v33, 3 }
 0x2bd   : > { %v9650_v42 = vrot.slane %v9648_v26, 2  ;;  %v9653_v50 = vrot.slane %v9651_v56, 3  ;;  %v12637_v26 = vld [vmem:[%s25252_s4 + $0xd0] sm:$0xff] }
 0x2be   : > { %v9699_v3 = vor.u32 %v9698_v34, %v9695_v35  ;;  %v20180_v35 = vld [vmem:[%s20493_s8 + $0xb8] sm:$0xff]  }
 0x2bf   : > { %17831 = vmatmul.mubr.msk.bf16.gmra.mrb[64].mxu1 %vm1323_vm2, %v2900_v9  ;;  %v9641_v9 = vrot.slane %v9639_v58, 2  ;;  %v9654_v53 = vor.u32 %v9653_v50, %v9650_v42  ;;  %12849 = vperm.xlu0 %19856, %v12631_v55   ;;  %v9686_v58 = vrot.slane %v9684_v8, 2  ;;  %v20169_v42 = vld [vmem:[%s20493_s8 + $0x170] sm:$0xff]   ;;  %v9756_v34 = vshrl.u32 %v20180_v35, 16 }
 0x2c0   : > { %17834 = vmatprep.mubr.msk.bf16.mxu1 %vm1323_vm2, %v2902_v60  ;;  %v9637_v60 = vsel %vm9584_vm8, %v9627_v19, %v9636_v11  ;;  %v20166_v19 = vld [vmem:[%s20493_s8 + $0x168] sm:$0xff]   ;;  %v2923_v50 = vrot.slane %v20169_v42, 1  ;;  %v20171_v55 = vld [vmem:[%s20493_s8 + $0x90] sm:$0xff]  }
 0x2c1   : > { %v9645_v52 = vor.u32 %v9644_v5, %v9641_v9  ;;  %v20168_v9 = vld [vmem:[%s20493_s8 + $0x88] sm:$0xff]   ;;  %v12645_v8 = vld [vmem:[%s25252_s4 + $0x110] sm:$0xff] }
 0x2c2   : > { %18451 = vmatmul.mubr.msk.bf16.gmra.mrb[132].mxu0 %vm1323_vm2, %v8657_v18  ;;  %v9660_v18 = vshll.u32 %v25303_v30, 16  ;;  %v9702_v5 = vshrl.u32 %v20168_v9, 16  ;;  %v9705_v59 = vshll.u32 %v20168_v9, 16  ;;  %v12650_v9 = vld [vmem:[%s25252_s4 + $0x138] sm:$0xff] }
 0x2c3   : > { %18456 = vmatprep.mubr.msk.bf16.mxu0 %vm1323_vm2, %v9601_v41  ;;  %v12632_v41 = vld [vmem:[%s25252_s4 + $0xa8] sm:$0xff]  ;;  %v9646_v12 = vsel %vm9584_vm8, %v9636_v11, %v9645_v52  ;;  %v9655_v57 = vsel %vm9584_vm8, %v9645_v52, %v9654_v53  ;;  %12859 = vperm.xlu0 %19856, %v12633_v44   ;;  %v20170_v52 = vld [vmem:[%s20493_s8 + $0x178] sm:$0xff]  }
 0x2c4   : > { %v9662_v47 = vrot.slane %v9660_v18, 3  ;;  %12854 = vperm.xlu1 %19857, %v12632_v41   ;;  %v9704_v15 = vrot.slane %v9702_v5, 2  ;;  %v9707_v18 = vrot.slane %v9705_v59, 3  ;;  %v12649_v5 = vld [vmem:[%s25252_s4 + $0x130] sm:$0xff] }
 0x2c6   : > { %v9663_v45 = vor.u32 %v9662_v47, %v9659_v37  ;;  %v20172_v37 = vld [vmem:[%s20493_s8 + $0x98] sm:$0xff]  }
 0x2c7   : > { %17835 = vmatmul.mubr.msk.bf16.gmra.mrb[68].mxu1 %vm1323_vm2, %v2904_v6  ;;  %v2915_v6 = vrot.slane %v25305_v25, 1  ;;  %v9711_v25 = vshrl.u32 %v20171_v55, 16  ;;  %v9720_v47 = vshrl.u32 %v20172_v37, 16 }
 0x2c8   : > { %17838 = vmatprep.mubr.msk.bf16.mxu1 %vm1323_vm2, %v2906_v51  ;;  %v25306_v51 = vld [vmem:[#allocation17_spill] sm:$0xff]  ;;  %12864 = vperm.xlu1 %19857, %v12634_v54   ;;  %v9673_v40 = vsel %vm9584_vm8, %v9663_v45, %v9672_v10 }
 0x2c9   : > { %v2917_v61 = vrot.slane %v25306_v51, 1  ;;  %v2916_v29 = vsel %vm2831_vm5, %v2913_v38, %v2915_v6  ;;  %v12640_v38 = vld [vmem:[%s25252_s4 + $0xe8] sm:$0xff]  ;;  %v9723_v51 = vshll.u32 %v20172_v37, 16  ;;  %v9713_v54 = vrot.slane %v9711_v25, 2  ;;  %v12654_v37 = vld [vmem:[%s25252_s4 + $0x158] sm:$0xff] }
 0x2ca   : > { %18457 = vmatmul.mubr.msk.bf16.vlgmr.msra.gmra.mrb[0].mxu0 %vm1323_vm2, %v9610_v62  ;;  %v9678_v62 = vshll.u32 %v20163_v49, 16  ;;  %v9722_v1 = vrot.slane %v9720_v47, 2  ;;  %v9758_v25 = vrot.slane %v9756_v34, 2  ;;  %v12653_v47 = vld [vmem:[%s25252_s4 + $0x150] sm:$0xff] }
 0x2cb   : > { %18593 = vmatpush3.bf16.msra.mxu0 %v11474_v13  ;;  %18460 = vmatprep.mubr.msk.bf16.mxu0 %vm1323_vm2, %v9619_v39  ;;  %v2918_v63 = vsel %vm2831_vm5, %v2915_v6, %v2917_v61  ;;  %v12636_v13 = vld [vmem:[%s25252_s4 + $0xc8] sm:$0xff]  ;;  %v12635_v39 = vld [vmem:[%s25252_s4 + $0xc0] sm:$0xff]  ;;  %v2920_v11 = vsel %vm2831_vm5, %v2917_v61, %v2919_v4  ;;  %v9714_v6 = vshll.u32 %v20171_v55, 16  ;;  %v12661_v34 = vld [vmem:[%s25252_s4 + $0x190] sm:$0xff] }
 0x2cc   : > { %v9680_v28 = vrot.slane %v9678_v62, 3  ;;  %12874 = vperm.xlu1 %19857, %v12636_v13   ;;  %12869 = vperm.xlu0 %19856, %v12635_v39   ;;  %v12644_v61 = vld [vmem:[%s25252_s4 + $0x108] sm:$0xff]  ;;  %v9725_v62 = vrot.slane %v9723_v51, 3  ;;  %v20175_v39 = vld [vmem:[%s20493_s8 + $0xa0] sm:$0xff]  }
 0x2cd   : > { %v9716_v44 = vrot.slane %v9714_v6, 3  ;;  %v9729_v43 = vshrl.u32 %v20175_v39, 16 }
 0x2ce   : > { %v9681_v56 = vor.u32 %v9680_v28, %v9677_v2  ;;  %v20176_v2 = vld [vmem:[%s20493_s8 + $0xa8] sm:$0xff]  }
 0x2cf   : > { %17839 = vmatmul.mubr.msk.bf16.gmra.mrb[72].mxu1 %vm1323_vm2, %v2908_v20  ;;  %v9664_v20 = vsel %vm9584_vm8, %v9654_v53, %v9663_v45  ;;  %v20174_v45 = vld [vmem:[%s20493_s8 + $0x188] sm:$0xff]   ;;  %v9717_v16 = vor.u32 %v9716_v44, %v9713_v54  ;;  %v9738_v28 = vshrl.u32 %v20176_v2, 16 }
 0x2d0   : > { %17842 = vmatprep.mubr.msk.bf16.mxu1 %vm1323_vm2, %v2910_v32  ;;  %v2921_v32 = vrot.slane %v20166_v19, 1  ;;  %12884 = vperm.xlu1 %19857, %v12638_v46   ;;  %v9741_v19 = vshll.u32 %v20176_v2, 16  ;;  %v9731_v46 = vrot.slane %v9729_v43, 2  ;;  %v20184_v54 = vld [vmem:[%s20493_s8 + $0xc8] sm:$0xff]   ;;  %v12658_v2 = vld [vmem:[%s25252_s4 + $0x178] sm:$0xff] }
 0x2d1   : > { %12879 = vperm.xlu0 %19856, %v12637_v26   ;;  %v9740_v17 = vrot.slane %v9738_v28, 2  ;;  %v9774_v44 = vshrl.u32 %v20184_v54, 16  ;;  %v12657_v28 = vld [vmem:[%s25252_s4 + $0x170] sm:$0xff] }
 0x2d2   : > { %18461 = vmatmul.mubr.msk.bf16.gmra.mrb[4].mxu0 %vm1323_vm2, %v9628_v23  ;;  %v2922_v21 = vsel %vm2831_vm5, %v2919_v4, %v2921_v32  ;;  %v9690_v23 = vor.u32 %v9689_v48, %v9686_v58  ;;  %v2924_v53 = vsel %vm2831_vm5, %v2921_v32, %v2923_v50  ;;  %v9732_v4 = vshll.u32 %v20175_v39, 16  ;;  %v12648_v32 = vld [vmem:[%s25252_s4 + $0x128] sm:$0xff]  ;;  %v20177_v58 = vld [vmem:[%s20493_s8 + $0x190] sm:$0xff]  }
 0x2d3   : > { %18464 = vmatprep.mubr.msk.bf16.mxu0 %vm1323_vm2, %v9637_v60  ;;  %v12639_v60 = vld [vmem:[%s25252_s4 + $0xe0] sm:$0xff]  ;;  %v2931_v48 = vrot.slane %v20177_v58, 1  ;;  %v9743_v33 = vrot.slane %v9741_v19, 3  ;;  %v9776_v43 = vrot.slane %v9774_v44, 2  ;;  %v12665_v44 = vld [vmem:[%s25252_s4 + $0x1b0] sm:$0xff] }
 0x2d4   : > { %v9691_v30 = vsel %vm9584_vm8, %v9681_v56, %v9690_v23  ;;  %12894 = vperm.xlu1 %19857, %v12640_v38   ;;  %v9734_v26 = vrot.slane %v9732_v4, 3 }
 0x2d5   : > { %12889 = vperm.xlu0 %19856, %v12639_v60   ;;  %v20179_v60 = vld [vmem:[%s20493_s8 + $0xb0] sm:$0xff]  }
 0x2d6   : > { %v9735_v59 = vor.u32 %v9734_v26, %v9731_v46  ;;  %v9747_v42 = vshrl.u32 %v20179_v60, 16  ;;  %v20188_v46 = vld [vmem:[%s20493_s8 + $0xd8] sm:$0xff]  }
 0x2d7   : > { %17843 = vmatmul.mubr.msk.bf16.gmra.mrb[76].mxu1 %vm1323_vm2, %v2912_v27  ;;  %v9682_v27 = vsel %vm9584_vm8, %v9672_v10, %v9681_v56  ;;  %v20178_v56 = vld [vmem:[%s20493_s8 + $0x198] sm:$0xff]   ;;  %v9792_v26 = vshrl.u32 %v20188_v46, 16 }
 0x2d8   : > { %17846 = vmatprep.mubr.msk.bf16.mxu1 %vm1323_vm2, %v2914_v24  ;;  %v2925_v24 = vrot.slane %v20170_v52, 1  ;;  %12904 = vperm.xlu1 %19857, %v12642_v22   ;;  %v9759_v52 = vshll.u32 %v20180_v35, 16  ;;  %v9749_v22 = vrot.slane %v9747_v42, 2  ;;  %v12662_v35 = vld [vmem:[%s25252_s4 + $0x198] sm:$0xff] }
 0x2d9   : > { %12899 = vperm.xlu0 %19856, %v12641_v14   ;;  %v9794_v42 = vrot.slane %v9792_v26, 2  ;;  %v12669_v26 = vld [vmem:[%s25252_s4 + $0x1d0] sm:$0xff] }
 0x2da   : > { %18465 = vmatmul.mubr.msk.bf16.gmra.mrb[8].mxu0 %vm1323_vm2, %v9646_v12  ;;  %v2926_v41 = vsel %vm2831_vm5, %v2923_v50, %v2925_v24  ;;  %v9708_v12 = vor.u32 %v9707_v18, %v9704_v15  ;;  %v2928_v10 = vsel %vm2831_vm5, %v2925_v24, %v2927_v7  ;;  %v9750_v50 = vshll.u32 %v20179_v60, 16  ;;  %v12652_v24 = vld [vmem:[%s25252_s4 + $0x148] sm:$0xff]  ;;  %v20181_v15 = vld [vmem:[%s20493_s8 + $0x1a0] sm:$0xff]  }
 0x2db   : > { %18468 = vmatprep.mubr.msk.bf16.mxu0 %vm1323_vm2, %v9655_v57  ;;  %v12643_v57 = vld [vmem:[%s25252_s4 + $0x100] sm:$0xff]  ;;  %v2935_v18 = vrot.slane %v20181_v15, 1  ;;  %v9761_v6 = vrot.slane %v9759_v52, 3 }
 0x2dc   : > { %v9709_v49 = vsel %vm9584_vm8, %v9699_v3, %v9708_v12  ;;  %12914 = vperm.xlu1 %19857, %v12644_v61   ;;  %v9752_v14 = vrot.slane %v9750_v50, 3 }
 0x2dd   : > { %12909 = vperm.xlu0 %19856, %v12643_v57   ;;  %v20183_v57 = vld [vmem:[%s20493_s8 + $0xc0] sm:$0xff]  }
 0x2de   : > { %v9753_v51 = vor.u32 %v9752_v14, %v9749_v22  ;;  %v9765_v31 = vshrl.u32 %v20183_v57, 16  ;;  %v20192_v22 = vld [vmem:[%s20493_s8 + $0xe8] sm:$0xff]  }
 0x2df   : > { %17847 = vmatmul.mubr.msk.bf16.gmra.mrb[80].mxu1 %vm1323_vm2, %v2916_v29  ;;  %v9700_v29 = vsel %vm9584_vm8, %v9690_v23, %v9699_v3  ;;  %v20182_v3 = vld [vmem:[%s20493_s8 + $0x1a8] sm:$0xff]   ;;  %v9810_v14 = vshrl.u32 %v20192_v22, 16 }
 0x2e0   : > { %17850 = vmatprep.mubr.msk.bf16.mxu1 %vm1323_vm2, %v2918_v63  ;;  %v2929_v63 = vrot.slane %v20174_v45, 1  ;;  %12924 = vperm.xlu1 %19857, %v12646_v0   ;;  %v9777_v45 = vshll.u32 %v20184_v54, 16  ;;  %v9767_v0 = vrot.slane %v9765_v31, 2  ;;  %v12666_v54 = vld [vmem:[%s25252_s4 + $0x1b8] sm:$0xff] }
 0x2e1   : > { %12919 = vperm.xlu0 %19856, %v12645_v8   ;;  %v9812_v31 = vrot.slane %v9810_v14, 2  ;;  %v12673_v14 = vld [vmem:[%s25252_s4 + $0x1f0] sm:$0xff] }
 0x2e2   : > { %18469 = vmatmul.mubr.msk.bf16.gmra.mrb[12].mxu0 %vm1323_vm2, %v9664_v20  ;;  %v2930_v13 = vsel %vm2831_vm5, %v2927_v7, %v2929_v63  ;;  %v9726_v20 = vor.u32 %v9725_v62, %v9722_v1  ;;  %v2932_v23 = vsel %vm2831_vm5, %v2929_v63, %v2931_v48  ;;  %v9768_v7 = vshll.u32 %v20183_v57, 16  ;;  %v12656_v63 = vld [vmem:[%s25252_s4 + $0x168] sm:$0xff]  ;;  %v20185_v1 = vld [vmem:[%s20493_s8 + $0x1b0] sm:$0xff]  }
 0x2e3   : > { %18472 = vmatprep.mubr.msk.bf16.mxu0 %vm1323_vm2, %v9673_v40  ;;  %v12647_v40 = vld [vmem:[%s25252_s4 + $0x120] sm:$0xff]  ;;  %v2939_v62 = vrot.slane %v20185_v1, 1  ;;  %v9779_v4 = vrot.slane %v9777_v45, 3 }
 0x2e4   : > { %v9727_v36 = vsel %vm9584_vm8, %v9717_v16, %v9726_v20  ;;  %12934 = vperm.xlu1 %19857, %v12648_v32   ;;  %v9770_v8 = vrot.slane %v9768_v7, 3 }
 0x2e5   : > { %12929 = vperm.xlu0 %19856, %v12647_v40   ;;  %v20187_v40 = vld [vmem:[%s20493_s8 + $0xd0] sm:$0xff]  }
 0x2e6   : > { %v9771_v19 = vor.u32 %v9770_v8, %v9767_v0  ;;  %v9783_v58 = vshrl.u32 %v20187_v40, 16  ;;  %v20196_v0 = vld [vmem:[%s20493_s8 + $0xf8] sm:$0xff]  }
 0x2e7   : > { %17851 = vmatmul.mubr.msk.bf16.gmra.mrb[84].mxu1 %vm1323_vm2, %v2920_v11  ;;  %v9718_v11 = vsel %vm9584_vm8, %v9708_v12, %v9717_v16  ;;  %v20186_v16 = vld [vmem:[%s20493_s8 + $0x1b8] sm:$0xff]   ;;  %v9828_v8 = vshrl.u32 %v20196_v0, 16 }
 0x2e8   : > { %17854 = vmatprep.mubr.msk.bf16.mxu1 %vm1323_vm2, %v2922_v21  ;;  %v2933_v21 = vrot.slane %v20178_v56, 1  ;;  %12944 = vperm.xlu1 %19857, %v12650_v9   ;;  %v9795_v56 = vshll.u32 %v20188_v46, 16  ;;  %v9785_v9 = vrot.slane %v9783_v58, 2  ;;  %v12670_v46 = vld [vmem:[%s25252_s4 + $0x1d8] sm:$0xff] }
 0x2e9   : > { %12939 = vperm.xlu0 %19856, %v12649_v5   ;;  %v9830_v58 = vrot.slane %v9828_v8, 2 }
 0x2ea   : > { %18473 = vmatmul.mubr.msk.bf16.gmra.mrb[16].mxu0 %vm1323_vm2, %v9682_v27  ;;  %v2934_v38 = vsel %vm2831_vm5, %v2931_v48, %v2933_v21  ;;  %v9744_v27 = vor.u32 %v9743_v33, %v9740_v17  ;;  %v2936_v12 = vsel %vm2831_vm5, %v2933_v21, %v2935_v18  ;;  %v9786_v48 = vshll.u32 %v20187_v40, 16  ;;  %v12660_v21 = vld [vmem:[%s25252_s4 + $0x188] sm:$0xff]  ;;  %v20189_v17 = vld [vmem:[%s20493_s8 + $0x1c0] sm:$0xff]  }
 0x2eb   : > { %18476 = vmatprep.mubr.msk.bf16.mxu0 %vm1323_vm2, %v9691_v30  ;;  %v12651_v30 = vld [vmem:[%s25252_s4 + $0x140] sm:$0xff]  ;;  %v2943_v33 = vrot.slane %v20189_v17, 1  ;;  %v9797_v50 = vrot.slane %v9795_v56, 3 }
 0x2ec   : > { %v9745_v55 = vsel %vm9584_vm8, %v9735_v59, %v9744_v27  ;;  %12954 = vperm.xlu1 %19857, %v12652_v24   ;;  %v9788_v5 = vrot.slane %v9786_v48, 3 }
 0x2ed   : > { %12949 = vperm.xlu0 %19856, %v12651_v30   ;;  %v20191_v30 = vld [vmem:[%s20493_s8 + $0xe0] sm:$0xff]  }
 0x2ee   : > { %v9789_v52 = vor.u32 %v9788_v5, %v9785_v9  ;;  %v9801_v15 = vshrl.u32 %v20191_v30, 16  ;;  %v20200_v9 = vld [vmem:[%s20493_s8 + $0x108] sm:$0xff]  }
 0x2ef   : > { %17855 = vmatmul.mubr.msk.bf16.gmra.mrb[88].mxu1 %vm1323_vm2, %v2924_v53  ;;  %v9736_v53 = vsel %vm9584_vm8, %v9726_v20, %v9735_v59  ;;  %v20190_v59 = vld [vmem:[%s20493_s8 + $0x1c8] sm:$0xff]   ;;  %v9846_v5 = vshrl.u32 %v20200_v9, 16 }
 0x2f0   : > { %17858 = vmatprep.mubr.msk.bf16.mxu1 %vm1323_vm2, %v2926_v41  ;;  %v2937_v41 = vrot.slane %v20182_v3, 1  ;;  %12964 = vperm.xlu1 %19857, %v12654_v37   ;;  %v9813_v3 = vshll.u32 %v20192_v22, 16  ;;  %v9803_v37 = vrot.slane %v9801_v15, 2  ;;  %v12674_v22 = vld [vmem:[%s25252_s4 + $0x1f8] sm:$0xff] }
 0x2f1   : > { %12959 = vperm.xlu0 %19856, %v12653_v47   ;;  %v9848_v15 = vrot.slane %v9846_v5, 2  ;;  %v12682_v5 = vld [vmem:[%s25252_s4 + $0x238] sm:$0xff] }
 0x2f2   : > { %18477 = vmatmul.mubr.msk.bf16.gmra.mrb[20].mxu0 %vm1323_vm2, %v9700_v29  ;;  %v2938_v61 = vsel %vm2831_vm5, %v2935_v18, %v2937_v41  ;;  %v9762_v29 = vor.u32 %v9761_v6, %v9758_v25  ;;  %v2940_v20 = vsel %vm2831_vm5, %v2937_v41, %v2939_v62  ;;  %v9804_v18 = vshll.u32 %v20191_v30, 16  ;;  %v12664_v41 = vld [vmem:[%s25252_s4 + $0x1a8] sm:$0xff]  ;;  %v20193_v25 = vld [vmem:[%s20493_s8 + $0x1d0] sm:$0xff]  }
 0x2f3   : > { %18480 = vmatprep.mubr.msk.bf16.mxu0 %vm1323_vm2, %v9709_v49  ;;  %v12655_v49 = vld [vmem:[%s25252_s4 + $0x160] sm:$0xff]  ;;  %v2947_v6 = vrot.slane %v20193_v25, 1  ;;  %v9815_v7 = vrot.slane %v9813_v3, 3 }
 0x2f4   : > { %v9763_v39 = vsel %vm9584_vm8, %v9753_v51, %v9762_v29  ;;  %12974 = vperm.xlu1 %19857, %v12656_v63   ;;  %v9806_v47 = vrot.slane %v9804_v18, 3 }
 0x2f5   : > { %12969 = vperm.xlu0 %19856, %v12655_v49   ;;  %v20195_v49 = vld [vmem:[%s20493_s8 + $0xf0] sm:$0xff]  }
 0x2f6   : > { %v9807_v45 = vor.u32 %v9806_v47, %v9803_v37  ;;  %v9819_v1 = vshrl.u32 %v20195_v49, 16  ;;  %v20204_v37 = vld [vmem:[%s20493_s8 + $0x118] sm:$0xff]  }
 0x2f7   : > { %17859 = vmatmul.mubr.msk.bf16.gmra.mrb[92].mxu1 %vm1323_vm2, %v2928_v10  ;;  %v9754_v10 = vsel %vm9584_vm8, %v9744_v27, %v9753_v51  ;;  %v20194_v51 = vld [vmem:[%s20493_s8 + $0x1d8] sm:$0xff]   ;;  %v9864_v47 = vshrl.u32 %v20204_v37, 16 }
 0x2f8   : > { %17862 = vmatprep.mubr.msk.bf16.mxu1 %vm1323_vm2, %v2930_v13  ;;  %v2941_v13 = vrot.slane %v20186_v16, 1  ;;  %12984 = vperm.xlu1 %19857, %v12658_v2   ;;  %v9831_v16 = vshll.u32 %v20196_v0, 16  ;;  %v9821_v2 = vrot.slane %v9819_v1, 2  ;;  %v20207_v0 = vld [vmem:[%s20493_s8 + $0x120] sm:$0xff]  }
 0x2f9   : > { %12979 = vperm.xlu0 %19856, %v12657_v28   ;;  %v9866_v1 = vrot.slane %v9864_v47, 2  ;;  %v9873_v8 = vshrl.u32 %v20207_v0, 16 }
 0x2fa   : > { %18481 = vmatmul.mubr.msk.bf16.gmra.mrb[24].mxu0 %vm1323_vm2, %v9718_v11  ;;  %v2942_v32 = vsel %vm2831_vm5, %v2939_v62, %v2941_v13  ;;  %v9780_v11 = vor.u32 %v9779_v4, %v9776_v43  ;;  %v2944_v27 = vsel %vm2831_vm5, %v2941_v13, %v2943_v33  ;;  %v9822_v62 = vshll.u32 %v20195_v49, 16  ;;  %v12668_v13 = vld [vmem:[%s25252_s4 + $0x1c8] sm:$0xff]  ;;  %v20197_v43 = vld [vmem:[%s20493_s8 + $0x1e0] sm:$0xff]  }
 0x2fb   : > { %18484 = vmatprep.mubr.msk.bf16.mxu0 %vm1323_vm2, %v9727_v36  ;;  %v12659_v36 = vld [vmem:[%s25252_s4 + $0x180] sm:$0xff]  ;;  %v2951_v4 = vrot.slane %v20197_v43, 1  ;;  %v9833_v48 = vrot.slane %v9831_v16, 3  ;;  %v9876_v16 = vshll.u32 %v20207_v0, 16 }
 0x2fc   : > { %v9781_v60 = vsel %vm9584_vm8, %v9771_v19, %v9780_v11  ;;  %12994 = vperm.xlu1 %19857, %v12660_v21   ;;  %v9824_v28 = vrot.slane %v9822_v62, 3 }
 0x2fd   : > { %12989 = vperm.xlu0 %19856, %v12659_v36   ;;  %v20199_v36 = vld [vmem:[%s20493_s8 + $0x100] sm:$0xff]  }
 0x2fe   : > { %v9825_v56 = vor.u32 %v9824_v28, %v9821_v2  ;;  %v9837_v17 = vshrl.u32 %v20199_v36, 16  ;;  %v20208_v2 = vld [vmem:[%s20493_s8 + $0x128] sm:$0xff]  }
 0x2ff   : > { %17863 = vmatmul.mubr.msk.bf16.gmra.mrb[96].mxu1 %vm1323_vm2, %v2932_v23  ;;  %v9772_v23 = vsel %vm9584_vm8, %v9762_v29, %v9771_v19  ;;  %v20198_v19 = vld [vmem:[%s20493_s8 + $0x1e8] sm:$0xff]   ;;  %v9882_v28 = vshrl.u32 %v20208_v2, 16 }
 0x300   : > { %17866 = vmatprep.mubr.msk.bf16.mxu1 %vm1323_vm2, %v2934_v38  ;;  %v2945_v38 = vrot.slane %v20190_v59, 1  ;;  %13004 = vperm.xlu1 %19857, %v12662_v35   ;;  %v9849_v59 = vshll.u32 %v20200_v9, 16  ;;  %v9839_v35 = vrot.slane %v9837_v17, 2 }
 0x301   : > { %12999 = vperm.xlu0 %19856, %v12661_v34   ;;  %v9884_v17 = vrot.slane %v9882_v28, 2 }
 0x302   : > { %18485 = vmatmul.mubr.msk.bf16.gmra.mrb[28].mxu0 %vm1323_vm2, %v9736_v53  ;;  %v2946_v24 = vsel %vm2831_vm5, %v2943_v33, %v2945_v38  ;;  %v9798_v53 = vor.u32 %v9797_v50, %v9794_v42  ;;  %v2948_v29 = vsel %vm2831_vm5, %v2945_v38, %v2947_v6  ;;  %v9840_v33 = vshll.u32 %v20199_v36, 16  ;;  %v12672_v38 = vld [vmem:[%s25252_s4 + $0x1e8] sm:$0xff]  ;;  %v20201_v42 = vld [vmem:[%s20493_s8 + $0x1f0] sm:$0xff]  }
 0x303   : > { %18488 = vmatprep.mubr.msk.bf16.mxu0 %vm1323_vm2, %v9745_v55  ;;  %v12663_v55 = vld [vmem:[%s25252_s4 + $0x1a0] sm:$0xff]  ;;  %v2955_v50 = vrot.slane %v20201_v42, 1  ;;  %v9851_v18 = vrot.slane %v9849_v59, 3  ;;  %v12681_v59 = vld [vmem:[%s25252_s4 + $0x230] sm:$0xff] }
 0x304   : > { %v9799_v57 = vsel %vm9584_vm8, %v9789_v52, %v9798_v53  ;;  %13014 = vperm.xlu1 %19857, %v12664_v41   ;;  %v9842_v34 = vrot.slane %v9840_v33, 3 }
 0x305   : > { %13009 = vperm.xlu0 %19856, %v12663_v55   ;;  %v20203_v55 = vld [vmem:[%s20493_s8 + $0x110] sm:$0xff]  }
 0x306   : > { %v9843_v3 = vor.u32 %v9842_v34, %v9839_v35  ;;  %v9855_v25 = vshrl.u32 %v20203_v55, 16  ;;  %v20212_v35 = vld [vmem:[%s20493_s8 + $0x138] sm:$0xff]  }
 0x307   : > { %17867 = vmatmul.mubr.msk.bf16.gmra.mrb[100].mxu1 %vm1323_vm2, %v2936_v12  ;;  %v9790_v12 = vsel %vm9584_vm8, %v9780_v11, %v9789_v52  ;;  %v20202_v52 = vld [vmem:[%s20493_s8 + $0x1f8] sm:$0xff]   ;;  %v9900_v34 = vshrl.u32 %v20212_v35, 16 }
 0x308   : > { %17870 = vmatprep.mubr.msk.bf16.mxu1 %vm1323_vm2, %v2938_v61  ;;  %v2949_v61 = vrot.slane %v20194_v51, 1  ;;  %13024 = vperm.xlu1 %19857, %v12666_v54   ;;  %v9867_v51 = vshll.u32 %v20204_v37, 16  ;;  %v9857_v54 = vrot.slane %v9855_v25, 2 }
 0x309   : > { %13019 = vperm.xlu0 %19856, %v12665_v44  }
 0x30a   : > { %18489 = vmatmul.mubr.msk.bf16.gmra.mrb[32].mxu0 %vm1323_vm2, %v9754_v10  ;;  %v2950_v63 = vsel %vm2831_vm5, %v2947_v6, %v2949_v61  ;;  %v9816_v10 = vor.u32 %v9815_v7, %v9812_v31  ;;  %v2952_v11 = vsel %vm2831_vm5, %v2949_v61, %v2951_v4  ;;  %v9858_v6 = vshll.u32 %v20203_v55, 16  ;;  %v12676_v61 = vld [vmem:[%s25252_s4 + $0x208] sm:$0xff]  ;;  %v20205_v31 = vld [vmem:[%s20493_s8 + $0x200] sm:$0xff]   ;;  %v20214_v55 = vld [vmem:[%s20493_s8 + $0x18] sm:$0xff]  }
 0x30b   : > { %18492 = vmatprep.mubr.msk.bf16.mxu0 %vm1323_vm2, %v9763_v39  ;;  %v12667_v39 = vld [vmem:[%s25252_s4 + $0x1c0] sm:$0xff]  ;;  %v2959_v7 = vrot.slane %v20205_v31, 1  ;;  %v9869_v62 = vrot.slane %v9867_v51, 3  ;;  %v4372_v25 = vrot.slane %v20214_v55, 1  ;;  %v12686_v51 = vld [vmem:[%s25252_s4 + $0x258] sm:$0xff] }
 0x30c   : > { %v9817_v40 = vsel %vm9584_vm8, %v9807_v45, %v9816_v10  ;;  %13034 = vperm.xlu1 %19857, %v12668_v13   ;;  %v9860_v44 = vrot.slane %v9858_v6, 3  ;;  %v12678_v13 = vld [vmem:[%s25252_s4 + $0x218] sm:$0xff] }
 0x30d   : > { %13029 = vperm.xlu0 %19856, %v12667_v39   ;;  %v12677_v39 = vld [vmem:[%s25252_s4 + $0x210] sm:$0xff] }
 0x30e   : > { %v9861_v43 = vor.u32 %v9860_v44, %v9857_v54 }
 0x30f   : > { %17871 = vmatmul.mubr.msk.bf16.gmra.mrb[104].mxu1 %vm1323_vm2, %v2940_v20  ;;  %v9808_v20 = vsel %vm9584_vm8, %v9798_v53, %v9807_v45  ;;  %v20206_v45 = vld [vmem:[%s20493_s8 + $0x208] sm:$0xff]  }
 0x310   : > { %17874 = vmatprep.mubr.msk.bf16.mxu1 %vm1323_vm2, %v2942_v32  ;;  %v2953_v32 = vrot.slane %v20198_v19, 1  ;;  %13044 = vperm.xlu1 %19857, %v12670_v46   ;;  %v9885_v19 = vshll.u32 %v20208_v2, 16  ;;  %v9878_v46 = vrot.slane %v9876_v16, 3 }
 0x311   : > { %13039 = vperm.xlu0 %19856, %v12669_v26  }
 0x312   : > { %18493 = vmatmul.mubr.msk.bf16.gmra.mrb[36].mxu0 %vm1323_vm2, %v9772_v23  ;;  %v2954_v21 = vsel %vm2831_vm5, %v2951_v4, %v2953_v32  ;;  %v9834_v23 = vor.u32 %v9833_v48, %v9830_v58  ;;  %v2956_v53 = vsel %vm2831_vm5, %v2953_v32, %v2955_v50  ;;  %v12680_v32 = vld [vmem:[%s25252_s4 + $0x228] sm:$0xff]  ;;  %v20209_v58 = vld [vmem:[%s20493_s8 + $0x210] sm:$0xff]   ;;  %v9887_v33 = vrot.slane %v9885_v19, 3  ;;  %v12690_v19 = vld [vmem:[%s25252_s4 + $0x278] sm:$0xff] }
 0x313   : > { %18496 = vmatprep.mubr.msk.bf16.mxu0 %vm1323_vm2, %v9781_v60  ;;  %v12671_v60 = vld [vmem:[%s25252_s4 + $0x1e0] sm:$0xff]  ;;  %v2963_v48 = vrot.slane %v20209_v58, 1 }
 0x314   : > { %v9835_v30 = vsel %vm9584_vm8, %v9825_v56, %v9834_v23  ;;  %13054 = vperm.xlu1 %19857, %v12672_v38  }
 0x315   : > { %13049 = vperm.xlu0 %19856, %v12671_v60   ;;  %v20211_v60 = vld [vmem:[%s20493_s8 + $0x130] sm:$0xff]  }
 0x316   : > { %v9891_v42 = vshrl.u32 %v20211_v60, 16 }
 0x317   : > { %17875 = vmatmul.mubr.msk.bf16.gmra.mrb[108].mxu1 %vm1323_vm2, %v2944_v27  ;;  %v9826_v27 = vsel %vm9584_vm8, %v9816_v10, %v9825_v56  ;;  %v20210_v56 = vld [vmem:[%s20493_s8 + $0x218] sm:$0xff]  }
 0x318   : > { %17878 = vmatprep.mubr.msk.bf16.mxu1 %vm1323_vm2, %v2946_v24  ;;  %v2957_v24 = vrot.slane %v20202_v52, 1  ;;  %13064 = vperm.xlu1 %19857, %v12674_v22   ;;  %v9903_v52 = vshll.u32 %v20212_v35, 16  ;;  %v9893_v22 = vrot.slane %v9891_v42, 2  ;;  %v20222_v42 = vld [vmem:[%s20493_s8 + $0x38] sm:$0xff]  }
 0x319   : > { %13059 = vperm.xlu0 %19856, %v12673_v14  }
 0x31a   : > { %18497 = vmatmul.mubr.msk.bf16.gmra.mrb[40].mxu0 %vm1323_vm2, %v9790_v12  ;;  %v2958_v41 = vsel %vm2831_vm5, %v2955_v50, %v2957_v24  ;;  %v9852_v12 = vor.u32 %v9851_v18, %v9848_v15  ;;  %v2960_v10 = vsel %vm2831_vm5, %v2957_v24, %v2959_v7  ;;  %v9894_v50 = vshll.u32 %v20211_v60, 16  ;;  %v12684_v24 = vld [vmem:[%s25252_s4 + $0x248] sm:$0xff]  ;;  %v20213_v18 = vld [vmem:[%s20493_s8 + $0x220] ss:$0 sps:$4 sm:$0x11]  }
 0x31b   : > { %18500 = vmatprep.mubr.msk.bf16.mxu0 %vm1323_vm2, %v9799_v57  ;;  %v12675_v57 = vld [vmem:[%s25252_s4 + $0x200] sm:$0xff]  ;;  %v9905_v37 = vrot.slane %v9903_v52, 3  ;;  %v22227_v52 = vpop.permute.xlu1 %12759 }
 0x31c   : > { %v9853_v49 = vsel %vm9584_vm8, %v9843_v3, %v9852_v12  ;;  %13074 = vperm.xlu1 %19857, %v12676_v61   ;;  %v9862_v26 = vsel %vm9584_vm8, %v9852_v12, %v9861_v43  ;;  %v9896_v14 = vrot.slane %v9894_v50, 3  ;;  %v9902_v12 = vrot.slane %v9900_v34, 2  ;;  %v12685_v61 = vld [vmem:[%s25252_s4 + $0x250] sm:$0xff] }
 0x31d   : > { %13069 = vperm.xlu0 %19856, %v12675_v57   ;;  %v4380_v50 = vrot.slane %v20222_v42, 1 }
 0x31e   : > { %v9897_v57 = vor.u32 %v9896_v14, %v9893_v22  ;;  %v9906_v44 = vor.u32 %v9905_v37, %v9902_v12  ;;  %v20223_v14 = vld [vmem:[%s20493_s8 + $0x160] sm:$0xff]   ;;  %v12696_v37 = vld [vmem:[%s25252_s4 + $0x2a8] sm:$0xff] }
 0x31f   : > { %17879 = vmatmul.mubr.msk.bf16.gmra.mrb[112].mxu1 %vm1323_vm2, %v2948_v29  ;;  %v9844_v29 = vsel %vm9584_vm8, %v9834_v23, %v9843_v3  ;;  %v25307_v3 = vld [vmem:[#allocation3_spill] sm:$0xff] }
 0x320   : > { %17882 = vmatprep.mubr.msk.bf16.mxu1 %vm1323_vm2, %v2950_v63  ;;  %v2961_v63 = vrot.slane %v20206_v45, 1  ;;  %13084 = vperm.xlu1 %19857, %v12678_v13   ;;  %v20216_v45 = vld [vmem:[%s20493_s8 + $0x148] sm:$0xff]  }
 0x321   : > { %13079 = vperm.xlu0 %19856, %v12677_v39   ;;  %v20218_v39 = vld [vmem:[%s20493_s8 + $0x28] sm:$0xff]  }
 0x322   : > { %18501 = vmatmul.mubr.msk.bf16.gmra.mrb[44].mxu0 %vm1323_vm2, %v9808_v20  ;;  %v2962_v4 = vsel %vm2831_vm5, %v2959_v7, %v2961_v63  ;;  %v9870_v20 = vor.u32 %v9869_v62, %v9866_v1  ;;  %v2964_v23 = vsel %vm2831_vm5, %v2961_v63, %v2963_v48  ;;  %v20215_v7 = vld [vmem:[%s20493_s8 + $0x140] sm:$0xff]   ;;  %v9918_v63 = vshrl.u32 %v20216_v45, 16  ;;  %v12688_v1 = vld [vmem:[%s25252_s4 + $0x268] sm:$0xff] }
 0x323   : > { %18504 = vmatprep.mubr.msk.bf16.mxu0 %vm1323_vm2, %v9817_v40  ;;  %v12679_v40 = vld [vmem:[%s25252_s4 + $0x220] sm:$0xff]  ;;  %v9912_v54 = vshll.u32 %v20215_v7, 16 }
 0x324   : > { %v9871_v36 = vsel %vm9584_vm8, %v9861_v43, %v9870_v20  ;;  %13094 = vperm.xlu1 %19857, %v12680_v32   ;;  %v12687_v62 = vld [vmem:[%s25252_s4 + $0x260] sm:$0xff]  ;;  %v4376_v43 = vrot.slane %v20218_v39, 1  ;;  %v12689_v32 = vld [vmem:[%s25252_s4 + $0x270] sm:$0xff] }
 0x325   : > { %13089 = vperm.xlu0 %19856, %v12679_v40   ;;  %v9914_v13 = vrot.slane %v9912_v54, 3 }
 0x327   : > { %17883 = vmatmul.mubr.msk.bf16.gmra.mrb[116].mxu1 %vm1323_vm2, %v2952_v11  ;;  %v9875_v11 = vrot.slane %v9873_v8, 2 }
 0x328   : > { %17886 = vmatprep.mubr.msk.bf16.mxu1 %vm1323_vm2, %v2954_v21  ;;  %v2965_v21 = vrot.slane %v20210_v56, 1  ;;  %13104 = vperm.xlu1 %19857, %v12682_v5   ;;  %v20220_v56 = vld [vmem:[%s20493_s8 + $0x158] sm:$0xff]  }
 0x329   : > { %v9879_v9 = vor.u32 %v9878_v46, %v9875_v11  ;;  %13099 = vperm.xlu0 %19856, %v12681_v59  }
 0x32a   : > { %18505 = vmatmul.mubr.msk.bf16.gmra.mrb[48].mxu0 %vm1323_vm2, %v9826_v27  ;;  %v2966_v38 = vsel %vm2831_vm5, %v2963_v48, %v2965_v21  ;;  %v9888_v27 = vor.u32 %v9887_v33, %v9884_v17  ;;  %v20219_v48 = vld [vmem:[%s20493_s8 + $0x150] sm:$0xff]   ;;  %v12692_v17 = vld [vmem:[%s25252_s4 + $0x288] sm:$0xff]  ;;  %v12691_v33 = vld [vmem:[%s25252_s4 + $0x280] sm:$0xff] }
 0x32b   : > { %18508 = vmatprep.mubr.msk.bf16.mxu0 %vm1323_vm2, %v9835_v30  ;;  %v12683_v30 = vld [vmem:[%s25252_s4 + $0x240] sm:$0xff]  ;;  %v9880_v15 = vsel %vm9584_vm8, %v9870_v20, %v9879_v9  ;;  %v9920_v20 = vrot.slane %v9918_v63, 2  ;;  %v9927_v11 = vshrl.u32 %v20219_v48, 16  ;;  %v9930_v46 = vshll.u32 %v20219_v48, 16  ;;  %v20229_v48 = vld [vmem:[%s20493_s8 + $0x50] sm:$0xff]  }
 0x32c   : > { %v9889_v6 = vsel %vm9584_vm8, %v9879_v9, %v9888_v27  ;;  %13114 = vperm.xlu1 %19857, %v12684_v24   ;;  %v9898_v8 = vsel %vm9584_vm8, %v9888_v27, %v9897_v57  ;;  %v20221_v9 = vld [vmem:[%s20493_s8 + $0x30] sm:$0xff]   ;;  %v22229_v24 = vpop.permute.xlu0 %12749 }
 0x32d   : > { %13109 = vperm.xlu0 %19856, %v12683_v30   ;;  %v4378_v5 = vrot.slane %v20221_v9, 1  ;;  %v9932_v60 = vrot.slane %v9930_v46, 3 }
 0x32f   : > { %17887 = vmatmul.mubr.msk.bf16.gmra.mrb[120].mxu1 %vm1323_vm2, %v2956_v53  ;;  %v2967_v53 = vrot.slane %v20213_v18, 1  ;;  %v4379_v30 = vsel %vm2831_vm5, %v4376_v43, %v4378_v5  ;;  %v12693_v18 = vld [vmem:[%s25252_s4 + $0x290] sm:$0xff]  ;;  %v4381_v22 = vsel %vm2831_vm5, %v4378_v5, %v4380_v50 }
 0x330   : > { %17890 = vmatprep.mubr.msk.bf16.mxu1 %vm1323_vm2, %v2958_v41  ;;  %v4371_v41 = vrot.slane %v25307_v3, 1  ;;  %13124 = vperm.xlu1 %19857, %v12686_v51   ;;  %v9945_v3 = vshrl.u32 %v20223_v14, 16  ;;  %v20225_v51 = vld [vmem:[%s20493_s8 + $0x40] sm:$0xff]  }
 0x331   : > { %v2968_v47 = vsel %vm2831_vm5, %v2965_v21, %v2967_v53  ;;  %13119 = vperm.xlu0 %19856, %v12685_v61   ;;  %v9936_v21 = vshrl.u32 %v20220_v56, 16  ;;  %v4382_v61 = vrot.slane %v20225_v51, 1 }
 0x332   : > { %18509 = vmatmul.mubr.msk.bf16.gmra.mrb[52].mxu0 %vm1323_vm2, %v9844_v29  ;;  %v4373_v31 = vsel %vm2831_vm5, %v4371_v41, %v4372_v25  ;;  %v9909_v29 = vshrl.u32 %v20215_v7, 16  ;;  %v9948_v41 = vshll.u32 %v20223_v14, 16  ;;  %v12703_v14 = vld [vmem:[%s25252_s4 + $0x2e0] sm:$0xff] }
 0x333   : > { %18512 = vmatprep.mubr.msk.bf16.mxu0 %vm1323_vm2, %v9853_v49  ;;  %v9921_v49 = vshll.u32 %v20216_v45, 16  ;;  %v9938_v35 = vrot.slane %v9936_v21, 2  ;;  %v20230_v21 = vld [vmem:[%s20493_s8 + $0x58] sm:$0xff]  }
 0x334   : > { %v9911_v16 = vrot.slane %v9909_v29, 2  ;;  %13134 = vperm.xlu1 %19857, %v12688_v1   ;;  %v9947_v29 = vrot.slane %v9945_v3, 2  ;;  %v9950_v54 = vrot.slane %v9948_v41, 3  ;;  %v20233_v3 = vld [vmem:[%s20493_s8 + $0x60] sm:$0xff]  }
 0x335   : > { %v9923_v2 = vrot.slane %v9921_v49, 3  ;;  %13129 = vperm.xlu0 %19856, %v12687_v62   ;;  %v4383_v62 = vsel %vm2831_vm5, %v4380_v50, %v4382_v61  ;;  %v4390_v41 = vrot.slane %v20233_v3, 1 }
 0x336   : > { %v9915_v40 = vor.u32 %v9914_v13, %v9911_v16  ;;  %v20227_v13 = vld [vmem:[%s20493_s8 + $0x170] sm:$0xff]  }
 0x337   : > { %17891 = vmatmul.mubr.msk.bf16.gmra.mrb[124].mxu1 %vm1323_vm2, %v2960_v10  ;;  %v20217_v10 = vld [vmem:[%s20493_s8 + $0x20] sm:$0xff]   ;;  %v9963_v39 = vshrl.u32 %v20227_v13, 16 }
 0x338   : > { %17894 = vmatprep.mubr.msk.bf16.mxu1 %vm1323_vm2, %v2962_v4  ;;  %v4374_v0 = vrot.slane %v20217_v10, 1  ;;  %v9907_v4 = vsel %vm9584_vm8, %v9897_v57, %v9906_v44  ;;  %13144 = vperm.xlu1 %19857, %v12690_v19   ;;  %v9916_v59 = vsel %vm9584_vm8, %v9906_v44, %v9915_v40  ;;  %v22252_v57 = vpop.permute.xlu1 %12764  ;;  %v20226_v44 = vld [vmem:[%s20493_s8 + $0x48] sm:$0xff]   ;;  %v12698_v10 = vld [vmem:[%s25252_s4 + $0x2b8] sm:$0xff] }
 0x339   : > { %13139 = vperm.xlu0 %19856, %v12689_v32   ;;  %v4384_v45 = vrot.slane %v20226_v44, 1  ;;  %v12706_v44 = vld [vmem:[%s25252_s4 + $0x2f8] sm:$0xff] }
 0x33a   : > { %18513 = vmatmul.mubr.msk.bf16.gmra.mrb[56].mxu0 %vm1323_vm2, %v9862_v26  ;;  %v4375_v28 = vsel %vm2831_vm5, %v4372_v25, %v4374_v0  ;;  %v4377_v58 = vsel %vm2831_vm5, %v4374_v0, %v4376_v43  ;;  %v9924_v26 = vor.u32 %v9923_v2, %v9920_v20  ;;  %v20224_v25 = vld [vmem:[%s20493_s8 + $0x168] sm:$0xff]   ;;  %v12697_v0 = vld [vmem:[%s25252_s4 + $0x2b0] sm:$0xff]  ;;  %v9966_v43 = vshll.u32 %v20227_v13, 16  ;;  %v20228_v20 = vld [vmem:[%s20493_s8 + $0x178] sm:$0xff]  }
 0x33b   : > { %18516 = vmatprep.mubr.msk.bf16.mxu0 %vm1323_vm2, %v9871_v36  ;;  %v9939_v36 = vshll.u32 %v20220_v56, 16  ;;  %v9957_v12 = vshll.u32 %v20224_v25, 16  ;;  %v4385_v16 = vsel %vm2831_vm5, %v4382_v61, %v4384_v45  ;;  %v9972_v2 = vshrl.u32 %v20228_v20, 16 }
 0x33c   : > { %v9925_v27 = vsel %vm9584_vm8, %v9915_v40, %v9924_v26  ;;  %13154 = vperm.xlu1 %19857, %v12692_v17   ;;  %v22271_v19 = vpop.permute.xlu1 %12774  ;;  %v12700_v40 = vld [vmem:[%s25252_s4 + $0x2c8] sm:$0xff]  ;;  %v9968_v56 = vrot.slane %v9966_v43, 3  ;;  %v12707_v43 = vld [vmem:[%s25252_s4 + $0x300] sm:$0xff] }
 0x33d   : > { %v9941_v34 = vrot.slane %v9939_v36, 3  ;;  %13149 = vperm.xlu0 %19856, %v12691_v33   ;;  %v9959_v1 = vrot.slane %v9957_v12, 3  ;;  %25309 = vst [vmem:[#allocation7_spill] sm:$0xff] %v22271_v19  ;;  %v4388_v36 = vrot.slane %v20230_v21, 1  ;;  %v9974_v33 = vrot.slane %v9972_v2, 2  ;;  %v20234_v12 = vld [vmem:[%s20493_s8 + $0x68] sm:$0xff]  }
 0x33f   : > { %17895 = vmatmul.mubr.msk.bf16.gmra.mrb[128].mxu1 %vm1323_vm2, %v2964_v23  ;;  %v25308_v23 = vld [vmem:[#allocation2_spill] sm:$0xff]  ;;  %v9942_v55 = vor.u32 %v9941_v34, %v9938_v35 }
 0x340   : > { %17898 = vmatprep.mubr.msk.bf16.mxu1 %vm1323_vm2, %v2966_v38  ;;  %v9929_v38 = vrot.slane %v9927_v11, 2  ;;  %v4386_v11 = vrot.slane %v20229_v48, 1  ;;  %v22289_v5 = vpop.permute.xlu1 %12784 }
 0x341   : > { %13159 = vperm.xlu0 %19856, %v12693_v18   ;;  %25311 = vst [vmem:[#allocation6_spill] sm:$0xff] %v22289_v5  ;;  %v20345_v5 = vld [vmem:[%s20493_s8 + $0x120] sm:$0xff]  }
 0x342   : > { %18517 = vmatmul.mubr.msk.bf16.gmra.mrb[60].mxu0 %vm1323_vm2, %v9880_v15  ;;  %v12694_v15 = vld [vmem:[%s25252_s4 + $0x298] sm:$0xff]  ;;  %v9933_v53 = vor.u32 %v9932_v60, %v9929_v38  ;;  %v4387_v9 = vsel %vm2831_vm5, %v4384_v45, %v4386_v11  ;;  %v12701_v60 = vld [vmem:[%s25252_s4 + $0x2d0] sm:$0xff]  ;;  %v4389_v50 = vsel %vm2831_vm5, %v4386_v11, %v4388_v36 }
 0x343   : > { %18520 = vmatprep.mubr.msk.bf16.mxu0 %vm1323_vm2, %v9889_v6  ;;  %v9954_v6 = vshrl.u32 %v20224_v25, 16  ;;  %13164 = vperm.xlu1 %19857, %v12694_v15   ;;  %v12702_v38 = vld [vmem:[%s25252_s4 + $0x2d8] sm:$0xff]  ;;  %v20232_v15 = vld [vmem:[%s20493_s8 + $0x188] sm:$0xff]   ;;  %v12705_v45 = vld [vmem:[%s25252_s4 + $0x2f0] sm:$0xff] }
 0x344   : > { %v9934_v7 = vsel %vm9584_vm8, %v9924_v26, %v9933_v53  ;;  %v9943_v63 = vsel %vm9584_vm8, %v9933_v53, %v9942_v55  ;;  %v9965_v26 = vrot.slane %v9963_v39, 2  ;;  %v9990_v18 = vshrl.u32 %v20232_v15, 16  ;;  %v12708_v39 = vld [vmem:[%s25252_s4 + $0x308] sm:$0xff]  ;;  %v20238_v11 = vld [vmem:[%s20493_s8 + $0x78] sm:$0xff]  }
 0x345   : > { %v9956_v49 = vrot.slane %v9954_v6, 2  ;;  %v9993_v53 = vshll.u32 %v20232_v15, 16 }
 0x346   : > { %v9969_v42 = vor.u32 %v9968_v56, %v9965_v26  ;;  %v9992_v51 = vrot.slane %v9990_v18, 2  ;;  %v12712_v18 = vld [vmem:[%s25252_s4 + $0x328] sm:$0xff] }
 0x347   : > { %17899 = vmatmul.mubr.msk.bf16.gmra.mrb[132].mxu1 %vm1323_vm2, %v2968_v47  ;;  %v12695_v47 = vld [vmem:[%s25252_s4 + $0x2a0] sm:$0xff]  ;;  %13174 = vperm.xlu1 %19857, %v12696_v37   ;;  %v4392_v37 = vrot.slane %v20234_v12, 1  ;;  %v9995_v61 = vrot.slane %v9993_v53, 3 }
 0x348   : > { %17904 = vmatprep.mubr.msk.bf16.mxu1 %vm1323_vm2, %v4373_v31  ;;  %v22254_v31 = vpop.permute.xlu0 %12754  ;;  %13169 = vperm.xlu0 %19856, %v12695_v47   ;;  %v12711_v53 = vld [vmem:[%s25252_s4 + $0x320] sm:$0xff] }
 0x34a   : > { %18521 = vmatmul.mubr.msk.bf16.gmra.mrb[64].mxu0 %vm1323_vm2, %v9898_v8  ;;  %v9951_v8 = vor.u32 %v9950_v54, %v9947_v29  ;;  %v4391_v54 = vsel %vm2831_vm5, %v4388_v36, %v4390_v41 }
 0x34b   : > { %18524 = vmatprep.mubr.msk.bf16.mxu0 %vm1323_vm2, %v9907_v4  ;;  %v9960_v4 = vor.u32 %v9959_v1, %v9956_v49  ;;  %13184 = vperm.xlu1 %19857, %v12698_v10   ;;  %v4393_v49 = vsel %vm2831_vm5, %v4390_v41, %v4392_v37  ;;  %v20235_v1 = vld [vmem:[%s20493_s8 + $0x190] sm:$0xff]  }
 0x34c   : > { %v22273_v32 = vpop.permute.xlu0 %12769  ;;  %13179 = vperm.xlu0 %19856, %v12697_v0   ;;  %v9952_v46 = vsel %vm9584_vm8, %v9942_v55, %v9951_v8  ;;  %v10002_v10 = vshll.u32 %v20235_v1, 16  ;;  %v9996_v0 = vor.u32 %v9995_v61, %v9992_v51 }
 0x34d   : > { %25310 = vst [vmem:[#allocation5_spill] sm:$0xff] %v22273_v32  ;;  %v9961_v17 = vsel %vm9584_vm8, %v9951_v8, %v9960_v4  ;;  %v9970_v55 = vsel %vm9584_vm8, %v9960_v4, %v9969_v42  ;;  %v20236_v8 = vld [vmem:[%s20493_s8 + $0x198] sm:$0xff]   ;;  %v20237_v4 = vld [vmem:[%s20493_s8 + $0x70] sm:$0xff]  }
 0x34e   : > { %v10011_v13 = vshll.u32 %v20236_v8, 16  ;;  %v10004_v48 = vrot.slane %v10002_v10, 3 }
 0x34f   : > { %17905 = vmatmul.mubr.msk.bf16.vlgmr.msra.gmra.mrb[0].mxu1 %vm1323_vm2, %v4375_v28  ;;  %v9975_v28 = vshll.u32 %v20228_v20, 16  ;;  %13194 = vperm.xlu1 %19857, %v12700_v40   ;;  %v4394_v20 = vrot.slane %v20237_v4, 1  ;;  %v20245_v4 = vld [vmem:[%s20493_s8 + $0x90] sm:$0xff]  }
 0x350   : > { %18731 = vmatpush3.bf16.msra.mxu1 %v25308_v23  ;;  %17908 = vmatprep.mubr.msk.bf16.mxu1 %vm1323_vm2, %v4377_v58  ;;  %v12699_v58 = vld [vmem:[%s25252_s4 + $0x2c0] sm:$0xff]  ;;  %v10013_v21 = vrot.slane %v10011_v13, 3 }
 0x351   : > { %v9977_v23 = vrot.slane %v9975_v28, 3  ;;  %13189 = vperm.xlu0 %19856, %v12699_v58   ;;  %v4395_v36 = vsel %vm2831_vm5, %v4392_v37, %v4394_v20 }
 0x352   : > { %18525 = vmatmul.mubr.msk.bf16.gmra.mrb[68].mxu0 %vm1323_vm2, %v9916_v59  ;;  %v22291_v59 = vpop.permute.xlu0 %12779 }
 0x353   : > { %18528 = vmatprep.mubr.msk.bf16.mxu0 %vm1323_vm2, %v9925_v27  ;;  %25312 = vst [vmem:[#allocation8_spill] sm:$0xff] %v22291_v59  ;;  %v20231_v27 = vld [vmem:[%s20493_s8 + $0x180] sm:$0xff]   ;;  %13204 = vperm.xlu1 %19857, %v12702_v38  }
 0x354   : > { %v9981_v35 = vshrl.u32 %v20231_v27, 16  ;;  %v9984_v34 = vshll.u32 %v20231_v27, 16  ;;  %v20239_v38 = vld [vmem:[%s20493_s8 + $0x1a0] sm:$0xff]   ;;  %v20240_v27 = vld [vmem:[%s20493_s8 + $0x1a8] sm:$0xff]  }
 0x355   : > { %13199 = vperm.xlu0 %19856, %v12701_v60   ;;  %v10017_v60 = vshrl.u32 %v20239_v38, 16 }
 0x356   : > { %v9983_v25 = vrot.slane %v9981_v35, 2  ;;  %v9986_v6 = vrot.slane %v9984_v34, 3  ;;  %v22317_v29 = vpop.permute.xlu0 %12789  ;;  %v10026_v35 = vshrl.u32 %v20240_v27, 16  ;;  %v10029_v34 = vshll.u32 %v20240_v27, 16 }
 0x357   : > { %17909 = vmatmul.mubr.msk.bf16.gmra.mrb[4].mxu1 %vm1323_vm2, %v4379_v30  ;;  %v9978_v30 = vor.u32 %v9977_v23, %v9974_v33  ;;  %25314 = vst [vmem:[#allocation9_spill] sm:$0xff] %v22317_v29  ;;  %v12709_v33 = vld [vmem:[%s25252_s4 + $0x310] sm:$0xff]  ;;  %v10019_v41 = vrot.slane %v10017_v60, 2 }
 0x358   : > { %17912 = vmatprep.mubr.msk.bf16.mxu1 %vm1323_vm2, %v4381_v22  ;;  %v12704_v22 = vld [vmem:[%s25252_s4 + $0x2e8] sm:$0xff]  ;;  %v10028_v37 = vrot.slane %v10026_v35, 2 }
 0x359   : > { %v9979_v47 = vsel %vm9584_vm8, %v9969_v42, %v9978_v30  ;;  %13214 = vperm.xlu1 %19857, %v12704_v22   ;;  %13209 = vperm.xlu0 %19856, %v12703_v14   ;;  %v10020_v42 = vshll.u32 %v20239_v38, 16  ;;  %v20241_v22 = vld [vmem:[%s20493_s8 + $0x80] sm:$0xff]  }
 0x35a   : > { %18529 = vmatmul.mubr.msk.bf16.gmra.mrb[72].mxu0 %vm1323_vm2, %v9934_v7  ;;  %v22315_v7 = vpop.permute.xlu1 %12794  ;;  %v22342_v28 = vpop.permute.xlu0 %12799  ;;  %v4398_v14 = vrot.slane %v20241_v22, 1  ;;  %v12720_v22 = vld [vmem:[%s25252_s4 + $0x368] sm:$0xff] }
 0x35b   : > { %18532 = vmatprep.mubr.msk.bf16.mxu0 %vm1323_vm2, %v9943_v63  ;;  %25313 = vst [vmem:[#allocation11_spill] sm:$0xff] %v22315_v7  ;;  %v9987_v63 = vor.u32 %v9986_v6, %v9983_v25  ;;  %25316 = vst [vmem:[#allocation12_spill] sm:$0xff] %v22342_v28  ;;  %v20242_v25 = vld [vmem:[%s20493_s8 + $0x88] sm:$0xff]  }
 0x35c   : > { %v4400_v6 = vrot.slane %v20242_v25, 1 }
 0x35d   : > { %13224 = vperm.xlu1 %19857, %v12706_v44   ;;  %13219 = vperm.xlu0 %19856, %v12705_v45   ;;  %v9988_v40 = vsel %vm9584_vm8, %v9978_v30, %v9987_v63  ;;  %v9997_v26 = vsel %vm9584_vm8, %v9987_v63, %v9996_v0  ;;  %v12714_v44 = vld [vmem:[%s25252_s4 + $0x338] sm:$0xff]  ;;  %v12713_v45 = vld [vmem:[%s25252_s4 + $0x330] sm:$0xff] }
 0x35e   : > { %v22340_v2 = vpop.permute.xlu1 %12804  ;;  %v22361_v15 = vpop.permute.xlu0 %12809 }
 0x35f   : > { %17913 = vmatmul.mubr.msk.bf16.gmra.mrb[8].mxu1 %vm1323_vm2, %v4383_v62  ;;  %v9999_v62 = vshrl.u32 %v20235_v1, 16  ;;  %25315 = vst [vmem:[#allocation10_spill] sm:$0xff] %v22340_v2  ;;  %25318 = vst [vmem:[#allocation13_spill] sm:$0xff] %v22361_v15  ;;  %v20243_v1 = vld [vmem:[%s20493_s8 + $0x1b0] sm:$0xff]   ;;  %v20334_v15 = vld [vmem:[%s20493_s8 + $0xf8] sm:$0xff]  }
 0x360   : > { %17916 = vmatprep.mubr.msk.bf16.mxu1 %vm1323_vm2, %v4385_v16  ;;  %v10008_v16 = vshrl.u32 %v20236_v8, 16  ;;  %v10038_v10 = vshll.u32 %v20243_v1, 16  ;;  %v20244_v8 = vld [vmem:[%s20493_s8 + $0x1b8] sm:$0xff]  }
 0x361   : > { %v10001_v58 = vrot.slane %v9999_v62, 2  ;;  %13234 = vperm.xlu1 %19857, %v12708_v39   ;;  %13229 = vperm.xlu0 %19856, %v12707_v43   ;;  %v10035_v62 = vshrl.u32 %v20243_v1, 16  ;;  %v10047_v13 = vshll.u32 %v20244_v8, 16  ;;  %v12716_v39 = vld [vmem:[%s25252_s4 + $0x348] sm:$0xff]  ;;  %v12715_v43 = vld [vmem:[%s25252_s4 + $0x340] sm:$0xff]  ;;  %v12722_v1 = vld [vmem:[%s25252_s4 + $0x378] sm:$0xff] }
 0x362   : > { %18533 = vmatmul.mubr.msk.bf16.gmra.mrb[76].mxu0 %vm1323_vm2, %v9952_v46  ;;  %v4396_v46 = vrot.slane %v20238_v11, 1  ;;  %v10010_v56 = vrot.slane %v10008_v16, 2  ;;  %v22359_v30 = vpop.permute.xlu1 %12814  ;;  %v10044_v16 = vshrl.u32 %v20244_v8, 16  ;;  %v20246_v11 = vld [vmem:[%s20493_s8 + $0x98] sm:$0xff]   ;;  %v20251_v8 = vld [vmem:[%s20493_s8 + $0x1d0] sm:$0xff]  }
 0x363   : > { %18536 = vmatprep.mubr.msk.bf16.mxu0 %vm1323_vm2, %v9961_v17  ;;  %v12710_v17 = vld [vmem:[%s25252_s4 + $0x318] sm:$0xff]  ;;  %v10005_v23 = vor.u32 %v10004_v48, %v10001_v58  ;;  %25317 = vst [vmem:[#allocation15_spill] sm:$0xff] %v22359_v30  ;;  %v10037_v58 = vrot.slane %v10035_v62, 2  ;;  %v10040_v48 = vrot.slane %v10038_v10, 3  ;;  %v12721_v62 = vld [vmem:[%s25252_s4 + $0x370] sm:$0xff] }
 0x364   : > { %v4399_v51 = vsel %vm2831_vm5, %v4396_v46, %v4398_v14 }
 0x365   : > { %13244 = vperm.xlu1 %19857, %v12710_v17   ;;  %13239 = vperm.xlu0 %19856, %v12709_v33   ;;  %v10006_v3 = vsel %vm9584_vm8, %v9996_v0, %v10005_v23  ;;  %v10041_v38 = vor.u32 %v10040_v48, %v10037_v58  ;;  %v12724_v48 = vld [vmem:[%s25252_s4 + $0x388] sm:$0xff] }
 0x366   : > { %v22377_v61 = vpop.permute.xlu1 %12824 }
 0x367   : > { %17917 = vmatmul.mubr.msk.bf16.gmra.mrb[12].mxu1 %vm1323_vm2, %v4387_v9  ;;  %v4397_v9 = vsel %vm2831_vm5, %v4394_v20, %v4396_v46  ;;  %25319 = vst [vmem:[#allocation14_spill] sm:$0xff] %v22377_v61  ;;  %v4402_v20 = vrot.slane %v20245_v4, 1  ;;  %v4404_v46 = vrot.slane %v20246_v11, 1  ;;  %v12723_v11 = vld [vmem:[%s25252_s4 + $0x380] sm:$0xff] }
 0x368   : > { %17920 = vmatprep.mubr.msk.bf16.mxu1 %vm1323_vm2, %v4389_v50  ;;  %v10014_v50 = vor.u32 %v10013_v21, %v10010_v56  ;;  %v10046_v56 = vrot.slane %v10044_v16, 2  ;;  %v10049_v21 = vrot.slane %v10047_v13, 3  ;;  %v10071_v16 = vshrl.u32 %v20251_v8, 16 }
 0x369   : > { %13254 = vperm.xlu1 %19857, %v12712_v18   ;;  %13249 = vperm.xlu0 %19856, %v12711_v53   ;;  %v4403_v33 = vsel %vm2831_vm5, %v4400_v6, %v4402_v20  ;;  %v4405_v60 = vsel %vm2831_vm5, %v4402_v20, %v4404_v46  ;;  %v10074_v13 = vshll.u32 %v20251_v8, 16 }
 0x36a   : > { %18537 = vmatmul.mubr.msk.bf16.gmra.mrb[80].mxu0 %vm1323_vm2, %v9970_v55  ;;  %v10022_v55 = vrot.slane %v10020_v42, 3  ;;  %v10015_v12 = vsel %vm9584_vm8, %v10005_v23, %v10014_v50  ;;  %v12718_v23 = vld [vmem:[%s25252_s4 + $0x358] sm:$0xff]  ;;  %v20247_v42 = vld [vmem:[%s20493_s8 + $0x1c0] sm:$0xff]   ;;  %v10050_v35 = vor.u32 %v10049_v21, %v10046_v56  ;;  %v10073_v21 = vrot.slane %v10071_v16, 2 }
 0x36b   : > { %18540 = vmatprep.mubr.msk.bf16.mxu0 %vm1323_vm2, %v9979_v47  ;;  %v10031_v47 = vrot.slane %v10029_v34, 3  ;;  %v10056_v27 = vshll.u32 %v20247_v42, 16  ;;  %v20248_v34 = vld [vmem:[%s20493_s8 + $0x1c8] sm:$0xff]  }
 0x36c   : > { %v10023_v63 = vor.u32 %v10022_v55, %v10019_v41  ;;  %v10062_v18 = vshrl.u32 %v20248_v34, 16  ;;  %v10065_v53 = vshll.u32 %v20248_v34, 16 }
 0x36d   : > { %v10032_v0 = vor.u32 %v10031_v47, %v10028_v37  ;;  %13264 = vperm.xlu1 %19857, %v12714_v44   ;;  %13259 = vperm.xlu0 %19856, %v12713_v45   ;;  %v10058_v37 = vrot.slane %v10056_v27, 3  ;;  %v20250_v47 = vld [vmem:[%s20493_s8 + $0xa8] sm:$0xff]   ;;  %v10051_v44 = vsel %vm9584_vm8, %v10041_v38, %v10050_v35 }
 0x36e   : > { %v10064_v45 = vrot.slane %v10062_v18, 2  ;;  %v12725_v18 = vld [vmem:[%s25252_s4 + $0x390] sm:$0xff] }
 0x36f   : > { %17921 = vmatmul.mubr.msk.bf16.gmra.mrb[16].mxu1 %vm1323_vm2, %v4391_v54  ;;  %v22379_v54 = vpop.permute.xlu0 %12819 }
 0x370   : > { %17924 = vmatprep.mubr.msk.bf16.mxu1 %vm1323_vm2, %v4393_v49  ;;  %25320 = vst [vmem:[#allocation16_spill] sm:$0xff] %v22379_v54  ;;  %v4401_v49 = vsel %vm2831_vm5, %v4398_v14, %v4400_v6  ;;  %v12719_v14 = vld [vmem:[%s25252_s4 + $0x360] sm:$0xff]  ;;  %v10042_v6 = vsel %vm9584_vm8, %v10032_v0, %v10041_v38  ;;  %v22920_v54 = vld [vmem:[%s20493_s8 + $0x208] sm:$0xff]  }
 0x371   : > { %13274 = vperm.xlu1 %19857, %v12716_v39   ;;  %13269 = vperm.xlu0 %19856, %v12715_v43   ;;  %v20252_v43 = vld [vmem:[%s20493_s8 + $0x1d8] sm:$0xff]  }
 0x372   : > { %18541 = vmatmul.mubr.msk.bf16.gmra.mrb[84].mxu0 %vm1323_vm2, %v9988_v40  ;;  %v10024_v40 = vsel %vm9584_vm8, %v10014_v50, %v10023_v63  ;;  %v10053_v50 = vshrl.u32 %v20247_v42, 16  ;;  %v10080_v4 = vshrl.u32 %v20252_v43, 16  ;;  %v10083_v20 = vshll.u32 %v20252_v43, 16 }
 0x373   : > { %18544 = vmatprep.mubr.msk.bf16.mxu0 %vm1323_vm2, %v9997_v26  ;;  %v10033_v26 = vsel %vm9584_vm8, %v10023_v63, %v10032_v0  ;;  %v22405_v17 = vpop.permute.xlu0 %12829  ;;  %v10067_v63 = vrot.slane %v10065_v53, 3 }
 0x374   : > { %25322 = vst [vmem:[#allocation3_spill] sm:$0xff] %v22405_v17  ;;  %v10085_v42 = vrot.slane %v10083_v20, 3  ;;  %v12729_v20 = vld [vmem:[%s25252_s4 + $0x3b0] sm:$0xff]  ;;  %v22894_v17 = vld [vmem:[%s20493_s8 + $0x1f8] sm:$0xff]  }
 0x375   : > { %13284 = vperm.xlu1 %19857, %v12718_v23   ;;  %v10068_v39 = vor.u32 %v10067_v63, %v10064_v45  ;;  %v20254_v23 = vld [vmem:[%s20493_s8 + $0xb8] sm:$0xff]   ;;  %v20257_v45 = vld [vmem:[%s20493_s8 + $0xc0] sm:$0xff]  }
 0x376   : > { %v4414_v63 = vrot.slane %v20257_v45, 1  ;;  %v12732_v45 = vld [vmem:[%s25252_s4 + $0x3c8] sm:$0xff] }
 0x377   : > { %17925 = vmatmul.mubr.msk.bf16.gmra.mrb[20].mxu1 %vm1323_vm2, %v4395_v36  ;;  %v22403_v36 = vpop.permute.xlu1 %12834  ;;  %v22430_v25 = vpop.permute.xlu0 %12839 }
 0x378   : > { %17928 = vmatprep.mubr.msk.bf16.mxu1 %vm1323_vm2, %v4397_v9  ;;  %25321 = vst [vmem:[#allocation17_spill] sm:$0xff] %v22403_v36  ;;  %v12717_v9 = vld [vmem:[%s25252_s4 + $0x350] sm:$0xff]  ;;  %25324 = vst [vmem:[#allocation18_spill] sm:$0xff] %v22430_v25  ;;  %v20330_v36 = vld [vmem:[%s20493_s8 + $0xe8] sm:$0xff]  }
 0x379   : > { %13279 = vperm.xlu0 %19856, %v12717_v9   ;;  %13294 = vperm.xlu1 %19857, %v12720_v22   ;;  %v4412_v9 = vrot.slane %v20254_v23, 1  ;;  %v20260_v23 = vld [vmem:[%s20493_s8 + $0x1f8] sm:$0xff]  }
 0x37a   : > { %18545 = vmatmul.mubr.msk.bf16.gmra.mrb[88].mxu0 %vm1323_vm2, %v10006_v3  ;;  %v20249_v3 = vld [vmem:[%s20493_s8 + $0xa0] sm:$0xff]  }
 0x37b   : > { %18548 = vmatprep.mubr.msk.bf16.mxu0 %vm1323_vm2, %v10015_v12  ;;  %v4406_v41 = vrot.slane %v20249_v3, 1  ;;  %v22428_v55 = vpop.permute.xlu1 %12844  ;;  %v10055_v12 = vrot.slane %v10053_v50, 2  ;;  %v22449_v58 = vpop.permute.xlu0 %12849 }
 0x37c   : > { %25323 = vst [vmem:[#allocation2_spill] sm:$0xff] %v22428_v55  ;;  %25326 = vst [vmem:[#allocation20_spill] sm:$0xff] %v22449_v58  ;;  %v11181_v55 = vrot.slane %v20330_v36, 3 }
 0x37d   : > { %13289 = vperm.xlu0 %19856, %v12719_v14   ;;  %v10059_v10 = vor.u32 %v10058_v37, %v10055_v12  ;;  %13304 = vperm.xlu1 %19857, %v12722_v1   ;;  %v20255_v14 = vld [vmem:[%s20493_s8 + $0x1e0] sm:$0xff]   ;;  %v20256_v12 = vld [vmem:[%s20493_s8 + $0x1e8] sm:$0xff]  }
 0x37e   : > { %v10089_v3 = vshrl.u32 %v20255_v14, 16  ;;  %v10098_v37 = vshrl.u32 %v20256_v12, 16 }
 0x37f   : > { %17929 = vmatmul.mubr.msk.bf16.gmra.mrb[24].mxu1 %vm1323_vm2, %v4399_v51  ;;  %v4408_v51 = vrot.slane %v20250_v47, 1  ;;  %v10060_v56 = vsel %vm9584_vm8, %v10050_v35, %v10059_v10  ;;  %v10069_v38 = vsel %vm9584_vm8, %v10059_v10, %v10068_v39  ;;  %v22467_v34 = vpop.permute.xlu0 %12859  ;;  %v12746_v35 = vld [vmem:[%s25252_s4 + $0x438] sm:$0xff]  ;;  %v10101_v47 = vshll.u32 %v20256_v12, 16  ;;  %v20258_v10 = vld [vmem:[%s20493_s8 + $0xc8] sm:$0xff]  }
 0x380   : > { %17932 = vmatprep.mubr.msk.bf16.mxu1 %vm1323_vm2, %v4401_v49  ;;  %v4407_v49 = vsel %vm2831_vm5, %v4404_v46, %v4406_v41  ;;  %v20253_v46 = vld [vmem:[%s20493_s8 + $0xb0] sm:$0xff]   ;;  %25328 = vst [vmem:[#allocation22_spill] sm:$0xff] %v22467_v34  ;;  %v10091_v1 = vrot.slane %v10089_v3, 2  ;;  %v10100_v16 = vrot.slane %v10098_v37, 2 }
 0x381   : > { %v4409_v0 = vsel %vm2831_vm5, %v4406_v41, %v4408_v51  ;;  %13299 = vperm.xlu0 %19856, %v12721_v62   ;;  %13314 = vperm.xlu1 %19857, %v12724_v48   ;;  %v10092_v41 = vshll.u32 %v20255_v14, 16  ;;  %v12728_v48 = vld [vmem:[%s25252_s4 + $0x3a8] sm:$0xff] }
 0x382   : > { %18549 = vmatmul.mubr.msk.bf16.gmra.mrb[92].mxu0 %vm1323_vm2, %v10024_v40  ;;  %v22447_v40 = vpop.permute.xlu1 %12854 }
 0x383   : > { %18552 = vmatprep.mubr.msk.bf16.mxu0 %vm1323_vm2, %v10033_v26  ;;  %25325 = vst [vmem:[#allocation19_spill] sm:$0xff] %v22447_v40  ;;  %v4410_v26 = vrot.slane %v20253_v46, 1  ;;  %v10094_v62 = vrot.slane %v10092_v41, 3  ;;  %v20262_v41 = vld [vmem:[%s20493_s8 + $0xd8] sm:$0xff]   ;;  %v22868_v40 = vld [vmem:[%s20493_s8 + $0x1e8] sm:$0xff]  }
 0x384   : > { %v4420_v12 = vrot.slane %v20262_v41, 1 }
 0x385   : > { %13309 = vperm.xlu0 %19856, %v12723_v11   ;;  %v4411_v50 = vsel %vm2831_vm5, %v4408_v51, %v4410_v26  ;;  %v4413_v22 = vsel %vm2831_vm5, %v4410_v26, %v4412_v9  ;;  %13424 = vperm.xlu1 %19857, %v12746_v35   ;;  %v12727_v51 = vld [vmem:[%s25252_s4 + $0x3a0] sm:$0xff]  ;;  %v10095_v11 = vor.u32 %v10094_v62, %v10091_v1  ;;  %v20259_v26 = vld [vmem:[%s20493_s8 + $0x1f0] sm:$0xff]  }
 0x386   : > { %v22465_v27 = vpop.permute.xlu1 %12864  ;;  %v20263_v1 = vld [vmem:[%s20493_s8 + $0x200] sm:$0xff]  }
 0x387   : > { %17933 = vmatmul.mubr.msk.bf16.gmra.mrb[28].mxu1 %vm1323_vm2, %v4403_v33  ;;  %v10076_v33 = vrot.slane %v10074_v13, 3  ;;  %25327 = vst [vmem:[#allocation21_spill] sm:$0xff] %v22465_v27  ;;  %v10103_v13 = vrot.slane %v10101_v47, 3  ;;  %v10125_v62 = vshrl.u32 %v20263_v1, 16 }
 0x388   : > { %17936 = vmatprep.mubr.msk.bf16.mxu1 %vm1323_vm2, %v4405_v60  ;;  %v10082_v60 = vrot.slane %v10080_v4, 2  ;;  %v22493_v4 = vpop.permute.xlu0 %12869 }
 0x389   : > { %v10077_v53 = vor.u32 %v10076_v33, %v10073_v21  ;;  %13319 = vperm.xlu0 %19856, %v12725_v18   ;;  %25330 = vst [vmem:[#allocation24_spill] sm:$0xff] %v22493_v4  ;;  %13329 = vperm.xlu1 %19857, %v12727_v51   ;;  %v10110_v21 = vshll.u32 %v20259_v26, 16  ;;  %v10104_v33 = vor.u32 %v10103_v13, %v10100_v16  ;;  %v20264_v16 = vld [vmem:[%s20493_s8 + $0x208] sm:$0xff]   ;;  %v20326_v4 = vld [vmem:[%s20493_s8 + $0xd8] sm:$0xff]  }
 0x38a   : > { %18553 = vmatmul.mubr.msk.bf16.gmra.mrb[96].mxu0 %vm1323_vm2, %v10042_v6  ;;  %v10086_v6 = vor.u32 %v10085_v42, %v10082_v60  ;;  %v22491_v43 = vpop.permute.xlu1 %12874  ;;  %v12731_v60 = vld [vmem:[%s25252_s4 + $0x3c0] sm:$0xff]  ;;  %v12730_v42 = vld [vmem:[%s25252_s4 + $0x3b8] sm:$0xff]  ;;  %v10137_v13 = vshll.u32 %v20264_v16, 16 }
 0x38b   : > { %18556 = vmatprep.mubr.msk.bf16.mxu0 %vm1323_vm2, %v10051_v44  ;;  %v12726_v44 = vld [vmem:[%s25252_s4 + $0x398] sm:$0xff]  ;;  %25329 = vst [vmem:[#allocation23_spill] sm:$0xff] %v22491_v43  ;;  %v10112_v3 = vrot.slane %v10110_v21, 3  ;;  %v10105_v37 = vsel %vm9584_vm8, %v10095_v11, %v10104_v33  ;;  %v10127_v21 = vrot.slane %v10125_v62, 2  ;;  %v20269_v62 = vld [vmem:[%s20493_s8 + $0xf0] sm:$0xff]  }
 0x38c   : > { %v10087_v8 = vsel %vm9584_vm8, %v10077_v53, %v10086_v6 }
 0x38d   : > { %13324 = vperm.xlu0 %19856, %v12726_v44   ;;  %13339 = vperm.xlu1 %19857, %v12729_v20  }
 0x38e   : > { %v22516_v18 = vpop.permute.xlu1 %12884 }
 0x38f   : > { %17937 = vmatmul.mubr.msk.bf16.gmra.mrb[32].mxu1 %vm1323_vm2, %v4407_v49  ;;  %v10078_v49 = vsel %vm9584_vm8, %v10068_v39, %v10077_v53  ;;  %v4415_v39 = vsel %vm2831_vm5, %v4412_v9, %v4414_v63  ;;  %v10116_v9 = vshrl.u32 %v20260_v23, 16  ;;  %25331 = vst [vmem:[#allocation25_spill] sm:$0xff] %v22516_v18  ;;  %v22518_v53 = vpop.permute.xlu0 %12879 }
 0x390   : > { %17940 = vmatprep.mubr.msk.bf16.mxu1 %vm1323_vm2, %v4409_v0  ;;  %v4416_v0 = vrot.slane %v20258_v10, 1  ;;  %25332 = vst [vmem:[#allocation26_spill] sm:$0xff] %v22518_v53  ;;  %v10128_v10 = vshll.u32 %v20263_v1, 16  ;;  %v12738_v1 = vld [vmem:[%s25252_s4 + $0x3f8] sm:$0xff]  ;;  %v11177_v53 = vrot.slane %v20326_v4, 3 }
 0x391   : > { %13334 = vperm.xlu0 %19856, %v12728_v48   ;;  %v10118_v47 = vrot.slane %v10116_v9, 2  ;;  %13349 = vperm.xlu1 %19857, %v12731_v60   ;;  %v12735_v48 = vld [vmem:[%s25252_s4 + $0x3e0] sm:$0xff]  ;;  %v20266_v9 = vld [vmem:[%s20493_s8 + $0xe8] sm:$0xff]  }
 0x392   : > { %18557 = vmatmul.mubr.msk.bf16.gmra.mrb[100].mxu0 %vm1323_vm2, %v10060_v56  ;;  %v4417_v46 = vsel %vm2831_vm5, %v4414_v63, %v4416_v0  ;;  %v10107_v56 = vshrl.u32 %v20259_v26, 16 }
 0x393   : > { %18560 = vmatprep.mubr.msk.bf16.mxu0 %vm1323_vm2, %v10069_v38  ;;  %v10119_v38 = vshll.u32 %v20260_v23, 16  ;;  %v22537_v20 = vpop.permute.xlu0 %12889  ;;  %v10130_v23 = vrot.slane %v10128_v10, 3  ;;  %v4426_v10 = vrot.slane %v20269_v62, 1 }
 0x394   : > { %v10109_v14 = vrot.slane %v10107_v56, 2  ;;  %25334 = vst [vmem:[#allocation28_spill] sm:$0xff] %v22537_v20 }
 0x395   : > { %v10121_v51 = vrot.slane %v10119_v38, 3  ;;  %13344 = vperm.xlu0 %19856, %v12730_v42   ;;  %v4424_v38 = vrot.slane %v20266_v9, 1  ;;  %v10131_v41 = vor.u32 %v10130_v23, %v10127_v21  ;;  %v12741_v9 = vld [vmem:[%s25252_s4 + $0x410] sm:$0xff] }
 0x396   : > { %v10113_v63 = vor.u32 %v10112_v3, %v10109_v14  ;;  %v12736_v3 = vld [vmem:[%s25252_s4 + $0x3e8] sm:$0xff] }
 0x397   : > { %17941 = vmatmul.mubr.msk.bf16.gmra.mrb[36].mxu1 %vm1323_vm2, %v4411_v50  ;;  %v20261_v50 = vld [vmem:[%s20493_s8 + $0xd0] sm:$0xff]   ;;  %v22555_v14 = vpop.permute.xlu0 %12899 }
 0x398   : > { %17944 = vmatprep.mubr.msk.bf16.mxu1 %vm1323_vm2, %v4413_v22  ;;  %v4418_v35 = vrot.slane %v20261_v50, 1  ;;  %v10096_v22 = vsel %vm9584_vm8, %v10086_v6, %v10095_v11  ;;  %v12733_v6 = vld [vmem:[%s25252_s4 + $0x3d0] sm:$0xff]  ;;  %v12734_v11 = vld [vmem:[%s25252_s4 + $0x3d8] sm:$0xff]  ;;  %v10114_v56 = vsel %vm9584_vm8, %v10104_v33, %v10113_v63  ;;  %v10139_v50 = vrot.slane %v10137_v13, 3  ;;  %25336 = vst [vmem:[#allocation30_spill] sm:$0xff] %v22555_v14 }
 0x399   : > { %13359 = vperm.xlu1 %19857, %v12733_v6   ;;  %13354 = vperm.xlu0 %19856, %v12732_v45   ;;  %v12737_v33 = vld [vmem:[%s25252_s4 + $0x3f0] sm:$0xff]  ;;  %v20268_v6 = vld [vmem:[%s20493_s8 + $0x218] sm:$0xff]  }
 0x39a   : > { %18561 = vmatmul.mubr.msk.bf16.gmra.mrb[104].mxu0 %vm1323_vm2, %v10078_v49  ;;  %v4419_v44 = vsel %vm2831_vm5, %v4416_v0, %v4418_v35  ;;  %v4421_v49 = vsel %vm2831_vm5, %v4418_v35, %v4420_v12  ;;  %v10134_v0 = vshrl.u32 %v20264_v16, 16  ;;  %v10152_v45 = vshrl.u32 %v20268_v6, 16 }
 0x39b   : > { %18564 = vmatprep.mubr.msk.bf16.mxu0 %vm1323_vm2, %v10087_v8  ;;  %v10122_v8 = vor.u32 %v10121_v51, %v10118_v47  ;;  %v20267_v47 = vld [vmem:[%s20493_s8 + $0x210] sm:$0xff]   ;;  %v22581_v23 = vpop.permute.xlu0 %12909 }
 0x39c   : > { %v10136_v42 = vrot.slane %v10134_v0, 2  ;;  %v10146_v51 = vshll.u32 %v20267_v47, 16  ;;  %25338 = vst [vmem:[#allocation32_spill] sm:$0xff] %v22581_v23  ;;  %v22801_v23 = vld [vmem:[%s20493_s8 + $0x1b0] sm:$0xff]  }
 0x39d   : > { %v10123_v60 = vsel %vm9584_vm8, %v10113_v63, %v10122_v8  ;;  %13369 = vperm.xlu1 %19857, %v12735_v48   ;;  %13364 = vperm.xlu0 %19856, %v12734_v11   ;;  %v10155_v63 = vshll.u32 %v20268_v6, 16  ;;  %v10132_v16 = vsel %vm9584_vm8, %v10122_v8, %v10131_v41  ;;  %v20270_v48 = vld [vmem:[%s20493_s8 + $0xf8] sm:$0xff]   ;;  %v4427_v8 = vsel %vm2831_vm5, %v4424_v38, %v4426_v10  ;;  %v20273_v6 = vld [vmem:[%s20493_s8 + $0x100] sm:$0xff]  }
 0x39e   : > { %v10148_v13 = vrot.slane %v10146_v51, 3  ;;  %v4428_v11 = vrot.slane %v20270_v48, 1  ;;  %v12742_v51 = vld [vmem:[%s25252_s4 + $0x418] sm:$0xff] }
 0x39f   : > { %17945 = vmatmul.mubr.msk.bf16.gmra.mrb[40].mxu1 %vm1323_vm2, %v4415_v39  ;;  %v22535_v39 = vpop.permute.xlu1 %12894 }
 0x3a0   : > { %17948 = vmatprep.mubr.msk.bf16.mxu1 %vm1323_vm2, %v4417_v46  ;;  %25333 = vst [vmem:[#allocation27_spill] sm:$0xff] %v22535_v39  ;;  %v20265_v46 = vld [vmem:[%s20493_s8 + $0xe0] sm:$0xff]  }
 0x3a1   : > { %v4422_v26 = vrot.slane %v20265_v46, 1  ;;  %13379 = vperm.xlu1 %19857, %v12737_v33   ;;  %13374 = vperm.xlu0 %19856, %v12736_v3   ;;  %v22819_v39 = vld [vmem:[%s20493_s8 + $0x1c0] sm:$0xff]  }
 0x3a2   : > { %18565 = vmatmul.mubr.msk.bf16.gmra.mrb[108].mxu0 %vm1323_vm2, %v10096_v22 }
 0x3a3   : > { %18568 = vmatprep.mubr.msk.bf16.mxu0 %vm1323_vm2, %v10105_v37  ;;  %v4423_v35 = vsel %vm2831_vm5, %v4420_v12, %v4422_v26  ;;  %v22553_v22 = vpop.permute.xlu1 %12904  ;;  %v4425_v37 = vsel %vm2831_vm5, %v4422_v26, %v4424_v38  ;;  %v10143_v12 = vshrl.u32 %v20267_v47, 16  ;;  %v10154_v26 = vrot.slane %v10152_v45, 2 }
 0x3a4   : > { %25335 = vst [vmem:[#allocation29_spill] sm:$0xff] %v22553_v22  ;;  %v4430_v45 = vrot.slane %v20273_v6, 1  ;;  %v20322_v22 = vld [vmem:[%s20493_s8 + $0xc8] sm:$0xff]  }
 0x3a5   : > { %v10145_v0 = vrot.slane %v10143_v12, 2  ;;  %13384 = vperm.xlu0 %19856, %v12738_v1   ;;  %v12743_v12 = vld [vmem:[%s25252_s4 + $0x420] sm:$0xff]  ;;  %v11173_v20 = vrot.slane %v20322_v22, 3 }
 0x3a7   : > { %17949 = vmatmul.mubr.msk.bf16.gmra.mrb[44].mxu1 %vm1323_vm2, %v4419_v44  ;;  %v10140_v44 = vor.u32 %v10139_v50, %v10136_v42  ;;  %v22579_v21 = vpop.permute.xlu1 %12914  ;;  %v10149_v42 = vor.u32 %v10148_v13, %v10145_v0  ;;  %v4429_v50 = vsel %vm2831_vm5, %v4426_v10, %v4428_v11 }
 0x3a8   : > { %17952 = vmatprep.mubr.msk.bf16.mxu1 %vm1323_vm2, %v4421_v49  ;;  %v12739_v49 = vld [vmem:[%s25252_s4 + $0x400] sm:$0xff]  ;;  %25337 = vst [vmem:[#allocation31_spill] sm:$0xff] %v22579_v21 }
 0x3a9   : > { %v10141_v46 = vsel %vm9584_vm8, %v10131_v41, %v10140_v44  ;;  %13389 = vperm.xlu1 %19857, %v12739_v49   ;;  %v22606_v49 = vpop.permute.xlu0 %12919  ;;  %v10150_v1 = vsel %vm9584_vm8, %v10140_v44, %v10149_v42  ;;  %v12745_v44 = vld [vmem:[%s25252_s4 + $0x430] sm:$0xff]  ;;  %v22783_v21 = vld [vmem:[%s20493_s8 + $0x1a0] sm:$0xff]  }
 0x3aa   : > { %18569 = vmatmul.mubr.msk.bf16.gmra.mrb[112].mxu0 %vm1323_vm2, %v10114_v56  ;;  %v10157_v56 = vrot.slane %v10155_v63, 3  ;;  %25340 = vst [vmem:[#allocation34_spill] sm:$0xff] %v22606_v49  ;;  %v20318_v49 = vld [vmem:[%s20493_s8 + $0xb8] sm:$0xff]  }
 0x3ab   : > { %18572 = vmatprep.mubr.msk.bf16.mxu0 %vm1323_vm2, %v10123_v60  ;;  %v12740_v60 = vld [vmem:[%s25252_s4 + $0x408] sm:$0xff]  ;;  %v22604_v63 = vpop.permute.xlu1 %12924 }
 0x3ac   : > { %v10158_v41 = vor.u32 %v10157_v56, %v10154_v26  ;;  %13394 = vperm.xlu0 %19856, %v12740_v60   ;;  %25339 = vst [vmem:[#allocation33_spill] sm:$0xff] %v22604_v63  ;;  %v4431_v26 = vsel %vm2831_vm5, %v4428_v11, %v4430_v45  ;;  %v12744_v56 = vld [vmem:[%s25252_s4 + $0x428] sm:$0xff]  ;;  %v20275_v60 = vld [vmem:[%s20493_s8 + $0x230] sm:$0xff]   ;;  %v20276_v11 = vld [vmem:[%s20493_s8 + $0x238] sm:$0xff]  }
 0x3ad   : > { %13399 = vperm.xlu1 %19857, %v12741_v9   ;;  %v20314_v63 = vld [vmem:[%s20493_s8 + $0xa8] sm:$0xff]  }
 0x3ae   : > { %v10159_v13 = vsel %vm9584_vm8, %v10149_v42, %v10158_v41  ;;  %v10179_v42 = vshrl.u32 %v20275_v60, 16 }
 0x3af   : > { %17953 = vmatmul.mubr.msk.bf16.gmra.mrb[48].mxu1 %vm1323_vm2, %v4423_v35  ;;  %v20271_v35 = vld [vmem:[%s20493_s8 + $0x220] sm:$0xff]  }
 0x3b0   : > { %17956 = vmatprep.mubr.msk.bf16.mxu1 %vm1323_vm2, %v4425_v37  ;;  %v10161_v33 = vshrl.u32 %v20271_v35, 16  ;;  %v10164_v3 = vshll.u32 %v20271_v35, 16  ;;  %v20272_v37 = vld [vmem:[%s20493_s8 + $0x228] sm:$0xff]   ;;  %13404 = vperm.xlu0 %19856, %v12742_v51   ;;  %v10181_v6 = vrot.slane %v10179_v42, 2 }
 0x3b1   : > { %v10170_v38 = vshrl.u32 %v20272_v37, 16  ;;  %v10173_v47 = vshll.u32 %v20272_v37, 16  ;;  %13409 = vperm.xlu1 %19857, %v12743_v12   ;;  %v22623_v37 = vpop.permute.xlu1 %12934 }
 0x3b2   : > { %18573 = vmatmul.mubr.msk.bf16.gmra.mrb[116].mxu0 %vm1323_vm2, %v10132_v16  ;;  %v10163_v62 = vrot.slane %v10161_v33, 2  ;;  %v10166_v10 = vrot.slane %v10164_v3, 3  ;;  %v20274_v16 = vld [vmem:[%s20493_s8 + $0x108] sm:$0xff]   ;;  %v10188_v33 = vshrl.u32 %v20276_v11, 16  ;;  %v10191_v3 = vshll.u32 %v20276_v11, 16  ;;  %25341 = vst [vmem:[#allocation35_spill] sm:$0xff] %v22623_v37 }
 0x3b3   : > { %18576 = vmatprep.mubr.msk.bf16.mxu0 %vm1323_vm2, %v10141_v46  ;;  %v4432_v0 = vrot.slane %v20274_v16, 1  ;;  %v10172_v48 = vrot.slane %v10170_v38, 2  ;;  %v10175_v46 = vrot.slane %v10173_v47, 3  ;;  %v22625_v38 = vpop.permute.xlu0 %12929  ;;  %v20277_v47 = vld [vmem:[%s20493_s8 + $0x110] sm:$0xff]  }
 0x3b4   : > { %25342 = vst [vmem:[#allocation36_spill] sm:$0xff] %v22625_v38  ;;  %13414 = vperm.xlu0 %19856, %v12744_v56   ;;  %v4434_v12 = vrot.slane %v20277_v47, 1  ;;  %v22765_v37 = vld [vmem:[%s20493_s8 + $0x190] sm:$0xff]   ;;  %v20310_v38 = vld [vmem:[%s20493_s8 + $0x98] sm:$0xff]  }
 0x3b5   : > { %v4433_v9 = vsel %vm2831_vm5, %v4430_v45, %v4432_v0  ;;  %v10176_v35 = vor.u32 %v10175_v46, %v10172_v48  ;;  %13419 = vperm.xlu1 %19857, %v12745_v44   ;;  %v10193_v48 = vrot.slane %v10191_v3, 3 }
 0x3b6   : > { %v4435_v46 = vsel %vm2831_vm5, %v4432_v0, %v4434_v12 }
 0x3b7   : > { %17957 = vmatmul.mubr.msk.bf16.gmra.mrb[52].mxu1 %vm1323_vm2, %v4427_v8  ;;  %v10167_v8 = vor.u32 %v10166_v10, %v10163_v62  ;;  %v20067_v10 = vld [vmem:[%s20493_s8 + $0x240] ss:$0 sps:$4 sm:$0x77]  }
 0x3b8   : > { %17960 = vmatprep.mubr.msk.bf16.mxu1 %vm1323_vm2, %v4429_v50  ;;  %v10182_v50 = vshll.u32 %v20275_v60, 16  ;;  %v10197_v44 = vshrl.u32 %v20067_v10, 16  ;;  %v10200_v56 = vshll.u32 %v20067_v10, 16  ;;  %v11125_v60 = vld [vmem:[%s20493_s8 + $0x20] sm:$0x8]  ;;  %v20282_v10 = vld [vmem:[%s20493_s8 + $0x28] sm:$0xff]  }
 0x3b9   : > { %v10168_v51 = vsel %vm9584_vm8, %v10158_v41, %v10167_v8  ;;  %v10177_v16 = vsel %vm9584_vm8, %v10167_v8, %v10176_v35  ;;  %v20279_v8 = vld [vmem:[%s20493_s8 + $0x120] sm:$0xff]  }
 0x3ba   : > { %18577 = vmatmul.mubr.msk.bf16.gmra.mrb[120].mxu0 %vm1323_vm2, %v10150_v1  ;;  %v10184_v45 = vrot.slane %v10182_v50, 3  ;;  %v20278_v1 = vld [vmem:[%s20493_s8 + $0x118] sm:$0xff]   ;;  %v4438_v42 = vrot.slane %v20279_v8, 1  ;;  %v10199_v0 = vrot.slane %v10197_v44, 2  ;;  %v10202_v11 = vrot.slane %v10200_v56, 3  ;;  %v20285_v56 = vld [vmem:[%s20493_s8 + $0x30] sm:$0xff]  }
 0x3bb   : > { %18580 = vmatprep.mubr.msk.bf16.mxu0 %vm1323_vm2, %v10159_v13  ;;  %v4436_v62 = vrot.slane %v20278_v1, 1  ;;  %v10190_v13 = vrot.slane %v10188_v33, 2  ;;  %v22644_v33 = vld [vmem:[%s20493_s8 + $0x128] sm:$0xff]  }
 0x3bc   : > { %v4440_v3 = vrot.slane %v22644_v33, 1 }
 0x3bd   : > { %v4437_v41 = vsel %vm2831_vm5, %v4434_v12, %v4436_v62  ;;  %v20281_v12 = vld [vmem:[%s20493_s8 + $0x24] sm:$0xf] }
 0x3bf   : > { %17961 = vmatmul.mubr.msk.bf16.gmra.mrb[56].mxu1 %vm1323_vm2, %v4431_v26  ;;  %v10185_v26 = vor.u32 %v10184_v45, %v10181_v6  ;;  %v4439_v6 = vsel %vm2831_vm5, %v4436_v62, %v4438_v42  ;;  %v10203_v45 = vor.u32 %v10202_v11, %v10199_v0 }
 0x3c0   : > { %17964 = vmatprep.mubr.msk.bf16.mxu1 %vm1323_vm2, %v4433_v9  ;;  %v10194_v9 = vor.u32 %v10193_v48, %v10190_v13  ;;  %v22657_v13 = vld [vmem:[%s20493_s8 + $0x130] sm:$0xff]  }
 0x3c1   : > { %v10186_v50 = vsel %vm9584_vm8, %v10176_v35, %v10185_v26  ;;  %v4441_v35 = vsel %vm2831_vm5, %v4438_v42, %v4440_v3  ;;  %v4442_v62 = vrot.slane %v22657_v13, 1  ;;  %v20286_v42 = vld [vmem:[%s20493_s8 + $0x38] sm:$0xff]  }
 0x3c2   : > { %18581 = vmatmul.mubr.msk.bf16.gmra.mrb[124].mxu0 %vm1323_vm2, %v10168_v51  ;;  %v10195_v47 = vsel %vm9584_vm8, %v10185_v26, %v10194_v9  ;;  %v16522_v51 = vcombine.low %v11125_v60, %v20281_v12  ;;  %v10204_v48 = vsel %vm9584_vm8, %v10194_v9, %v10203_v45  ;;  %v11135_v60 = vrot.slane %v20285_v56, 3 }
 0x3c3   : > { %18584 = vmatprep.mubr.msk.bf16.mxu0 %vm1323_vm2, %v10177_v16  ;;  %v11133_v16 = vrot.slane %v20282_v10, 3  ;;  %v4443_v44 = vsel %vm2831_vm5, %v4440_v3, %v4442_v62  ;;  %v11137_v9 = vrot.slane %v20286_v42, 3  ;;  %v22680_v3 = vld [vmem:[%s20493_s8 + $0x148] sm:$0xff]  }
 0x3c4   : > { %v11132_v1 = vrot.slane %v16522_v51, 3 }
 0x3c5   : > { %v11136_v11 = vsel %vm11131_vm9, %v11133_v16, %v11135_v60  ;;  %v11138_v12 = vsel %vm11131_vm9, %v11135_v60, %v11137_v9  ;;  %v20293_v60 = vld [vmem:[%s20493_s8 + $0x50] sm:$0xff]  }
 0x3c7   : > { %17965 = vmatmul.mubr.msk.bf16.gmra.mrb[60].mxu1 %vm1323_vm2, %v4435_v46  ;;  %v22662_v46 = vld [vmem:[%s20493_s8 + $0x138] sm:$0xff]  }
 0x3c8   : > { %17968 = vmatprep.mubr.msk.bf16.mxu1 %vm1323_vm2, %v4437_v41  ;;  %v4444_v26 = vrot.slane %v22662_v46, 1  ;;  %v11134_v41 = vsel %vm11131_vm9, %v11132_v1, %v11133_v16  ;;  %v20290_v1 = vld [vmem:[%s20493_s8 + $0x48] sm:$0xff]   ;;  %v22693_v16 = vld [vmem:[%s20493_s8 + $0x150] sm:$0xff]  }
 0x3c9   : > { %v11141_v10 = vrot.slane %v20290_v1, 3  ;;  %v20297_v1 = vld [vmem:[%s20493_s8 + $0x60] sm:$0xff]  }
 0x3ca   : > { %18585 = vmatmul.mubr.msk.bf16.gmra.mrb[128].mxu0 %vm1323_vm2, %v10186_v50  ;;  %v4445_v8 = vsel %vm2831_vm5, %v4442_v62, %v4444_v26  ;;  %v22675_v50 = vld [vmem:[%s20493_s8 + $0x140] sm:$0xff]   ;;  %v4450_v62 = vrot.slane %v22693_v16, 1 }
 0x3cb   : > { %18588 = vmatprep.mubr.msk.bf16.mxu0 %vm1323_vm2, %v10195_v47  ;;  %v4446_v0 = vrot.slane %v22675_v50, 1  ;;  %v4448_v47 = vrot.slane %v22680_v3, 1 }
 0x3cd   : > { %v4447_v51 = vsel %vm2831_vm5, %v4444_v26, %v4446_v0  ;;  %v22698_v26 = vld [vmem:[%s20493_s8 + $0x158] sm:$0xff]   ;;  %v4451_v56 = vsel %vm2831_vm5, %v4448_v47, %v4450_v62 }
 0x3cf   : > { %17969 = vmatmul.mubr.msk.bf16.gmra.mrb[64].mxu1 %vm1323_vm2, %v4439_v6  ;;  %v20289_v6 = vld [vmem:[%s20493_s8 + $0x40] sm:$0xff]  }
 0x3d0   : > { %17972 = vmatprep.mubr.msk.bf16.mxu1 %vm1323_vm2, %v4441_v35  ;;  %v11139_v45 = vrot.slane %v20289_v6, 3  ;;  %v4449_v35 = vsel %vm2831_vm5, %v4446_v0, %v4448_v47  ;;  %v20294_v0 = vld [vmem:[%s20493_s8 + $0x58] sm:$0xff]  }
 0x3d2   : > { %18589 = vmatmul.mubr.msk.bf16.gmra.mrb[132].mxu0 %vm1323_vm2, %v10204_v48  ;;  %v11140_v48 = vsel %vm11131_vm9, %v11137_v9, %v11139_v45  ;;  %v11145_v9 = vrot.slane %v20294_v0, 3 }
 0x3d3   : > { %18594 = vmatprep.mubr.msk.bf16.mxu0 %vm1323_vm2, %v11134_v41  ;;  %v4452_v41 = vrot.slane %v22698_v26, 1 }
 0x3d5   : > { %v4453_v42 = vsel %vm2831_vm5, %v4450_v62, %v4452_v41  ;;  %v11147_v62 = vrot.slane %v20297_v1, 3  ;;  %v20302_v1 = vld [vmem:[%s20493_s8 + $0x78] sm:$0xff]  }
 0x3d7   : > { %17973 = vmatmul.mubr.msk.bf16.gmra.mrb[68].mxu1 %vm1323_vm2, %v4443_v44  ;;  %v11142_v44 = vsel %vm11131_vm9, %v11139_v45, %v11141_v10 }
 0x3d8   : > { %17976 = vmatprep.mubr.msk.bf16.mxu1 %vm1323_vm2, %v4445_v8  ;;  %v11143_v8 = vrot.slane %v20293_v60, 3 }
 0x3da   : > { %18595 = vmatmul.mubr.msk.bf16.vlgmr.msra.gmra.mrb[0].mxu0 %vm1323_vm2, %v11136_v11  ;;  %v22711_v11 = vld [vmem:[%s20493_s8 + $0x160] sm:$0xff]   ;;  %v11144_v47 = vsel %vm11131_vm9, %v11141_v10, %v11143_v8  ;;  %v11146_v45 = vsel %vm11131_vm9, %v11143_v8, %v11145_v9  ;;  %v22734_v8 = vld [vmem:[%s20493_s8 + $0x178] sm:$0xff]  }
 0x3db   : > { %18598 = vmatprep.mubr.msk.bf16.mxu0 %vm1323_vm2, %v11138_v12  ;;  %v4454_v12 = vrot.slane %v22711_v11, 1 }
 0x3df   : > { %17977 = vmatmul.mubr.msk.bf16.gmra.mrb[72].mxu1 %vm1323_vm2, %v4447_v51  ;;  %v22716_v51 = vld [vmem:[%s20493_s8 + $0x168] sm:$0xff]  }
 0x3e0   : > { %17980 = vmatprep.mubr.msk.bf16.mxu1 %vm1323_vm2, %v4449_v35  ;;  %v4456_v6 = vrot.slane %v22716_v51, 1  ;;  %v4455_v35 = vsel %vm2831_vm5, %v4452_v41, %v4454_v12  ;;  %v11148_v41 = vsel %vm11131_vm9, %v11145_v9, %v11147_v62  ;;  %v11153_v9 = vrot.slane %v20302_v1, 3  ;;  %v20306_v1 = vld [vmem:[%s20493_s8 + $0x88] sm:$0xff]  }
 0x3e2   : > { %18599 = vmatmul.mubr.msk.bf16.gmra.mrb[4].mxu0 %vm1323_vm2, %v11140_v48  ;;  %v4457_v48 = vsel %vm2831_vm5, %v4454_v12, %v4456_v6 }
 0x3e3   : > { %18602 = vmatprep.mubr.msk.bf16.mxu0 %vm1323_vm2, %v11142_v44  ;;  %v20298_v44 = vld [vmem:[%s20493_s8 + $0x68] sm:$0xff]  }
 0x3e4   : > { %v11149_v10 = vrot.slane %v20298_v44, 3  ;;  %v22752_v44 = vld [vmem:[%s20493_s8 + $0x188] sm:$0xff]  }
 0x3e6   : > { %v11150_v0 = vsel %vm11131_vm9, %v11147_v62, %v11149_v10 }
 0x3e7   : > { %17981 = vmatmul.mubr.msk.bf16.gmra.mrb[76].mxu1 %vm1323_vm2, %v4451_v56  ;;  %v22729_v56 = vld [vmem:[%s20493_s8 + $0x170] sm:$0xff]  }
 0x3e8   : > { %17984 = vmatprep.mubr.msk.bf16.mxu1 %vm1323_vm2, %v4453_v42  ;;  %v4458_v60 = vrot.slane %v22729_v56, 1  ;;  %v4460_v42 = vrot.slane %v22734_v8, 1 }
 0x3ea   : > { %18603 = vmatmul.mubr.msk.bf16.gmra.mrb[8].mxu0 %vm1323_vm2, %v11144_v47  ;;  %v4459_v12 = vsel %vm2831_vm5, %v4456_v6, %v4458_v60  ;;  %v20301_v47 = vld [vmem:[%s20493_s8 + $0x70] sm:$0xff]  }
 0x3eb   : > { %18606 = vmatprep.mubr.msk.bf16.mxu0 %vm1323_vm2, %v11146_v45  ;;  %v11151_v45 = vrot.slane %v20301_v47, 3 }
 0x3ed   : > { %v11152_v6 = vsel %vm11131_vm9, %v11149_v10, %v11151_v45  ;;  %v11157_v10 = vrot.slane %v20306_v1, 3 }
 0x3ef   : > { %17985 = vmatmul.mubr.msk.bf16.gmra.mrb[80].mxu1 %vm1323_vm2, %v4455_v35  ;;  %v4461_v35 = vsel %vm2831_vm5, %v4458_v60, %v4460_v42  ;;  %v11154_v60 = vsel %vm11131_vm9, %v11151_v45, %v11153_v9  ;;  %v4466_v45 = vrot.slane %v22765_v37, 1 }
 0x3f0   : > { %17988 = vmatprep.mubr.msk.bf16.mxu1 %vm1323_vm2, %v4457_v48  ;;  %v22747_v48 = vld [vmem:[%s20493_s8 + $0x180] sm:$0xff]  }
 0x3f1   : > { %v4462_v62 = vrot.slane %v22747_v48, 1 }
 0x3f2   : > { %18607 = vmatmul.mubr.msk.bf16.gmra.mrb[12].mxu0 %vm1323_vm2, %v11148_v41  ;;  %v4464_v41 = vrot.slane %v22752_v44, 1 }
 0x3f3   : > { %18610 = vmatprep.mubr.msk.bf16.mxu0 %vm1323_vm2, %v11150_v0  ;;  %v4463_v0 = vsel %vm2831_vm5, %v4460_v42, %v4462_v62 }
 0x3f7   : > { %17989 = vmatmul.mubr.msk.bf16.gmra.mrb[84].mxu1 %vm1323_vm2, %v4459_v12  ;;  %v20305_v12 = vld [vmem:[%s20493_s8 + $0x80] sm:$0xff]  }
 0x3f8   : > { %17992 = vmatprep.mubr.msk.bf16.mxu1 %vm1323_vm2, %v4461_v35  ;;  %v11155_v47 = vrot.slane %v20305_v12, 3  ;;  %v4465_v35 = vsel %vm2831_vm5, %v4462_v62, %v4464_v41  ;;  %v20309_v12 = vld [vmem:[%s20493_s8 + $0x90] sm:$0xff]  }
 0x3fa   : > { %18611 = vmatmul.mubr.msk.bf16.gmra.mrb[16].mxu0 %vm1323_vm2, %v11152_v6  ;;  %v11156_v42 = vsel %vm11131_vm9, %v11153_v9, %v11155_v47  ;;  %v22770_v6 = vld [vmem:[%s20493_s8 + $0x198] sm:$0xff]   ;;  %v11158_v62 = vsel %vm11131_vm9, %v11155_v47, %v11157_v10  ;;  %v11161_v9 = vrot.slane %v20310_v38, 3  ;;  %v4470_v47 = vrot.slane %v22783_v21, 1 }
 0x3fb   : > { %18614 = vmatprep.mubr.msk.bf16.mxu0 %vm1323_vm2, %v11154_v60  ;;  %v4468_v60 = vrot.slane %v22770_v6, 1 }
 0x3fd   : > { %v4469_v1 = vsel %vm2831_vm5, %v4466_v45, %v4468_v60  ;;  %v4471_v38 = vsel %vm2831_vm5, %v4468_v60, %v4470_v47 }
 0x3ff   : > { %17993 = vmatmul.mubr.msk.bf16.gmra.mrb[88].mxu1 %vm1323_vm2, %v4463_v0  ;;  %v4467_v0 = vsel %vm2831_vm5, %v4464_v41, %v4466_v45 }
 0x400   : > { %17996 = vmatprep.mubr.msk.bf16.mxu1 %vm1323_vm2, %v4465_v35  ;;  %v11159_v35 = vrot.slane %v20309_v12, 3 }
 0x402   : > { %18615 = vmatmul.mubr.msk.bf16.gmra.mrb[20].mxu0 %vm1323_vm2, %v11156_v42  ;;  %v11160_v41 = vsel %vm11131_vm9, %v11157_v10, %v11159_v35  ;;  %v22788_v42 = vld [vmem:[%s20493_s8 + $0x1a8] sm:$0xff]   ;;  %v11162_v45 = vsel %vm11131_vm9, %v11159_v35, %v11161_v9  ;;  %v11165_v10 = vrot.slane %v20314_v63, 3  ;;  %v4474_v35 = vrot.slane %v22801_v23, 1 }
 0x403   : > { %18618 = vmatprep.mubr.msk.bf16.mxu0 %vm1323_vm2, %v11158_v62  ;;  %v4472_v62 = vrot.slane %v22788_v42, 1 }
 0x405   : > { %v4475_v63 = vsel %vm2831_vm5, %v4472_v62, %v4474_v35 }
 0x407   : > { %17997 = vmatmul.mubr.msk.bf16.gmra.mrb[92].mxu1 %vm1323_vm2, %v4467_v0  ;;  %v20313_v0 = vld [vmem:[%s20493_s8 + $0xa0] sm:$0xff]  }
 0x408   : > { %18000 = vmatprep.mubr.msk.bf16.mxu1 %vm1323_vm2, %v4469_v1  ;;  %v11163_v12 = vrot.slane %v20313_v0, 3  ;;  %v4473_v1 = vsel %vm2831_vm5, %v4470_v47, %v4472_v62 }
 0x40a   : > { %18619 = vmatmul.mubr.msk.bf16.gmra.mrb[24].mxu0 %vm1323_vm2, %v11160_v41  ;;  %v11164_v60 = vsel %vm11131_vm9, %v11161_v9, %v11163_v12  ;;  %v22806_v41 = vld [vmem:[%s20493_s8 + $0x1b8] sm:$0xff]   ;;  %v11166_v47 = vsel %vm11131_vm9, %v11163_v12, %v11165_v10  ;;  %v11169_v9 = vrot.slane %v20318_v49, 3  ;;  %v4478_v12 = vrot.slane %v22819_v39, 1 }
 0x40b   : > { %18622 = vmatprep.mubr.msk.bf16.mxu0 %vm1323_vm2, %v11162_v45  ;;  %v4476_v45 = vrot.slane %v22806_v41, 1 }
 0x40d   : > { %v4479_v49 = vsel %vm2831_vm5, %v4476_v45, %v4478_v12 }
 0x40f   : > { %18001 = vmatmul.mubr.msk.bf16.gmra.mrb[96].mxu1 %vm1323_vm2, %v4471_v38  ;;  %v20317_v38 = vld [vmem:[%s20493_s8 + $0xb0] sm:$0xff]  }
 0x410   : > { %18004 = vmatprep.mubr.msk.bf16.mxu1 %vm1323_vm2, %v4473_v1  ;;  %v11167_v0 = vrot.slane %v20317_v38, 3  ;;  %v4477_v1 = vsel %vm2831_vm5, %v4474_v35, %v4476_v45 }
 0x412   : > { %18623 = vmatmul.mubr.msk.bf16.gmra.mrb[28].mxu0 %vm1323_vm2, %v11164_v60  ;;  %v11168_v62 = vsel %vm11131_vm9, %v11165_v10, %v11167_v0  ;;  %v22824_v60 = vld [vmem:[%s20493_s8 + $0x1c8] sm:$0xff]   ;;  %v11170_v35 = vsel %vm11131_vm9, %v11167_v0, %v11169_v9  ;;  %v22837_v10 = vld [vmem:[%s20493_s8 + $0x1d0] sm:$0xff]  }
 0x413   : > { %18626 = vmatprep.mubr.msk.bf16.mxu0 %vm1323_vm2, %v11166_v47  ;;  %v4480_v47 = vrot.slane %v22824_v60, 1  ;;  %v4482_v0 = vrot.slane %v22837_v10, 1 }
 0x417   : > { %18005 = vmatmul.mubr.msk.bf16.gmra.mrb[100].mxu1 %vm1323_vm2, %v4475_v63  ;;  %v20321_v63 = vld [vmem:[%s20493_s8 + $0xc0] sm:$0xff]  }
 0x418   : > { %18008 = vmatprep.mubr.msk.bf16.mxu1 %vm1323_vm2, %v4477_v1  ;;  %v11171_v38 = vrot.slane %v20321_v63, 3  ;;  %v4481_v1 = vsel %vm2831_vm5, %v4478_v12, %v4480_v47 }
 0x41a   : > { %18627 = vmatmul.mubr.msk.bf16.gmra.mrb[32].mxu0 %vm1323_vm2, %v11168_v62  ;;  %v11172_v45 = vsel %vm11131_vm9, %v11169_v9, %v11171_v38  ;;  %v22842_v62 = vld [vmem:[%s20493_s8 + $0x1d8] sm:$0xff]   ;;  %v11174_v22 = vsel %vm11131_vm9, %v11171_v38, %v11173_v20  ;;  %v20325_v9 = vld [vmem:[%s20493_s8 + $0xd0] sm:$0xff]   ;;  %v22863_v38 = vld [vmem:[%s20493_s8 + $0x1e0] sm:$0xff]  }
 0x41b   : > { %18630 = vmatprep.mubr.msk.bf16.mxu0 %vm1323_vm2, %v11170_v35  ;;  %v4484_v35 = vrot.slane %v22842_v62, 1  ;;  %v11175_v43 = vrot.slane %v20325_v9, 3 }
 0x41d   : > { %v4485_v18 = vsel %vm2831_vm5, %v4482_v0, %v4484_v35  ;;  %v11178_v4 = vsel %vm11131_vm9, %v11175_v43, %v11177_v53 }
 0x41f   : > { %18009 = vmatmul.mubr.msk.bf16.gmra.mrb[104].mxu1 %vm1323_vm2, %v4479_v49 }
 0x420   : > { %18012 = vmatprep.mubr.msk.bf16.mxu1 %vm1323_vm2, %v4481_v1  ;;  %v4483_v1 = vsel %vm2831_vm5, %v4480_v47, %v4482_v0  ;;  %v4486_v47 = vrot.slane %v22863_v38, 1 }
 0x422   : > { %v22845_v12 = vpop.f32.mrb[0].mxu1  ;;  %18631 = vmatmul.mubr.msk.bf16.gmra.mrb[36].mxu0 %vm1323_vm2, %v11172_v45  ;;  %v11176_v45 = vsel %vm11131_vm9, %v11173_v20, %v11175_v43  ;;  %v20329_v20 = vld [vmem:[%s20493_s8 + $0xe0] sm:$0xff]   ;;  %v22889_v43 = vld [vmem:[%s20493_s8 + $0x1f0] sm:$0xff]  }
 0x423   : > { %v22848_v63 = vpop.f32.mrb[1].mxu1  ;;  %18634 = vmatprep.mubr.msk.bf16.mxu0 %vm1323_vm2, %v11174_v22  ;;  %v4488_v22 = vrot.slane %v22868_v40, 1  ;;  %v11179_v58 = vrot.slane %v20329_v20, 3 }
 0x424   : > { %v22851_v49 = vpop.f32.mrb[2].mxu1 }
 0x425   : > { %v22854_v14 = vpop.f32.mrb[3].mxu1  ;;  %v4489_v34 = vsel %vm2831_vm5, %v4486_v47, %v4488_v22  ;;  %v11182_v36 = vsel %vm11131_vm9, %v11179_v58, %v11181_v55 }
 0x427   : > { %18013 = vmatmul.mubr.msk.bf16.gmra.mrb[108].mxu1 %vm1323_vm2, %v4483_v1  ;;  %v4487_v1 = vsel %vm2831_vm5, %v4484_v35, %v4486_v47  ;;  %v4490_v35 = vrot.slane %v22889_v43, 1 }
 0x428   : > { %18016 = vmatprep.mubr.msk.bf16.mxu1 %vm1323_vm2, %v4485_v18 }
 0x42a   : > { %v22871_v0 = vpop.f32.mrb[4].mxu1  ;;  %18635 = vmatmul.mubr.msk.bf16.gmra.mrb[40].mxu0 %vm1323_vm2, %v11176_v45  ;;  %v11180_v45 = vsel %vm11131_vm9, %v11177_v53, %v11179_v58  ;;  %v20333_v53 = vld [vmem:[%s20493_s8 + $0xf0] sm:$0xff]   ;;  %v11185_v58 = vrot.slane %v20334_v15, 3  ;;  %v25348_v15 = vmov 0 }
 0x42b   : > { %v22874_v9 = vpop.f32.mrb[5].mxu1  ;;  %18638 = vmatprep.mubr.msk.bf16.mxu0 %vm1323_vm2, %v11178_v4  ;;  %v4492_v4 = vrot.slane %v22894_v17, 1  ;;  %v11183_v30 = vrot.slane %v20333_v53, 3  ;;  %v25349_v15 = vsel %vm22924_vm12, 4294967295, %v25348_v15 }
 0x42c   : > { %v22877_v18 = vpop.f32.mrb[6].mxu1  ;;  %25350 = vst [vmem:[#allocation42_spill] sm:$0xff] %v25349_v15 }
 0x42d   : > { %v22880_v27 = vpop.f32.mrb[7].mxu1  ;;  %v4493_v61 = vsel %vm2831_vm5, %v4490_v35, %v4492_v4  ;;  %v11186_v53 = vsel %vm11131_vm9, %v11183_v30, %v11185_v58 }
 0x42e   : > { %25343 = vst [vmem:[#allocation37_spill] sm:$0xff] %v22880_v27 }
 0x42f   : > { %18017 = vmatmul.mubr.msk.bf16.gmra.mrb[112].mxu1 %vm1323_vm2, %v4487_v1  ;;  %v4491_v1 = vsel %vm2831_vm5, %v4488_v22, %v4490_v35  ;;  %v4496_v35 = vrot.slane %v22920_v54, 1 }
 0x430   : > { %18020 = vmatprep.mubr.msk.bf16.mxu1 %vm1323_vm2, %v4489_v34 }
 0x432   : > { %v22897_v47 = vpop.f32.mrb[8].mxu1  ;;  %18639 = vmatmul.mubr.msk.bf16.gmra.mrb[44].mxu0 %vm1323_vm2, %v11180_v45  ;;  %v22915_v45 = vld [vmem:[%s20493_s8 + $0x200] sm:$0xff]  }
 0x433   : > { %25344 = vst [vmem:[#allocation38_spill] sm:$0xff] %v22897_v47  ;;  %v22900_v20 = vpop.f32.mrb[9].mxu1  ;;  %18642 = vmatprep.mubr.msk.bf16.mxu0 %vm1323_vm2, %v11182_v36  ;;  %v4494_v22 = vrot.slane %v22915_v45, 1  ;;  %v11184_v36 = vsel %vm11131_vm9, %v11181_v55, %v11183_v30  ;;  %v11195_v47 = vrot.slane %v20345_v5, 3  ;;  %v5768_v5 = vshrl.u32 %v22662_v46, 16 }
 0x434   : > { %25345 = vst [vmem:[#allocation39_spill] sm:$0xff] %v22900_v20  ;;  %v22903_v34 = vpop.f32.mrb[10].mxu1 }
 0x435   : > { %25346 = vst [vmem:[#allocation40_spill] sm:$0xff] %v22903_v34  ;;  %v22906_v25 = vpop.f32.mrb[11].mxu1  ;;  %v4495_v29 = vsel %vm2831_vm5, %v4492_v4, %v4494_v22  ;;  %v4497_v15 = vsel %vm2831_vm5, %v4494_v22, %v4496_v35 }
 0x436   : > { %25347 = vst [vmem:[#allocation41_spill] sm:$0xff] %v22906_v25  ;;  %v20338_v25 = vld [vmem:[%s20493_s8 + $0x108] sm:$0xff]  }
 0x437   : > { %18021 = vmatmul.mubr.msk.bf16.gmra.mrb[116].mxu1 %vm1323_vm2, %v4491_v1 }
 0x438   : > { %18024 = vmatprep.mubr.msk.bf16.mxu1 %vm1323_vm2, %v4493_v61  ;;  %v13571_v61 = vld [vmem:[%s21698_s27 + $0x10] sm:$0x3] }
 0x439   : > { %v13572_v7 = vsel %vm22924_vm12, 0, %v13571_v61  ;;  %v11189_v61 = vrot.slane %v20338_v25, 3 }
 0x43a   : > { %v22929_v1 = vpop.f32.mrb[12].mxu1  ;;  %13573 = vst [vmem:[%s21698_s27 + $0x10] sm:$0x3] %v13572_v7  ;;  %18643 = vmatmul.mubr.msk.bf16.gmra.mrb[48].mxu0 %vm1323_vm2, %v11184_v36  ;;  %v22950_v7 = vld [vmem:[%s20493_s8 + $0x210] sm:$0xff]  }
 0x43b   : > { %25351 = vst [vmem:[#allocation43_spill] sm:$0xff] %v22929_v1  ;;  %v22934_v55 = vpop.f32.mrb[13].mxu1  ;;  %18646 = vmatprep.mubr.msk.bf16.mxu0 %vm1323_vm2, %v11186_v53  ;;  %v20337_v1 = vld [vmem:[%s20493_s8 + $0x100] sm:$0xff]   ;;  %v4498_v4 = vrot.slane %v22950_v7, 1 }
 0x43c   : > { %25352 = vst [vmem:[#allocation44_spill] sm:$0xff] %v22934_v55  ;;  %v22938_v2 = vpop.f32.mrb[14].mxu1  ;;  %v11187_v30 = vrot.slane %v20337_v1, 3 }
 0x43d   : > { %25353 = vst [vmem:[#allocation45_spill] sm:$0xff] %v22938_v2  ;;  %v22941_v28 = vpop.f32.mrb[15].mxu1 }
 0x43e   : > { %25354 = vst [vmem:[#allocation46_spill] sm:$0xff] %v22941_v28  ;;  %v11188_v36 = vsel %vm11131_vm9, %v11185_v58, %v11187_v30  ;;  %v22955_v28 = vld [vmem:[%s20493_s8 + $0x218] sm:$0xff]   ;;  %v11190_v25 = vsel %vm11131_vm9, %v11187_v30, %v11189_v61  ;;  %v20341_v58 = vld [vmem:[%s20493_s8 + $0x110] sm:$0xff]   ;;  %v22976_v30 = vld [vmem:[%s20493_s8 + $0x220] sm:$0xff]  }
 0x43f   : > { %18025 = vmatmul.mubr.msk.bf16.gmra.mrb[120].mxu1 %vm1323_vm2, %v4495_v29  ;;  %v4500_v1 = vrot.slane %v22955_v28, 1  ;;  %v11191_v55 = vrot.slane %v20341_v58, 3 }
 0x440   : > { %18028 = vmatprep.mubr.msk.bf16.mxu1 %vm1323_vm2, %v4497_v15  ;;  %v4499_v15 = vsel %vm2831_vm5, %v4496_v35, %v4498_v4  ;;  %v4502_v35 = vrot.slane %v22976_v30, 1 }
 0x441   : > { %v4501_v19 = vsel %vm2831_vm5, %v4498_v4, %v4500_v1  ;;  %v5750_v4 = vshrl.u32 %v22644_v33, 16 }
 0x442   : > { %v22958_v22 = vpop.f32.mrb[16].mxu1  ;;  %18647 = vmatmul.mubr.msk.bf16.gmra.mrb[52].mxu0 %vm1323_vm2, %v11188_v36  ;;  %v11192_v36 = vsel %vm11131_vm9, %v11189_v61, %v11191_v55  ;;  %v4503_v61 = vsel %vm2831_vm5, %v4500_v1, %v4502_v35  ;;  %v5759_v1 = vshrl.u32 %v22657_v13, 16 }
 0x443   : > { %25355 = vst [vmem:[#allocation47_spill] sm:$0xff] %v22958_v22  ;;  %v22961_v53 = vpop.f32.mrb[17].mxu1  ;;  %18650 = vmatprep.mubr.msk.bf16.mxu0 %vm1323_vm2, %v11190_v25  ;;  %v20342_v22 = vld [vmem:[%s20493_s8 + $0x118] sm:$0xff]  }
 0x444   : > { %25356 = vst [vmem:[#allocation48_spill] sm:$0xff] %v22961_v53  ;;  %v22964_v29 = vpop.f32.mrb[18].mxu1  ;;  %v11193_v34 = vrot.slane %v20342_v22, 3  ;;  %v5753_v22 = vshll.u32 %v22644_v33, 16 }
 0x445   : > { %25357 = vst [vmem:[#allocation49_spill] sm:$0xff] %v22964_v29  ;;  %v22967_v2 = vpop.f32.mrb[19].mxu1  ;;  %v20068_v53 = vld [vmem:[%s20493_s8 + $0x230] ss:$0 sps:$4 sm:$0x11]  }
 0x446   : > { %25358 = vst [vmem:[#allocation50_spill] sm:$0xff] %v22967_v2  ;;  %v22981_v2 = vld [vmem:[%s20493_s8 + $0x228] sm:$0xff]   ;;  %v5755_v32 = vrot.slane %v5753_v22, 2 }
 0x447   : > { %18029 = vmatmul.mubr.msk.bf16.gmra.mrb[124].mxu1 %vm1323_vm2, %v4499_v15  ;;  %v4504_v25 = vrot.slane %v22981_v2, 1 }
 0x448   : > { %18032 = vmatprep.mubr.msk.bf16.mxu1 %vm1323_vm2, %v4501_v19  ;;  %v11194_v19 = vsel %vm11131_vm9, %v11191_v55, %v11193_v34  ;;  %v20346_v55 = vld [vmem:[%s20493_s8 + $0x128] sm:$0xff]  }
 0x449   : > { %v4505_v33 = vsel %vm2831_vm5, %v4502_v35, %v4504_v25  ;;  %v11197_v59 = vrot.slane %v20346_v55, 3  ;;  %v5771_v35 = vshll.u32 %v22662_v46, 16  ;;  %v20347_v46 = vld [vmem:[%s20493_s8 + $0x130] sm:$0xff]  }
 0x44a   : > { %v22986_v58 = vpop.f32.mrb[20].mxu1  ;;  %18651 = vmatmul.mubr.msk.bf16.gmra.mrb[56].mxu0 %vm1323_vm2, %v11192_v36  ;;  %v4506_v36 = vrot.slane %v20068_v53, 1  ;;  %v25365_v55 = vld [vmem:[#allocation4_spill] sm:$0xff] }
 0x44b   : > { %25359 = vst [vmem:[#allocation51_spill] sm:$0xff] %v22986_v58  ;;  %v22989_v15 = vpop.f32.mrb[21].mxu1  ;;  %18654 = vmatprep.mubr.msk.bf16.mxu0 %vm1323_vm2, %v11194_v19  ;;  %v5752_v58 = vrot.slane %v5750_v4, 1  ;;  %v11196_v19 = vsel %vm11131_vm9, %v11193_v34, %v11195_v47  ;;  %v11198_v22 = vsel %vm11131_vm9, %v11195_v47, %v11197_v59  ;;  %v5770_v47 = vrot.slane %v5768_v5, 1 }
 0x44c   : > { %25360 = vst [vmem:[#allocation52_spill] sm:$0xff] %v22989_v15  ;;  %v22992_v29 = vpop.f32.mrb[22].mxu1  ;;  %v5773_v15 = vrot.slane %v5771_v35, 2  ;;  %v5789_v5 = vshll.u32 %v22680_v3, 16 }
 0x44d   : > { %25361 = vst [vmem:[#allocation53_spill] sm:$0xff] %v22992_v29  ;;  %v22996_v20 = vpop.f32.mrb[23].mxu1  ;;  %v5756_v29 = vor.u32 %v5755_v32, %v5752_v58  ;;  %v11199_v58 = vrot.slane %v20347_v46, 3 }
 0x44e   : > { %25362 = vst [vmem:[#allocation54_spill] sm:$0xff] %v22996_v20  ;;  %v5762_v20 = vshll.u32 %v22657_v13, 16  ;;  %v4507_v13 = vsel %vm2831_vm5, %v4504_v25, %v4506_v36  ;;  %v5780_v36 = vshll.u32 %v22675_v50, 16 }
 0x44f   : > { %18033 = vmatmul.mubr.msk.bf16.gmra.mrb[128].mxu1 %vm1323_vm2, %v4503_v61 }
 0x450   : > { %18036 = vmatprep.mubr.msk.bf16.mxu1 %vm1323_vm2, %v4505_v33  ;;  %v5761_v33 = vrot.slane %v5759_v1, 1  ;;  %v5764_v34 = vrot.slane %v5762_v20, 2  ;;  %v5777_v20 = vshrl.u32 %v22675_v50, 16  ;;  %v11200_v1 = vsel %vm11131_vm9, %v11197_v59, %v11199_v58 }
 0x451   : > { %v5782_v59 = vrot.slane %v5780_v36, 2 }
 0x452   : > { %v23009_v4 = vpop.f32.mrb[24].mxu1  ;;  %18655 = vmatmul.mubr.msk.bf16.gmra.mrb[60].mxu0 %vm1323_vm2, %v11196_v19  ;;  %v5765_v25 = vor.u32 %v5764_v34, %v5761_v33  ;;  %v5774_v19 = vor.u32 %v5773_v15, %v5770_v47  ;;  %v5779_v33 = vrot.slane %v5777_v20, 1  ;;  %v20350_v47 = vld [vmem:[%s20493_s8 + $0x148] sm:$0xff]   ;;  %v5798_v20 = vshll.u32 %v22693_v16, 16 }
 0x453   : > { %25363 = vst [vmem:[#allocation55_spill] sm:$0xff] %v23009_v4  ;;  %v23012_v61 = vpop.f32.mrb[25].mxu1  ;;  %18658 = vmatprep.mubr.msk.bf16.mxu0 %vm1323_vm2, %v11198_v22  ;;  %v5757_v4 = vsel %vm5434_vm3, %v25365_v55, %v5756_v29  ;;  %v5786_v22 = vshrl.u32 %v22680_v3, 16  ;;  %v20349_v3 = vld [vmem:[%s20493_s8 + $0x140] sm:$0xff]  }
 0x454   : > { %25364 = vst [vmem:[#allocation56_spill] sm:$0xff] %v23012_v61  ;;  %v23015_v53 = vpop.f32.mrb[26].mxu1  ;;  %v20348_v61 = vld [vmem:[%s20493_s8 + $0x138] sm:$0xff]   ;;  %v5766_v50 = vsel %vm5434_vm3, %v5756_v29, %v5765_v25  ;;  %v11203_v34 = vrot.slane %v20349_v3, 3  ;;  %v5775_v46 = vsel %vm5434_vm3, %v5765_v25, %v5774_v19  ;;  %v5795_v29 = vshrl.u32 %v22693_v16, 16 }
 0x455   : > { %v23018_v32 = vpop.f32.mrb[27].mxu1  ;;  %v11201_v27 = vrot.slane %v20348_v61, 3  ;;  %v5788_v55 = vrot.slane %v5786_v22, 1  ;;  %v5804_v3 = vshrl.u32 %v22698_v26, 16  ;;  %v5807_v25 = vshll.u32 %v22698_v26, 16  ;;  %v20351_v26 = vld [vmem:[%s20493_s8 + $0x150] sm:$0xff]  }
 0x457   : > { %18037 = vmatmul.mubr.msk.bf16.gmra.mrb[132].mxu1 %vm1323_vm2, %v4507_v13  ;;  %v11202_v61 = vsel %vm11131_vm9, %v11199_v58, %v11201_v27  ;;  %v5791_v58 = vrot.slane %v5789_v5, 2  ;;  %v11204_v36 = vsel %vm11131_vm9, %v11201_v27, %v11203_v34  ;;  %v5800_v27 = vrot.slane %v5798_v20, 2 }
 0x458   : > { %18110 = vmatprep.mubr.msk.bf16.mxu1 %vm1323_vm2, %v5757_v4 }
 0x45a   : > { %v23032_v35 = vpop.f32.mrb[28].mxu1  ;;  %18659 = vmatmul.mubr.msk.bf16.gmra.mrb[64].mxu0 %vm1323_vm2, %v11200_v1  ;;  %v5783_v1 = vor.u32 %v5782_v59, %v5779_v33  ;;  %v5797_v59 = vrot.slane %v5795_v29, 1  ;;  %v5816_v29 = vshll.u32 %v22711_v11, 16 }
 0x45b   : > { %v23035_v13 = vpop.f32.mrb[29].mxu1  ;;  %18662 = vmatprep.mubr.msk.bf16.mxu0 %vm1323_vm2, %v11202_v61  ;;  %v5792_v61 = vor.u32 %v5791_v58, %v5788_v55  ;;  %v11207_v55 = vrot.slane %v20351_v26, 3  ;;  %v5822_v26 = vshrl.u32 %v22716_v51, 16 }
 0x45c   : > { %25366 = vst [vmem:[#allocation4_spill] sm:$0xff] %v23035_v13  ;;  %v23038_v4 = vpop.f32.mrb[30].mxu1  ;;  %v11205_v13 = vrot.slane %v20350_v47, 3  ;;  %v5784_v16 = vsel %vm5434_vm3, %v5774_v19, %v5783_v1  ;;  %v5806_v47 = vrot.slane %v5804_v3, 1  ;;  %v5813_v19 = vshrl.u32 %v22711_v11, 16 }
 0x45d   : > { %v23041_v15 = vpop.f32.mrb[31].mxu1  ;;  %v5793_v58 = vsel %vm5434_vm3, %v5783_v1, %v5792_v61  ;;  %v5825_v1 = vshll.u32 %v22716_v51, 16  ;;  %v20353_v51 = vld [vmem:[%s20493_s8 + $0x160] sm:$0xff]  }
 0x45e   : > { %v11206_v5 = vsel %vm11131_vm9, %v11203_v34, %v11205_v13  ;;  %v5809_v34 = vrot.slane %v5807_v25, 2  ;;  %v11208_v20 = vsel %vm11131_vm9, %v11205_v13, %v11207_v55  ;;  %v5818_v13 = vrot.slane %v5816_v29, 2 }
 0x45f   : > { %18111 = vmatmul.mubr.msk.bf16.vlgmr.msra.gmra.mrb[68].mxu1 %vm1323_vm2, %v5766_v50 }
 0x460   : > { %18114 = vmatprep.mubr.msk.bf16.mxu1 %vm1323_vm2, %v5775_v46 }
 0x462   : > { %v23054_v22 = vpop.f32.mrb[32].mxu1  ;;  %18663 = vmatmul.mubr.msk.bf16.gmra.mrb[68].mxu0 %vm1323_vm2, %v11204_v36  ;;  %v5801_v36 = vor.u32 %v5800_v27, %v5797_v59  ;;  %v5815_v59 = vrot.slane %v5813_v19, 1  ;;  %v5834_v19 = vshll.u32 %v22729_v56, 16 }
 0x463   : > { %25367 = vst [vmem:[#allocation57_spill] sm:$0xff] %v23054_v22  ;;  %v23057_v50 = vpop.f32.mrb[33].mxu1  ;;  %18666 = vmatprep.mubr.msk.bf16.mxu0 %vm1323_vm2, %v11206_v5  ;;  %v20352_v22 = vld [vmem:[%s20493_s8 + $0x158] sm:$0xff]   ;;  %v5810_v5 = vor.u32 %v5809_v34, %v5806_v47  ;;  %v5824_v34 = vrot.slane %v5822_v26, 1 }
 0x464   : > { %25368 = vst [vmem:[#allocation58_spill] sm:$0xff] %v23057_v50  ;;  %v23060_v33 = vpop.f32.mrb[34].mxu1  ;;  %v11209_v50 = vrot.slane %v20352_v22, 3  ;;  %v5802_v11 = vsel %vm5434_vm3, %v5792_v61, %v5801_v36  ;;  %v5831_v61 = vshrl.u32 %v22729_v56, 16 }
 0x465   : > { %v23063_v46 = vpop.f32.mrb[35].mxu1  ;;  %v5811_v47 = vsel %vm5434_vm3, %v5801_v36, %v5810_v5  ;;  %v5843_v36 = vshll.u32 %v22734_v8, 16 }
 0x466   : > { %v11210_v25 = vsel %vm11131_vm9, %v11207_v55, %v11209_v50  ;;  %v5827_v55 = vrot.slane %v5825_v1, 2 }
 0x467   : > { %18115 = vmatmul.mubr.msk.bf16.gmra.mrb[72].mxu1 %vm1323_vm2, %v5784_v16 }
 0x468   : > { %18118 = vmatprep.mubr.msk.bf16.mxu1 %vm1323_vm2, %v5793_v58  ;;  %v11211_v58 = vrot.slane %v20353_v51, 3  ;;  %v5840_v51 = vshrl.u32 %v22734_v8, 16  ;;  %v20355_v8 = vld [vmem:[%s20493_s8 + $0x170] sm:$0xff]  }
 0x46a   : > { %v23076_v3 = vpop.f32.mrb[36].mxu1  ;;  %18667 = vmatmul.mubr.msk.bf16.gmra.mrb[72].mxu0 %vm1323_vm2, %v11208_v20  ;;  %v5819_v20 = vor.u32 %v5818_v13, %v5815_v59  ;;  %v11212_v29 = vsel %vm11131_vm9, %v11209_v50, %v11211_v58  ;;  %v5833_v59 = vrot.slane %v5831_v61, 1  ;;  %v5836_v50 = vrot.slane %v5834_v19, 2 }
 0x46b   : > { %25369 = vst [vmem:[#allocation59_spill] sm:$0xff] %v23076_v3  ;;  %v23079_v22 = vpop.f32.mrb[37].mxu1  ;;  %18670 = vmatprep.mubr.msk.bf16.mxu0 %vm1323_vm2, %v11210_v25  ;;  %v20354_v3 = vld [vmem:[%s20493_s8 + $0x168] sm:$0xff]   ;;  %v5828_v25 = vor.u32 %v5827_v55, %v5824_v34  ;;  %v5842_v55 = vrot.slane %v5840_v51, 1  ;;  %v5852_v61 = vshll.u32 %v22747_v48, 16 }
 0x46c   : > { %25370 = vst [vmem:[#allocation60_spill] sm:$0xff] %v23079_v22  ;;  %v23082_v16 = vpop.f32.mrb[38].mxu1  ;;  %v11213_v22 = vrot.slane %v20354_v3, 3  ;;  %v5820_v56 = vsel %vm5434_vm3, %v5810_v5, %v5819_v20  ;;  %v5849_v5 = vshrl.u32 %v22747_v48, 16 }
 0x46d   : > { %v23085_v27 = vpop.f32.mrb[39].mxu1  ;;  %v5829_v34 = vsel %vm5434_vm3, %v5819_v20, %v5828_v25  ;;  %v5861_v20 = vshll.u32 %v22752_v44, 16 }
 0x46e   : > { %v11214_v1 = vsel %vm11131_vm9, %v11211_v58, %v11213_v22  ;;  %v5845_v58 = vrot.slane %v5843_v36, 2 }
 0x46f   : > { %18119 = vmatmul.mubr.msk.bf16.gmra.mrb[76].mxu1 %vm1323_vm2, %v5802_v11 }
 0x470   : > { %18122 = vmatprep.mubr.msk.bf16.mxu1 %vm1323_vm2, %v5811_v47  ;;  %v11215_v47 = vrot.slane %v20355_v8, 3  ;;  %v5858_v8 = vshrl.u32 %v22752_v44, 16  ;;  %v20357_v44 = vld [vmem:[%s20493_s8 + $0x180] sm:$0xff]  }
 0x472   : > { %v23098_v26 = vpop.f32.mrb[40].mxu1  ;;  %18671 = vmatmul.mubr.msk.bf16.gmra.mrb[76].mxu0 %vm1323_vm2, %v11212_v29  ;;  %v5837_v29 = vor.u32 %v5836_v50, %v5833_v59  ;;  %v11216_v19 = vsel %vm11131_vm9, %v11213_v22, %v11215_v47  ;;  %v5851_v59 = vrot.slane %v5849_v5, 1  ;;  %v5854_v22 = vrot.slane %v5852_v61, 2 }
 0x473   : > { %25371 = vst [vmem:[#allocation61_spill] sm:$0xff] %v23098_v26  ;;  %v23101_v3 = vpop.f32.mrb[41].mxu1  ;;  %18674 = vmatprep.mubr.msk.bf16.mxu0 %vm1323_vm2, %v11214_v1  ;;  %v20356_v26 = vld [vmem:[%s20493_s8 + $0x178] sm:$0xff]   ;;  %v5846_v1 = vor.u32 %v5845_v58, %v5842_v55  ;;  %v5860_v58 = vrot.slane %v5858_v8, 1 }
 0x474   : > { %25372 = vst [vmem:[#allocation62_spill] sm:$0xff] %v23101_v3  ;;  %v23104_v11 = vpop.f32.mrb[42].mxu1  ;;  %v11217_v3 = vrot.slane %v20356_v26, 3  ;;  %v5838_v48 = vsel %vm5434_vm3, %v5828_v25, %v5837_v29  ;;  %v5870_v25 = vshll.u32 %v22765_v37, 16  ;;  %v5855_v5 = vor.u32 %v5854_v22, %v5851_v59 }
 0x475   : > { %v23107_v13 = vpop.f32.mrb[43].mxu1  ;;  %v5847_v55 = vsel %vm5434_vm3, %v5837_v29, %v5846_v1  ;;  %v5879_v29 = vshll.u32 %v22770_v6, 16 }
 0x476   : > { %v11218_v36 = vsel %vm11131_vm9, %v11215_v47, %v11217_v3  ;;  %v5863_v47 = vrot.slane %v5861_v20, 2 }
 0x477   : > { %18123 = vmatmul.mubr.msk.bf16.gmra.mrb[80].mxu1 %vm1323_vm2, %v5820_v56 }
 0x478   : > { %18126 = vmatprep.mubr.msk.bf16.mxu1 %vm1323_vm2, %v5829_v34  ;;  %v11219_v34 = vrot.slane %v20357_v44, 3  ;;  %v5876_v44 = vshrl.u32 %v22770_v6, 16  ;;  %v20359_v6 = vld [vmem:[%s20493_s8 + $0x190] sm:$0xff]  }
 0x479   : > { %v11223_v22 = vrot.slane %v20359_v6, 3 }
 0x47a   : > { %v23120_v51 = vpop.f32.mrb[44].mxu1  ;;  %18675 = vmatmul.mubr.msk.bf16.gmra.mrb[80].mxu0 %vm1323_vm2, %v11216_v19  ;;  %v5867_v19 = vshrl.u32 %v22765_v37, 16  ;;  %v11220_v61 = vsel %vm11131_vm9, %v11217_v3, %v11219_v34  ;;  %v5872_v37 = vrot.slane %v5870_v25, 2  ;;  %v5856_v3 = vsel %vm5434_vm3, %v5846_v1, %v5855_v5 }
 0x47b   : > { %25373 = vst [vmem:[#allocation63_spill] sm:$0xff] %v23120_v51  ;;  %v23123_v26 = vpop.f32.mrb[45].mxu1  ;;  %18678 = vmatprep.mubr.msk.bf16.mxu0 %vm1323_vm2, %v11218_v36  ;;  %v20358_v51 = vld [vmem:[%s20493_s8 + $0x188] sm:$0xff]   ;;  %v5864_v36 = vor.u32 %v5863_v47, %v5860_v58  ;;  %v5878_v47 = vrot.slane %v5876_v44, 1  ;;  %v5885_v25 = vshrl.u32 %v22783_v21, 16  ;;  %v5894_v1 = vshrl.u32 %v22788_v42, 16 }
 0x47c   : > { %25374 = vst [vmem:[#allocation64_spill] sm:$0xff] %v23123_v26  ;;  %v23126_v56 = vpop.f32.mrb[46].mxu1  ;;  %v11221_v26 = vrot.slane %v20358_v51, 3 }
 0x47d   : > { %25375 = vst [vmem:[#allocation65_spill] sm:$0xff] %v23126_v56  ;;  %v23129_v50 = vpop.f32.mrb[47].mxu1  ;;  %v5865_v58 = vsel %vm5434_vm3, %v5855_v5, %v5864_v36 }
 0x47e   : > { %25376 = vst [vmem:[#allocation66_spill] sm:$0xff] %v23129_v50  ;;  %v11222_v20 = vsel %vm11131_vm9, %v11219_v34, %v11221_v26  ;;  %v5881_v34 = vrot.slane %v5879_v29, 2  ;;  %v11224_v6 = vsel %vm11131_vm9, %v11221_v26, %v11223_v22  ;;  %v5903_v26 = vshrl.u32 %v22801_v23, 16  ;;  %v20368_v50 = vld [vmem:[%s20493_s8 + $0x1d8] sm:$0xff]  }
 0x47f   : > { %18127 = vmatmul.mubr.msk.bf16.gmra.mrb[84].mxu1 %vm1323_vm2, %v5838_v48  ;;  %v5869_v48 = vrot.slane %v5867_v19, 1 }
 0x480   : > { %18130 = vmatprep.mubr.msk.bf16.mxu1 %vm1323_vm2, %v5847_v55  ;;  %v5882_v5 = vor.u32 %v5881_v34, %v5878_v47  ;;  %v5906_v47 = vshll.u32 %v22801_v23, 16 }
 0x481   : > { %v5873_v19 = vor.u32 %v5872_v37, %v5869_v48 }
 0x482   : > { %v23142_v8 = vpop.f32.mrb[48].mxu1  ;;  %18679 = vmatmul.mubr.msk.bf16.gmra.mrb[84].mxu0 %vm1323_vm2, %v11220_v61  ;;  %v5888_v61 = vshll.u32 %v22783_v21, 16  ;;  %v5887_v21 = vrot.slane %v5885_v25, 1  ;;  %v20362_v25 = vld [vmem:[%s20493_s8 + $0x1a8] sm:$0xff]   ;;  %v5908_v23 = vrot.slane %v5906_v47, 2 }
 0x483   : > { %25377 = vst [vmem:[#allocation67_spill] sm:$0xff] %v23142_v8  ;;  %v23145_v51 = vpop.f32.mrb[49].mxu1  ;;  %18682 = vmatprep.mubr.msk.bf16.mxu0 %vm1323_vm2, %v11222_v20  ;;  %v20360_v8 = vld [vmem:[%s20493_s8 + $0x198] sm:$0xff]   ;;  %v5897_v20 = vshll.u32 %v22788_v42, 16  ;;  %v5874_v48 = vsel %vm5434_vm3, %v5864_v36, %v5873_v19  ;;  %v5896_v42 = vrot.slane %v5894_v1, 1  ;;  %v5883_v36 = vsel %vm5434_vm3, %v5873_v19, %v5882_v5 }
 0x484   : > { %25378 = vst [vmem:[#allocation68_spill] sm:$0xff] %v23145_v51  ;;  %v23148_v55 = vpop.f32.mrb[50].mxu1  ;;  %v11225_v51 = vrot.slane %v20360_v8, 3  ;;  %v5890_v37 = vrot.slane %v5888_v61, 2  ;;  %v11229_v61 = vrot.slane %v20362_v25, 3  ;;  %v5924_v25 = vshll.u32 %v22819_v39, 16 }
 0x485   : > { %25379 = vst [vmem:[#allocation69_spill] sm:$0xff] %v23148_v55  ;;  %v23151_v59 = vpop.f32.mrb[51].mxu1 }
 0x486   : > { %25380 = vst [vmem:[#allocation70_spill] sm:$0xff] %v23151_v59  ;;  %v11226_v29 = vsel %vm11131_vm9, %v11223_v22, %v11225_v51  ;;  %v20361_v22 = vld [vmem:[%s20493_s8 + $0x1a0] sm:$0xff]   ;;  %v5891_v1 = vor.u32 %v5890_v37, %v5887_v21  ;;  %v20363_v21 = vld [vmem:[%s20493_s8 + $0x1b0] sm:$0xff]  }
 0x487   : > { %18131 = vmatmul.mubr.msk.bf16.gmra.mrb[88].mxu1 %vm1323_vm2, %v5856_v3  ;;  %v11231_v37 = vrot.slane %v20363_v21, 3 }
 0x488   : > { %18134 = vmatprep.mubr.msk.bf16.mxu1 %vm1323_vm2, %v5865_v58  ;;  %v5899_v58 = vrot.slane %v5897_v20, 2 }
 0x48a   : > { %v23164_v44 = vpop.f32.mrb[52].mxu1  ;;  %18683 = vmatmul.mubr.msk.bf16.gmra.mrb[88].mxu0 %vm1323_vm2, %v11224_v6  ;;  %v5900_v20 = vor.u32 %v5899_v58, %v5896_v42  ;;  %v5905_v6 = vrot.slane %v5903_v26, 1  ;;  %v20364_v42 = vld [vmem:[%s20493_s8 + $0x1b8] sm:$0xff]   ;;  %v5933_v26 = vshll.u32 %v22824_v60, 16 }
 0x48b   : > { %25381 = vst [vmem:[#allocation71_spill] sm:$0xff] %v23164_v44  ;;  %v23167_v8 = vpop.f32.mrb[53].mxu1  ;;  %18686 = vmatprep.mubr.msk.bf16.mxu0 %vm1323_vm2, %v11226_v29  ;;  %v5912_v29 = vshrl.u32 %v22806_v41, 16  ;;  %v11233_v58 = vrot.slane %v20364_v42, 3 }
 0x48c   : > { %25382 = vst [vmem:[#allocation72_spill] sm:$0xff] %v23167_v8  ;;  %v23171_v3 = vpop.f32.mrb[54].mxu1  ;;  %v11227_v8 = vrot.slane %v20361_v22, 3  ;;  %v5915_v22 = vshll.u32 %v22806_v41, 16  ;;  %v5901_v47 = vsel %vm5434_vm3, %v5891_v1, %v5900_v20 }
 0x48d   : > { %25383 = vst [vmem:[#allocation73_spill] sm:$0xff] %v23171_v3  ;;  %v23175_v34 = vpop.f32.mrb[55].mxu1  ;;  %v5914_v21 = vrot.slane %v5912_v29, 1 }
 0x48e   : > { %25384 = vst [vmem:[#allocation74_spill] sm:$0xff] %v23175_v34  ;;  %v11228_v34 = vsel %vm11131_vm9, %v11225_v51, %v11227_v8  ;;  %v11230_v19 = vsel %vm11131_vm9, %v11227_v8, %v11229_v61  ;;  %v5930_v51 = vshrl.u32 %v22824_v60, 16  ;;  %v5892_v8 = vsel %vm5434_vm3, %v5882_v5, %v5891_v1 }
 0x48f   : > { %18135 = vmatmul.mubr.msk.bf16.gmra.mrb[92].mxu1 %vm1323_vm2, %v5874_v48  ;;  %v5921_v48 = vshrl.u32 %v22819_v39, 16  ;;  %v20365_v39 = vld [vmem:[%s20493_s8 + $0x1c0] sm:$0xff]   ;;  %v5917_v42 = vrot.slane %v5915_v22, 2  ;;  %v5939_v60 = vshrl.u32 %v22837_v10, 16  ;;  %v11232_v5 = vsel %vm11131_vm9, %v11229_v61, %v11231_v37 }
 0x490   : > { %18138 = vmatprep.mubr.msk.bf16.mxu1 %vm1323_vm2, %v5883_v36  ;;  %v11235_v44 = vrot.slane %v20365_v39, 3  ;;  %v11234_v1 = vsel %vm11131_vm9, %v11231_v37, %v11233_v58 }
 0x491   : > { %v5923_v59 = vrot.slane %v5921_v48, 1  ;;  %v5918_v48 = vor.u32 %v5917_v42, %v5914_v21  ;;  %v5966_v21 = vshrl.u32 %v22868_v40, 16  ;;  %v5969_v42 = vshll.u32 %v22868_v40, 16 }
 0x492   : > { %v23186_v3 = vpop.f32.mrb[56].mxu1  ;;  %18687 = vmatmul.mubr.msk.bf16.gmra.mrb[92].mxu0 %vm1323_vm2, %v11228_v34  ;;  %v5942_v34 = vshll.u32 %v22837_v10, 16  ;;  %v23214_v22 = vsel %vm11131_vm9, %v11233_v58, %v11235_v44  ;;  %v5948_v10 = vshrl.u32 %v22842_v62, 16  ;;  %v5960_v58 = vshll.u32 %v22863_v38, 16 }
 0x493   : > { %25385 = vst [vmem:[#allocation75_spill] sm:$0xff] %v23186_v3  ;;  %v23191_v36 = vpop.f32.mrb[57].mxu1  ;;  %v5909_v3 = vor.u32 %v5908_v23, %v5905_v6  ;;  %18690 = vmatprep.mubr.msk.bf16.mxu0 %vm1323_vm2, %v11230_v19  ;;  %v5932_v6 = vrot.slane %v5930_v51, 1  ;;  %v5935_v23 = vrot.slane %v5933_v26, 2  ;;  %v5951_v19 = vshll.u32 %v22842_v62, 16  ;;  %v20367_v26 = vld [vmem:[%s20493_s8 + $0x1d0] sm:$0xff]  }
 0x494   : > { %25386 = vst [vmem:[#allocation76_spill] sm:$0xff] %v23191_v36  ;;  %v23198_v41 = vpop.f32.mrb[58].mxu1  ;;  %v5944_v39 = vrot.slane %v5942_v34, 2  ;;  %v11241_v62 = vrot.slane %v20368_v50, 3  ;;  %v5975_v34 = vshrl.u32 %v22889_v43, 16 }
 0x495   : > { %25387 = vst [vmem:[#allocation77_spill] sm:$0xff] %v23198_v41  ;;  %v23203_v36 = vpop.f32.mrb[59].mxu1  ;;  %v5926_v41 = vrot.slane %v5924_v25, 2  ;;  %v5910_v29 = vsel %vm5434_vm3, %v5900_v20, %v5909_v3  ;;  %v20366_v25 = vld [vmem:[%s20493_s8 + $0x1c8] sm:$0xff]   ;;  %v5957_v20 = vshrl.u32 %v22863_v38, 16  ;;  %v5936_v55 = vor.u32 %v5935_v23, %v5932_v6  ;;  %v20369_v23 = vld [vmem:[%s20493_s8 + $0x1e0] sm:$0xff]  }
 0x496   : > { %25388 = vst [vmem:[#allocation78_spill] sm:$0xff] %v23203_v36  ;;  %v11237_v61 = vrot.slane %v20366_v25, 3  ;;  %v5978_v38 = vshll.u32 %v22889_v43, 16  ;;  %v5919_v50 = vsel %vm5434_vm3, %v5909_v3, %v5918_v48 }
 0x497   : > { %18139 = vmatmul.mubr.msk.bf16.gmra.mrb[96].mxu1 %vm1323_vm2, %v5892_v8  ;;  %v5941_v8 = vrot.slane %v5939_v60, 1  ;;  %v5927_v51 = vor.u32 %v5926_v41, %v5923_v59  ;;  %v5950_v59 = vrot.slane %v5948_v10, 1  ;;  %v5953_v41 = vrot.slane %v5951_v19, 2 }
 0x498   : > { %18142 = vmatprep.mubr.msk.bf16.mxu1 %vm1323_vm2, %v5901_v47  ;;  %v11239_v47 = vrot.slane %v20367_v26, 3  ;;  %v11238_v6 = vsel %vm11131_vm9, %v11235_v44, %v11237_v61  ;;  %v5959_v19 = vrot.slane %v5957_v20, 1  ;;  %v5971_v44 = vrot.slane %v5969_v42, 2  ;;  %v20371_v42 = vld [vmem:[%s20493_s8 + $0x1f0] sm:$0xff]  }
 0x499   : > { %v5945_v40 = vor.u32 %v5944_v39, %v5941_v8  ;;  %v5928_v26 = vsel %vm5434_vm3, %v5918_v48, %v5927_v51  ;;  %v5937_v43 = vsel %vm5434_vm3, %v5927_v51, %v5936_v55  ;;  %v5954_v8 = vor.u32 %v5953_v41, %v5950_v59  ;;  %v20370_v39 = vld [vmem:[%s20493_s8 + $0x1e8] sm:$0xff]  }
 0x49a   : > { %v23219_v37 = vpop.f32.mrb[60].mxu1  ;;  %18691 = vmatmul.mubr.msk.bf16.gmra.mrb[96].mxu0 %vm1323_vm2, %v11232_v5  ;;  %v11243_v5 = vrot.slane %v20369_v23, 3  ;;  %v23242_v10 = vsel %vm11131_vm9, %v11237_v61, %v11239_v47  ;;  %v23247_v3 = vsel %vm11131_vm9, %v11239_v47, %v11241_v62  ;;  %v11245_v48 = vrot.slane %v20370_v39, 3 }
 0x49b   : > { %25389 = vst [vmem:[#allocation79_spill] sm:$0xff] %v23219_v37  ;;  %v23224_v36 = vpop.f32.mrb[61].mxu1  ;;  %18694 = vmatprep.mubr.msk.bf16.mxu0 %vm1323_vm2, %v11234_v1  ;;  %v5968_v1 = vrot.slane %v5966_v21, 1  ;;  %v5977_v61 = vrot.slane %v5975_v34, 1  ;;  %v5980_v23 = vrot.slane %v5978_v38, 2  ;;  %v23252_v20 = vsel %vm5434_vm3, %v5936_v55, %v5945_v40 }
 0x49c   : > { %25390 = vst [vmem:[#allocation80_spill] sm:$0xff] %v23224_v36  ;;  %v23230_v60 = vpop.f32.mrb[62].mxu1  ;;  %v5984_v51 = vshrl.u32 %v22894_v17, 16  ;;  %v5987_v47 = vshll.u32 %v22894_v17, 16  ;;  %v11247_v59 = vrot.slane %v20371_v42, 3  ;;  %v5993_v41 = vshrl.u32 %v22915_v45, 16 }
 0x49d   : > { %25391 = vst [vmem:[#allocation81_spill] sm:$0xff] %v23230_v60  ;;  %v23234_v25 = vpop.f32.mrb[63].mxu1  ;;  %v5962_v60 = vrot.slane %v5960_v58, 2  ;;  %v5996_v34 = vshll.u32 %v22915_v45, 16  ;;  %v5972_v55 = vor.u32 %v5971_v44, %v5968_v1  ;;  %v6002_v39 = vshrl.u32 %v22920_v54, 16  ;;  %v20373_v42 = vld [vmem:[%s20493_s8 + $0x200] sm:$0xff]  }
 0x49e   : > { %25392 = vst [vmem:[#allocation82_spill] sm:$0xff] %v23234_v25  ;;  %v6005_v25 = vshll.u32 %v22920_v54, 16  ;;  %v5981_v45 = vor.u32 %v5980_v23, %v5977_v61  ;;  %v11251_v1 = vrot.slane %v20373_v42, 3  ;;  %v5989_v54 = vrot.slane %v5987_v47, 2 }
 0x49f   : > { %18143 = vmatmul.mubr.msk.bf16.gmra.mrb[100].mxu1 %vm1323_vm2, %v5910_v29  ;;  %v23255_v29 = vsel %vm11131_vm9, %v11241_v62, %v11243_v5  ;;  %v5963_v21 = vor.u32 %v5962_v60, %v5959_v19  ;;  %v23274_v60 = vsel %vm5434_vm3, %v5945_v40, %v5954_v8  ;;  %v23277_v19 = vsel %vm11131_vm9, %v11243_v5, %v11245_v48 }
 0x4a0   : > { %18146 = vmatprep.mubr.msk.bf16.mxu1 %vm1323_vm2, %v5919_v50  ;;  %v20372_v50 = vld [vmem:[%s20493_s8 + $0x1f8] sm:$0xff]   ;;  %v23289_v5 = vsel %vm11131_vm9, %v11245_v48, %v11247_v59  ;;  %v5995_v61 = vrot.slane %v5993_v41, 1  ;;  %v5998_v23 = vrot.slane %v5996_v34, 2  ;;  %v6004_v47 = vrot.slane %v6002_v39, 1  ;;  %v20374_v34 = vld [vmem:[%s20493_s8 + $0x208] sm:$0xff]  }
 0x4a1   : > { %v11249_v62 = vrot.slane %v20372_v50, 3  ;;  %v5986_v50 = vrot.slane %v5984_v51, 1  ;;  %v23286_v40 = vsel %vm5434_vm3, %v5954_v8, %v5963_v21  ;;  %v23300_v8 = vsel %vm5434_vm3, %v5972_v55, %v5981_v45 }
 0x4a2   : > { %v23259_v58 = vpop.f32.mrb[64].mxu1  ;;  %18695 = vmatmul.mubr.msk.bf16.gmra.mrb[100].mxu0 %vm1323_vm2, %v23214_v22  ;;  %v6014_v22 = vshll.u32 %v22950_v7, 16  ;;  %v6023_v41 = vshll.u32 %v22955_v28, 16  ;;  %v11253_v42 = vrot.slane %v20374_v34, 3  ;;  %v6038_v37 = vshrl.u32 %v22981_v2, 16 }
 0x4a3   : > { %25393 = vst [vmem:[#allocation83_spill] sm:$0xff] %v23259_v58  ;;  %v23264_v38 = vpop.f32.mrb[65].mxu1  ;;  %18698 = vmatprep.mubr.msk.bf16.mxu0 %vm1323_vm2, %v11238_v6  ;;  %v23293_v6 = vsel %vm5434_vm3, %v5963_v21, %v5972_v55  ;;  %v23296_v51 = vsel %vm11131_vm9, %v11247_v59, %v11249_v62  ;;  %v23303_v48 = vsel %vm11131_vm9, %v11249_v62, %v11251_v1  ;;  %v6032_v55 = vshll.u32 %v22976_v30, 16  ;;  %v20376_v58 = vld [vmem:[%s20493_s8 + $0x218] sm:$0xff]  }
 0x4a4   : > { %25394 = vst [vmem:[#allocation84_spill] sm:$0xff] %v23264_v38  ;;  %v23271_v17 = vpop.f32.mrb[66].mxu1  ;;  %v6011_v38 = vshrl.u32 %v22950_v7, 16  ;;  %v6007_v7 = vrot.slane %v6005_v25, 2  ;;  %v5990_v21 = vor.u32 %v5989_v54, %v5986_v50  ;;  %v6016_v39 = vrot.slane %v6014_v22, 2 }
 0x4a5   : > { %25395 = vst [vmem:[#allocation85_spill] sm:$0xff] %v23271_v17  ;;  %v23280_v44 = vpop.f32.mrb[67].mxu1  ;;  %v5999_v25 = vor.u32 %v5998_v23, %v5995_v61  ;;  %v6029_v17 = vshrl.u32 %v22976_v30, 16  ;;  %v11257_v36 = vrot.slane %v20376_v58, 3  ;;  %v6025_v50 = vrot.slane %v6023_v41, 2  ;;  %v20378_v23 = vld [vmem:[%s20493_s8 + $0x220] sm:$0xff]  }
 0x4a6   : > { %25396 = vst [vmem:[#allocation86_spill] sm:$0xff] %v23280_v44  ;;  %v6013_v59 = vrot.slane %v6011_v38, 1  ;;  %v20375_v44 = vld [vmem:[%s20493_s8 + $0x210] sm:$0xff]   ;;  %v6008_v62 = vor.u32 %v6007_v7, %v6004_v47  ;;  %v23320_v30 = vsel %vm5434_vm3, %v5981_v45, %v5990_v21  ;;  %v23323_v58 = vsel %vm11131_vm9, %v11251_v1, %v11253_v42 }
 0x4a7   : > { %18147 = vmatmul.mubr.msk.bf16.gmra.mrb[104].mxu1 %vm1323_vm2, %v5928_v26  ;;  %v6020_v26 = vshrl.u32 %v22955_v28, 16  ;;  %v6041_v28 = vshll.u32 %v22981_v2, 16  ;;  %v20377_v54 = vld [vmem:[%s20493_s8 + $0x230] ss:$0 sps:$4 sm:$0x33]   ;;  %v11259_v2 = vrot.slane %v20378_v23, 3  ;;  %v23327_v47 = vsel %vm5434_vm3, %v5990_v21, %v5999_v25 }
 0x4a8   : > { %18150 = vmatprep.mubr.msk.bf16.mxu1 %vm1323_vm2, %v5937_v43  ;;  %v11255_v43 = vrot.slane %v20375_v44, 3  ;;  %v6047_v22 = vshrl.u32 %v20377_v54, 16  ;;  %v6050_v44 = vshll.u32 %v20377_v54, 16  ;;  %v6017_v61 = vor.u32 %v6016_v39, %v6013_v59 }
 0x4a9   : > { %v6022_v38 = vrot.slane %v6020_v26, 1  ;;  %v6031_v7 = vrot.slane %v6029_v17, 1  ;;  %v6034_v26 = vrot.slane %v6032_v55, 2  ;;  %v23340_v45 = vsel %vm5434_vm3, %v5999_v25, %v6008_v62 }
 0x4aa   : > { %18699 = vmatmul.mubr.msk.bf16.gmra.mrb[104].mxu0 %vm1323_vm2, %v23242_v10  ;;  %v23330_v10 = vsel %vm11131_vm9, %v11253_v42, %v11255_v43  ;;  %v23343_v1 = vsel %vm11131_vm9, %v11255_v43, %v11257_v36  ;;  %v6040_v21 = vrot.slane %v6038_v37, 1  ;;  %v6043_v34 = vrot.slane %v6041_v28, 2  ;;  %v20379_v28 = vld [vmem:[%s20493_s8 + $0x228] sm:$0xff]  }
 0x4ab   : > { %18702 = vmatprep.mubr.msk.bf16.mxu0 %vm1323_vm2, %v23247_v3  ;;  %v23335_v3 = vld [vmem:[%s25250_s2] ss:$0 sm:$0xff]  ;;  %v6026_v59 = vor.u32 %v6025_v50, %v6022_v38  ;;  %v6049_v39 = vrot.slane %v6047_v22, 1  ;;  %v6052_v55 = vrot.slane %v6050_v44, 2  ;;  %v23355_v43 = vsel %vm5434_vm3, %v6008_v62, %v6017_v61  ;;  %v20380_v44 = vld [vmem:[%s20493_s8 + $0x230] sm:$0xff]  }
 0x4ac   : > { %v6035_v22 = vor.u32 %v6034_v26, %v6031_v7  ;;  %v11263_v23 = vrot.slane %v20380_v44, 3  ;;  %v6044_v62 = vor.u32 %v6043_v34, %v6040_v21  ;;  %v20382_v34 = vld [vmem:[%s20493_s8 + $0x240] ss:$0 sps:$4 sm:$0x77]  }
 0x4ad   : > { %v18596_v41 = vpop.f32.mrb[0].mxu0  ;;  %v6053_v7 = vor.u32 %v6052_v55, %v6049_v39 }
 0x4ae   : > { %v18732_v17 = vadd.f32 %v18596_v41, %v22845_v12  ;;  %v11510_v42 = vpop.f32.mrb[1].mxu0  ;;  %v23358_v12 = vsel %vm11131_vm9, %v11257_v36, %v11259_v2 }
 0x4af   : > { %18151 = vmatmul.mubr.msk.bf16.gmra.mrb[108].mxu1 %vm1323_vm2, %v23252_v20  ;;  %v23351_v20 = vld [vmem:[%s25251_s3] ss:$0 sm:$0xff]  ;;  %v18733_v25 = vadd.f32 %v11510_v42, %v22848_v63  ;;  %v18597_v37 = vpop.f32.mrb[2].mxu0  ;;  %v20381_v42 = vld [vmem:[%s20493_s8 + $0x238] sm:$0xff]   ;;  %v23403_v44 = vsel %vm5434_vm3, %v6044_v62, %v6053_v7 }
 0x4b0   : > { %18154 = vmatprep.mubr.msk.bf16.mxu1 %vm1323_vm2, %v23274_v60  ;;  %v11261_v60 = vrot.slane %v20379_v28, 3  ;;  %v12198_v38 = vmul.f32 %v18732_v17, %v23335_v3  ;;  %v18734_v50 = vadd.f32 %v18597_v37, %v22851_v49  ;;  %v11513_v54 = vpop.f32.mrb[3].mxu0  ;;  %v11265_v56 = vrot.slane %v20381_v42, 3  ;;  %v25397_v7 = vld [vmem:[#allocation37_spill] sm:$0xff] }
 0x4b1   : > { %v12196_v41 = vmul.f32 %v18733_v25, %v23335_v3  ;;  %v18735_v63 = vadd.f32 %v11513_v54, %v22854_v14  ;;  %v23372_v49 = vsel %vm5434_vm3, %v6017_v61, %v6026_v59  ;;  %v11267_v17 = vrot.slane %v20382_v34, 3 }
 0x4b2   : > { %v12341_v36 = vadd.f32 %v23351_v20, %v12198_v38  ;;  %v12199_v28 = vmul.f32 %v18734_v50, %v23335_v3  ;;  %18703 = vmatmul.mubr.msk.bf16.gmra.mrb[108].mxu0 %vm1323_vm2, %v23255_v29  ;;  %v23379_v21 = vsel %vm11131_vm9, %v11259_v2, %v11261_v60  ;;  %v23384_v61 = vsel %vm5434_vm3, %v6026_v59, %v6035_v22 }
 0x4b3   : > { %v12339_v26 = vadd.f32 %v23351_v20, %v12196_v41  ;;  %v12197_v14 = vmul.f32 %v18735_v63, %v23335_v3  ;;  %18706 = vmatprep.mubr.msk.bf16.mxu0 %vm1323_vm2, %v23277_v19  ;;  %v23387_v39 = vsel %vm11131_vm9, %v11261_v60, %v11263_v23  ;;  %v23393_v19 = vsel %vm5434_vm3, %v6035_v22, %v6044_v62 }
 0x4b4   : > { %v12477_v25 = vmax.f32 %v12341_v36, 0.0  ;;  %v12342_v29 = vadd.f32 %v23351_v20, %v12199_v28  ;;  %v23396_v2 = vsel %vm11131_vm9, %v11263_v23, %v11265_v56  ;;  %v23408_v23 = vsel %vm11131_vm9, %v11265_v56, %v11267_v17 }
 0x4b5   : > { %v12475_v55 = vmax.f32 %v12339_v26, 0.0  ;;  %v12340_v37 = vadd.f32 %v23351_v20, %v12197_v14  ;;  %v18600_v38 = vpop.f32.mrb[4].mxu0 }
 0x4b6   : > { %v13429_v50 = vmul.f32 %v22227_v52, %v12477_v25  ;;  %v12478_v59 = vmax.f32 %v12342_v29, 0.0  ;;  %v18736_v54 = vadd.f32 %v18600_v38, %v22871_v0  ;;  %v11526_v60 = vpop.f32.mrb[5].mxu0 }
 0x4b7   : > { %18155 = vmatmul.mubr.msk.bf16.gmra.mrb[112].mxu1 %vm1323_vm2, %v23286_v40  ;;  %v13427_v40 = vmul.f32 %v22229_v24, %v12475_v55  ;;  %v12476_v41 = vmax.f32 %v12340_v37, 0.0  ;;  %v18737_v22 = vadd.f32 %v11526_v60, %v22874_v9  ;;  %v18601_v63 = vpop.f32.mrb[6].mxu0 }
 0x4b8   : > { %18158 = vmatprep.mubr.msk.bf16.mxu1 %vm1323_vm2, %v23293_v6  ;;  %v16733_v52 = vpack.c.bf16 %v13429_v50, %v13429_v50  ;;  %v13430_v42 = vmul.f32 %v22252_v57, %v12478_v59  ;;  %v12202_v0 = vmul.f32 %v18736_v54, %v23335_v3  ;;  %v18738_v36 = vadd.f32 %v18601_v63, %v22877_v18  ;;  %v11529_v6 = vpop.f32.mrb[7].mxu0 }
 0x4b9   : > { %v16731_v28 = vpack.c.bf16 %v13427_v40, %v13427_v40  ;;  %v13428_v62 = vmul.f32 %v22254_v31, %v12476_v41  ;;  %v12200_v24 = vmul.f32 %v18737_v22, %v23335_v3  ;;  %v18739_v26 = vadd.f32 %v11529_v6, %v25397_v7 }
 0x4ba   : > { %v14004_v9 = vshrl.u32 %v16733_v52, 16  ;;  %v14007_v14 = vshll.u32 %v16733_v52, 16  ;;  %v16734_v34 = vpack.c.bf16 %v13430_v42, %v13430_v42  ;;  %v12345_v56 = vadd.f32 %v23351_v20, %v12202_v0  ;;  %18707 = vmatmul.mubr.msk.bf16.gmra.mrb[112].mxu0 %vm1323_vm2, %v23289_v5 }
 0x4bb   : > { %v13985_v57 = vshrl.u32 %v16731_v28, 16  ;;  %v13988_v17 = vshll.u32 %v16731_v28, 16  ;;  %v16732_v18 = vpack.c.bf16 %v13428_v62, %v13428_v62  ;;  %v12343_v25 = vadd.f32 %v23351_v20, %v12200_v24  ;;  %18710 = vmatprep.mubr.msk.bf16.mxu0 %vm1323_vm2, %v23296_v51  ;;  %v15483_v51 = vld [vmem:[%s21698_s27 + $0x10] sm:$0xe] }
 0x4bc   : > { %v14006_v31 = vrot.slane %v14004_v9, 6  ;;  %v14009_v29 = vrot.slane %v14007_v14, 7  ;;  %v14014_v55 = vshrl.u32 %v16734_v34, 16  ;;  %v14017_v37 = vshll.u32 %v16734_v34, 16  ;;  %v25403_v9 = vld [vmem:[#allocation8_spill] sm:$0xff] }
 0x4bd   : > { %v13987_v38 = vrot.slane %v13985_v57, 6  ;;  %v13990_v50 = vrot.slane %v13988_v17, 7  ;;  %v13994_v59 = vshrl.u32 %v16732_v18, 16  ;;  %v13997_v54 = vshll.u32 %v16732_v18, 16  ;;  %v18604_v60 = vpop.f32.mrb[8].mxu0  ;;  %v25404_v18 = vld [vmem:[#allocation5_spill] sm:$0xff] }
 0x4be   : > { %v14010_v5 = vor.u32 %v14009_v29, %v14006_v31  ;;  %v25398_v40 = vmov 0  ;;  %v14016_v41 = vrot.slane %v14014_v55, 6  ;;  %v14019_v22 = vrot.slane %v14017_v37, 7  ;;  %v11542_v52 = vpop.f32.mrb[9].mxu0 }
 0x4bf   : > { %18159 = vmatmul.mubr.msk.bf16.gmra.mrb[116].mxu1 %vm1323_vm2, %v23300_v8  ;;  %v25399_v40 = vsel %vm23426_vm0, 4294967295, %v25398_v40  ;;  %v12481_v63 = vmax.f32 %v12345_v56, 0.0  ;;  %v13991_v42 = vor.u32 %v13990_v50, %v13987_v38  ;;  %v13996_v0 = vrot.slane %v13994_v59, 6  ;;  %v18605_v62 = vpop.f32.mrb[10].mxu0 }
 0x4c0   : > { %25400 = vst [vmem:[#allocation37_spill] sm:$0xff] %v25399_v40  ;;  %18162 = vmatprep.mubr.msk.bf16.mxu1 %vm1323_vm2, %v23320_v30  ;;  %v13999_v6 = vrot.slane %v13997_v54, 7  ;;  %v12479_v28 = vmax.f32 %v12343_v25, 0.0  ;;  %v14012_v24 = vrot.slane %v14010_v5, 4  ;;  %v14020_v7 = vor.u32 %v14019_v22, %v14016_v41  ;;  %v11545_v30 = vpop.f32.mrb[11].mxu0  ;;  %v25405_v22 = vld [vmem:[#allocation38_spill] sm:$0xff] }
 0x4c1   : > { %v13433_v14 = vmul.f32 %v25403_v9, %v12481_v63  ;;  %v12203_v34 = vmul.f32 %v18738_v36, %v23335_v3  ;;  %v13992_v56 = vrot.slane %v13991_v42, 4  ;;  %v15484_v57 = vsel %vm23426_vm0, %v13991_v42, %v15483_v51 }
 0x4c2   : > { %v14000_v17 = vor.u32 %v13999_v6, %v13996_v0  ;;  %v13431_v31 = vmul.f32 %v25404_v18, %v12479_v28  ;;  %15485 = vst [vmem:[%s21698_s27 + $0x10] sm:$0xe] %v15484_v57  ;;  %v14021_v25 = vsel %vm23435_vm1, %v14012_v24, %v14020_v7  ;;  %v14022_v29 = vrot.slane %v14020_v7, 4  ;;  %18711 = vmatmul.mubr.msk.bf16.gmra.mrb[116].mxu0 %vm1323_vm2, %v23303_v48  ;;  %v25406_v24 = vld [vmem:[#allocation6_spill] sm:$0xff] }
 0x4c3   : > { %v16737_v55 = vpack.c.bf16 %v13433_v14, %v13433_v14  ;;  %v12346_v37 = vadd.f32 %v23351_v20, %v12203_v34  ;;  %15488 = vst.msk [vmem:[%s21698_s27 + $0x1c] sm:$0xf] %vm13563_vm6, %v14021_v25  ;;  %v12201_v59 = vmul.f32 %v18739_v26, %v23335_v3  ;;  %18714 = vmatprep.mubr.msk.bf16.mxu0 %vm1323_vm2, %v23323_v58  ;;  %v25408_v25 = vld [vmem:[#allocation40_spill] sm:$0xff] }
 0x4c4   : > { %v14001_v36 = vsel %vm23435_vm1, %v13992_v56, %v14000_v17  ;;  %v14002_v38 = vrot.slane %v14000_v17, 4  ;;  %v16735_v50 = vpack.c.bf16 %v13431_v31, %v13431_v31  ;;  %v18740_v48 = vadd.f32 %v18604_v60, %v25405_v22  ;;  %v25407_v56 = vld [vmem:[#allocation39_spill] sm:$0xff] }
 0x4c5   : > { %15486 = vst.msk [vmem:[%s21698_s27 + $0x14] sm:$0xf] %vm13563_vm6, %v14001_v36  ;;  %v14044_v54 = vshrl.u32 %v16737_v55, 16  ;;  %v14047_v51 = vshll.u32 %v16737_v55, 16  ;;  %v12482_v41 = vmax.f32 %v12346_v37, 0.0  ;;  %v12344_v6 = vadd.f32 %v23351_v20, %v12201_v59  ;;  %v18608_v28 = vpop.f32.mrb[12].mxu0 }
 0x4c6   : > { %v14011_v63 = vsel %vm23435_vm1, %v14002_v38, %v14010_v5  ;;  %v14024_v42 = vshrl.u32 %v16735_v50, 16  ;;  %v14027_v0 = vshll.u32 %v16735_v50, 16  ;;  %v12206_v9 = vmul.f32 %v18740_v48, %v23335_v3  ;;  %v11558_v60 = vpop.f32.mrb[13].mxu0  ;;  %v25409_v38 = vld [vmem:[#allocation7_spill] sm:$0xff]  ;;  %v25410_v59 = vld [vmem:[#allocation41_spill] sm:$0xff] }
 0x4c7   : > { %18163 = vmatmul.mubr.msk.bf16.gmra.mrb[120].mxu1 %vm1323_vm2, %v23327_v47  ;;  %15487 = vst.msk [vmem:[%s21698_s27 + $0x18] sm:$0xf] %vm13563_vm6, %v14011_v63  ;;  %v14046_v58 = vrot.slane %v14044_v54, 6  ;;  %v14049_v26 = vrot.slane %v14047_v51, 7  ;;  %v13434_v7 = vmul.f32 %v25406_v24, %v12482_v41  ;;  %v12480_v34 = vmax.f32 %v12344_v6, 0.0  ;;  %v23472_v17 = vpop.f32.mrb[14].mxu0 }
 0x4c8   : > { %18166 = vmatprep.mubr.msk.bf16.mxu1 %vm1323_vm2, %v23340_v45  ;;  %v14026_v5 = vrot.slane %v14024_v42, 6  ;;  %v14029_v14 = vrot.slane %v14027_v0, 7  ;;  %v18741_v57 = vadd.f32 %v11542_v52, %v25407_v56  ;;  %v12349_v31 = vadd.f32 %v23351_v20, %v12206_v9  ;;  %v23478_v37 = vpop.f32.mrb[15].mxu0  ;;  %v25411_v6 = vld [vmem:[#allocation12_spill] sm:$0xff] }
 0x4c9   : > { %v23474_v47 = vor.u32 %v14049_v26, %v14046_v58  ;;  %v16738_v18 = vpack.c.bf16 %v13434_v7, %v13434_v7  ;;  %v18742_v55 = vadd.f32 %v18605_v62, %v25408_v25  ;;  %v13432_v45 = vmul.f32 %v25409_v38, %v12480_v34  ;;  %v25412_v34 = vld [vmem:[#allocation43_spill] sm:$0xff]  ;;  %v25413_v25 = vld [vmem:[#allocation9_spill] sm:$0xff] }
 0x4ca   : > { %v14030_v36 = vor.u32 %v14029_v14, %v14026_v5  ;;  %v12204_v50 = vmul.f32 %v18741_v57, %v23335_v3  ;;  %v18743_v54 = vadd.f32 %v11545_v30, %v25410_v59  ;;  %v12485_v22 = vmax.f32 %v12349_v31, 0.0  ;;  %18715 = vmatmul.mubr.msk.bf16.gmra.mrb[120].mxu0 %vm1323_vm2, %v23330_v10 }
 0x4cb   : > { %v14052_v52 = vrot.slane %v23474_v47, 4  ;;  %v14054_v51 = vshrl.u32 %v16738_v18, 16  ;;  %v14057_v41 = vshll.u32 %v16738_v18, 16  ;;  %v16736_v63 = vpack.c.bf16 %v13432_v45, %v13432_v45  ;;  %18718 = vmatprep.mubr.msk.bf16.mxu0 %vm1323_vm2, %v23343_v1 }
 0x4cc   : > { %v14031_v62 = vsel %vm23435_vm1, %v14022_v29, %v14030_v36  ;;  %v14032_v48 = vrot.slane %v14030_v36, 4  ;;  %v12347_v42 = vadd.f32 %v23351_v20, %v12204_v50  ;;  %v13437_v58 = vmul.f32 %v25411_v6, %v12485_v22 }
 0x4cd   : > { %15489 = vst.msk [vmem:[%s21698_s27 + $0x20] sm:$0xf] %vm13563_vm6, %v14031_v62  ;;  %v14056_v30 = vrot.slane %v14054_v51, 6  ;;  %v14059_v0 = vrot.slane %v14057_v41, 7  ;;  %v12207_v26 = vmul.f32 %v18742_v55, %v23335_v3  ;;  %v14034_v24 = vshrl.u32 %v16736_v63, 16  ;;  %v23496_v9 = vpop.f32.mrb[16].mxu0 }
 0x4ce   : > { %v14037_v10 = vshll.u32 %v16736_v63, 16  ;;  %v12483_v7 = vmax.f32 %v12347_v42, 0.0  ;;  %v12205_v29 = vmul.f32 %v18743_v54, %v23335_v3  ;;  %v16741_v1 = vpack.c.bf16 %v13437_v58, %v13437_v58  ;;  %v23502_v57 = vpop.f32.mrb[17].mxu0  ;;  %v25414_v42 = vld [vmem:[#allocation44_spill] sm:$0xff] }
 0x4cf   : > { %18167 = vmatmul.mubr.msk.bf16.gmra.mrb[124].mxu1 %vm1323_vm2, %v23355_v43  ;;  %v14060_v5 = vor.u32 %v14059_v0, %v14056_v30  ;;  %v12350_v14 = vadd.f32 %v23351_v20, %v12207_v26  ;;  %v18744_v56 = vadd.f32 %v18608_v28, %v25412_v34  ;;  %v14036_v18 = vrot.slane %v14034_v24, 6  ;;  %v23508_v38 = vpop.f32.mrb[18].mxu0  ;;  %v25415_v24 = vld [vmem:[#allocation10_spill] sm:$0xff] }
 0x4d0   : > { %18170 = vmatprep.mubr.msk.bf16.mxu1 %vm1323_vm2, %v23372_v49  ;;  %v14039_v31 = vrot.slane %v14037_v10, 7  ;;  %v13435_v55 = vmul.f32 %v25413_v25, %v12483_v7  ;;  %v12348_v36 = vadd.f32 %v23351_v20, %v12205_v29  ;;  %v14084_v50 = vshrl.u32 %v16741_v1, 16  ;;  %v23512_v28 = vpop.f32.mrb[19].mxu0 }
 0x4d1   : > { %v14061_v43 = vsel %vm23435_vm1, %v14052_v52, %v14060_v5  ;;  %v14062_v45 = vrot.slane %v14060_v5, 4  ;;  %v14087_v59 = vshll.u32 %v16741_v1, 16  ;;  %v12486_v51 = vmax.f32 %v12350_v14, 0.0 }
 0x4d2   : > { %15492 = vst.msk [vmem:[%s21698_s27 + $0x2c] sm:$0xf] %vm13563_vm6, %v14061_v43  ;;  %v14040_v49 = vor.u32 %v14039_v31, %v14036_v18  ;;  %v16739_v54 = vpack.c.bf16 %v13435_v55, %v13435_v55  ;;  %v12484_v41 = vmax.f32 %v12348_v36, 0.0  ;;  %v14086_v22 = vrot.slane %v14084_v50, 6  ;;  %18719 = vmatmul.mubr.msk.bf16.gmra.mrb[124].mxu0 %vm1323_vm2, %v23358_v12  ;;  %v25417_v55 = vld [vmem:[#allocation45_spill] sm:$0xff] }
 0x4d3   : > { %v14089_v62 = vrot.slane %v14087_v59, 7  ;;  %v12210_v63 = vmul.f32 %v18744_v56, %v23335_v3  ;;  %v18745_v30 = vadd.f32 %v11558_v60, %v25414_v42  ;;  %18722 = vmatprep.mubr.msk.bf16.mxu0 %vm1323_vm2, %v23379_v21  ;;  %v13438_v10 = vmul.f32 %v25415_v24, %v12486_v51  ;;  %v25416_v60 = vld [vmem:[#allocation11_spill] sm:$0xff] }
 0x4d4   : > { %v14041_v52 = vsel %vm23435_vm1, %v14032_v48, %v14040_v49  ;;  %v14042_v0 = vrot.slane %v14040_v49, 4  ;;  %v14064_v6 = vshrl.u32 %v16739_v54, 16  ;;  %v14067_v58 = vshll.u32 %v16739_v54, 16 }
 0x4d5   : > { %15490 = vst.msk [vmem:[%s21698_s27 + $0x24] sm:$0xf] %vm13563_vm6, %v14041_v52  ;;  %v23526_v26 = vor.u32 %v14089_v62, %v14086_v22  ;;  %v13436_v7 = vmul.f32 %v25416_v60, %v12484_v41  ;;  %v12353_v12 = vadd.f32 %v23351_v20, %v12210_v63  ;;  %v12208_v1 = vmul.f32 %v18745_v30, %v23335_v3  ;;  %v23535_v14 = vpop.f32.mrb[20].mxu0  ;;  %v25419_v62 = vld [vmem:[#allocation16_spill] sm:$0xff] }
 0x4d6   : > { %v14051_v48 = vsel %vm23435_vm1, %v14042_v0, %v23474_v47  ;;  %v14066_v29 = vrot.slane %v14064_v6, 6  ;;  %v14069_v5 = vrot.slane %v14067_v58, 7  ;;  %v16742_v34 = vpack.c.bf16 %v13438_v10, %v13438_v10  ;;  %v23542_v31 = vpop.f32.mrb[21].mxu0  ;;  %v25420_v6 = vld [vmem:[#allocation13_spill] sm:$0xff] }
 0x4d7   : > { %18171 = vmatmul.mubr.msk.bf16.gmra.mrb[128].mxu1 %vm1323_vm2, %v23384_v61  ;;  %15491 = vst.msk [vmem:[%s21698_s27 + $0x28] sm:$0xf] %vm13563_vm6, %v14051_v48  ;;  %v14092_v21 = vrot.slane %v23526_v26, 4  ;;  %v16740_v56 = vpack.c.bf16 %v13436_v7, %v13436_v7  ;;  %v12489_v18 = vmax.f32 %v12353_v12, 0.0  ;;  %v12351_v25 = vadd.f32 %v23351_v20, %v12208_v1  ;;  %v25418_v61 = vld [vmem:[#allocation46_spill] sm:$0xff]  ;;  %v23551_v50 = vpop.f32.mrb[22].mxu0 }
 0x4d8   : > { %18174 = vmatprep.mubr.msk.bf16.mxu1 %vm1323_vm2, %v23393_v19  ;;  %v14070_v47 = vor.u32 %v14069_v5, %v14066_v29  ;;  %v18746_v36 = vadd.f32 %v23472_v17, %v25417_v55  ;;  %v18747_v43 = vadd.f32 %v23478_v37, %v25418_v61  ;;  %v14094_v59 = vshrl.u32 %v16742_v34, 16  ;;  %v23553_v41 = vpop.f32.mrb[23].mxu0  ;;  %v25421_v7 = vld [vmem:[#allocation47_spill] sm:$0xff]  ;;  %v25422_v48 = vld [vmem:[#allocation48_spill] sm:$0xff] }
 0x4d9   : > { %v14097_v49 = vshll.u32 %v16742_v34, 16  ;;  %v14074_v54 = vshrl.u32 %v16740_v56, 16  ;;  %v14077_v51 = vshll.u32 %v16740_v56, 16  ;;  %v13441_v63 = vmul.f32 %v25419_v62, %v12489_v18 }
 0x4da   : > { %v14071_v19 = vsel %vm23435_vm1, %v14062_v45, %v14070_v47  ;;  %v14072_v22 = vrot.slane %v14070_v47, 4  ;;  %v12487_v42 = vmax.f32 %v12351_v25, 0.0  ;;  %v14096_v17 = vrot.slane %v14094_v59, 6  ;;  %18723 = vmatmul.mubr.msk.bf16.gmra.mrb[128].mxu0 %vm1323_vm2, %v23387_v39 }
 0x4db   : > { %15493 = vst.msk [vmem:[%s21698_s27 + $0x30] sm:$0xf] %vm13563_vm6, %v14071_v19  ;;  %v14099_v30 = vrot.slane %v14097_v49, 7  ;;  %v14076_v37 = vrot.slane %v14074_v54, 6  ;;  %v14079_v52 = vrot.slane %v14077_v51, 7  ;;  %v16745_v0 = vpack.c.bf16 %v13441_v63, %v13441_v63  ;;  %18726 = vmatprep.mubr.msk.bf16.mxu0 %vm1323_vm2, %v23396_v2  ;;  %v25423_v63 = vld [vmem:[#allocation14_spill] sm:$0xff] }
 0x4dc   : > { %v13439_v58 = vmul.f32 %v25420_v6, %v12487_v42  ;;  %v12211_v24 = vmul.f32 %v18746_v36, %v23335_v3  ;;  %v12209_v45 = vmul.f32 %v18747_v43, %v23335_v3  ;;  %v18748_v12 = vadd.f32 %v23496_v9, %v25421_v7 }
 0x4dd   : > { %v14100_v10 = vor.u32 %v14099_v30, %v14096_v17  ;;  %v14080_v60 = vor.u32 %v14079_v52, %v14076_v37  ;;  %v18749_v39 = vadd.f32 %v23502_v57, %v25422_v48  ;;  %v14124_v29 = vshrl.u32 %v16745_v0, 16  ;;  %v23572_v56 = vpop.f32.mrb[24].mxu0  ;;  %v25424_v30 = vld [vmem:[#allocation49_spill] sm:$0xff] }
 0x4de   : > { %v14127_v5 = vshll.u32 %v16745_v0, 16  ;;  %v16743_v1 = vpack.c.bf16 %v13439_v58, %v13439_v58  ;;  %v12354_v34 = vadd.f32 %v23351_v20, %v12211_v24  ;;  %v23580_v57 = vpop.f32.mrb[25].mxu0  ;;  %v12352_v59 = vadd.f32 %v23351_v20, %v12209_v45  ;;  %v25425_v58 = vld [vmem:[#allocation50_spill] sm:$0xff] }
 0x4df   : > { %18175 = vmatmul.mubr.msk.bf16.gmra.mrb[132].mxu1 %vm1323_vm2, %v23403_v44  ;;  %v14101_v2 = vsel %vm23435_vm1, %v14092_v21, %v14100_v10  ;;  %v14102_v18 = vrot.slane %v14100_v10, 4  ;;  %v14081_v9 = vsel %vm23435_vm1, %v14072_v22, %v14080_v60  ;;  %v14082_v47 = vrot.slane %v14080_v60, 4  ;;  %v23586_v44 = vpop.f32.mrb[26].mxu0  ;;  %v25426_v10 = vld [vmem:[#allocation15_spill] sm:$0xff] }
 0x4e0   : > { %15496 = vst.msk [vmem:[%s21698_s27 + $0x3c] sm:$0xf] %vm13563_vm6, %v14101_v2  ;;  %15494 = vst.msk [vmem:[%s21698_s27 + $0x34] sm:$0xf] %vm13563_vm6, %v14081_v9  ;;  %v14126_v25 = vrot.slane %v14124_v29, 6  ;;  %v14129_v55 = vrot.slane %v14127_v5, 7  ;;  %v12214_v49 = vmul.f32 %v18748_v12, %v23335_v3  ;;  %v12212_v62 = vmul.f32 %v18749_v39, %v23335_v3 }
 0x4e1   : > { %v14104_v36 = vshrl.u32 %v16743_v1, 16  ;;  %v14107_v61 = vshll.u32 %v16743_v1, 16  ;;  %v14091_v21 = vsel %vm23435_vm1, %v14082_v47, %v23526_v26  ;;  %v12490_v43 = vmax.f32 %v12354_v34, 0.0  ;;  %v23593_v54 = vpop.f32.mrb[27].mxu0  ;;  %v25427_v34 = vld [vmem:[#allocation18_spill] sm:$0xff]  ;;  %v25428_v47 = vld [vmem:[#allocation3_spill] sm:$0xff] }
 0x4e2   : > { %15495 = vst.msk [vmem:[%s21698_s27 + $0x38] sm:$0xf] %vm13563_vm6, %v14091_v21  ;;  %v23597_v51 = vor.u32 %v14129_v55, %v14126_v25  ;;  %v12488_v17 = vmax.f32 %v12352_v59, 0.0  ;;  %v12357_v26 = vadd.f32 %v23351_v20, %v12214_v49  ;;  %v18750_v37 = vadd.f32 %v23508_v38, %v25424_v30  ;;  %18727 = vmatmul.mubr.msk.bf16.gmra.mrb[132].mxu0 %vm1323_vm2, %v23408_v23 }
 0x4e3   : > { %v14106_v19 = vrot.slane %v14104_v36, 6  ;;  %v14109_v22 = vrot.slane %v14107_v61, 7  ;;  %v13442_v42 = vmul.f32 %v25423_v63, %v12490_v43  ;;  %v12355_v6 = vadd.f32 %v23351_v20, %v12212_v62  ;;  %v25429_v36 = vld [vmem:[#allocation51_spill] sm:$0xff] }
 0x4e4   : > { %v14132_v52 = vrot.slane %v23597_v51, 4  ;;  %v18751_v24 = vadd.f32 %v23512_v28, %v25425_v58  ;;  %v13440_v60 = vmul.f32 %v25426_v10, %v12488_v17  ;;  %v12493_v7 = vmax.f32 %v12357_v26, 0.0 }
 0x4e5   : > { %v14110_v0 = vor.u32 %v14109_v22, %v14106_v19  ;;  %v16746_v45 = vpack.c.bf16 %v13442_v42, %v13442_v42  ;;  %v12215_v12 = vmul.f32 %v18750_v37, %v23335_v3  ;;  %v12491_v39 = vmax.f32 %v12355_v6, 0.0  ;;  %v23615_v29 = vpop.f32.mrb[28].mxu0 }
 0x4e6   : > { %v12213_v23 = vmul.f32 %v18751_v24, %v23335_v3  ;;  %v16744_v28 = vpack.c.bf16 %v13440_v60, %v13440_v60  ;;  %v13445_v2 = vmul.f32 %v25427_v34, %v12493_v7  ;;  %v23620_v9 = vpop.f32.mrb[29].mxu0  ;;  %v18752_v61 = vadd.f32 %v23535_v14, %v25429_v36  ;;  %v25430_v7 = vld [vmem:[#allocation2_spill] sm:$0xff] }
 0x4e7   : > { %v14111_v38 = vsel %vm23435_vm1, %v14102_v18, %v14110_v0  ;;  %v14112_v48 = vrot.slane %v14110_v0, 4  ;;  %v14134_v5 = vshrl.u32 %v16746_v45, 16  ;;  %v14137_v1 = vshll.u32 %v16746_v45, 16  ;;  %v23627_v21 = vpop.f32.mrb[30].mxu0 }
 0x4e8   : > { %15497 = vst.msk [vmem:[%s21698_s27 + $0x40] sm:$0xf] %vm13563_vm6, %v14111_v38  ;;  %v13443_v25 = vmul.f32 %v25428_v47, %v12491_v39  ;;  %v12358_v55 = vadd.f32 %v23351_v20, %v12215_v12  ;;  %v12356_v18 = vadd.f32 %v23351_v20, %v12213_v23  ;;  %v14114_v49 = vshrl.u32 %v16744_v28, 16  ;;  %v23629_v22 = vpop.f32.mrb[31].mxu0  ;;  %v25431_v47 = vld [vmem:[#allocation17_spill] sm:$0xff] }
 0x4e9   : > { %v14136_v43 = vrot.slane %v14134_v5, 6  ;;  %v14139_v59 = vrot.slane %v14137_v1, 7  ;;  %v14117_v19 = vshll.u32 %v16744_v28, 16  ;;  %v16749_v62 = vpack.c.bf16 %v13445_v2, %v13445_v2 }
 0x4ea   : > { %v16747_v63 = vpack.c.bf16 %v13443_v25, %v13443_v25  ;;  %v12494_v42 = vmax.f32 %v12358_v55, 0.0  ;;  %v12492_v17 = vmax.f32 %v12356_v18, 0.0  ;;  %v14116_v30 = vrot.slane %v14114_v49, 6 }
 0x4eb   : > { %v14140_v26 = vor.u32 %v14139_v59, %v14136_v43  ;;  %v14119_v37 = vrot.slane %v14117_v19, 7  ;;  %v12218_v0 = vmul.f32 %v18752_v61, %v23335_v3  ;;  %v14164_v6 = vshrl.u32 %v16749_v62, 16  ;;  %v25432_v61 = vld [vmem:[#allocation52_spill] sm:$0xff] }
 0x4ec   : > { %v14167_v14 = vshll.u32 %v16749_v62, 16  ;;  %v14144_v58 = vshrl.u32 %v16747_v63, 16  ;;  %v14147_v24 = vshll.u32 %v16747_v63, 16  ;;  %v13446_v12 = vmul.f32 %v25430_v7, %v12494_v42 }
 0x4ed   : > { %v14141_v45 = vsel %vm23435_vm1, %v14132_v52, %v14140_v26  ;;  %v14142_v10 = vrot.slane %v14140_v26, 4  ;;  %v14120_v60 = vor.u32 %v14119_v37, %v14116_v30  ;;  %v14166_v38 = vrot.slane %v14164_v6, 6  ;;  %v23637_v1 = vpop.f32.mrb[32].mxu0 }
 0x4ee   : > { %15500 = vst.msk [vmem:[%s21698_s27 + $0x4c] sm:$0xf] %vm13563_vm6, %v14141_v45  ;;  %v14169_v39 = vrot.slane %v14167_v14, 7  ;;  %v14146_v23 = vrot.slane %v14144_v58, 6  ;;  %v14149_v5 = vrot.slane %v14147_v24, 7  ;;  %v16750_v2 = vpack.c.bf16 %v13446_v12, %v13446_v12  ;;  %v23642_v25 = vpop.f32.mrb[33].mxu0 }
 0x4ef   : > { %v14121_v28 = vsel %vm23435_vm1, %v14112_v48, %v14120_v60  ;;  %v14122_v34 = vrot.slane %v14120_v60, 4  ;;  %v13444_v52 = vmul.f32 %v25431_v47, %v12492_v17  ;;  %v12361_v36 = vadd.f32 %v23351_v20, %v12218_v0  ;;  %v23649_v59 = vpop.f32.mrb[34].mxu0  ;;  %v25434_v24 = vld [vmem:[#allocation53_spill] sm:$0xff]  ;;  %v25435_v60 = vld [vmem:[#allocation54_spill] sm:$0xff] }
 0x4f0   : > { %15498 = vst.msk [vmem:[%s21698_s27 + $0x44] sm:$0xf] %vm13563_vm6, %v14121_v28  ;;  %v14170_v55 = vor.u32 %v14169_v39, %v14166_v38  ;;  %v14150_v18 = vor.u32 %v14149_v5, %v14146_v23  ;;  %v18753_v43 = vadd.f32 %v23542_v31, %v25432_v61  ;;  %v14174_v49 = vshrl.u32 %v16750_v2, 16  ;;  %v23654_v63 = vpop.f32.mrb[35].mxu0  ;;  %v25436_v39 = vld [vmem:[#allocation55_spill] sm:$0xff] }
 0x4f1   : > { %v14131_v48 = vsel %vm23435_vm1, %v14122_v34, %v23597_v51  ;;  %v14177_v19 = vshll.u32 %v16750_v2, 16  ;;  %v16748_v62 = vpack.c.bf16 %v13444_v52, %v13444_v52  ;;  %v12497_v30 = vmax.f32 %v12361_v36, 0.0  ;;  %v25433_v51 = vld [vmem:[#allocation22_spill] sm:$0xff] }
 0x4f2   : > { %15499 = vst.msk [vmem:[%s21698_s27 + $0x48] sm:$0xf] %vm13563_vm6, %v14131_v48  ;;  %v14172_v42 = vrot.slane %v14170_v55, 4  ;;  %v14151_v17 = vsel %vm23435_vm1, %v14142_v10, %v14150_v18  ;;  %v14152_v26 = vrot.slane %v14150_v18, 4  ;;  %v14176_v31 = vrot.slane %v14174_v49, 6 }
 0x4f3   : > { %15501 = vst.msk [vmem:[%s21698_s27 + $0x50] sm:$0xf] %vm13563_vm6, %v14151_v17  ;;  %v14179_v37 = vrot.slane %v14177_v19, 7  ;;  %v14154_v0 = vshrl.u32 %v16748_v62, 16  ;;  %v14157_v6 = vshll.u32 %v16748_v62, 16  ;;  %v13449_v14 = vmul.f32 %v25433_v51, %v12497_v30 }
 0x4f4   : > { %v12216_v58 = vmul.f32 %v18753_v43, %v23335_v3  ;;  %v18754_v45 = vadd.f32 %v23551_v50, %v25434_v24  ;;  %v18755_v7 = vadd.f32 %v23553_v41, %v25435_v60  ;;  %v18756_v23 = vadd.f32 %v23572_v56, %v25436_v39  ;;  %v25440_v39 = vld [vmem:[#allocation19_spill] sm:$0xff] }
 0x4f5   : > { %v23668_v10 = vor.u32 %v14179_v37, %v14176_v31  ;;  %v14156_v12 = vrot.slane %v14154_v0, 6  ;;  %v14159_v38 = vrot.slane %v14157_v6, 7  ;;  %v16753_v5 = vpack.c.bf16 %v13449_v14, %v13449_v14  ;;  %v23675_v47 = vpop.f32.mrb[36].mxu0  ;;  %v25437_v0 = vld [vmem:[#allocation20_spill] sm:$0xff] }
 0x4f6   : > { %v12359_v28 = vadd.f32 %v23351_v20, %v12216_v58  ;;  %v12219_v34 = vmul.f32 %v18754_v45, %v23335_v3  ;;  %v12217_v2 = vmul.f32 %v18755_v7, %v23335_v3  ;;  %v12222_v18 = vmul.f32 %v18756_v23, %v23335_v3  ;;  %v23682_v56 = vpop.f32.mrb[37].mxu0 }
 0x4f7   : > { %v14181_v50 = vsel %vm23435_vm1, %v14172_v42, %v23668_v10  ;;  %v14182_v41 = vrot.slane %v23668_v10, 4  ;;  %v14160_v52 = vor.u32 %v14159_v38, %v14156_v12  ;;  %v14204_v36 = vshrl.u32 %v16753_v5, 16  ;;  %v23687_v49 = vpop.f32.mrb[38].mxu0  ;;  %v25439_v10 = vld [vmem:[#allocation21_spill] sm:$0xff] }
 0x4f8   : > { %15504 = vst.msk [vmem:[%s21698_s27 + $0x5c] sm:$0xf] %vm13563_vm6, %v14181_v50  ;;  %v14207_v61 = vshll.u32 %v16753_v5, 16  ;;  %v12495_v43 = vmax.f32 %v12359_v28, 0.0  ;;  %v12362_v48 = vadd.f32 %v23351_v20, %v12219_v34  ;;  %v12360_v42 = vadd.f32 %v23351_v20, %v12217_v2  ;;  %v23693_v30 = vpop.f32.mrb[39].mxu0  ;;  %v25441_v5 = vld [vmem:[#allocation26_spill] sm:$0xff] }
 0x4f9   : > { %v14161_v19 = vsel %vm23435_vm1, %v14152_v26, %v14160_v52  ;;  %v14162_v62 = vrot.slane %v14160_v52, 4  ;;  %v12365_v17 = vadd.f32 %v23351_v20, %v12222_v18  ;;  %v14206_v31 = vrot.slane %v14204_v36, 6  ;;  %v25438_v26 = vld [vmem:[#allocation56_spill] sm:$0xff] }
 0x4fa   : > { %15502 = vst.msk [vmem:[%s21698_s27 + $0x54] sm:$0xf] %vm13563_vm6, %v14161_v19  ;;  %v14209_v37 = vrot.slane %v14207_v61, 7  ;;  %v13447_v6 = vmul.f32 %v25437_v0, %v12495_v43  ;;  %v12498_v51 = vmax.f32 %v12362_v48, 0.0  ;;  %v12496_v58 = vmax.f32 %v12360_v42, 0.0 }
 0x4fb   : > { %v14171_v14 = vsel %vm23435_vm1, %v14162_v62, %v14170_v55  ;;  %v12501_v24 = vmax.f32 %v12365_v17, 0.0  ;;  %v18757_v45 = vadd.f32 %v23580_v57, %v25438_v26  ;;  %v18758_v38 = vadd.f32 %v23586_v44, %v23015_v53 }
 0x4fc   : > { %15503 = vst.msk [vmem:[%s21698_s27 + $0x58] sm:$0xf] %vm13563_vm6, %v14171_v14  ;;  %v23704_v60 = vor.u32 %v14209_v37, %v14206_v31  ;;  %v16751_v7 = vpack.c.bf16 %v13447_v6, %v13447_v6  ;;  %v13450_v12 = vmul.f32 %v25439_v10, %v12498_v51  ;;  %v13448_v23 = vmul.f32 %v25440_v39, %v12496_v58  ;;  %v25442_v39 = vld [vmem:[#allocation24_spill] sm:$0xff] }
 0x4fd   : > { %v13453_v28 = vmul.f32 %v25441_v5, %v12501_v24  ;;  %v12220_v55 = vmul.f32 %v18757_v45, %v23335_v3  ;;  %v18759_v34 = vadd.f32 %v23593_v54, %v23018_v32  ;;  %v23715_v18 = vpop.f32.mrb[40].mxu0  ;;  %v12223_v44 = vmul.f32 %v18758_v38, %v23335_v3 }
 0x4fe   : > { %v14212_v57 = vrot.slane %v23704_v60, 4  ;;  %v14184_v2 = vshrl.u32 %v16751_v7, 16  ;;  %v14187_v50 = vshll.u32 %v16751_v7, 16  ;;  %v16754_v52 = vpack.c.bf16 %v13450_v12, %v13450_v12  ;;  %v23719_v43 = vpop.f32.mrb[41].mxu0 }
 0x4ff   : > { %v16752_v36 = vpack.c.bf16 %v13448_v23, %v13448_v23  ;;  %v16757_v61 = vpack.c.bf16 %v13453_v28, %v13453_v28  ;;  %v12363_v53 = vadd.f32 %v23351_v20, %v12220_v55  ;;  %v23721_v32 = vpop.f32.mrb[42].mxu0  ;;  %v12366_v55 = vadd.f32 %v23351_v20, %v12223_v44 }
 0x500   : > { %v14186_v48 = vrot.slane %v14184_v2, 6  ;;  %v14189_v19 = vrot.slane %v14187_v50, 7  ;;  %v14214_v62 = vshrl.u32 %v16754_v52, 16  ;;  %v14217_v42 = vshll.u32 %v16754_v52, 16  ;;  %v23723_v0 = vpop.f32.mrb[43].mxu0 }
 0x501   : > { %v14194_v54 = vshrl.u32 %v16752_v36, 16  ;;  %v14197_v17 = vshll.u32 %v16752_v36, 16  ;;  %v14244_v31 = vshrl.u32 %v16757_v61, 16  ;;  %v14247_v37 = vshll.u32 %v16757_v61, 16 }
 0x502   : > { %v14190_v6 = vor.u32 %v14189_v19, %v14186_v48  ;;  %v14216_v51 = vrot.slane %v14214_v62, 6  ;;  %v14219_v14 = vrot.slane %v14217_v42, 7  ;;  %v12499_v58 = vmax.f32 %v12363_v53, 0.0 }
 0x503   : > { %v14196_v24 = vrot.slane %v14194_v54, 6  ;;  %v14199_v26 = vrot.slane %v14197_v17, 7  ;;  %v14246_v45 = vrot.slane %v14244_v31, 6  ;;  %v14249_v7 = vrot.slane %v14247_v37, 7  ;;  %v25443_v17 = vld [vmem:[#allocation25_spill] sm:$0xff]  ;;  %v25444_v37 = vld [vmem:[#allocation4_spill] sm:$0xff] }
 0x504   : > { %v14191_v10 = vsel %vm23435_vm1, %v14182_v41, %v14190_v6  ;;  %v14192_v12 = vrot.slane %v14190_v6, 4  ;;  %v14220_v38 = vor.u32 %v14219_v14, %v14216_v51  ;;  %v13451_v23 = vmul.f32 %v25442_v39, %v12499_v58  ;;  %v25446_v39 = vld [vmem:[#allocation57_spill] sm:$0xff] }
 0x505   : > { %15505 = vst.msk [vmem:[%s21698_s27 + $0x60] sm:$0xf] %vm13563_vm6, %v14191_v10  ;;  %v14200_v5 = vor.u32 %v14199_v26, %v14196_v24  ;;  %v23730_v28 = vor.u32 %v14249_v7, %v14246_v45  ;;  %v12221_v2 = vmul.f32 %v18759_v34, %v23335_v3  ;;  %v18760_v41 = vadd.f32 %v23615_v29, %v23032_v35  ;;  %v23738_v61 = vpop.f32.mrb[44].mxu0 }
 0x506   : > { %v14221_v50 = vsel %vm23435_vm1, %v14212_v57, %v14220_v38  ;;  %v14222_v52 = vrot.slane %v14220_v38, 4  ;;  %v16755_v36 = vpack.c.bf16 %v13451_v23, %v13451_v23  ;;  %v12502_v34 = vmax.f32 %v12366_v55, 0.0  ;;  %v23745_v19 = vpop.f32.mrb[45].mxu0 }
 0x507   : > { %15508 = vst.msk [vmem:[%s21698_s27 + $0x6c] sm:$0xf] %vm13563_vm6, %v14221_v50  ;;  %v14201_v53 = vsel %vm23435_vm1, %v14192_v12, %v14200_v5  ;;  %v14202_v48 = vrot.slane %v14200_v5, 4  ;;  %v14252_v44 = vrot.slane %v23730_v28, 4  ;;  %v12364_v35 = vadd.f32 %v23351_v20, %v12221_v2  ;;  %v23751_v42 = vpop.f32.mrb[46].mxu0 }
 0x508   : > { %15506 = vst.msk [vmem:[%s21698_s27 + $0x64] sm:$0xf] %vm13563_vm6, %v14201_v53  ;;  %v14224_v57 = vshrl.u32 %v16755_v36, 16  ;;  %v14227_v62 = vshll.u32 %v16755_v36, 16  ;;  %v12226_v29 = vmul.f32 %v18760_v41, %v23335_v3  ;;  %v13454_v31 = vmul.f32 %v25443_v17, %v12502_v34  ;;  %v23761_v14 = vpop.f32.mrb[47].mxu0 }
 0x509   : > { %v14211_v54 = vsel %vm23435_vm1, %v14202_v48, %v23704_v60  ;;  %v18761_v6 = vadd.f32 %v23620_v9, %v25444_v37  ;;  %v18762_v51 = vadd.f32 %v23627_v21, %v23038_v4  ;;  %v12500_v26 = vmax.f32 %v12364_v35, 0.0  ;;  %v25445_v4 = vld [vmem:[#allocation23_spill] sm:$0xff]  ;;  %v25447_v48 = vld [vmem:[#allocation30_spill] sm:$0xff] }
 0x50a   : > { %15507 = vst.msk [vmem:[%s21698_s27 + $0x68] sm:$0xf] %vm13563_vm6, %v14211_v54  ;;  %v14226_v58 = vrot.slane %v14224_v57, 6  ;;  %v14229_v24 = vrot.slane %v14227_v62, 7  ;;  %v12369_v45 = vadd.f32 %v23351_v20, %v12226_v29  ;;  %v16758_v7 = vpack.c.bf16 %v13454_v31, %v13454_v31 }
 0x50b   : > { %v12224_v60 = vmul.f32 %v18761_v6, %v23335_v3  ;;  %v12227_v10 = vmul.f32 %v18762_v51, %v23335_v3  ;;  %v18763_v9 = vadd.f32 %v23629_v22, %v23041_v15  ;;  %v13452_v21 = vmul.f32 %v25445_v4, %v12500_v26  ;;  %v25448_v6 = vld [vmem:[#allocation28_spill] sm:$0xff] }
 0x50c   : > { %v14230_v12 = vor.u32 %v14229_v24, %v14226_v58  ;;  %v12505_v38 = vmax.f32 %v12369_v45, 0.0  ;;  %v18764_v23 = vadd.f32 %v23637_v1, %v25446_v39  ;;  %v14254_v5 = vshrl.u32 %v16758_v7, 16  ;;  %v25449_v58 = vld [vmem:[#allocation29_spill] sm:$0xff] }
 0x50d   : > { %v14257_v55 = vshll.u32 %v16758_v7, 16  ;;  %v12367_v2 = vadd.f32 %v23351_v20, %v12224_v60  ;;  %v12370_v50 = vadd.f32 %v23351_v20, %v12227_v10  ;;  %v16756_v53 = vpack.c.bf16 %v13452_v21, %v13452_v21  ;;  %v23778_v22 = vpop.f32.mrb[48].mxu0 }
 0x50e   : > { %v14231_v36 = vsel %vm23435_vm1, %v14222_v52, %v14230_v12  ;;  %v14232_v41 = vrot.slane %v14230_v12, 4  ;;  %v13457_v15 = vmul.f32 %v25447_v48, %v12505_v38  ;;  %v14256_v34 = vrot.slane %v14254_v5, 6  ;;  %v23782_v35 = vpop.f32.mrb[49].mxu0 }
 0x50f   : > { %15509 = vst.msk [vmem:[%s21698_s27 + $0x70] sm:$0xf] %vm13563_vm6, %v14231_v36  ;;  %v14259_v57 = vrot.slane %v14257_v55, 7  ;;  %v12503_v1 = vmax.f32 %v12367_v2, 0.0  ;;  %v12506_v62 = vmax.f32 %v12370_v50, 0.0  ;;  %v14234_v29 = vshrl.u32 %v16756_v53, 16 }
 0x510   : > { %v14237_v54 = vshll.u32 %v16756_v53, 16  ;;  %v16761_v17 = vpack.c.bf16 %v13457_v15, %v13457_v15  ;;  %v12225_v52 = vmul.f32 %v18763_v9, %v23335_v3  ;;  %v23785_v31 = vpop.f32.mrb[50].mxu0  ;;  %v12230_v26 = vmul.f32 %v18764_v23, %v23335_v3 }
 0x511   : > { %v14260_v37 = vor.u32 %v14259_v57, %v14256_v34  ;;  %v13455_v51 = vmul.f32 %v25448_v6, %v12503_v1  ;;  %v13458_v24 = vmul.f32 %v25449_v58, %v12506_v62  ;;  %v23790_v45 = vpop.f32.mrb[51].mxu0  ;;  %v14236_v7 = vrot.slane %v14234_v29, 6 }
 0x512   : > { %v14239_v60 = vrot.slane %v14237_v54, 7  ;;  %v14284_v10 = vshrl.u32 %v16761_v17, 16  ;;  %v14287_v12 = vshll.u32 %v16761_v17, 16  ;;  %v12368_v3 = vadd.f32 %v23351_v20, %v12225_v52  ;;  %v25450_v17 = vld [vmem:[#allocation27_spill] sm:$0xff] }
 0x513   : > { %v14261_v4 = vsel %vm23435_vm1, %v14252_v44, %v14260_v37  ;;  %v14262_v21 = vrot.slane %v14260_v37, 4  ;;  %v16759_v9 = vpack.c.bf16 %v13455_v51, %v13455_v51  ;;  %v16762_v38 = vpack.c.bf16 %v13458_v24, %v13458_v24  ;;  %v23815_v37 = vld [vmem:[%s25251_s3] ss:$0 sm:$0xff] }
 0x514   : > { %15512 = vst.msk [vmem:[%s21698_s27 + $0x7c] sm:$0xf] %vm13563_vm6, %v14261_v4  ;;  %v14240_v39 = vor.u32 %v14239_v60, %v14236_v7  ;;  %v14286_v5 = vrot.slane %v14284_v10, 6  ;;  %v14289_v55 = vrot.slane %v14287_v12, 7  ;;  %v12504_v15 = vmax.f32 %v12368_v3, 0.0 }
 0x515   : > { %v14264_v23 = vshrl.u32 %v16759_v9, 16  ;;  %v14267_v2 = vshll.u32 %v16759_v9, 16  ;;  %v14294_v50 = vshrl.u32 %v16762_v38, 16  ;;  %v14297_v36 = vshll.u32 %v16762_v38, 16  ;;  %v23801_v34 = vpop.f32.mrb[52].mxu0  ;;  %v25452_v9 = vld [vmem:[#allocation59_spill] sm:$0xff] }
 0x516   : > { %v14241_v53 = vsel %vm23435_vm1, %v14232_v41, %v14240_v39  ;;  %v14242_v48 = vrot.slane %v14240_v39, 4  ;;  %v23799_v44 = vor.u32 %v14289_v55, %v14286_v5  ;;  %v23805_v29 = vpop.f32.mrb[53].mxu0  ;;  %v13456_v52 = vmul.f32 %v25450_v17, %v12504_v15 }
 0x517   : > { %15510 = vst.msk [vmem:[%s21698_s27 + $0x74] sm:$0xf] %vm13563_vm6, %v14241_v53  ;;  %v14266_v57 = vrot.slane %v14264_v23, 6  ;;  %v14269_v1 = vrot.slane %v14267_v2, 7  ;;  %v14296_v62 = vrot.slane %v14294_v50, 6  ;;  %v14299_v20 = vrot.slane %v14297_v36, 7 }
 0x518   : > { %v14251_v54 = vsel %vm23435_vm1, %v14242_v48, %v23730_v28  ;;  %v14292_v41 = vrot.slane %v23799_v44, 4  ;;  %v12373_v6 = vadd.f32 %v23815_v37, %v12230_v26  ;;  %v23818_v51 = vpop.f32.mrb[54].mxu0  ;;  %v25451_v28 = vld [vmem:[#allocation58_spill] sm:$0xff]  ;;  %v18766_v60 = vadd.f32 %v23649_v59, %v23060_v33  ;;  %v25454_v50 = vld [vmem:[#allocation60_spill] sm:$0xff] }
 0x519   : > { %15511 = vst.msk [vmem:[%s21698_s27 + $0x78] sm:$0xf] %vm13563_vm6, %v14251_v54  ;;  %v14270_v58 = vor.u32 %v14269_v1, %v14266_v57  ;;  %v23822_v24 = vor.u32 %v14299_v20, %v14296_v62  ;;  %v18765_v7 = vadd.f32 %v23642_v25, %v25451_v28  ;;  %v23828_v10 = vpop.f32.mrb[55].mxu0  ;;  %v16760_v12 = vpack.c.bf16 %v13456_v52, %v13456_v52 }
 0x51a   : > { %v12509_v4 = vmax.f32 %v12373_v6, 0.0  ;;  %v18767_v26 = vadd.f32 %v23654_v63, %v23063_v46  ;;  %v18768_v38 = vadd.f32 %v23675_v47, %v25452_v9  ;;  %v25453_v46 = vld [vmem:[#allocation34_spill] sm:$0xff]  ;;  %v18769_v36 = vadd.f32 %v23682_v56, %v25454_v50  ;;  %v12940_v9 = vpop.permute.xlu0 %12939 }
 0x51b   : > { %v14271_v39 = vsel %vm23435_vm1, %v14262_v21, %v14270_v58  ;;  %v14272_v5 = vrot.slane %v14270_v58, 4  ;;  %v14301_v25 = vsel %vm23435_vm1, %v14292_v41, %v23822_v24  ;;  %v14302_v33 = vrot.slane %v23822_v24, 4  ;;  %v23848_v47 = vld [vmem:[%s25250_s2] ss:$0 sm:$0xff] }
 0x51c   : > { %15513 = vst.msk [vmem:[%s21698_s27 + $0x80] sm:$0xf] %vm13563_vm6, %v14271_v39  ;;  %15516 = vst.msk [vmem:[%s21698_s27 + $0x8c] sm:$0xf] %vm13563_vm6, %v14301_v25  ;;  %v14274_v59 = vshrl.u32 %v16760_v12, 16  ;;  %v14277_v55 = vshll.u32 %v16760_v12, 16  ;;  %v13461_v63 = vmul.f32 %v25453_v46, %v12509_v4  ;;  %v12228_v21 = vmul.f32 %v23848_v47, %v18765_v7 }
 0x51d   : > { %v12231_v3 = vmul.f32 %v23848_v47, %v18766_v60  ;;  %v12229_v23 = vmul.f32 %v23848_v47, %v18767_v26  ;;  %v12234_v2 = vmul.f32 %v23848_v47, %v18768_v38  ;;  %v23857_v1 = vpop.f32.mrb[56].mxu0  ;;  %v12232_v41 = vmul.f32 %v23848_v47, %v18769_v36 }
 0x51e   : > { %v14276_v53 = vrot.slane %v14274_v59, 6  ;;  %v14279_v48 = vrot.slane %v14277_v55, 7  ;;  %v16765_v15 = vpack.c.bf16 %v13461_v63, %v13461_v63  ;;  %v12371_v57 = vadd.f32 %v23815_v37, %v12228_v21  ;;  %v23863_v17 = vpop.f32.mrb[57].mxu0  ;;  %v25455_v55 = vld [vmem:[#allocation32_spill] sm:$0xff]  ;;  %v25456_v63 = vld [vmem:[#allocation33_spill] sm:$0xff] }
 0x51f   : > { %v12374_v62 = vadd.f32 %v23815_v37, %v12231_v3  ;;  %v12372_v20 = vadd.f32 %v23815_v37, %v12229_v23  ;;  %v12377_v54 = vadd.f32 %v23815_v37, %v12234_v2  ;;  %v23865_v28 = vpop.f32.mrb[58].mxu0  ;;  %v12375_v4 = vadd.f32 %v23815_v37, %v12232_v41  ;;  %v25457_v3 = vld [vmem:[#allocation31_spill] sm:$0xff] }
 0x520   : > { %v14280_v52 = vor.u32 %v14279_v48, %v14276_v53  ;;  %v14324_v56 = vshrl.u32 %v16765_v15, 16  ;;  %v14327_v6 = vshll.u32 %v16765_v15, 16  ;;  %v12507_v58 = vmax.f32 %v12371_v57, 0.0  ;;  %v23868_v26 = vpop.f32.mrb[59].mxu0 }
 0x521   : > { %v12510_v7 = vmax.f32 %v12374_v62, 0.0  ;;  %v12508_v60 = vmax.f32 %v12372_v20, 0.0  ;;  %v12513_v12 = vmax.f32 %v12377_v54, 0.0  ;;  %v12511_v53 = vmax.f32 %v12375_v4, 0.0  ;;  %v25458_v54 = vld [vmem:[#allocation36_spill] sm:$0xff] }
 0x522   : > { %v14281_v38 = vsel %vm23435_vm1, %v14272_v5, %v14280_v52  ;;  %v14282_v39 = vrot.slane %v14280_v52, 4  ;;  %v14326_v25 = vrot.slane %v14324_v56, 6  ;;  %v14329_v59 = vrot.slane %v14327_v6, 7 }
 0x523   : > { %15514 = vst.msk [vmem:[%s21698_s27 + $0x84] sm:$0xf] %vm13563_vm6, %v14281_v38  ;;  %v13459_v46 = vmul.f32 %v25455_v55, %v12507_v58  ;;  %v13462_v21 = vmul.f32 %v25456_v63, %v12510_v7  ;;  %v13460_v23 = vmul.f32 %v25457_v3, %v12508_v60  ;;  %v13465_v2 = vmul.f32 %v12940_v9, %v12513_v12 }
 0x524   : > { %v14291_v50 = vsel %vm23435_vm1, %v14282_v39, %v23799_v44  ;;  %v14330_v36 = vor.u32 %v14329_v59, %v14326_v25  ;;  %v18770_v5 = vadd.f32 %v23687_v49, %v23082_v16  ;;  %v13463_v41 = vmul.f32 %v25458_v54, %v12511_v53 }
 0x525   : > { %15515 = vst.msk [vmem:[%s21698_s27 + $0x88] sm:$0xf] %vm13563_vm6, %v14291_v50  ;;  %v16763_v48 = vpack.c.bf16 %v13459_v46, %v13459_v46  ;;  %v16766_v15 = vpack.c.bf16 %v13462_v21, %v13462_v21  ;;  %v16764_v57 = vpack.c.bf16 %v13460_v23, %v13460_v23  ;;  %v16769_v62 = vpack.c.bf16 %v13465_v2, %v13465_v2  ;;  %v23888_v44 = vpop.f32.mrb[60].mxu0 }
 0x526   : > { %v14332_v20 = vrot.slane %v14330_v36, 4  ;;  %v12235_v52 = vmul.f32 %v23848_v47, %v18770_v5  ;;  %v18771_v56 = vadd.f32 %v23693_v30, %v23085_v27  ;;  %v23890_v49 = vpop.f32.mrb[61].mxu0  ;;  %v12945_v27 = vpop.permute.xlu1 %12944  ;;  %v16767_v50 = vpack.c.bf16 %v13463_v41, %v13463_v41 }
 0x527   : > { %v14304_v6 = vshrl.u32 %v16763_v48, 16  ;;  %v14307_v58 = vshll.u32 %v16763_v48, 16  ;;  %v14334_v7 = vshrl.u32 %v16766_v15, 16  ;;  %v14337_v16 = vshll.u32 %v16766_v15, 16  ;;  %v23892_v38 = vpop.f32.mrb[62].mxu0  ;;  %v23897_v5 = vpop.permute.xlu0 %12949 }
 0x528   : > { %v14314_v60 = vshrl.u32 %v16764_v57, 16  ;;  %v14317_v12 = vshll.u32 %v16764_v57, 16  ;;  %v14364_v4 = vshrl.u32 %v16769_v62, 16  ;;  %v14367_v9 = vshll.u32 %v16769_v62, 16  ;;  %v23894_v46 = vpop.f32.mrb[63].mxu0  ;;  %v25459_v62 = vld [vmem:[#allocation61_spill] sm:$0xff] }
 0x529   : > { %v14306_v39 = vrot.slane %v14304_v6, 6  ;;  %v14309_v25 = vrot.slane %v14307_v58, 7  ;;  %v14336_v59 = vrot.slane %v14334_v7, 6  ;;  %v14339_v55 = vrot.slane %v14337_v16, 7 }
 0x52a   : > { %v14316_v30 = vrot.slane %v14314_v60, 6  ;;  %v14319_v63 = vrot.slane %v14317_v12, 7  ;;  %v14366_v21 = vrot.slane %v14364_v4, 6  ;;  %v14369_v3 = vrot.slane %v14367_v9, 7  ;;  %v23923_v9 = vpop.permute.xlu1 %12954 }
 0x52b   : > { %v14310_v23 = vor.u32 %v14309_v25, %v14306_v39  ;;  %v14340_v2 = vor.u32 %v14339_v55, %v14336_v59  ;;  %v12378_v53 = vadd.f32 %v23815_v37, %v12235_v52  ;;  %v12233_v57 = vmul.f32 %v23848_v47, %v18771_v56  ;;  %v25460_v55 = vld [vmem:[#allocation62_spill] sm:$0xff] }
 0x52c   : > { %v14320_v48 = vor.u32 %v14319_v63, %v14316_v30  ;;  %v23899_v15 = vor.u32 %v14369_v3, %v14366_v21  ;;  %v18772_v54 = vadd.f32 %v23715_v18, %v25459_v62  ;;  %v14344_v18 = vshrl.u32 %v16767_v50, 16  ;;  %v25461_v62 = vld [vmem:[#allocation63_spill] sm:$0xff] }
 0x52d   : > { %v14311_v6 = vsel %vm23435_vm1, %v14302_v33, %v14310_v23  ;;  %v14312_v58 = vrot.slane %v14310_v23, 4  ;;  %v14341_v41 = vsel %vm23435_vm1, %v14332_v20, %v14340_v2  ;;  %v14342_v52 = vrot.slane %v14340_v2, 4  ;;  %v23915_v24 = vpop.f32.mrb[64].mxu0 }
 0x52e   : > { %15517 = vst.msk [vmem:[%s21698_s27 + $0x90] sm:$0xf] %vm13563_vm6, %v14311_v6  ;;  %15520 = vst.msk [vmem:[%s21698_s27 + $0x9c] sm:$0xf] %vm13563_vm6, %v14341_v41  ;;  %v14322_v7 = vrot.slane %v14320_v48, 4  ;;  %v14372_v56 = vrot.slane %v23899_v15, 4  ;;  %v12376_v20 = vadd.f32 %v23815_v37, %v12233_v57  ;;  %v12238_v12 = vmul.f32 %v23848_v47, %v18772_v54 }
 0x52f   : > { %v14347_v16 = vshll.u32 %v16767_v50, 16  ;;  %v14321_v33 = vsel %vm23435_vm1, %v14312_v58, %v14320_v48  ;;  %v12514_v60 = vmax.f32 %v12378_v53, 0.0  ;;  %v23921_v4 = vpop.f32.mrb[65].mxu0  ;;  %v14346_v25 = vrot.slane %v14344_v18, 6  ;;  %v12960_v53 = vpop.permute.xlu0 %12959  ;;  %v25462_v58 = vld [vmem:[#allocation35_spill] sm:$0xff] }
 0x530   : > { %v14331_v39 = vsel %vm23435_vm1, %v14322_v7, %v14330_v36  ;;  %15518 = vst.msk [vmem:[%s21698_s27 + $0x94] sm:$0xf] %vm13563_vm6, %v14321_v33  ;;  %v18773_v30 = vadd.f32 %v23719_v43, %v25460_v55  ;;  %v23931_v63 = vpop.f32.mrb[66].mxu0  ;;  %v12512_v3 = vmax.f32 %v12376_v20, 0.0  ;;  %v12381_v23 = vadd.f32 %v23815_v37, %v12238_v12 }
 0x531   : > { %v14349_v59 = vrot.slane %v14347_v16, 7  ;;  %15519 = vst.msk [vmem:[%s21698_s27 + $0x98] sm:$0xf] %vm13563_vm6, %v14331_v39  ;;  %v13466_v21 = vmul.f32 %v12945_v27, %v12514_v60  ;;  %v18774_v2 = vadd.f32 %v23721_v32, %v23104_v11  ;;  %v23938_v50 = vpop.f32.mrb[67].mxu0  ;;  %v18775_v57 = vadd.f32 %v23723_v0, %v23107_v13  ;;  %v12965_v39 = vpop.permute.xlu1 %12964 }
 0x532   : > { %v23940_v36 = vpop.f32.mrb[68].mxu1  ;;  %v12236_v43 = vmul.f32 %v23848_v47, %v18773_v30  ;;  %v18776_v27 = vadd.f32 %v23738_v61, %v25461_v62  ;;  %v13464_v11 = vmul.f32 %v25462_v58, %v12512_v3  ;;  %v12517_v32 = vmax.f32 %v12381_v23, 0.0 }
 0x533   : > { %v14350_v48 = vor.u32 %v14349_v59, %v14346_v25  ;;  %v23947_v54 = vpop.f32.mrb[69].mxu1  ;;  %v16770_v6 = vpack.c.bf16 %v13466_v21, %v13466_v21  ;;  %v12239_v41 = vmul.f32 %v23848_v47, %v18774_v2  ;;  %v12237_v13 = vmul.f32 %v23848_v47, %v18775_v57 }
 0x534   : > { %v23951_v7 = vpop.f32.mrb[70].mxu1  ;;  %v12379_v33 = vadd.f32 %v23815_v37, %v12236_v43  ;;  %v16768_v20 = vpack.c.bf16 %v13464_v11, %v13464_v11  ;;  %v13469_v12 = vmul.f32 %v12960_v53, %v12517_v32  ;;  %v23968_v43 = vpop.permute.xlu0 %12969 }
 0x535   : > { %v14351_v18 = vsel %vm23435_vm1, %v14342_v52, %v14350_v48  ;;  %v14352_v16 = vrot.slane %v14350_v48, 4  ;;  %v23957_v0 = vpop.f32.mrb[71].mxu1  ;;  %v14374_v61 = vshrl.u32 %v16770_v6, 16  ;;  %v14377_v60 = vshll.u32 %v16770_v6, 16  ;;  %v23964_v30 = vpop.f32.mrb[68].mxu0 }
 0x536   : > { %15521 = vst.msk [vmem:[%s21698_s27 + $0xa0] sm:$0xf] %vm13563_vm6, %v14351_v18  ;;  %v12515_v25 = vmax.f32 %v12379_v33, 0.0  ;;  %v12382_v59 = vadd.f32 %v23815_v37, %v12239_v41  ;;  %v12380_v55 = vadd.f32 %v23815_v37, %v12237_v13  ;;  %v12242_v52 = vmul.f32 %v23848_v47, %v18776_v27  ;;  %v23966_v48 = vpop.f32.mrb[69].mxu0 }
 0x537   : > { %v14376_v21 = vrot.slane %v14374_v61, 6  ;;  %v14379_v3 = vrot.slane %v14377_v60, 7  ;;  %v14354_v23 = vshrl.u32 %v16768_v20, 16  ;;  %v14357_v2 = vshll.u32 %v16768_v20, 16  ;;  %v23971_v58 = vpop.f32.mrb[70].mxu0 }
 0x538   : > { %v16773_v57 = vpack.c.bf16 %v13469_v12, %v13469_v12  ;;  %v13467_v53 = vmul.f32 %v23897_v5, %v12515_v25  ;;  %v12518_v62 = vmax.f32 %v12382_v59, 0.0  ;;  %v12516_v6 = vmax.f32 %v12380_v55, 0.0  ;;  %v23974_v18 = vpop.f32.mrb[71].mxu0 }
 0x539   : > { %v14380_v11 = vor.u32 %v14379_v3, %v14376_v21  ;;  %v14356_v32 = vrot.slane %v14354_v23, 6  ;;  %v14359_v27 = vrot.slane %v14357_v2, 7  ;;  %v12385_v41 = vadd.f32 %v23815_v37, %v12242_v52  ;;  %v23987_v21 = vpop.permute.xlu1 %12974 }
 0x53a   : > { %v23976_v33 = vpop.f32.mrb[72].mxu1  ;;  %v14404_v13 = vshrl.u32 %v16773_v57, 16  ;;  %v14407_v61 = vshll.u32 %v16773_v57, 16  ;;  %v16771_v60 = vpack.c.bf16 %v13467_v53, %v13467_v53  ;;  %v13470_v20 = vmul.f32 %v12965_v39, %v12518_v62 }
 0x53b   : > { %v23978_v12 = vpop.f32.mrb[73].mxu1  ;;  %v14381_v5 = vsel %vm23435_vm1, %v14372_v56, %v14380_v11  ;;  %v14382_v25 = vrot.slane %v14380_v11, 4  ;;  %v14360_v59 = vor.u32 %v14359_v27, %v14356_v32  ;;  %v13468_v55 = vmul.f32 %v23923_v9, %v12516_v6 }
 0x53c   : > { %v23985_v52 = vpop.f32.mrb[74].mxu1  ;;  %15524 = vst.msk [vmem:[%s21698_s27 + $0xac] sm:$0xf] %vm13563_vm6, %v14381_v5  ;;  %v14406_v3 = vrot.slane %v14404_v13, 6  ;;  %v14409_v39 = vrot.slane %v14407_v61, 7  ;;  %v14384_v23 = vshrl.u32 %v16771_v60, 16  ;;  %v16774_v62 = vpack.c.bf16 %v13470_v20, %v13470_v20  ;;  %v12980_v13 = vpop.permute.xlu0 %12979 }
 0x53d   : > { %25463 = vst [vmem:[#allocation8_spill] sm:$0xff] %v23985_v52  ;;  %v14387_v2 = vshll.u32 %v16771_v60, 16  ;;  %v23991_v57 = vpop.f32.mrb[75].mxu1  ;;  %v14361_v56 = vsel %vm23435_vm1, %v14352_v16, %v14360_v59  ;;  %v14362_v53 = vrot.slane %v14360_v59, 4  ;;  %v16772_v11 = vpack.c.bf16 %v13468_v55, %v13468_v55  ;;  %v23997_v5 = vpop.f32.mrb[72].mxu0 }
 0x53e   : > { %25464 = vst [vmem:[#allocation5_spill] sm:$0xff] %v23991_v57  ;;  %15522 = vst.msk [vmem:[%s21698_s27 + $0xa4] sm:$0xf] %vm13563_vm6, %v14361_v56  ;;  %v14410_v9 = vor.u32 %v14409_v39, %v14406_v3  ;;  %v14386_v6 = vrot.slane %v14384_v23, 6  ;;  %v12521_v27 = vmax.f32 %v12385_v41, 0.0  ;;  %v14414_v60 = vshrl.u32 %v16774_v62, 16  ;;  %v12985_v52 = vpop.permute.xlu1 %12984 }
 0x53f   : > { %v14389_v32 = vrot.slane %v14387_v2, 7  ;;  %v14371_v61 = vsel %vm23435_vm1, %v14362_v53, %v23899_v15  ;;  %v14417_v40 = vshll.u32 %v16774_v62, 16  ;;  %v14394_v16 = vshrl.u32 %v16772_v11, 16  ;;  %v24002_v57 = vpop.f32.mrb[73].mxu0  ;;  %v25465_v56 = vld [vmem:[#allocation64_spill] sm:$0xff] }
 0x540   : > { %15523 = vst.msk [vmem:[%s21698_s27 + $0xa8] sm:$0xf] %vm13563_vm6, %v14371_v61  ;;  %v14412_v20 = vrot.slane %v14410_v9, 4  ;;  %v14397_v55 = vshll.u32 %v16772_v11, 16  ;;  %v13473_v3 = vmul.f32 %v12980_v13, %v12521_v27  ;;  %v24006_v41 = vpop.f32.mrb[74].mxu0  ;;  %v14416_v39 = vrot.slane %v14414_v60, 6 }
 0x541   : > { %v14390_v59 = vor.u32 %v14389_v32, %v14386_v6  ;;  %v14419_v23 = vrot.slane %v14417_v40, 7  ;;  %v14396_v2 = vrot.slane %v14394_v16, 6  ;;  %v18777_v15 = vadd.f32 %v23745_v19, %v25465_v56  ;;  %v24010_v53 = vpop.f32.mrb[75].mxu0  ;;  %v25469_v13 = vld [vmem:[#allocation65_spill] sm:$0xff]  ;;  %v25470_v16 = vld [vmem:[#allocation66_spill] sm:$0xff] }
 0x542   : > { %25466 = vst [vmem:[#allocation38_spill] sm:$0xff] %v24010_v53  ;;  %v24012_v62 = vpop.f32.mrb[76].mxu1  ;;  %v14399_v32 = vrot.slane %v14397_v55, 7  ;;  %v16777_v11 = vpack.c.bf16 %v13473_v3, %v13473_v3  ;;  %v18778_v60 = vadd.f32 %v23751_v42, %v25469_v13  ;;  %v18779_v56 = vadd.f32 %v23761_v14, %v25470_v16  ;;  %v25472_v3 = vld [vmem:[#allocation67_spill] sm:$0xff] }
 0x543   : > { %25467 = vst [vmem:[#allocation6_spill] sm:$0xff] %v24012_v62  ;;  %v14391_v61 = vsel %vm23435_vm1, %v14382_v25, %v14390_v59  ;;  %v14392_v6 = vrot.slane %v14390_v59, 4  ;;  %v24016_v27 = vpop.f32.mrb[77].mxu1  ;;  %v24020_v40 = vor.u32 %v14419_v23, %v14416_v39  ;;  %v12240_v19 = vmul.f32 %v23848_v47, %v18777_v15  ;;  %v12990_v15 = vpop.permute.xlu0 %12989 }
 0x544   : > { %25468 = vst [vmem:[#allocation39_spill] sm:$0xff] %v24016_v27  ;;  %15525 = vst.msk [vmem:[%s21698_s27 + $0xb0] sm:$0xf] %vm13563_vm6, %v14391_v61  ;;  %v24027_v62 = vpop.f32.mrb[78].mxu1  ;;  %v14400_v25 = vor.u32 %v14399_v32, %v14396_v2  ;;  %v14444_v59 = vshrl.u32 %v16777_v11, 16  ;;  %v14447_v55 = vshll.u32 %v16777_v11, 16  ;;  %v18780_v61 = vadd.f32 %v23778_v22, %v25472_v3 }
 0x545   : > { %25471 = vst [vmem:[#allocation40_spill] sm:$0xff] %v24027_v62  ;;  %v24031_v27 = vpop.f32.mrb[79].mxu1  ;;  %v14421_v39 = vsel %vm23435_vm1, %v14412_v20, %v24020_v40  ;;  %v12383_v23 = vadd.f32 %v23815_v37, %v12240_v19  ;;  %v12243_v14 = vmul.f32 %v23848_v47, %v18778_v60  ;;  %v24043_v13 = vpop.f32.mrb[76].mxu0  ;;  %v12241_v19 = vmul.f32 %v23848_v47, %v18779_v56 }
 0x546   : > { %25473 = vst [vmem:[#allocation7_spill] sm:$0xff] %v24031_v27  ;;  %15528 = vst.msk [vmem:[%s21698_s27 + $0xbc] sm:$0xf] %vm13563_vm6, %v14421_v39  ;;  %v14401_v2 = vsel %vm23435_vm1, %v14392_v6, %v14400_v25  ;;  %v14402_v32 = vrot.slane %v14400_v25, 4  ;;  %v14446_v22 = vrot.slane %v14444_v59, 6  ;;  %v14449_v11 = vrot.slane %v14447_v55, 7  ;;  %v24052_v39 = vpop.permute.xlu1 %12994 }
 0x547   : > { %25474 = vst [vmem:[#allocation41_spill] sm:$0xff] %v24043_v13  ;;  %15526 = vst.msk [vmem:[%s21698_s27 + $0xb4] sm:$0xf] %vm13563_vm6, %v14401_v2  ;;  %v12519_v20 = vmax.f32 %v12383_v23, 0.0  ;;  %v12386_v16 = vadd.f32 %v23815_v37, %v12243_v14  ;;  %v12246_v60 = vmul.f32 %v23848_v47, %v18780_v61  ;;  %v24050_v3 = vpop.f32.mrb[77].mxu0  ;;  %v25476_v59 = vld [vmem:[#allocation68_spill] sm:$0xff]  ;;  %v12384_v42 = vadd.f32 %v23815_v37, %v12241_v19 }
 0x548   : > { %25475 = vst [vmem:[#allocation12_spill] sm:$0xff] %v24050_v3  ;;  %v14411_v6 = vsel %vm23435_vm1, %v14402_v32, %v14410_v9  ;;  %v24056_v25 = vor.u32 %v14449_v11, %v14446_v22  ;;  %v18781_v55 = vadd.f32 %v23782_v35, %v25476_v59  ;;  %v25477_v2 = vld [vmem:[#allocation69_spill] sm:$0xff]  ;;  %v24062_v14 = vpop.f32.mrb[78].mxu0  ;;  %v25481_v11 = vld [vmem:[#allocation70_spill] sm:$0xff] }
 0x549   : > { %v18782_v23 = vadd.f32 %v23785_v31, %v25477_v2  ;;  %25478 = vst [vmem:[#allocation43_spill] sm:$0xff] %v24062_v14  ;;  %15527 = vst.msk [vmem:[%s21698_s27 + $0xb8] sm:$0xf] %vm13563_vm6, %v14411_v6  ;;  %v13471_v56 = vmul.f32 %v23968_v43, %v12519_v20  ;;  %v12522_v61 = vmax.f32 %v12386_v16, 0.0  ;;  %v12389_v27 = vadd.f32 %v23815_v37, %v12246_v60  ;;  %v24069_v9 = vpop.f32.mrb[79].mxu0  ;;  %v13000_v2 = vpop.permute.xlu0 %12999  ;;  %v25484_v14 = vld [vmem:[#allocation71_spill] sm:$0xff] }
 0x54a   : > { %25479 = vst [vmem:[#allocation9_spill] sm:$0xff] %v24069_v9  ;;  %v24071_v32 = vpop.f32.mrb[80].mxu1  ;;  %v14452_v35 = vrot.slane %v24056_v25, 4  ;;  %v12244_v22 = vmul.f32 %v23848_v47, %v18781_v55  ;;  %v18783_v6 = vadd.f32 %v23790_v45, %v25481_v11  ;;  %v12520_v16 = vmax.f32 %v12384_v42, 0.0 }
 0x54b   : > { %25480 = vst [vmem:[#allocation44_spill] sm:$0xff] %v24071_v32  ;;  %v12247_v31 = vmul.f32 %v23848_v47, %v18782_v23  ;;  %v24078_v59 = vpop.f32.mrb[81].mxu1  ;;  %v16775_v43 = vpack.c.bf16 %v13471_v56, %v13471_v56  ;;  %v13474_v20 = vmul.f32 %v12985_v52, %v12522_v61  ;;  %v12525_v19 = vmax.f32 %v12389_v27, 0.0 }
 0x54c   : > { %25482 = vst [vmem:[#allocation10_spill] sm:$0xff] %v24078_v59  ;;  %v24080_v60 = vpop.f32.mrb[82].mxu1  ;;  %v12387_v32 = vadd.f32 %v23815_v37, %v12244_v22  ;;  %v12245_v55 = vmul.f32 %v23848_v47, %v18783_v6  ;;  %v18784_v23 = vadd.f32 %v23801_v34, %v25484_v14  ;;  %v13472_v52 = vmul.f32 %v23987_v21, %v12520_v16 }
 0x54d   : > { %25483 = vst [vmem:[#allocation11_spill] sm:$0xff] %v24080_v60  ;;  %v12390_v9 = vadd.f32 %v23815_v37, %v12247_v31  ;;  %v24087_v62 = vpop.f32.mrb[83].mxu1  ;;  %v14424_v45 = vshrl.u32 %v16775_v43, 16  ;;  %v14427_v11 = vshll.u32 %v16775_v43, 16  ;;  %v16778_v56 = vpack.c.bf16 %v13474_v20, %v13474_v20  ;;  %v24091_v22 = vpop.f32.mrb[80].mxu0 }
 0x54e   : > { %25485 = vst [vmem:[#allocation45_spill] sm:$0xff] %v24087_v62  ;;  %v13477_v27 = vmul.f32 %v13000_v2, %v12525_v19  ;;  %v12523_v42 = vmax.f32 %v12387_v32, 0.0  ;;  %v12388_v60 = vadd.f32 %v23815_v37, %v12245_v55  ;;  %v13005_v31 = vpop.permute.xlu1 %13004  ;;  %v24093_v34 = vpop.f32.mrb[81].mxu0  ;;  %v16776_v14 = vpack.c.bf16 %v13472_v52, %v13472_v52 }
 0x54f   : > { %v12526_v61 = vmax.f32 %v12390_v9, 0.0  ;;  %v14426_v59 = vrot.slane %v14424_v45, 6  ;;  %v14429_v6 = vrot.slane %v14427_v11, 7  ;;  %v14454_v3 = vshrl.u32 %v16778_v56, 16  ;;  %v24095_v53 = vpop.f32.mrb[82].mxu0  ;;  %v24101_v55 = vpop.permute.xlu0 %13009 }
 0x550   : > { %v14457_v13 = vshll.u32 %v16778_v56, 16  ;;  %v16781_v62 = vpack.c.bf16 %v13477_v27, %v13477_v27  ;;  %v13475_v43 = vmul.f32 %v12990_v15, %v12523_v42  ;;  %v12524_v16 = vmax.f32 %v12388_v60, 0.0  ;;  %v24097_v19 = vpop.f32.mrb[83].mxu0 }
 0x551   : > { %v13478_v20 = vmul.f32 %v13005_v31, %v12526_v61  ;;  %v14430_v21 = vor.u32 %v14429_v6, %v14426_v59  ;;  %v14456_v32 = vrot.slane %v14454_v3, 6  ;;  %25486 = vst [vmem:[#allocation46_spill] sm:$0xff] %v24097_v19  ;;  %v14434_v45 = vshrl.u32 %v16776_v14, 16 }
 0x552   : > { %v14459_v9 = vrot.slane %v14457_v13, 7  ;;  %v24099_v2 = vpop.f32.mrb[84].mxu1  ;;  %v14437_v11 = vshll.u32 %v16776_v14, 16  ;;  %v14484_v56 = vshrl.u32 %v16781_v62, 16  ;;  %v14487_v52 = vshll.u32 %v16781_v62, 16  ;;  %v24117_v19 = vpop.permute.xlu1 %13014 }
 0x553   : > { %25487 = vst [vmem:[#allocation16_spill] sm:$0xff] %v24099_v2  ;;  %v24103_v27 = vpop.f32.mrb[85].mxu1  ;;  %v25489_v15 = vrot.slane %v24020_v40, 4  ;;  %v14432_v13 = vrot.slane %v14430_v21, 4  ;;  %v16779_v60 = vpack.c.bf16 %v13475_v43, %v13475_v43  ;;  %v14436_v61 = vrot.slane %v14434_v45, 6 }
 0x554   : > { %25488 = vst [vmem:[#allocation13_spill] sm:$0xff] %v24103_v27  ;;  %v14460_v59 = vor.u32 %v14459_v9, %v14456_v32  ;;  %v24109_v42 = vpop.f32.mrb[86].mxu1  ;;  %v14439_v31 = vrot.slane %v14437_v11, 7  ;;  %v14486_v6 = vrot.slane %v14484_v56, 6  ;;  %v14489_v14 = vrot.slane %v14487_v52, 7  ;;  %v25490_v52 = vld [vmem:[#allocation72_spill] sm:$0xff] }
 0x555   : > { %v14431_v3 = vsel %vm23435_vm1, %v25489_v15, %v14430_v21  ;;  %v24113_v62 = vpop.f32.mrb[87].mxu1  ;;  %v14464_v2 = vshrl.u32 %v16779_v60, 16  ;;  %v14467_v15 = vshll.u32 %v16779_v60, 16  ;;  %v16782_v32 = vpack.c.bf16 %v13478_v20, %v13478_v20  ;;  %v24124_v45 = vpop.f32.mrb[84].mxu0 }
 0x556   : > { %15529 = vst.msk [vmem:[%s21698_s27 + $0xc0] sm:$0xf] %vm13563_vm6, %v14431_v3  ;;  %v14461_v40 = vsel %vm23435_vm1, %v14452_v35, %v14460_v59  ;;  %v14462_v27 = vrot.slane %v14460_v59, 4  ;;  %v14440_v43 = vor.u32 %v14439_v31, %v14436_v61  ;;  %v24121_v21 = vor.u32 %v14489_v14, %v14486_v6  ;;  %v24129_v59 = vpop.f32.mrb[85].mxu0  ;;  %v13020_v60 = vpop.permute.xlu0 %13019 }
 0x557   : > { %15532 = vst.msk [vmem:[%s21698_s27 + $0xcc] sm:$0xf] %vm13563_vm6, %v14461_v40  ;;  %v13476_v9 = vmul.f32 %v24052_v39, %v12524_v16  ;;  %v14466_v11 = vrot.slane %v14464_v2, 6  ;;  %v14469_v56 = vrot.slane %v14467_v15, 7  ;;  %v12250_v35 = vmul.f32 %v23848_v47, %v18784_v23  ;;  %v24134_v16 = vpop.f32.mrb[86].mxu0 }
 0x558   : > { %v18785_v3 = vadd.f32 %v23805_v29, %v25490_v52  ;;  %v14441_v61 = vsel %vm23435_vm1, %v14432_v13, %v14440_v43  ;;  %v14442_v31 = vrot.slane %v14440_v43, 4  ;;  %v14492_v20 = vrot.slane %v24121_v21, 4  ;;  %v24139_v14 = vpop.f32.mrb[87].mxu0  ;;  %v25493_v52 = vld [vmem:[#allocation73_spill] sm:$0xff] }
 0x559   : > { %v14494_v39 = vshrl.u32 %v16782_v32, 16  ;;  %15530 = vst.msk [vmem:[%s21698_s27 + $0xc4] sm:$0xf] %vm13563_vm6, %v14441_v61  ;;  %v14470_v2 = vor.u32 %v14469_v56, %v14466_v11  ;;  %v14497_v23 = vshll.u32 %v16782_v32, 16  ;;  %v16780_v6 = vpack.c.bf16 %v13476_v9, %v13476_v9  ;;  %25491 = vst [vmem:[#allocation47_spill] sm:$0xff] %v24139_v14  ;;  %v13025_v14 = vpop.permute.xlu1 %13024 }
 0x55a   : > { %v12393_v29 = vadd.f32 %v23815_v37, %v12250_v35  ;;  %v24141_v40 = vpop.f32.mrb[88].mxu1  ;;  %v14451_v13 = vsel %vm23435_vm1, %v14442_v31, %v24056_v25  ;;  %v12248_v43 = vmul.f32 %v23848_v47, %v18785_v3  ;;  %v18786_v61 = vadd.f32 %v23818_v51, %v25493_v52  ;;  %v25498_v52 = vld [vmem:[#allocation75_spill] sm:$0xff] }
 0x55b   : > { %25492 = vst [vmem:[#allocation48_spill] sm:$0xff] %v24141_v40  ;;  %v14496_v15 = vrot.slane %v14494_v39, 6  ;;  %v24149_v11 = vpop.f32.mrb[89].mxu1  ;;  %15531 = vst.msk [vmem:[%s21698_s27 + $0xc8] sm:$0xf] %vm13563_vm6, %v14451_v13  ;;  %v14471_v32 = vsel %vm23435_vm1, %v14462_v27, %v14470_v2  ;;  %v14472_v9 = vrot.slane %v14470_v2, 4 }
 0x55c   : > { %25494 = vst [vmem:[#allocation14_spill] sm:$0xff] %v24149_v11  ;;  %v14499_v56 = vrot.slane %v14497_v23, 7  ;;  %v14474_v35 = vshrl.u32 %v16780_v6, 16  ;;  %v24155_v40 = vpop.f32.mrb[90].mxu1  ;;  %15533 = vst.msk [vmem:[%s21698_s27 + $0xd0] sm:$0xf] %vm13563_vm6, %v14471_v32  ;;  %v12391_v31 = vadd.f32 %v23815_v37, %v12248_v43  ;;  %v12251_v51 = vmul.f32 %v23848_v47, %v18786_v61  ;;  %v24172_v61 = vpop.permute.xlu0 %13029 }
 0x55d   : > { %25495 = vst [vmem:[#allocation49_spill] sm:$0xff] %v24155_v40  ;;  %v14477_v25 = vshll.u32 %v16780_v6, 16  ;;  %v12529_v3 = vmax.f32 %v12393_v29, 0.0  ;;  %v24161_v39 = vpop.f32.mrb[91].mxu1  ;;  %v25497_v2 = vld [vmem:[#allocation74_spill] sm:$0xff]  ;;  %v18788_v40 = vadd.f32 %v23857_v1, %v25498_v52  ;;  %v24170_v43 = vpop.f32.mrb[88].mxu0 }
 0x55e   : > { %25496 = vst [vmem:[#allocation50_spill] sm:$0xff] %v24161_v39  ;;  %v24163_v13 = vor.u32 %v14499_v56, %v14496_v15  ;;  %v14476_v27 = vrot.slane %v14474_v35, 6  ;;  %v18787_v23 = vadd.f32 %v23828_v10, %v25497_v2  ;;  %v12527_v6 = vmax.f32 %v12391_v31, 0.0  ;;  %v24180_v1 = vpop.f32.mrb[89].mxu0  ;;  %v25500_v52 = vld [vmem:[#allocation76_spill] sm:$0xff] }
 0x55f   : > { %v14479_v11 = vrot.slane %v14477_v25, 7  ;;  %v13481_v32 = vmul.f32 %v13020_v60, %v12529_v3  ;;  %v12394_v29 = vadd.f32 %v23815_v37, %v12251_v51  ;;  %v12254_v35 = vmul.f32 %v23848_v47, %v18788_v40  ;;  %v24185_v51 = vpop.f32.mrb[90].mxu0  ;;  %v25501_v40 = vld [vmem:[#allocation77_spill] sm:$0xff] }
 0x560   : > { %v14501_v15 = vsel %vm23435_vm1, %v14492_v20, %v24163_v13  ;;  %v12249_v10 = vmul.f32 %v23848_v47, %v18787_v23  ;;  %v13479_v3 = vmul.f32 %v24101_v55, %v12527_v6  ;;  %25499 = vst [vmem:[#allocation15_spill] sm:$0xff] %v24185_v51  ;;  %v18789_v23 = vadd.f32 %v23863_v17, %v25500_v52  ;;  %v24193_v39 = vpop.f32.mrb[91].mxu0 }
 0x561   : > { %15536 = vst.msk [vmem:[%s21698_s27 + $0xdc] sm:$0xf] %vm13563_vm6, %v14501_v15  ;;  %v14480_v60 = vor.u32 %v14479_v11, %v14476_v27  ;;  %v16785_v25 = vpack.c.bf16 %v13481_v32, %v13481_v32  ;;  %v12530_v31 = vmax.f32 %v12394_v29, 0.0  ;;  %v12397_v2 = vadd.f32 %v23815_v37, %v12254_v35  ;;  %25502 = vst [vmem:[#allocation18_spill] sm:$0xff] %v24193_v39  ;;  %v24197_v27 = vpop.permute.xlu1 %13034 }
 0x562   : > { %v12392_v20 = vadd.f32 %v23815_v37, %v12249_v10  ;;  %v18790_v56 = vadd.f32 %v23865_v28, %v25501_v40  ;;  %v24195_v11 = vpop.f32.mrb[92].mxu1  ;;  %v16783_v17 = vpack.c.bf16 %v13479_v3, %v13479_v3 }
 0x563   : > { %25503 = vst [vmem:[#allocation3_spill] sm:$0xff] %v24195_v11  ;;  %v14481_v55 = vsel %vm23435_vm1, %v14472_v9, %v14480_v60  ;;  %v14482_v32 = vrot.slane %v14480_v60, 4  ;;  %v14524_v6 = vshrl.u32 %v16785_v25, 16  ;;  %v14527_v29 = vshll.u32 %v16785_v25, 16  ;;  %v24201_v15 = vpop.f32.mrb[93].mxu1  ;;  %v13040_v25 = vpop.permute.xlu0 %13039 }
 0x564   : > { %25504 = vst [vmem:[#allocation51_spill] sm:$0xff] %v24201_v15  ;;  %15534 = vst.msk [vmem:[%s21698_s27 + $0xd4] sm:$0xf] %vm13563_vm6, %v14481_v55  ;;  %v13482_v10 = vmul.f32 %v13025_v14, %v12530_v31  ;;  %v12528_v28 = vmax.f32 %v12392_v20, 0.0  ;;  %v12533_v35 = vmax.f32 %v12397_v2, 0.0  ;;  %v24205_v52 = vpop.f32.mrb[94].mxu1  ;;  %v12252_v60 = vmul.f32 %v23848_v47, %v18789_v23 }
 0x565   : > { %25505 = vst [vmem:[#allocation2_spill] sm:$0xff] %v24205_v52  ;;  %v14491_v40 = vsel %vm23435_vm1, %v14482_v32, %v24121_v21  ;;  %v14526_v11 = vrot.slane %v14524_v6, 6  ;;  %v14529_v9 = vrot.slane %v14527_v29, 7  ;;  %v24211_v39 = vpop.f32.mrb[95].mxu1  ;;  %v14504_v55 = vshrl.u32 %v16783_v17, 16  ;;  %v24220_v32 = vpop.f32.mrb[92].mxu0 }
 0x566   : > { %25506 = vst [vmem:[#allocation17_spill] sm:$0xff] %v24211_v39  ;;  %15535 = vst.msk [vmem:[%s21698_s27 + $0xd8] sm:$0xf] %vm13563_vm6, %v14491_v40  ;;  %v14507_v3 = vshll.u32 %v16783_v17, 16  ;;  %v16786_v14 = vpack.c.bf16 %v13482_v10, %v13482_v10  ;;  %v13480_v31 = vmul.f32 %v24117_v19, %v12528_v28  ;;  %v13485_v2 = vmul.f32 %v13040_v25, %v12533_v35  ;;  %v24222_v15 = vpop.f32.mrb[93].mxu0  ;;  %v13045_v40 = vpop.permute.xlu1 %13044 }
 0x567   : > { %v24216_v20 = vor.u32 %v14529_v9, %v14526_v11  ;;  %v12395_v52 = vadd.f32 %v23815_v37, %v12252_v60  ;;  %v12255_v21 = vmul.f32 %v23848_v47, %v18790_v56  ;;  %25507 = vst [vmem:[#allocation52_spill] sm:$0xff] %v24220_v32  ;;  %v14506_v23 = vrot.slane %v14504_v55, 6  ;;  %25508 = vst [vmem:[#allocation22_spill] sm:$0xff] %v24222_v15  ;;  %v24225_v28 = vpop.f32.mrb[94].mxu0 }
 0x568   : > { %v14509_v6 = vrot.slane %v14507_v3, 7  ;;  %v14534_v29 = vshrl.u32 %v16786_v14, 16  ;;  %v14537_v39 = vshll.u32 %v16786_v14, 16  ;;  %v16784_v10 = vpack.c.bf16 %v13480_v31, %v13480_v31  ;;  %25509 = vst [vmem:[#allocation53_spill] sm:$0xff] %v24225_v28  ;;  %v24228_v25 = vpop.f32.mrb[95].mxu0  ;;  %v24234_v31 = vpop.permute.xlu0 %13049 }
 0x569   : > { %v14532_v17 = vrot.slane %v24216_v20, 4  ;;  %v16789_v19 = vpack.c.bf16 %v13485_v2, %v13485_v2  ;;  %v12531_v11 = vmax.f32 %v12395_v52, 0.0  ;;  %v12398_v60 = vadd.f32 %v23815_v37, %v12255_v21  ;;  %25510 = vst [vmem:[#allocation54_spill] sm:$0xff] %v24228_v25 }
 0x56a   : > { %v14510_v35 = vor.u32 %v14509_v6, %v14506_v23  ;;  %v14536_v9 = vrot.slane %v14534_v29, 6  ;;  %v14539_v56 = vrot.slane %v14537_v39, 7  ;;  %v24230_v55 = vpop.f32.mrb[96].mxu1  ;;  %v14514_v3 = vshrl.u32 %v16784_v10, 16 }
 0x56b   : > { %25511 = vst [vmem:[#allocation55_spill] sm:$0xff] %v24230_v55  ;;  %v14517_v14 = vshll.u32 %v16784_v10, 16  ;;  %v14564_v15 = vshrl.u32 %v16789_v19, 16  ;;  %v14567_v32 = vshll.u32 %v16789_v19, 16  ;;  %v24232_v51 = vpop.f32.mrb[97].mxu1  ;;  %v25513_v52 = vrot.slane %v24163_v13, 4 }
 0x56c   : > { %25512 = vst [vmem:[#allocation20_spill] sm:$0xff] %v24232_v51  ;;  %v14512_v2 = vrot.slane %v14510_v35, 4  ;;  %v14540_v21 = vor.u32 %v14539_v56, %v14536_v9  ;;  %v13483_v23 = vmul.f32 %v24172_v61, %v12531_v11  ;;  %v24241_v6 = vpop.f32.mrb[98].mxu1  ;;  %v14516_v29 = vrot.slane %v14514_v3, 6  ;;  %v25515_v11 = vld [vmem:[#allocation78_spill] sm:$0xff]  ;;  %v25516_v56 = vld [vmem:[#allocation79_spill] sm:$0xff]  ;;  %v24259_v3 = vpop.permute.xlu1 %13054 }
 0x56d   : > { %v14511_v39 = vsel %vm23435_vm1, %v25513_v52, %v14510_v35  ;;  %v14519_v10 = vrot.slane %v14517_v14, 7  ;;  %v14566_v19 = vrot.slane %v14564_v15, 6  ;;  %v14569_v51 = vrot.slane %v14567_v32, 7  ;;  %v24245_v55 = vpop.f32.mrb[99].mxu1  ;;  %v24257_v32 = vpop.f32.mrb[96].mxu0 }
 0x56e   : > { %15537 = vst.msk [vmem:[%s21698_s27 + $0xe0] sm:$0xf] %vm13563_vm6, %v14511_v39  ;;  %25514 = vst [vmem:[#allocation56_spill] sm:$0xff] %v24245_v55  ;;  %v14541_v13 = vsel %vm23435_vm1, %v14532_v17, %v14540_v21  ;;  %v14542_v25 = vrot.slane %v14540_v21, 4  ;;  %v16787_v28 = vpack.c.bf16 %v13483_v23, %v13483_v23  ;;  %v12534_v52 = vmax.f32 %v12398_v60, 0.0  ;;  %v25517_v60 = vld [vmem:[#allocation80_spill] sm:$0xff] }
 0x56f   : > { %15540 = vst.msk [vmem:[%s21698_s27 + $0xec] sm:$0xf] %vm13563_vm6, %v14541_v13  ;;  %v14520_v35 = vor.u32 %v14519_v10, %v14516_v29  ;;  %v24251_v61 = vor.u32 %v14569_v51, %v14566_v19  ;;  %v18791_v9 = vadd.f32 %v23868_v26, %v25515_v11  ;;  %v18792_v15 = vadd.f32 %v23888_v44, %v25516_v56  ;;  %v24263_v23 = vpop.f32.mrb[97].mxu0  ;;  %v13060_v19 = vpop.permute.xlu0 %13059 }
 0x570   : > { %v14544_v17 = vshrl.u32 %v16787_v28, 16  ;;  %v14547_v14 = vshll.u32 %v16787_v28, 16  ;;  %v13486_v39 = vmul.f32 %v13045_v40, %v12534_v52  ;;  %v18793_v21 = vadd.f32 %v23890_v49, %v25517_v60  ;;  %v24269_v10 = vpop.f32.mrb[98].mxu0 }
 0x571   : > { %v14521_v51 = vsel %vm23435_vm1, %v14512_v2, %v14520_v35  ;;  %v14522_v26 = vrot.slane %v14520_v35, 4  ;;  %v14572_v29 = vrot.slane %v24251_v61, 4  ;;  %v12253_v44 = vmul.f32 %v23848_v47, %v18791_v9  ;;  %v24274_v52 = vpop.f32.mrb[99].mxu0  ;;  %v25519_v9 = vld [vmem:[#allocation81_spill] sm:$0xff] }
 0x572   : > { %15538 = vst.msk [vmem:[%s21698_s27 + $0xe4] sm:$0xf] %vm13563_vm6, %v14521_v51  ;;  %v14546_v40 = vrot.slane %v14544_v17, 6  ;;  %v14549_v28 = vrot.slane %v14547_v14, 7  ;;  %v16790_v13 = vpack.c.bf16 %v13486_v39, %v13486_v39  ;;  %v12258_v49 = vmul.f32 %v23848_v47, %v18792_v15  ;;  %25518 = vst [vmem:[#allocation21_spill] sm:$0xff] %v24274_v52  ;;  %v24288_v60 = vpop.f32.mrb[100].mxu1 }
 0x573   : > { %v14531_v2 = vsel %vm23435_vm1, %v14522_v26, %v24216_v20  ;;  %v12396_v35 = vadd.f32 %v23815_v37, %v12253_v44  ;;  %v12256_v11 = vmul.f32 %v23848_v47, %v18793_v21  ;;  %v18794_v56 = vadd.f32 %v23892_v38, %v25519_v9  ;;  %25520 = vst [vmem:[#allocation19_spill] sm:$0xff] %v24288_v60  ;;  %v25521_v21 = vld [vmem:[#allocation82_spill] sm:$0xff]  ;;  %v24294_v38 = vpop.f32.mrb[101].mxu1 }
 0x574   : > { %15539 = vst.msk [vmem:[%s21698_s27 + $0xe8] sm:$0xf] %vm13563_vm6, %v14531_v2  ;;  %v24285_v17 = vor.u32 %v14549_v28, %v14546_v40  ;;  %v14574_v14 = vshrl.u32 %v16790_v13, 16  ;;  %v14577_v15 = vshll.u32 %v16790_v13, 16  ;;  %v12401_v39 = vadd.f32 %v23815_v37, %v12258_v49  ;;  %25522 = vst [vmem:[#allocation26_spill] sm:$0xff] %v24294_v38  ;;  %v13065_v2 = vpop.permute.xlu1 %13064  ;;  %v24300_v9 = vpop.f32.mrb[102].mxu1 }
 0x575   : > { %v12532_v51 = vmax.f32 %v12396_v35, 0.0  ;;  %v12399_v20 = vadd.f32 %v23815_v37, %v12256_v11  ;;  %v12259_v26 = vmul.f32 %v23848_v47, %v18794_v56  ;;  %v18795_v44 = vadd.f32 %v23894_v46, %v25521_v21  ;;  %25523 = vst [vmem:[#allocation24_spill] sm:$0xff] %v24300_v9  ;;  %v24308_v46 = vld [vmem:[%s25251_s3] ss:$0 sm:$0xff] }
 0x576   : > { %v14551_v40 = vsel %vm23435_vm1, %v14542_v25, %v24285_v17  ;;  %v14552_v28 = vrot.slane %v24285_v17, 4  ;;  %v14576_v13 = vrot.slane %v14574_v14, 6  ;;  %v14579_v49 = vrot.slane %v14577_v15, 7  ;;  %v24311_v25 = vpop.f32.mrb[100].mxu0  ;;  %v24313_v17 = vpop.f32.mrb[103].mxu1 }
 0x577   : > { %15541 = vst.msk [vmem:[%s21698_s27 + $0xf0] sm:$0xf] %vm13563_vm6, %v14551_v40  ;;  %v13484_v37 = vmul.f32 %v24197_v27, %v12532_v51  ;;  %v12537_v35 = vmax.f32 %v12401_v39, 0.0  ;;  %v12535_v11 = vmax.f32 %v12399_v20, 0.0  ;;  %v12402_v56 = vadd.f32 %v24308_v46, %v12259_v26  ;;  %25524 = vst [vmem:[#allocation25_spill] sm:$0xff] %v24311_v25  ;;  %v24315_v14 = vpop.permute.xlu0 %13069  ;;  %v25526_v39 = vld [vmem:[#allocation83_spill] sm:$0xff] }
 0x578   : > { %25525 = vst [vmem:[#allocation4_spill] sm:$0xff] %v24313_v17  ;;  %v24317_v15 = vor.u32 %v14579_v49, %v14576_v13  ;;  %v12257_v27 = vmul.f32 %v23848_v47, %v18795_v44  ;;  %v18796_v51 = vadd.f32 %v23915_v24, %v25526_v39  ;;  %v25527_v20 = vld [vmem:[#allocation84_spill] sm:$0xff]  ;;  %v24324_v40 = vpop.f32.mrb[101].mxu0 }
 0x579   : > { %v18797_v21 = vadd.f32 %v23921_v4, %v25527_v20  ;;  %25528 = vst [vmem:[#allocation23_spill] sm:$0xff] %v24324_v40  ;;  %v16788_v26 = vpack.c.bf16 %v13484_v37, %v13484_v37  ;;  %v13489_v9 = vmul.f32 %v13060_v19, %v12537_v35  ;;  %v13487_v38 = vmul.f32 %v24234_v31, %v12535_v11  ;;  %v24327_v25 = vpop.f32.mrb[102].mxu0 }
 0x57a   : > { %v12538_v17 = vmax.f32 %v12402_v56, 0.0  ;;  %25529 = vst [vmem:[#allocation57_spill] sm:$0xff] %v24327_v25  ;;  %v14581_v13 = vsel %vm23435_vm1, %v14572_v29, %v24317_v15  ;;  %v14582_v44 = vrot.slane %v24317_v15, 4  ;;  %v12400_v24 = vadd.f32 %v24308_v46, %v12257_v27  ;;  %v24335_v4 = vpop.f32.mrb[103].mxu0  ;;  %v24343_v29 = vld [vmem:[%s25250_s2] ss:$0 sm:$0xff] }
 0x57b   : > { %v12262_v49 = vmul.f32 %v23848_v47, %v18796_v51  ;;  %25530 = vst [vmem:[#allocation30_spill] sm:$0xff] %v24335_v4  ;;  %15544 = vst.msk [vmem:[%s21698_s27 + $0xfc] sm:$0xf] %vm13563_vm6, %v14581_v13  ;;  %v14554_v19 = vshrl.u32 %v16788_v26, 16  ;;  %v14557_v37 = vshll.u32 %v16788_v26, 16  ;;  %v16793_v31 = vpack.c.bf16 %v13489_v9, %v13489_v9  ;;  %v24346_v13 = vpop.permute.xlu1 %13074  ;;  %v13080_v26 = vpop.permute.xlu0 %13079 }
 0x57c   : > { %v16791_v35 = vpack.c.bf16 %v13487_v38, %v13487_v38  ;;  %v13490_v11 = vmul.f32 %v13065_v2, %v12538_v17  ;;  %v12536_v56 = vmax.f32 %v12400_v24, 0.0  ;;  %v12260_v15 = vmul.f32 %v24343_v29, %v18797_v21 }
 0x57d   : > { %v12405_v39 = vadd.f32 %v24308_v46, %v12262_v49  ;;  %v14556_v47 = vrot.slane %v14554_v19, 6  ;;  %v14559_v27 = vrot.slane %v14557_v37, 7  ;;  %v14604_v51 = vshrl.u32 %v16793_v31, 16  ;;  %v24349_v37 = vpop.f32.mrb[104].mxu1 }
 0x57e   : > { %v14607_v20 = vshll.u32 %v16793_v31, 16  ;;  %v14584_v9 = vshrl.u32 %v16791_v35, 16  ;;  %v14587_v38 = vshll.u32 %v16791_v35, 16  ;;  %v16794_v2 = vpack.c.bf16 %v13490_v11, %v13490_v11  ;;  %v24351_v31 = vpop.f32.mrb[104].mxu0 }
 0x57f   : > { %v13488_v17 = vmul.f32 %v24259_v3, %v12536_v56  ;;  %v14560_v24 = vor.u32 %v14559_v27, %v14556_v47  ;;  %v14606_v49 = vrot.slane %v14604_v51, 6  ;;  %v12541_v25 = vmax.f32 %v12405_v39, 0.0  ;;  %v24355_v3 = vpop.f32.mrb[105].mxu1  ;;  %v24357_v56 = vpop.f32.mrb[105].mxu0 }
 0x580   : > { %v14609_v4 = vrot.slane %v14607_v20, 7  ;;  %v14586_v40 = vrot.slane %v14584_v9, 6  ;;  %v14589_v60 = vrot.slane %v14587_v38, 7  ;;  %v14614_v21 = vshrl.u32 %v16794_v2, 16  ;;  %v24361_v20 = vpop.f32.mrb[106].mxu1  ;;  %v24363_v9 = vpop.f32.mrb[106].mxu0 }
 0x581   : > { %v14617_v19 = vshll.u32 %v16794_v2, 16  ;;  %v14561_v52 = vsel %vm23435_vm1, %v14552_v28, %v14560_v24  ;;  %v14562_v35 = vrot.slane %v14560_v24, 4  ;;  %v16792_v55 = vpack.c.bf16 %v13488_v17, %v13488_v17  ;;  %v13085_v17 = vpop.permute.xlu1 %13084  ;;  %v24368_v24 = vpop.permute.xlu0 %13089 }
 0x582   : > { %v14610_v11 = vor.u32 %v14609_v4, %v14606_v49  ;;  %15542 = vst.msk [vmem:[%s21698_s27 + $0xf4] sm:$0xf] %vm13563_vm6, %v14561_v52  ;;  %v14590_v39 = vor.u32 %v14589_v60, %v14586_v40  ;;  %v14616_v47 = vrot.slane %v14614_v21, 6  ;;  %v13493_v51 = vmul.f32 %v13080_v26, %v12541_v25 }
 0x583   : > { %v14619_v27 = vrot.slane %v14617_v19, 7  ;;  %v14571_v28 = vsel %vm23435_vm1, %v14562_v35, %v24251_v61  ;;  %v14594_v38 = vshrl.u32 %v16792_v55, 16  ;;  %v14597_v2 = vshll.u32 %v16792_v55, 16  ;;  %v25531_v55 = vld [vmem:[#allocation85_spill] sm:$0xff]  ;;  %v24381_v19 = vpop.f32.mrb[107].mxu1  ;;  %v24383_v35 = vpop.f32.mrb[107].mxu0 }
 0x584   : > { %v14612_v4 = vrot.slane %v14610_v11, 4  ;;  %15543 = vst.msk [vmem:[%s21698_s27 + $0xf8] sm:$0xf] %vm13563_vm6, %v14571_v28  ;;  %v14591_v52 = vsel %vm23435_vm1, %v14582_v44, %v14590_v39  ;;  %v14592_v60 = vrot.slane %v14590_v39, 4  ;;  %v16797_v40 = vpack.c.bf16 %v13493_v51, %v13493_v51 }
 0x585   : > { %v24374_v25 = vor.u32 %v14619_v27, %v14616_v47  ;;  %15545 = vst.msk [vmem:[%s21698_s27 + $0x100] sm:$0xf] %vm13563_vm6, %v14591_v52  ;;  %v14596_v26 = vrot.slane %v14594_v38, 6  ;;  %v14599_v61 = vrot.slane %v14597_v2, 7  ;;  %v12403_v49 = vadd.f32 %v24308_v46, %v12260_v15 }
 0x586   : > { %v18798_v21 = vadd.f32 %v23931_v63, %v25531_v55  ;;  %v14644_v47 = vshrl.u32 %v16797_v40, 16  ;;  %v14647_v27 = vshll.u32 %v16797_v40, 16  ;;  %v25532_v63 = vld [vmem:[#allocation86_spill] sm:$0xff]  ;;  %v18800_v55 = vadd.f32 %v23964_v30, %v23940_v36 }
 0x587   : > { %v14621_v44 = vsel %vm23435_vm1, %v14612_v4, %v24374_v25  ;;  %v14600_v51 = vor.u32 %v14599_v61, %v14596_v26  ;;  %v12539_v15 = vmax.f32 %v12403_v49, 0.0  ;;  %v18799_v38 = vadd.f32 %v23938_v50, %v25532_v63  ;;  %v24402_v49 = vpop.permute.xlu1 %13094  ;;  %v13100_v50 = vpop.permute.xlu0 %13099 }
 0x588   : > { %15548 = vst.msk [vmem:[%s21698_s27 + $0x10c] sm:$0xf] %vm13563_vm6, %v14621_v44  ;;  %v12263_v28 = vmul.f32 %v24343_v29, %v18798_v21  ;;  %v14646_v2 = vrot.slane %v14644_v47, 6  ;;  %v14649_v52 = vrot.slane %v14647_v27, 7  ;;  %v18801_v4 = vadd.f32 %v23966_v48, %v23947_v54  ;;  %v24421_v63 = vpop.f32.mrb[108].mxu1 }
 0x589   : > { %v14601_v40 = vsel %vm23435_vm1, %v14592_v60, %v14600_v51  ;;  %v14602_v44 = vrot.slane %v14600_v51, 4  ;;  %v13491_v26 = vmul.f32 %v24315_v14, %v12539_v15  ;;  %v12261_v36 = vmul.f32 %v24343_v29, %v18799_v38  ;;  %v24423_v38 = vpop.f32.mrb[108].mxu0 }
 0x58a   : > { %v12406_v61 = vadd.f32 %v24308_v46, %v12263_v28  ;;  %15546 = vst.msk [vmem:[%s21698_s27 + $0x104] sm:$0xf] %vm13563_vm6, %v14601_v40  ;;  %v24406_v21 = vor.u32 %v14649_v52, %v14646_v2  ;;  %v12266_v54 = vmul.f32 %v24343_v29, %v18800_v55  ;;  %v12264_v30 = vmul.f32 %v24343_v29, %v18801_v4 }
 0x58b   : > { %v14611_v48 = vsel %vm23435_vm1, %v14602_v44, %v14610_v11  ;;  %v16795_v60 = vpack.c.bf16 %v13491_v26, %v13491_v26  ;;  %v18802_v47 = vadd.f32 %v23971_v58, %v23951_v7  ;;  %v12404_v51 = vadd.f32 %v24308_v46, %v12261_v36  ;;  %v24426_v7 = vpop.f32.mrb[109].mxu1  ;;  %v24428_v58 = vpop.f32.mrb[109].mxu0 }
 0x58c   : > { %v12542_v14 = vmax.f32 %v12406_v61, 0.0  ;;  %15547 = vst.msk [vmem:[%s21698_s27 + $0x108] sm:$0xf] %vm13563_vm6, %v14611_v48  ;;  %v14652_v27 = vrot.slane %v24406_v21, 4  ;;  %v12409_v15 = vadd.f32 %v24308_v46, %v12266_v54  ;;  %v12407_v28 = vadd.f32 %v24308_v46, %v12264_v30  ;;  %v24432_v61 = vpop.f32.mrb[110].mxu1  ;;  %v24434_v36 = vpop.f32.mrb[110].mxu0 }
 0x58d   : > { %v14624_v11 = vshrl.u32 %v16795_v60, 16  ;;  %v14627_v2 = vshll.u32 %v16795_v60, 16  ;;  %v12267_v55 = vmul.f32 %v24343_v29, %v18802_v47  ;;  %v12540_v4 = vmax.f32 %v12404_v51, 0.0  ;;  %25533 = vst [vmem:[#allocation28_spill] sm:$0xff] %v24432_v61  ;;  %25534 = vst [vmem:[#allocation29_spill] sm:$0xff] %v24434_v36  ;;  %v13105_v60 = vpop.permute.xlu1 %13104 }
 0x58e   : > { %v13494_v52 = vmul.f32 %v13085_v17, %v12542_v14  ;;  %v12545_v40 = vmax.f32 %v12409_v15, 0.0  ;;  %v12543_v44 = vmax.f32 %v12407_v28, 0.0  ;;  %v18803_v26 = vadd.f32 %v23974_v18, %v23957_v0  ;;  %v24437_v14 = vpop.permute.xlu0 %13109 }
 0x58f   : > { %v14626_v54 = vrot.slane %v14624_v11, 6  ;;  %v14629_v30 = vrot.slane %v14627_v2, 7  ;;  %v12410_v17 = vadd.f32 %v24308_v46, %v12267_v55  ;;  %v13492_v47 = vmul.f32 %v24346_v13, %v12540_v4 }
 0x590   : > { %v16798_v48 = vpack.c.bf16 %v13494_v52, %v13494_v52  ;;  %v13497_v51 = vmul.f32 %v13100_v50, %v12545_v40  ;;  %v13495_v15 = vmul.f32 %v24368_v24, %v12543_v44  ;;  %v12265_v0 = vmul.f32 %v24343_v29, %v18803_v26  ;;  %v24447_v40 = vpop.f32.mrb[111].mxu1  ;;  %v24449_v44 = vpop.f32.mrb[111].mxu0 }
 0x591   : > { %v14630_v18 = vor.u32 %v14629_v30, %v14626_v54  ;;  %v12546_v36 = vmax.f32 %v12410_v17, 0.0  ;;  %v16796_v11 = vpack.c.bf16 %v13492_v47, %v13492_v47  ;;  %v25535_v61 = vrot.slane %v24374_v25, 4  ;;  %25536 = vst [vmem:[#allocation27_spill] sm:$0xff] %v24447_v40  ;;  %25537 = vst [vmem:[#allocation58_spill] sm:$0xff] %v24449_v44 }
 0x592   : > { %v14654_v28 = vshrl.u32 %v16798_v48, 16  ;;  %v14657_v39 = vshll.u32 %v16798_v48, 16  ;;  %v16801_v2 = vpack.c.bf16 %v13497_v51, %v13497_v51  ;;  %v16799_v52 = vpack.c.bf16 %v13495_v15, %v13495_v15  ;;  %v24453_v15 = vpop.permute.xlu1 %13114 }
 0x593   : > { %v12408_v55 = vadd.f32 %v24308_v46, %v12265_v0  ;;  %v14631_v13 = vsel %vm23435_vm1, %v25535_v61, %v14630_v18  ;;  %v14632_v50 = vrot.slane %v14630_v18, 4  ;;  %v14634_v26 = vshrl.u32 %v16796_v11, 16  ;;  %v24455_v61 = vpop.permute.xlu0 %13119 }
 0x594   : > { %v14656_v4 = vrot.slane %v14654_v28, 6  ;;  %v14659_v24 = vrot.slane %v14657_v39, 7  ;;  %15549 = vst.msk [vmem:[%s21698_s27 + $0x110] sm:$0xf] %vm13563_vm6, %v14631_v13  ;;  %v14637_v54 = vshll.u32 %v16796_v11, 16  ;;  %v14684_v30 = vshrl.u32 %v16801_v2, 16 }
 0x595   : > { %v14687_v48 = vshll.u32 %v16801_v2, 16  ;;  %v14664_v47 = vshrl.u32 %v16799_v52, 16  ;;  %v14667_v25 = vshll.u32 %v16799_v52, 16  ;;  %v13498_v51 = vmul.f32 %v13105_v60, %v12546_v36 }
 0x596   : > { %v14660_v17 = vor.u32 %v14659_v24, %v14656_v4  ;;  %v14636_v39 = vrot.slane %v14634_v26, 6  ;;  %v14639_v0 = vrot.slane %v14637_v54, 7  ;;  %v14686_v18 = vrot.slane %v14684_v30, 6  ;;  %v24463_v4 = vpop.f32.mrb[112].mxu1  ;;  %v24465_v24 = vpop.f32.mrb[112].mxu0  ;;  %v25538_v30 = vld [vmem:[#allocation8_spill] sm:$0xff] }
 0x597   : > { %v14689_v28 = vrot.slane %v14687_v48, 7  ;;  %v14666_v11 = vrot.slane %v14664_v47, 6  ;;  %v14669_v40 = vrot.slane %v14667_v25, 7  ;;  %v16802_v36 = vpack.c.bf16 %v13498_v51, %v13498_v51  ;;  %v24477_v47 = vpop.f32.mrb[113].mxu0 }
 0x598   : > { %v14661_v13 = vsel %vm23435_vm1, %v14652_v27, %v14660_v17  ;;  %v14662_v44 = vrot.slane %v14660_v17, 4  ;;  %v14640_v2 = vor.u32 %v14639_v0, %v14636_v39  ;;  %v12544_v60 = vmax.f32 %v12408_v55, 0.0  ;;  %v24475_v17 = vpop.f32.mrb[113].mxu1  ;;  %25540 = vst [vmem:[#allocation34_spill] sm:$0xff] %v24477_v47  ;;  %v24489_v39 = vpop.permute.xlu0 %13129 }
 0x599   : > { %15552 = vst.msk [vmem:[%s21698_s27 + $0x11c] sm:$0xf] %vm13563_vm6, %v14661_v13  ;;  %v24461_v52 = vor.u32 %v14689_v28, %v14686_v18  ;;  %v24467_v26 = vor.u32 %v14669_v40, %v14666_v11  ;;  %v18804_v27 = vadd.f32 %v23997_v5, %v23976_v33  ;;  %v18805_v54 = vadd.f32 %v24002_v57, %v23978_v12  ;;  %v25541_v11 = vld [vmem:[#allocation5_spill] sm:$0xff] }
 0x59a   : > { %v18806_v48 = vadd.f32 %v24006_v41, %v25538_v30  ;;  %25539 = vst [vmem:[#allocation59_spill] sm:$0xff] %v24475_v17  ;;  %v14641_v55 = vsel %vm23435_vm1, %v14632_v50, %v14640_v2  ;;  %v14642_v40 = vrot.slane %v14640_v2, 4  ;;  %v14694_v51 = vshrl.u32 %v16802_v36, 16  ;;  %v13125_v41 = vpop.permute.xlu1 %13124  ;;  %v25542_v2 = vld [vmem:[#allocation38_spill] sm:$0xff] }
 0x59b   : > { %v14692_v25 = vrot.slane %v24461_v52, 4  ;;  %15550 = vst.msk [vmem:[%s21698_s27 + $0x114] sm:$0xf] %vm13563_vm6, %v14641_v55  ;;  %v14671_v33 = vsel %vm23435_vm1, %v14662_v44, %v24467_v26  ;;  %v14672_v12 = vrot.slane %v24467_v26, 4  ;;  %v14697_v57 = vshll.u32 %v16802_v36, 16  ;;  %v24505_v26 = vpop.f32.mrb[114].mxu0 }
 0x59c   : > { %v13496_v5 = vmul.f32 %v24402_v49, %v12544_v60  ;;  %v14651_v50 = vsel %vm23435_vm1, %v14642_v40, %v24406_v21  ;;  %15553 = vst.msk [vmem:[%s21698_s27 + $0x120] sm:$0xf] %vm13563_vm6, %v14671_v33  ;;  %v14696_v0 = vrot.slane %v14694_v51, 6  ;;  %v12270_v18 = vmul.f32 %v24343_v29, %v18804_v27  ;;  %v24503_v60 = vpop.f32.mrb[114].mxu1  ;;  %25544 = vst [vmem:[#allocation32_spill] sm:$0xff] %v24505_v26  ;;  %v25545_v27 = vld [vmem:[#allocation6_spill] sm:$0xff] }
 0x59d   : > { %v12268_v28 = vmul.f32 %v24343_v29, %v18805_v54  ;;  %15551 = vst.msk [vmem:[%s21698_s27 + $0x118] sm:$0xf] %vm13563_vm6, %v14651_v50  ;;  %v14699_v44 = vrot.slane %v14697_v57, 7  ;;  %v12271_v49 = vmul.f32 %v24343_v29, %v18806_v48  ;;  %v18807_v36 = vadd.f32 %v25542_v2, %v25541_v11  ;;  %25543 = vst [vmem:[#allocation60_spill] sm:$0xff] %v24503_v60  ;;  %v25546_v55 = vld [vmem:[#allocation41_spill] sm:$0xff]  ;;  %v25547_v40 = vld [vmem:[#allocation39_spill] sm:$0xff] }
 0x59e   : > { %v16800_v13 = vpack.c.bf16 %v13496_v5, %v13496_v5  ;;  %v12413_v21 = vadd.f32 %v24308_v46, %v12270_v18  ;;  %v18808_v54 = vadd.f32 %v25546_v55, %v25545_v27  ;;  %v25548_v51 = vld [vmem:[#allocation12_spill] sm:$0xff]  ;;  %v24516_v11 = vpop.f32.mrb[115].mxu1  ;;  %v24518_v2 = vpop.f32.mrb[115].mxu0 }
 0x59f   : > { %v12411_v30 = vadd.f32 %v24308_v46, %v12268_v28  ;;  %v18809_v33 = vadd.f32 %v25548_v51, %v25547_v40  ;;  %v24513_v57 = vor.u32 %v14699_v44, %v14696_v0  ;;  %v12414_v50 = vadd.f32 %v24308_v46, %v12271_v49  ;;  %25549 = vst [vmem:[#allocation33_spill] sm:$0xff] %v24516_v11  ;;  %v24526_v40 = vpop.permute.xlu1 %13134  ;;  %v13140_v49 = vpop.permute.xlu0 %13139 }
 0x5a0   : > { %v14674_v48 = vshrl.u32 %v16800_v13, 16  ;;  %v14677_v5 = vshll.u32 %v16800_v13, 16  ;;  %25550 = vst [vmem:[#allocation31_spill] sm:$0xff] %v24518_v2  ;;  %v12549_v18 = vmax.f32 %v12413_v21, 0.0  ;;  %v12269_v28 = vmul.f32 %v24343_v29, %v18807_v36  ;;  %v24537_v17 = vpop.f32.mrb[116].mxu1 }
 0x5a1   : > { %v12547_v26 = vmax.f32 %v12411_v30, 0.0  ;;  %v12274_v27 = vmul.f32 %v24343_v29, %v18808_v54  ;;  %v14701_v0 = vsel %vm23435_vm1, %v14692_v25, %v24513_v57  ;;  %v14702_v44 = vrot.slane %v24513_v57, 4 }
 0x5a2   : > { %v14676_v55 = vrot.slane %v14674_v48, 6  ;;  %v14679_v13 = vrot.slane %v14677_v5, 7  ;;  %15556 = vst.msk [vmem:[%s21698_s27 + $0x12c] sm:$0xf] %vm13563_vm6, %v14701_v0  ;;  %v13501_v21 = vmul.f32 %v24455_v61, %v12549_v18  ;;  %v12550_v36 = vmax.f32 %v12414_v50, 0.0  ;;  %v25551_v48 = vld [vmem:[#allocation40_spill] sm:$0xff] }
 0x5a3   : > { %v13499_v30 = vmul.f32 %v24437_v14, %v12547_v26  ;;  %v12412_v54 = vadd.f32 %v24308_v46, %v12269_v28  ;;  %v12417_v25 = vadd.f32 %v24308_v46, %v12274_v27  ;;  %v12272_v57 = vmul.f32 %v24343_v29, %v18809_v33  ;;  %v25552_v5 = vld [vmem:[#allocation43_spill] sm:$0xff]  ;;  %v24539_v61 = vpop.f32.mrb[116].mxu0  ;;  %v24544_v33 = vpop.f32.mrb[117].mxu1 }
 0x5a4   : > { %v14680_v51 = vor.u32 %v14679_v13, %v14676_v55  ;;  %v18810_v2 = vadd.f32 %v25552_v5, %v25551_v48  ;;  %v16805_v11 = vpack.c.bf16 %v13501_v21, %v13501_v21  ;;  %v13502_v47 = vmul.f32 %v13125_v41, %v12550_v36  ;;  %25553 = vst [vmem:[#allocation36_spill] sm:$0xff] %v24544_v33  ;;  %v24546_v28 = vpop.f32.mrb[117].mxu0  ;;  %v24558_v33 = vpop.f32.mrb[118].mxu1 }
 0x5a5   : > { %v16803_v60 = vpack.c.bf16 %v13499_v30, %v13499_v30  ;;  %v12548_v0 = vmax.f32 %v12412_v54, 0.0  ;;  %v12553_v50 = vmax.f32 %v12417_v25, 0.0  ;;  %v12415_v18 = vadd.f32 %v24308_v46, %v12272_v57  ;;  %25554 = vst [vmem:[#allocation61_spill] sm:$0xff] %v24546_v28  ;;  %v13145_v54 = vpop.permute.xlu1 %13144 }
 0x5a6   : > { %v14681_v14 = vsel %vm23435_vm1, %v14672_v12, %v14680_v51  ;;  %v14682_v26 = vrot.slane %v14680_v51, 4  ;;  %v14724_v41 = vshrl.u32 %v16805_v11, 16  ;;  %v14727_v27 = vshll.u32 %v16805_v11, 16  ;;  %v24554_v51 = vpop.permute.xlu0 %13149 }
 0x5a7   : > { %15554 = vst.msk [vmem:[%s21698_s27 + $0x124] sm:$0xf] %vm13563_vm6, %v14681_v14  ;;  %v14704_v55 = vshrl.u32 %v16803_v60, 16  ;;  %v14707_v13 = vshll.u32 %v16803_v60, 16  ;;  %v16806_v12 = vpack.c.bf16 %v13502_v47, %v13502_v47  ;;  %v13500_v30 = vmul.f32 %v24453_v15, %v12548_v0 }
 0x5a8   : > { %v14691_v21 = vsel %vm23435_vm1, %v14682_v26, %v24461_v52  ;;  %v13505_v36 = vmul.f32 %v13140_v49, %v12553_v50  ;;  %v14726_v25 = vrot.slane %v14724_v41, 6  ;;  %v14729_v57 = vrot.slane %v14727_v27, 7  ;;  %v24560_v52 = vpop.f32.mrb[118].mxu0  ;;  %v24563_v26 = vpop.f32.mrb[119].mxu1 }
 0x5a9   : > { %15555 = vst.msk [vmem:[%s21698_s27 + $0x128] sm:$0xf] %vm13563_vm6, %v14691_v21  ;;  %v14706_v48 = vrot.slane %v14704_v55, 6  ;;  %v14709_v5 = vrot.slane %v14707_v13, 7  ;;  %v14734_v11 = vshrl.u32 %v16806_v12, 16  ;;  %v14737_v14 = vshll.u32 %v16806_v12, 16 }
 0x5aa   : > { %v16804_v60 = vpack.c.bf16 %v13500_v30, %v13500_v30  ;;  %v16809_v28 = vpack.c.bf16 %v13505_v36, %v13505_v36  ;;  %v14730_v15 = vor.u32 %v14729_v57, %v14726_v25  ;;  %v12551_v49 = vmax.f32 %v12415_v18, 0.0  ;;  %25555 = vst [vmem:[#allocation62_spill] sm:$0xff] %v24563_v26  ;;  %v24565_v50 = vpop.f32.mrb[119].mxu0  ;;  %v24575_v26 = vpop.permute.xlu1 %13154 }
 0x5ab   : > { %v14710_v47 = vor.u32 %v14709_v5, %v14706_v48  ;;  %v12275_v0 = vmul.f32 %v24343_v29, %v18810_v2  ;;  %25556 = vst [vmem:[#allocation63_spill] sm:$0xff] %v24565_v50  ;;  %v14736_v41 = vrot.slane %v14734_v11, 6  ;;  %v14739_v27 = vrot.slane %v14737_v14, 7  ;;  %v25557_v14 = vld [vmem:[#allocation7_spill] sm:$0xff] }
 0x5ac   : > { %v14714_v55 = vshrl.u32 %v16804_v60, 16  ;;  %v14717_v13 = vshll.u32 %v16804_v60, 16  ;;  %v14732_v21 = vrot.slane %v14730_v15, 4  ;;  %v14764_v36 = vshrl.u32 %v16809_v28, 16  ;;  %v25558_v60 = vld [vmem:[#allocation9_spill] sm:$0xff] }
 0x5ad   : > { %v14711_v12 = vsel %vm23435_vm1, %v14702_v44, %v14710_v47  ;;  %v14712_v30 = vrot.slane %v14710_v47, 4  ;;  %v14740_v18 = vor.u32 %v14739_v27, %v14736_v41  ;;  %v14767_v57 = vshll.u32 %v16809_v28, 16  ;;  %v13160_v44 = vpop.permute.xlu0 %13159 }
 0x5ae   : > { %15557 = vst.msk [vmem:[%s21698_s27 + $0x130] sm:$0xf] %vm13563_vm6, %v14711_v12  ;;  %v14716_v25 = vrot.slane %v14714_v55, 6  ;;  %v14719_v2 = vrot.slane %v14717_v13, 7  ;;  %v14766_v48 = vrot.slane %v14764_v36, 6  ;;  %v13503_v5 = vmul.f32 %v24489_v39, %v12551_v49  ;;  %v25559_v49 = vld [vmem:[#allocation44_spill] sm:$0xff] }
 0x5af   : > { %v12418_v11 = vadd.f32 %v24308_v46, %v12275_v0  ;;  %v18811_v50 = vadd.f32 %v25558_v60, %v25557_v14  ;;  %v14741_v47 = vsel %vm23435_vm1, %v14732_v21, %v14740_v18  ;;  %v14742_v12 = vrot.slane %v14740_v18, 4  ;;  %v25560_v21 = vld [vmem:[#allocation10_spill] sm:$0xff] }
 0x5b0   : > { %v14720_v41 = vor.u32 %v14719_v2, %v14716_v25  ;;  %v14769_v27 = vrot.slane %v14767_v57, 7  ;;  %15560 = vst.msk [vmem:[%s21698_s27 + $0x13c] sm:$0xf] %vm13563_vm6, %v14741_v47  ;;  %v16807_v28 = vpack.c.bf16 %v13503_v5, %v13503_v5  ;;  %v18812_v0 = vadd.f32 %v24091_v22, %v25559_v49  ;;  %v25563_v49 = vld [vmem:[#allocation46_spill] sm:$0xff] }
 0x5b1   : > { %v12554_v55 = vmax.f32 %v12418_v11, 0.0  ;;  %v12273_v39 = vmul.f32 %v24343_v29, %v18811_v50  ;;  %v18813_v18 = vadd.f32 %v24093_v34, %v25560_v21 }
 0x5b2   : > { %v14721_v13 = vsel %vm23435_vm1, %v14712_v30, %v14720_v41  ;;  %v14722_v36 = vrot.slane %v14720_v41, 4  ;;  %v24586_v14 = vor.u32 %v14769_v27, %v14766_v48  ;;  %v14744_v25 = vshrl.u32 %v16807_v28, 16  ;;  %v13165_v41 = vpop.permute.xlu1 %13164  ;;  %v24600_v27 = vpop.permute.xlu0 %13169 }
 0x5b3   : > { %15558 = vst.msk [vmem:[%s21698_s27 + $0x134] sm:$0xf] %vm13563_vm6, %v14721_v13  ;;  %v14747_v2 = vshll.u32 %v16807_v28, 16  ;;  %v13506_v57 = vmul.f32 %v13145_v54, %v12554_v55  ;;  %v12416_v5 = vadd.f32 %v24308_v46, %v12273_v39  ;;  %v12278_v30 = vmul.f32 %v24343_v29, %v18812_v0  ;;  %v25562_v39 = vld [vmem:[#allocation45_spill] sm:$0xff] }
 0x5b4   : > { %v14731_v50 = vsel %vm23435_vm1, %v14722_v36, %v14730_v15  ;;  %v14772_v22 = vrot.slane %v24586_v14, 4  ;;  %v12276_v48 = vmul.f32 %v24343_v29, %v18813_v18  ;;  %v14746_v11 = vrot.slane %v14744_v25, 6  ;;  %v25561_v15 = vld [vmem:[#allocation11_spill] sm:$0xff]  ;;  %v24609_v25 = vpop.f32.mrb[120].mxu1 }
 0x5b5   : > { %15559 = vst.msk [vmem:[%s21698_s27 + $0x138] sm:$0xf] %vm13563_vm6, %v14731_v50  ;;  %v14749_v34 = vrot.slane %v14747_v2, 7  ;;  %v16810_v60 = vpack.c.bf16 %v13506_v57, %v13506_v57  ;;  %v12552_v47 = vmax.f32 %v12416_v5, 0.0  ;;  %v12421_v54 = vadd.f32 %v24308_v46, %v12278_v30  ;;  %v24611_v2 = vpop.f32.mrb[120].mxu0 }
 0x5b6   : > { %v12419_v28 = vadd.f32 %v24308_v46, %v12276_v48  ;;  %v18814_v55 = vadd.f32 %v24095_v53, %v25561_v15  ;;  %v18815_v0 = vadd.f32 %v25563_v49, %v25562_v39  ;;  %v24615_v53 = vpop.f32.mrb[121].mxu1  ;;  %v24617_v48 = vpop.f32.mrb[121].mxu0 }
 0x5b7   : > { %v14750_v13 = vor.u32 %v14749_v34, %v14746_v11  ;;  %v14774_v36 = vshrl.u32 %v16810_v60, 16  ;;  %v14777_v21 = vshll.u32 %v16810_v60, 16  ;;  %v13504_v18 = vmul.f32 %v24526_v40, %v12552_v47  ;;  %25564 = vst [vmem:[#allocation35_spill] sm:$0xff] %v24617_v48  ;;  %v24621_v47 = vpop.f32.mrb[122].mxu1  ;;  %v24623_v15 = vpop.f32.mrb[122].mxu0 }
 0x5b8   : > { %v12557_v57 = vmax.f32 %v12421_v54, 0.0  ;;  %v12555_v5 = vmax.f32 %v12419_v28, 0.0  ;;  %v12279_v50 = vmul.f32 %v24343_v29, %v18814_v55  ;;  %v12277_v30 = vmul.f32 %v24343_v29, %v18815_v0  ;;  %25565 = vst [vmem:[#allocation64_spill] sm:$0xff] %v24621_v47  ;;  %25566 = vst [vmem:[#allocation65_spill] sm:$0xff] %v24623_v15  ;;  %v24629_v49 = vpop.f32.mrb[123].mxu1  ;;  %v24631_v0 = vpop.f32.mrb[123].mxu0 }
 0x5b9   : > { %v14751_v11 = vsel %vm23435_vm1, %v14742_v12, %v14750_v13  ;;  %v14752_v34 = vrot.slane %v14750_v13, 4  ;;  %v14776_v60 = vrot.slane %v14774_v36, 6  ;;  %v14779_v40 = vrot.slane %v14777_v21, 7  ;;  %25567 = vst [vmem:[#allocation66_spill] sm:$0xff] %v24629_v49  ;;  %25568 = vst [vmem:[#allocation67_spill] sm:$0xff] %v24631_v0  ;;  %v25569_v36 = vld [vmem:[#allocation16_spill] sm:$0xff] }
 0x5ba   : > { %15561 = vst.msk [vmem:[%s21698_s27 + $0x140] sm:$0xf] %vm13563_vm6, %v14751_v11  ;;  %v16808_v54 = vpack.c.bf16 %v13504_v18, %v13504_v18  ;;  %v13509_v28 = vmul.f32 %v13160_v44, %v12557_v57  ;;  %v13507_v55 = vmul.f32 %v24554_v51, %v12555_v5  ;;  %v12422_v39 = vadd.f32 %v24308_v46, %v12279_v50  ;;  %v25570_v15 = vld [vmem:[#allocation13_spill] sm:$0xff] }
 0x5bb   : > { %v14780_v12 = vor.u32 %v14779_v40, %v14776_v60  ;;  %v12420_v13 = vadd.f32 %v24308_v46, %v12277_v30  ;;  %v18816_v21 = vadd.f32 %v24124_v45, %v25569_v36  ;;  %v18817_v11 = vadd.f32 %v24129_v59, %v25570_v15  ;;  %v24643_v15 = vpop.permute.xlu1 %13174 }
 0x5bc   : > { %v14754_v18 = vshrl.u32 %v16808_v54, 16  ;;  %v14757_v44 = vshll.u32 %v16808_v54, 16  ;;  %v16813_v57 = vpack.c.bf16 %v13509_v28, %v13509_v28  ;;  %v16811_v51 = vpack.c.bf16 %v13507_v55, %v13507_v55  ;;  %v13180_v54 = vpop.permute.xlu0 %13179 }
 0x5bd   : > { %v14781_v5 = vsel %vm23435_vm1, %v14772_v22, %v14780_v12  ;;  %v14782_v50 = vrot.slane %v14780_v12, 4  ;;  %v12558_v49 = vmax.f32 %v12422_v39, 0.0  ;;  %v12556_v47 = vmax.f32 %v12420_v13, 0.0 }
 0x5be   : > { %15564 = vst.msk [vmem:[%s21698_s27 + $0x14c] sm:$0xf] %vm13563_vm6, %v14781_v5  ;;  %v14756_v60 = vrot.slane %v14754_v18, 6  ;;  %v14759_v30 = vrot.slane %v14757_v44, 7  ;;  %v14804_v40 = vshrl.u32 %v16813_v57, 16  ;;  %v14807_v0 = vshll.u32 %v16813_v57, 16 }
 0x5bf   : > { %v14784_v45 = vshrl.u32 %v16811_v51, 16  ;;  %v14787_v36 = vshll.u32 %v16811_v51, 16  ;;  %v13510_v48 = vmul.f32 %v13165_v41, %v12558_v49  ;;  %v13508_v59 = vmul.f32 %v24575_v26, %v12556_v47  ;;  %v24646_v5 = vpop.f32.mrb[124].mxu1  ;;  %v24648_v57 = vpop.f32.mrb[124].mxu0 }
 0x5c0   : > { %v14760_v28 = vor.u32 %v14759_v30, %v14756_v60  ;;  %v14806_v22 = vrot.slane %v14804_v40, 6  ;;  %v14809_v55 = vrot.slane %v14807_v0, 7  ;;  %v12282_v39 = vmul.f32 %v24343_v29, %v18816_v21  ;;  %v24653_v51 = vpop.f32.mrb[125].mxu1  ;;  %v24655_v0 = vpop.f32.mrb[125].mxu0 }
 0x5c1   : > { %v14786_v12 = vrot.slane %v14784_v45, 6  ;;  %v14789_v13 = vrot.slane %v14787_v36, 7  ;;  %v16814_v18 = vpack.c.bf16 %v13510_v48, %v13510_v48  ;;  %v16812_v44 = vpack.c.bf16 %v13508_v59, %v13508_v59  ;;  %v24659_v40 = vpop.f32.mrb[126].mxu1  ;;  %v24661_v45 = vpop.f32.mrb[126].mxu0 }
 0x5c2   : > { %v14761_v26 = vsel %vm23435_vm1, %v14752_v34, %v14760_v28  ;;  %v14762_v41 = vrot.slane %v14760_v28, 4  ;;  %v14810_v47 = vor.u32 %v14809_v55, %v14806_v22  ;;  %v12425_v49 = vadd.f32 %v24308_v46, %v12282_v39  ;;  %25571 = vst [vmem:[#allocation68_spill] sm:$0xff] %v24659_v40  ;;  %25572 = vst [vmem:[#allocation69_spill] sm:$0xff] %v24661_v45 }
 0x5c3   : > { %15562 = vst.msk [vmem:[%s21698_s27 + $0x144] sm:$0xf] %vm13563_vm6, %v14761_v26  ;;  %v14790_v48 = vor.u32 %v14789_v13, %v14786_v12  ;;  %v14814_v21 = vshrl.u32 %v16814_v18, 16  ;;  %v14817_v60 = vshll.u32 %v16814_v18, 16  ;;  %v14794_v30 = vshrl.u32 %v16812_v44, 16 }
 0x5c4   : > { %v14771_v34 = vsel %vm23435_vm1, %v14762_v41, %v24586_v14  ;;  %v14812_v36 = vrot.slane %v14810_v47, 4  ;;  %v14797_v59 = vshll.u32 %v16812_v44, 16  ;;  %v12561_v28 = vmax.f32 %v12425_v49, 0.0  ;;  %v25573_v44 = vld [vmem:[#allocation47_spill] sm:$0xff] }
 0x5c5   : > { %15563 = vst.msk [vmem:[%s21698_s27 + $0x148] sm:$0xf] %vm13563_vm6, %v14771_v34  ;;  %v14791_v22 = vsel %vm23435_vm1, %v14782_v50, %v14790_v48  ;;  %v14792_v55 = vrot.slane %v14790_v48, 4  ;;  %v14816_v39 = vrot.slane %v14814_v21, 6  ;;  %v14819_v12 = vrot.slane %v14817_v60, 7  ;;  %v25574_v50 = vld [vmem:[#allocation48_spill] sm:$0xff] }
 0x5c6   : > { %15565 = vst.msk [vmem:[%s21698_s27 + $0x150] sm:$0xf] %vm13563_vm6, %v14791_v22  ;;  %v14796_v13 = vrot.slane %v14794_v30, 6  ;;  %v14799_v18 = vrot.slane %v14797_v59, 7  ;;  %v13513_v26 = vmul.f32 %v13180_v54, %v12561_v28  ;;  %v12280_v45 = vmul.f32 %v24343_v29, %v18817_v11  ;;  %v25575_v54 = vld [vmem:[#allocation14_spill] sm:$0xff]  ;;  %v24684_v30 = vpop.f32.mrb[127].mxu1  ;;  %v13185_v59 = vpop.permute.xlu1 %13184 }
 0x5c7   : > { %v24673_v40 = vor.u32 %v14819_v12, %v14816_v39  ;;  %v18818_v14 = vadd.f32 %v24134_v16, %v24109_v42  ;;  %v18819_v41 = vadd.f32 %v25573_v44, %v24113_v62  ;;  %v18820_v49 = vadd.f32 %v24170_v43, %v25574_v50  ;;  %v24686_v34 = vpop.f32.mrb[127].mxu0  ;;  %v13190_v42 = vpop.permute.xlu0 %13189 }
 0x5c8   : > { %v14800_v48 = vor.u32 %v14799_v18, %v14796_v13  ;;  %v16817_v21 = vpack.c.bf16 %v13513_v26, %v13513_v26  ;;  %v12423_v60 = vadd.f32 %v24308_v46, %v12280_v45  ;;  %v18821_v11 = vadd.f32 %v24180_v1, %v25575_v54 }
 0x5c9   : > { %v14821_v62 = vsel %vm23435_vm1, %v14812_v36, %v24673_v40  ;;  %v12283_v43 = vmul.f32 %v24343_v29, %v18818_v14  ;;  %v12281_v45 = vmul.f32 %v24343_v29, %v18819_v41  ;;  %v12286_v18 = vmul.f32 %v24343_v29, %v18820_v49  ;;  %v25576_v49 = vld [vmem:[#allocation49_spill] sm:$0xff] }
 0x5ca   : > { %15568 = vst.msk [vmem:[%s21698_s27 + $0x15c] sm:$0xf] %vm13563_vm6, %v14821_v62  ;;  %v14801_v1 = vsel %vm23435_vm1, %v14792_v55, %v14800_v48  ;;  %v14802_v28 = vrot.slane %v14800_v48, 4  ;;  %v14844_v22 = vshrl.u32 %v16817_v21, 16  ;;  %v14847_v39 = vshll.u32 %v16817_v21, 16  ;;  %v25577_v62 = vld [vmem:[#allocation15_spill] sm:$0xff] }
 0x5cb   : > { %15566 = vst.msk [vmem:[%s21698_s27 + $0x154] sm:$0xf] %vm13563_vm6, %v14801_v1  ;;  %v12559_v12 = vmax.f32 %v12423_v60, 0.0  ;;  %v12426_v36 = vadd.f32 %v24308_v46, %v12283_v43  ;;  %v12424_v13 = vadd.f32 %v24308_v46, %v12281_v45  ;;  %v12284_v41 = vmul.f32 %v24343_v29, %v18821_v11  ;;  %v25579_v45 = vld [vmem:[#allocation18_spill] sm:$0xff]  ;;  %v13200_v11 = vpop.permute.xlu0 %13199 }
 0x5cc   : > { %v14811_v26 = vsel %vm23435_vm1, %v14802_v28, %v14810_v47  ;;  %v14846_v14 = vrot.slane %v14844_v22, 6  ;;  %v14849_v44 = vrot.slane %v14847_v39, 7  ;;  %v12429_v21 = vadd.f32 %v24308_v46, %v12286_v18  ;;  %v25578_v47 = vld [vmem:[#allocation50_spill] sm:$0xff]  ;;  %v24717_v28 = vpop.permute.xlu1 %13194 }
 0x5cd   : > { %15567 = vst.msk [vmem:[%s21698_s27 + $0x158] sm:$0xf] %vm13563_vm6, %v14811_v26  ;;  %v13511_v55 = vmul.f32 %v24600_v27, %v12559_v12  ;;  %v12562_v50 = vmax.f32 %v12426_v36, 0.0  ;;  %v12560_v48 = vmax.f32 %v12424_v13, 0.0  ;;  %v12427_v54 = vadd.f32 %v24308_v46, %v12284_v41 }
 0x5ce   : > { %v24710_v60 = vor.u32 %v14849_v44, %v14846_v14  ;;  %v18822_v43 = vadd.f32 %v25577_v62, %v25576_v49  ;;  %v18823_v1 = vadd.f32 %v25579_v45, %v25578_v47  ;;  %v12565_v12 = vmax.f32 %v12429_v21, 0.0  ;;  %v24723_v14 = vpop.f32.mrb[128].mxu1  ;;  %v24725_v44 = vpop.f32.mrb[128].mxu0 }
 0x5cf   : > { %v16815_v22 = vpack.c.bf16 %v13511_v55, %v13511_v55  ;;  %v13514_v39 = vmul.f32 %v13185_v59, %v12562_v50  ;;  %v13512_v27 = vmul.f32 %v24643_v15, %v12560_v48  ;;  %v12563_v13 = vmax.f32 %v12427_v54, 0.0  ;;  %v24727_v55 = vpop.f32.mrb[129].mxu1  ;;  %v24729_v59 = vpop.f32.mrb[129].mxu0 }
 0x5d0   : > { %v14852_v36 = vrot.slane %v24710_v60, 4  ;;  %v12287_v18 = vmul.f32 %v24343_v29, %v18822_v43  ;;  %v12285_v26 = vmul.f32 %v24343_v29, %v18823_v1  ;;  %25580 = vst [vmem:[#allocation70_spill] sm:$0xff] %v24727_v55  ;;  %25581 = vst [vmem:[#allocation71_spill] sm:$0xff] %v24729_v59  ;;  %v13517_v15 = vmul.f32 %v13200_v11, %v12565_v12  ;;  %v24733_v54 = vpop.f32.mrb[130].mxu1  ;;  %v24735_v43 = vpop.f32.mrb[130].mxu0 }
 0x5d1   : > { %v14824_v41 = vshrl.u32 %v16815_v22, 16  ;;  %v14827_v49 = vshll.u32 %v16815_v22, 16  ;;  %v16818_v62 = vpack.c.bf16 %v13514_v39, %v13514_v39  ;;  %v16816_v47 = vpack.c.bf16 %v13512_v27, %v13512_v27  ;;  %25582 = vst [vmem:[#allocation72_spill] sm:$0xff] %v24733_v54  ;;  %25583 = vst [vmem:[#allocation73_spill] sm:$0xff] %v24735_v43  ;;  %v24737_v39 = vpop.f32.mrb[131].mxu1  ;;  %v24739_v27 = vpop.f32.mrb[131].mxu0 }
 0x5d2   : > { %v13515_v50 = vmul.f32 %v13190_v42, %v12563_v13  ;;  %v12430_v48 = vadd.f32 %v24308_v46, %v12287_v18  ;;  %v12428_v21 = vadd.f32 %v24308_v46, %v12285_v26  ;;  %25584 = vst [vmem:[#allocation74_spill] sm:$0xff] %v24737_v39  ;;  %25585 = vst [vmem:[#allocation75_spill] sm:$0xff] %v24739_v27  ;;  %v25586_v39 = vrot.slane %v24673_v40, 4 }
 0x5d3   : > { %v14826_v45 = vrot.slane %v14824_v41, 6  ;;  %v14829_v1 = vrot.slane %v14827_v49, 7  ;;  %v14854_v16 = vshrl.u32 %v16818_v62, 16  ;;  %v14857_v22 = vshll.u32 %v16818_v62, 16  ;;  %v13205_v49 = vpop.permute.xlu1 %13204  ;;  %v24741_v62 = vpop.permute.xlu0 %13209 }
 0x5d4   : > { %v14834_v55 = vshrl.u32 %v16816_v47, 16  ;;  %v14837_v59 = vshll.u32 %v16816_v47, 16  ;;  %v16821_v11 = vpack.c.bf16 %v13517_v15, %v13517_v15  ;;  %v16819_v42 = vpack.c.bf16 %v13515_v50, %v13515_v50 }
 0x5d5   : > { %v14830_v12 = vor.u32 %v14829_v1, %v14826_v45  ;;  %v14856_v13 = vrot.slane %v14854_v16, 6  ;;  %v14859_v46 = vrot.slane %v14857_v22, 7  ;;  %v12566_v18 = vmax.f32 %v12430_v48, 0.0 }
 0x5d6   : > { %v14836_v26 = vrot.slane %v14834_v55, 6  ;;  %v14839_v54 = vrot.slane %v14837_v59, 7  ;;  %v14884_v43 = vshrl.u32 %v16821_v11, 16  ;;  %v14887_v41 = vshll.u32 %v16821_v11, 16 }
 0x5d7   : > { %v14831_v47 = vsel %vm23435_vm1, %v25586_v39, %v14830_v12  ;;  %v14832_v15 = vrot.slane %v14830_v12, 4  ;;  %v14860_v27 = vor.u32 %v14859_v46, %v14856_v13  ;;  %v14864_v50 = vshrl.u32 %v16819_v42, 16  ;;  %v25588_v46 = vld [vmem:[#allocation52_spill] sm:$0xff] }
 0x5d8   : > { %15569 = vst.msk [vmem:[%s21698_s27 + $0x160] sm:$0xf] %vm13563_vm6, %v14831_v47  ;;  %v14840_v16 = vor.u32 %v14839_v54, %v14836_v26  ;;  %v14886_v55 = vrot.slane %v14884_v43, 6  ;;  %v14889_v59 = vrot.slane %v14887_v41, 7  ;;  %v14867_v48 = vshll.u32 %v16819_v42, 16  ;;  %v25587_v42 = vld [vmem:[#allocation3_spill] sm:$0xff] }
 0x5d9   : > { %v14861_v45 = vsel %vm23435_vm1, %v14852_v36, %v14860_v27  ;;  %v14862_v1 = vrot.slane %v14860_v27, 4  ;;  %v14866_v22 = vrot.slane %v14864_v50, 6  ;;  %v13518_v11 = vmul.f32 %v13205_v49, %v12566_v18  ;;  %v25589_v27 = vld [vmem:[#allocation51_spill] sm:$0xff]  ;;  %v25590_v26 = vld [vmem:[#allocation22_spill] sm:$0xff]  ;;  %v24763_v41 = vpop.f32.mrb[132].mxu1  ;;  %v24765_v49 = vpop.f32.mrb[132].mxu0 }
 0x5da   : > { %15572 = vst.msk [vmem:[%s21698_s27 + $0x16c] sm:$0xf] %vm13563_vm6, %v14861_v45  ;;  %v14841_v40 = vsel %vm23435_vm1, %v14832_v15, %v14840_v16  ;;  %v14842_v39 = vrot.slane %v14840_v16, 4  ;;  %v24755_v12 = vor.u32 %v14889_v59, %v14886_v55  ;;  %v14869_v13 = vrot.slane %v14867_v48, 7  ;;  %25591 = vst [vmem:[#allocation76_spill] sm:$0xff] %v24765_v49  ;;  %v25592_v16 = vld [vmem:[#allocation2_spill] sm:$0xff]  ;;  %v24777_v45 = vpop.permute.xlu1 %13214 }
 0x5db   : > { %15570 = vst.msk [vmem:[%s21698_s27 + $0x164] sm:$0xf] %vm13563_vm6, %v14841_v40  ;;  %v16822_v54 = vpack.c.bf16 %v13518_v11, %v13518_v11  ;;  %v12564_v43 = vmax.f32 %v12428_v21, 0.0  ;;  %v18824_v36 = vadd.f32 %v25588_v46, %v25587_v42  ;;  %v18825_v18 = vadd.f32 %v25590_v26, %v25589_v27  ;;  %v25593_v55 = vld [vmem:[#allocation53_spill] sm:$0xff]  ;;  %v24773_v59 = vpop.f32.mrb[133].mxu1  ;;  %v24775_v48 = vpop.f32.mrb[133].mxu0 }
 0x5dc   : > { %v14851_v47 = vsel %vm23435_vm1, %v14842_v39, %v24710_v60  ;;  %v14892_v15 = vrot.slane %v24755_v12, 4  ;;  %v14870_v50 = vor.u32 %v14869_v13, %v14866_v22  ;;  %v18826_v21 = vadd.f32 %v25593_v55, %v25592_v16  ;;  %25594 = vst [vmem:[#allocation77_spill] sm:$0xff] %v24773_v59  ;;  %25595 = vst [vmem:[#allocation78_spill] sm:$0xff] %v24775_v48  ;;  %v13220_v11 = vpop.permute.xlu0 %13219  ;;  %v24787_v26 = vpop.f32.mrb[134].mxu1  ;;  %v25603_v59 = vld [vmem:[#allocation20_spill] sm:$0xff] }
 0x5dd   : > { %15571 = vst.msk [vmem:[%s21698_s27 + $0x168] sm:$0xf] %vm13563_vm6, %v14851_v47  ;;  %v14894_v40 = vshrl.u32 %v16822_v54, 16  ;;  %v14897_v42 = vshll.u32 %v16822_v54, 16  ;;  %v13516_v60 = vmul.f32 %v24717_v28, %v12564_v43  ;;  %v12290_v39 = vmul.f32 %v24343_v29, %v18824_v36  ;;  %25596 = vst [vmem:[#allocation79_spill] sm:$0xff] %v24787_v26  ;;  %v24789_v16 = vpop.f32.mrb[134].mxu0 }
 0x5de   : > { %v14871_v22 = vsel %vm23435_vm1, %v14862_v1, %v14870_v50  ;;  %v14872_v13 = vrot.slane %v14870_v50, 4  ;;  %v12288_v46 = vmul.f32 %v24343_v29, %v18825_v18  ;;  %v12291_v27 = vmul.f32 %v24343_v29, %v18826_v21  ;;  %25597 = vst [vmem:[#allocation80_spill] sm:$0xff] %v24789_v16  ;;  %v24796_v28 = vld [vmem:[%s25251_s3] ss:$0 sm:$0xff]  ;;  %v25598_v36 = vld [vmem:[#allocation17_spill] sm:$0xff]  ;;  %v25600_v21 = vld [vmem:[#allocation55_spill] sm:$0xff] }
 0x5df   : > { %15573 = vst.msk [vmem:[%s21698_s27 + $0x170] sm:$0xf] %vm13563_vm6, %v14871_v22  ;;  %v14896_v47 = vrot.slane %v14894_v40, 6  ;;  %v14899_v54 = vrot.slane %v14897_v42, 7  ;;  %v16820_v55 = vpack.c.bf16 %v13516_v60, %v13516_v60  ;;  %v12433_v1 = vadd.f32 %v24796_v28, %v12290_v39  ;;  %v25599_v18 = vld [vmem:[#allocation54_spill] sm:$0xff] }
 0x5e0   : > { %v12431_v43 = vadd.f32 %v24796_v28, %v12288_v46  ;;  %v12434_v29 = vadd.f32 %v24796_v28, %v12291_v27  ;;  %v18827_v50 = vadd.f32 %v25599_v18, %v25598_v36  ;;  %v18828_v22 = vadd.f32 %v24257_v32, %v25600_v21  ;;  %v24810_v39 = vld [vmem:[%s25250_s2] ss:$0 sm:$0xff]  ;;  %v24814_v36 = vpop.f32.mrb[135].mxu1  ;;  %v24816_v32 = vpop.f32.mrb[135].mxu0 }
 0x5e1   : > { %v24805_v40 = vor.u32 %v14899_v54, %v14896_v47  ;;  %v14874_v42 = vshrl.u32 %v16820_v55, 16  ;;  %v14877_v60 = vshll.u32 %v16820_v55, 16  ;;  %v12569_v16 = vmax.f32 %v12433_v1, 0.0  ;;  %25601 = vst [vmem:[#allocation81_spill] sm:$0xff] %v24814_v36  ;;  %25602 = vst [vmem:[#allocation82_spill] sm:$0xff] %v24816_v32  ;;  %v13225_v47 = vpop.permute.xlu1 %13224 }
 0x5e2   : > { %v12567_v26 = vmax.f32 %v12431_v43, 0.0  ;;  %v12570_v48 = vmax.f32 %v12434_v29, 0.0  ;;  %v12289_v46 = vmul.f32 %v24810_v39, %v18827_v50  ;;  %v12294_v27 = vmul.f32 %v24810_v39, %v18828_v22  ;;  %v13230_v29 = vpop.permute.xlu0 %13229 }
 0x5e3   : > { %v14901_v54 = vsel %vm23435_vm1, %v14892_v15, %v24805_v40  ;;  %v14902_v55 = vrot.slane %v24805_v40, 4  ;;  %v14876_v1 = vrot.slane %v14874_v42, 6  ;;  %v14879_v43 = vrot.slane %v14877_v60, 7 }
 0x5e4   : > { %15576 = vst.msk [vmem:[%s21698_s27 + $0x17c] sm:$0xf] %vm13563_vm6, %v14901_v54  ;;  %v13521_v18 = vmul.f32 %v13220_v11, %v12569_v16  ;;  %v13519_v50 = vmul.f32 %v24741_v62, %v12567_v26  ;;  %v13522_v21 = vmul.f32 %v13225_v47, %v12570_v48  ;;  %v12432_v22 = vadd.f32 %v24796_v28, %v12289_v46 }
 0x5e5   : > { %v14880_v32 = vor.u32 %v14879_v43, %v14876_v1  ;;  %v12437_v36 = vadd.f32 %v24796_v28, %v12294_v27  ;;  %v18829_v15 = vadd.f32 %v24263_v23, %v25603_v59  ;;  %v18830_v40 = vadd.f32 %v24269_v10, %v24241_v6  ;;  %v24840_v1 = vpop.permute.xlu1 %13234 }
 0x5e6   : > { %v16825_v42 = vpack.c.bf16 %v13521_v18, %v13521_v18  ;;  %v16823_v60 = vpack.c.bf16 %v13519_v50, %v13519_v50  ;;  %v16826_v49 = vpack.c.bf16 %v13522_v21, %v13522_v21  ;;  %v12568_v54 = vmax.f32 %v12432_v22, 0.0 }
 0x5e7   : > { %v14881_v62 = vsel %vm23435_vm1, %v14872_v13, %v14880_v32  ;;  %v14882_v48 = vrot.slane %v14880_v32, 4  ;;  %v12573_v11 = vmax.f32 %v12437_v36, 0.0  ;;  %v12292_v26 = vmul.f32 %v24810_v39, %v18829_v15  ;;  %v13240_v13 = vpop.permute.xlu0 %13239 }
 0x5e8   : > { %15574 = vst.msk [vmem:[%s21698_s27 + $0x174] sm:$0xf] %vm13563_vm6, %v14881_v62  ;;  %v14924_v16 = vshrl.u32 %v16825_v42, 16  ;;  %v14927_v46 = vshll.u32 %v16825_v42, 16  ;;  %v14904_v23 = vshrl.u32 %v16823_v60, 16  ;;  %v14907_v59 = vshll.u32 %v16823_v60, 16 }
 0x5e9   : > { %v14891_v6 = vsel %vm23435_vm1, %v14882_v48, %v24755_v12  ;;  %v14934_v10 = vshrl.u32 %v16826_v49, 16  ;;  %v14937_v27 = vshll.u32 %v16826_v49, 16  ;;  %v13520_v47 = vmul.f32 %v24777_v45, %v12568_v54 }
 0x5ea   : > { %15575 = vst.msk [vmem:[%s21698_s27 + $0x178] sm:$0xf] %vm13563_vm6, %v14891_v6  ;;  %v14926_v36 = vrot.slane %v14924_v16, 6  ;;  %v14929_v32 = vrot.slane %v14927_v46, 7  ;;  %v14906_v43 = vrot.slane %v14904_v23, 6  ;;  %v14909_v18 = vrot.slane %v14907_v59, 7 }
 0x5eb   : > { %v14936_v50 = vrot.slane %v14934_v10, 6  ;;  %v14939_v21 = vrot.slane %v14937_v27, 7  ;;  %v16824_v22 = vpack.c.bf16 %v13520_v47, %v13520_v47  ;;  %v13525_v15 = vmul.f32 %v13240_v13, %v12573_v11 }
 0x5ec   : > { %v14930_v42 = vor.u32 %v14929_v32, %v14926_v36  ;;  %v14910_v12 = vor.u32 %v14909_v18, %v14906_v43  ;;  %v12435_v49 = vadd.f32 %v24796_v28, %v12292_v26  ;;  %v12295_v45 = vmul.f32 %v24810_v39, %v18830_v40  ;;  %v13245_v26 = vpop.permute.xlu1 %13244  ;;  %v25604_v43 = vld [vmem:[#allocation56_spill] sm:$0xff]  ;;  %v25605_v18 = vld [vmem:[#allocation21_spill] sm:$0xff] }
 0x5ed   : > { %v14940_v60 = vor.u32 %v14939_v21, %v14936_v50  ;;  %v14914_v54 = vshrl.u32 %v16824_v22, 16  ;;  %v14917_v62 = vshll.u32 %v16824_v22, 16  ;;  %v16829_v48 = vpack.c.bf16 %v13525_v15, %v13525_v15  ;;  %v25606_v21 = vld [vmem:[#allocation19_spill] sm:$0xff]  ;;  %v25607_v22 = vld [vmem:[#allocation25_spill] sm:$0xff] }
 0x5ee   : > { %v14932_v16 = vrot.slane %v14930_v42, 4  ;;  %v14911_v46 = vsel %vm23435_vm1, %v14902_v55, %v14910_v12  ;;  %v14912_v23 = vrot.slane %v14910_v12, 4  ;;  %v12571_v59 = vmax.f32 %v12435_v49, 0.0  ;;  %v13250_v12 = vpop.permute.xlu0 %13249 }
 0x5ef   : > { %15577 = vst.msk [vmem:[%s21698_s27 + $0x180] sm:$0xf] %vm13563_vm6, %v14911_v46  ;;  %v14942_v11 = vrot.slane %v14940_v60, 4  ;;  %v14916_v6 = vrot.slane %v14914_v54, 6  ;;  %v14919_v10 = vrot.slane %v14917_v62, 7  ;;  %v14964_v27 = vshrl.u32 %v16829_v48, 16 }
 0x5f0   : > { %v14941_v40 = vsel %vm23435_vm1, %v14932_v16, %v14940_v60  ;;  %v14967_v47 = vshll.u32 %v16829_v48, 16  ;;  %v13523_v13 = vmul.f32 %v13230_v29, %v12571_v59  ;;  %v12438_v36 = vadd.f32 %v24796_v28, %v12295_v45  ;;  %v25608_v60 = vld [vmem:[#allocation26_spill] sm:$0xff]  ;;  %v25609_v48 = vld [vmem:[#allocation23_spill] sm:$0xff] }
 0x5f1   : > { %15580 = vst.msk [vmem:[%s21698_s27 + $0x18c] sm:$0xf] %vm13563_vm6, %v14941_v40  ;;  %v14920_v55 = vor.u32 %v14919_v10, %v14916_v6  ;;  %v14966_v32 = vrot.slane %v14964_v27, 6  ;;  %v18831_v50 = vadd.f32 %v25605_v18, %v25604_v43  ;;  %v18832_v15 = vadd.f32 %v25607_v22, %v25606_v21  ;;  %v25610_v22 = vld [vmem:[#allocation24_spill] sm:$0xff] }
 0x5f2   : > { %v14969_v49 = vrot.slane %v14967_v47, 7  ;;  %v16827_v54 = vpack.c.bf16 %v13523_v13, %v13523_v13  ;;  %v12574_v62 = vmax.f32 %v12438_v36, 0.0  ;;  %v18833_v29 = vadd.f32 %v25609_v48, %v25608_v60 }
 0x5f3   : > { %v14921_v45 = vsel %vm23435_vm1, %v14912_v23, %v14920_v55  ;;  %v14922_v16 = vrot.slane %v14920_v55, 4  ;;  %v12293_v46 = vmul.f32 %v24810_v39, %v18831_v50  ;;  %v12298_v59 = vmul.f32 %v24810_v39, %v18832_v15  ;;  %v24874_v55 = vpop.permute.xlu1 %13254  ;;  %v25611_v15 = vld [vmem:[#allocation57_spill] sm:$0xff] }
 0x5f4   : > { %15578 = vst.msk [vmem:[%s21698_s27 + $0x184] sm:$0xf] %vm13563_vm6, %v14921_v45  ;;  %v24867_v6 = vor.u32 %v14969_v49, %v14966_v32  ;;  %v14944_v10 = vshrl.u32 %v16827_v54, 16  ;;  %v14947_v27 = vshll.u32 %v16827_v54, 16  ;;  %v13526_v40 = vmul.f32 %v13245_v26, %v12574_v62  ;;  %v13260_v54 = vpop.permute.xlu0 %13259  ;;  %v25613_v45 = vld [vmem:[#allocation30_spill] sm:$0xff] }
 0x5f5   : > { %v14931_v47 = vsel %vm23435_vm1, %v14922_v16, %v14930_v42  ;;  %v12436_v13 = vadd.f32 %v24796_v28, %v12293_v46  ;;  %v12441_v36 = vadd.f32 %v24796_v28, %v12298_v59  ;;  %v12296_v23 = vmul.f32 %v24810_v39, %v18833_v29  ;;  %v25612_v29 = vld [vmem:[#allocation4_spill] sm:$0xff] }
 0x5f6   : > { %15579 = vst.msk [vmem:[%s21698_s27 + $0x188] sm:$0xf] %vm13563_vm6, %v14931_v47  ;;  %v14972_v43 = vrot.slane %v24867_v6, 4  ;;  %v14946_v32 = vrot.slane %v14944_v10, 6  ;;  %v14949_v18 = vrot.slane %v14947_v27, 7  ;;  %v16830_v50 = vpack.c.bf16 %v13526_v40, %v13526_v40 }
 0x5f7   : > { %v12572_v21 = vmax.f32 %v12436_v13, 0.0  ;;  %v12577_v26 = vmax.f32 %v12441_v36, 0.0  ;;  %v12439_v42 = vadd.f32 %v24796_v28, %v12296_v23  ;;  %v18834_v49 = vadd.f32 %v25611_v15, %v25610_v22  ;;  %v13265_v22 = vpop.permute.xlu1 %13264 }
 0x5f8   : > { %v14950_v62 = vor.u32 %v14949_v18, %v14946_v32  ;;  %v14974_v60 = vshrl.u32 %v16830_v50, 16  ;;  %v14977_v48 = vshll.u32 %v16830_v50, 16  ;;  %v18835_v16 = vadd.f32 %v25613_v45, %v25612_v29 }
 0x5f9   : > { %v13524_v46 = vmul.f32 %v24840_v1, %v12572_v21  ;;  %v13529_v59 = vmul.f32 %v13260_v54, %v12577_v26  ;;  %v12575_v10 = vmax.f32 %v12439_v42, 0.0  ;;  %v12299_v27 = vmul.f32 %v24810_v39, %v18834_v49 }
 0x5fa   : > { %v14951_v40 = vsel %vm23435_vm1, %v14942_v11, %v14950_v62  ;;  %v14952_v47 = vrot.slane %v14950_v62, 4  ;;  %v14976_v13 = vrot.slane %v14974_v60, 6  ;;  %v14979_v36 = vrot.slane %v14977_v48, 7 }
 0x5fb   : > { %15581 = vst.msk [vmem:[%s21698_s27 + $0x190] sm:$0xf] %vm13563_vm6, %v14951_v40  ;;  %v16828_v23 = vpack.c.bf16 %v13524_v46, %v13524_v46  ;;  %v16833_v32 = vpack.c.bf16 %v13529_v59, %v13529_v59  ;;  %v13527_v18 = vmul.f32 %v13250_v12, %v12575_v10  ;;  %v12442_v50 = vadd.f32 %v24796_v28, %v12299_v27 }
 0x5fc   : > { %v14980_v1 = vor.u32 %v14979_v36, %v14976_v13  ;;  %v12297_v21 = vmul.f32 %v24810_v39, %v18835_v16  ;;  %v18836_v26 = vadd.f32 %v24351_v31, %v24349_v37  ;;  %v18837_v11 = vadd.f32 %v24357_v56, %v24355_v3  ;;  %v13270_v37 = vpop.permute.xlu0 %13269  ;;  %v24905_v13 = vpop.permute.xlu1 %13274 }
 0x5fd   : > { %v14954_v42 = vshrl.u32 %v16828_v23, 16  ;;  %v14957_v15 = vshll.u32 %v16828_v23, 16  ;;  %v15004_v49 = vshrl.u32 %v16833_v32, 16  ;;  %v15007_v54 = vshll.u32 %v16833_v32, 16 }
 0x5fe   : > { %v14981_v62 = vsel %vm23435_vm1, %v14972_v43, %v14980_v1  ;;  %v14982_v12 = vrot.slane %v14980_v1, 4  ;;  %v16831_v60 = vpack.c.bf16 %v13527_v18, %v13527_v18  ;;  %v12578_v48 = vmax.f32 %v12442_v50, 0.0 }
 0x5ff   : > { %15584 = vst.msk [vmem:[%s21698_s27 + $0x19c] sm:$0xf] %vm13563_vm6, %v14981_v62  ;;  %v14956_v29 = vrot.slane %v14954_v42, 6  ;;  %v14959_v45 = vrot.slane %v14957_v15, 7  ;;  %v15006_v16 = vrot.slane %v15004_v49, 6  ;;  %v15009_v46 = vrot.slane %v15007_v54, 7 }
 0x600   : > { %v14984_v31 = vshrl.u32 %v16831_v60, 16  ;;  %v14987_v59 = vshll.u32 %v16831_v60, 16  ;;  %v13530_v3 = vmul.f32 %v13265_v22, %v12578_v48  ;;  %v12440_v56 = vadd.f32 %v24796_v28, %v12297_v21  ;;  %v13280_v60 = vpop.permute.xlu0 %13279 }
 0x601   : > { %v14960_v10 = vor.u32 %v14959_v45, %v14956_v29  ;;  %v24901_v27 = vor.u32 %v15009_v46, %v15006_v16  ;;  %v12302_v43 = vmul.f32 %v24810_v39, %v18836_v26  ;;  %v12300_v40 = vmul.f32 %v24810_v39, %v18837_v11 }
 0x602   : > { %v14986_v36 = vrot.slane %v14984_v31, 6  ;;  %v14989_v23 = vrot.slane %v14987_v59, 7  ;;  %v16834_v32 = vpack.c.bf16 %v13530_v3, %v13530_v3  ;;  %v12576_v18 = vmax.f32 %v12440_v56, 0.0  ;;  %v13285_v59 = vpop.permute.xlu1 %13284 }
 0x603   : > { %v14961_v50 = vsel %vm23435_vm1, %v14952_v47, %v14960_v10  ;;  %v14962_v22 = vrot.slane %v14960_v10, 4  ;;  %v15012_v1 = vrot.slane %v24901_v27, 4  ;;  %v12445_v21 = vadd.f32 %v24796_v28, %v12302_v43 }
 0x604   : > { %15582 = vst.msk [vmem:[%s21698_s27 + $0x194] sm:$0xf] %vm13563_vm6, %v14961_v50  ;;  %v14990_v26 = vor.u32 %v14989_v23, %v14986_v36  ;;  %v15014_v11 = vshrl.u32 %v16834_v32, 16  ;;  %v15017_v42 = vshll.u32 %v16834_v32, 16  ;;  %v13528_v15 = vmul.f32 %v24874_v55, %v12576_v18  ;;  %v13290_v50 = vpop.permute.xlu0 %13289 }
 0x605   : > { %v14971_v49 = vsel %vm23435_vm1, %v14962_v22, %v24867_v6  ;;  %v12581_v54 = vmax.f32 %v12445_v21, 0.0  ;;  %v12443_v47 = vadd.f32 %v24796_v28, %v12300_v40  ;;  %v18838_v62 = vadd.f32 %v24363_v9, %v24361_v20 }
 0x606   : > { %15583 = vst.msk [vmem:[%s21698_s27 + $0x198] sm:$0xf] %vm13563_vm6, %v14971_v49  ;;  %v14991_v48 = vsel %vm23435_vm1, %v14982_v12, %v14990_v26  ;;  %v14992_v29 = vrot.slane %v14990_v26, 4  ;;  %v15016_v45 = vrot.slane %v15014_v11, 6  ;;  %v15019_v16 = vrot.slane %v15017_v42, 7  ;;  %v24942_v42 = vpop.permute.xlu1 %13294 }
 0x607   : > { %15585 = vst.msk [vmem:[%s21698_s27 + $0x1a0] sm:$0xf] %vm13563_vm6, %v14991_v48  ;;  %v16832_v55 = vpack.c.bf16 %v13528_v15, %v13528_v15  ;;  %v13533_v46 = vmul.f32 %v13280_v60, %v12581_v54  ;;  %v12579_v6 = vmax.f32 %v12443_v47, 0.0  ;;  %v12303_v31 = vmul.f32 %v24810_v39, %v18838_v62 }
 0x608   : > { %v15020_v3 = vor.u32 %v15019_v16, %v15016_v45  ;;  %v18839_v20 = vadd.f32 %v24383_v35, %v24381_v19  ;;  %v18840_v9 = vadd.f32 %v24423_v38, %v24421_v63  ;;  %v18841_v12 = vadd.f32 %v24428_v58, %v24426_v7 }
 0x609   : > { %v14994_v56 = vshrl.u32 %v16832_v55, 16  ;;  %v14997_v10 = vshll.u32 %v16832_v55, 16  ;;  %v16837_v43 = vpack.c.bf16 %v13533_v46, %v13533_v46  ;;  %v13531_v40 = vmul.f32 %v13270_v37, %v12579_v6 }
 0x60a   : > { %v15021_v36 = vsel %vm23435_vm1, %v15012_v1, %v15020_v3  ;;  %v15022_v23 = vrot.slane %v15020_v3, 4  ;;  %v12446_v32 = vadd.f32 %v24796_v28, %v12303_v31  ;;  %v12301_v18 = vmul.f32 %v24810_v39, %v18839_v20  ;;  %v13300_v20 = vpop.permute.xlu0 %13299 }
 0x60b   : > { %15588 = vst.msk [vmem:[%s21698_s27 + $0x1ac] sm:$0xf] %vm13563_vm6, %v15021_v36  ;;  %v14996_v19 = vrot.slane %v14994_v56, 6  ;;  %v14999_v35 = vrot.slane %v14997_v10, 7  ;;  %v15044_v63 = vshrl.u32 %v16837_v43, 16  ;;  %v15047_v38 = vshll.u32 %v16837_v43, 16 }
 0x60c   : > { %v16835_v7 = vpack.c.bf16 %v13531_v40, %v13531_v40  ;;  %v12582_v58 = vmax.f32 %v12446_v32, 0.0  ;;  %v12444_v37 = vadd.f32 %v24796_v28, %v12301_v18  ;;  %v12306_v22 = vmul.f32 %v24810_v39, %v18840_v9  ;;  %v25615_v36 = vld [vmem:[#allocation29_spill] sm:$0xff]  ;;  %v25616_v18 = vld [vmem:[#allocation27_spill] sm:$0xff] }
 0x60d   : > { %v15000_v1 = vor.u32 %v14999_v35, %v14996_v19  ;;  %v15046_v21 = vrot.slane %v15044_v63, 6  ;;  %v15049_v26 = vrot.slane %v15047_v38, 7  ;;  %v12304_v11 = vmul.f32 %v24810_v39, %v18841_v12  ;;  %v13305_v35 = vpop.permute.xlu1 %13304 }
 0x60e   : > { %v15024_v15 = vshrl.u32 %v16835_v7, 16  ;;  %v15027_v49 = vshll.u32 %v16835_v7, 16  ;;  %v13534_v54 = vmul.f32 %v13285_v59, %v12582_v58  ;;  %v12580_v47 = vmax.f32 %v12444_v37, 0.0 }
 0x60f   : > { %v15001_v62 = vsel %vm23435_vm1, %v14992_v29, %v15000_v1  ;;  %v15002_v60 = vrot.slane %v15000_v1, 4  ;;  %v24946_v48 = vor.u32 %v15049_v26, %v15046_v21  ;;  %v12449_v45 = vadd.f32 %v24796_v28, %v12306_v22 }
 0x610   : > { %15586 = vst.msk [vmem:[%s21698_s27 + $0x1a4] sm:$0xf] %vm13563_vm6, %v15001_v62  ;;  %v15026_v16 = vrot.slane %v15024_v15, 6  ;;  %v15029_v55 = vrot.slane %v15027_v49, 7  ;;  %v16838_v46 = vpack.c.bf16 %v13534_v54, %v13534_v54  ;;  %v13532_v6 = vmul.f32 %v24905_v13, %v12580_v47  ;;  %v25614_v13 = vld [vmem:[#allocation28_spill] sm:$0xff] }
 0x611   : > { %v15011_v31 = vsel %vm23435_vm1, %v15002_v60, %v24901_v27  ;;  %v15052_v59 = vrot.slane %v24946_v48, 4  ;;  %v12585_v3 = vmax.f32 %v12449_v45, 0.0  ;;  %v12447_v29 = vadd.f32 %v24796_v28, %v12304_v11  ;;  %v25617_v27 = vld [vmem:[#allocation58_spill] sm:$0xff] }
 0x612   : > { %15587 = vst.msk [vmem:[%s21698_s27 + $0x1a8] sm:$0xf] %vm13563_vm6, %v15011_v31  ;;  %v15030_v9 = vor.u32 %v15029_v55, %v15026_v16  ;;  %v15054_v12 = vshrl.u32 %v16838_v46, 16  ;;  %v15057_v56 = vshll.u32 %v16838_v46, 16  ;;  %v16836_v10 = vpack.c.bf16 %v13532_v6, %v13532_v6 }
 0x613   : > { %v13537_v43 = vmul.f32 %v13300_v20, %v12585_v3  ;;  %v12583_v40 = vmax.f32 %v12447_v29, 0.0  ;;  %v18842_v32 = vadd.f32 %v25615_v36, %v25614_v13  ;;  %v18843_v19 = vadd.f32 %v25617_v27, %v25616_v18 }
 0x614   : > { %v15031_v63 = vsel %vm23435_vm1, %v15022_v23, %v15030_v9  ;;  %v15032_v38 = vrot.slane %v15030_v9, 4  ;;  %v15056_v7 = vrot.slane %v15054_v12, 6  ;;  %v15059_v58 = vrot.slane %v15057_v56, 7 }
 0x615   : > { %15589 = vst.msk [vmem:[%s21698_s27 + $0x1b0] sm:$0xf] %vm13563_vm6, %v15031_v63  ;;  %v15034_v37 = vshrl.u32 %v16836_v10, 16  ;;  %v15037_v22 = vshll.u32 %v16836_v10, 16  ;;  %v16841_v1 = vpack.c.bf16 %v13537_v43, %v13537_v43  ;;  %v13535_v21 = vmul.f32 %v13290_v50, %v12583_v40  ;;  %v13310_v50 = vpop.permute.xlu0 %13309  ;;  %v25619_v63 = vld [vmem:[#allocation34_spill] sm:$0xff] }
 0x616   : > { %v15060_v26 = vor.u32 %v15059_v58, %v15056_v7  ;;  %v12307_v11 = vmul.f32 %v24810_v39, %v18842_v32  ;;  %v12305_v15 = vmul.f32 %v24810_v39, %v18843_v19  ;;  %v18844_v49 = vadd.f32 %v24465_v24, %v24463_v4  ;;  %v24977_v24 = vpop.permute.xlu1 %13314  ;;  %v25618_v19 = vld [vmem:[#allocation59_spill] sm:$0xff] }
 0x617   : > { %v15036_v54 = vrot.slane %v15034_v37, 6  ;;  %v15039_v23 = vrot.slane %v15037_v22, 7  ;;  %v15084_v47 = vshrl.u32 %v16841_v1, 16  ;;  %v15087_v62 = vshll.u32 %v16841_v1, 16  ;;  %v25621_v22 = vld [vmem:[#allocation32_spill] sm:$0xff] }
 0x618   : > { %v15061_v60 = vsel %vm23435_vm1, %v15052_v59, %v15060_v26  ;;  %v15062_v45 = vrot.slane %v15060_v26, 4  ;;  %v16839_v16 = vpack.c.bf16 %v13535_v21, %v13535_v21  ;;  %v12450_v55 = vadd.f32 %v24796_v28, %v12307_v11  ;;  %v25622_v11 = vld [vmem:[#allocation33_spill] sm:$0xff] }
 0x619   : > { %15592 = vst.msk [vmem:[%s21698_s27 + $0x1bc] sm:$0xf] %vm13563_vm6, %v15061_v60  ;;  %v15040_v46 = vor.u32 %v15039_v23, %v15036_v54  ;;  %v15086_v6 = vrot.slane %v15084_v47, 6  ;;  %v15089_v31 = vrot.slane %v15087_v62, 7  ;;  %v12448_v4 = vadd.f32 %v24796_v28, %v12305_v15  ;;  %v13320_v21 = vpop.permute.xlu0 %13319  ;;  %v25623_v15 = vld [vmem:[#allocation31_spill] sm:$0xff] }
 0x61a   : > { %v15064_v3 = vshrl.u32 %v16839_v16, 16  ;;  %v15067_v29 = vshll.u32 %v16839_v16, 16  ;;  %v12586_v20 = vmax.f32 %v12450_v55, 0.0  ;;  %v12310_v59 = vmul.f32 %v24810_v39, %v18844_v49  ;;  %v25003_v54 = vpop.permute.xlu1 %13424 }
 0x61b   : > { %v15041_v9 = vsel %vm23435_vm1, %v15032_v38, %v15040_v46  ;;  %v15042_v12 = vrot.slane %v15040_v46, 4  ;;  %v24982_v56 = vor.u32 %v15089_v31, %v15086_v6  ;;  %v12584_v10 = vmax.f32 %v12448_v4, 0.0 }
 0x61c   : > { %15590 = vst.msk [vmem:[%s21698_s27 + $0x1b4] sm:$0xf] %vm13563_vm6, %v15041_v9  ;;  %v15066_v43 = vrot.slane %v15064_v3, 6  ;;  %v15069_v40 = vrot.slane %v15067_v29, 7  ;;  %v13538_v13 = vmul.f32 %v13305_v35, %v12586_v20  ;;  %v12453_v36 = vadd.f32 %v24796_v28, %v12310_v59  ;;  %v25620_v35 = vld [vmem:[#allocation60_spill] sm:$0xff] }
 0x61d   : > { %v15051_v32 = vsel %vm23435_vm1, %v15042_v12, %v24946_v48  ;;  %v15092_v18 = vrot.slane %v24982_v56, 4  ;;  %v13536_v27 = vmul.f32 %v24942_v42, %v12584_v10  ;;  %v18845_v38 = vadd.f32 %v25619_v63, %v25618_v19 }
 0x61e   : > { %15591 = vst.msk [vmem:[%s21698_s27 + $0x1b8] sm:$0xf] %vm13563_vm6, %v15051_v32  ;;  %v15070_v7 = vor.u32 %v15069_v40, %v15066_v43  ;;  %v16842_v58 = vpack.c.bf16 %v13538_v13, %v13538_v13  ;;  %v12589_v37 = vmax.f32 %v12453_v36, 0.0  ;;  %v18846_v1 = vadd.f32 %v25621_v22, %v25620_v35  ;;  %v13325_v43 = vpop.permute.xlu0 %13324 }
 0x61f   : > { %v16840_v26 = vpack.c.bf16 %v13536_v27, %v13536_v27  ;;  %v12308_v48 = vmul.f32 %v24810_v39, %v18845_v38  ;;  %v18847_v49 = vadd.f32 %v25623_v15, %v25622_v11  ;;  %v18848_v42 = vadd.f32 %v24539_v61, %v24537_v17  ;;  %v13330_v27 = vpop.permute.xlu1 %13329  ;;  %v25624_v11 = vld [vmem:[#allocation36_spill] sm:$0xff]  ;;  %v25625_v15 = vld [vmem:[#allocation61_spill] sm:$0xff] }
 0x620   : > { %v15071_v23 = vsel %vm23435_vm1, %v15062_v45, %v15070_v7  ;;  %v15072_v47 = vrot.slane %v15070_v7, 4  ;;  %v15094_v62 = vshrl.u32 %v16842_v58, 16  ;;  %v15097_v60 = vshll.u32 %v16842_v58, 16 }
 0x621   : > { %15593 = vst.msk [vmem:[%s21698_s27 + $0x1c0] sm:$0xf] %vm13563_vm6, %v15071_v23  ;;  %v15074_v16 = vshrl.u32 %v16840_v26, 16  ;;  %v15077_v55 = vshll.u32 %v16840_v26, 16  ;;  %v13541_v46 = vmul.f32 %v13320_v21, %v12589_v37  ;;  %v12451_v6 = vadd.f32 %v24796_v28, %v12308_v48 }
 0x622   : > { %v15096_v31 = vrot.slane %v15094_v62, 6  ;;  %v15099_v4 = vrot.slane %v15097_v60, 7  ;;  %v12311_v3 = vmul.f32 %v24810_v39, %v18846_v1  ;;  %v12309_v17 = vmul.f32 %v24810_v39, %v18847_v49 }
 0x623   : > { %v15076_v61 = vrot.slane %v15074_v16, 6  ;;  %v15079_v29 = vrot.slane %v15077_v55, 7  ;;  %v16845_v20 = vpack.c.bf16 %v13541_v46, %v13541_v46  ;;  %v12587_v45 = vmax.f32 %v12451_v6, 0.0  ;;  %v13340_v6 = vpop.permute.xlu1 %13339 }
 0x624   : > { %v15100_v59 = vor.u32 %v15099_v4, %v15096_v31  ;;  %v12454_v9 = vadd.f32 %v24796_v28, %v12311_v3  ;;  %v12452_v12 = vadd.f32 %v24796_v28, %v12309_v17  ;;  %v12314_v10 = vmul.f32 %v24810_v39, %v18848_v42 }
 0x625   : > { %v15080_v40 = vor.u32 %v15079_v29, %v15076_v61  ;;  %v15124_v13 = vshrl.u32 %v16845_v20, 16  ;;  %v15127_v36 = vshll.u32 %v16845_v20, 16  ;;  %v13539_v32 = vmul.f32 %v13310_v50, %v12587_v45 }
 0x626   : > { %v15101_v19 = vsel %vm23435_vm1, %v15092_v18, %v15100_v59  ;;  %v15102_v63 = vrot.slane %v15100_v59, 4  ;;  %v12590_v38 = vmax.f32 %v12454_v9, 0.0  ;;  %v12588_v7 = vmax.f32 %v12452_v12, 0.0 }
 0x627   : > { %15596 = vst.msk [vmem:[%s21698_s27 + $0x1cc] sm:$0xf] %vm13563_vm6, %v15101_v19  ;;  %v15081_v58 = vsel %vm23435_vm1, %v15072_v47, %v15080_v40  ;;  %v15082_v37 = vrot.slane %v15080_v40, 4  ;;  %v15126_v35 = vrot.slane %v15124_v13, 6  ;;  %v15129_v22 = vrot.slane %v15127_v36, 7 }
 0x628   : > { %15594 = vst.msk [vmem:[%s21698_s27 + $0x1c4] sm:$0xf] %vm13563_vm6, %v15081_v58  ;;  %v16843_v1 = vpack.c.bf16 %v13539_v32, %v13539_v32  ;;  %v13542_v50 = vmul.f32 %v13325_v43, %v12590_v38  ;;  %v13540_v21 = vmul.f32 %v24977_v24, %v12588_v7  ;;  %v12457_v18 = vadd.f32 %v24796_v28, %v12314_v10  ;;  %v25034_v24 = vpop.permute.xlu0 %13334 }
 0x629   : > { %v15091_v26 = vsel %vm23435_vm1, %v15082_v37, %v24982_v56  ;;  %v15130_v48 = vor.u32 %v15129_v22, %v15126_v35  ;;  %v18849_v49 = vadd.f32 %v25625_v15, %v25624_v11  ;;  %v18850_v42 = vadd.f32 %v24560_v52, %v24558_v33 }
 0x62a   : > { %15595 = vst.msk [vmem:[%s21698_s27 + $0x1c8] sm:$0xf] %vm13563_vm6, %v15091_v26  ;;  %v15104_v23 = vshrl.u32 %v16843_v1, 16  ;;  %v15107_v47 = vshll.u32 %v16843_v1, 16  ;;  %v16846_v62 = vpack.c.bf16 %v13542_v50, %v13542_v50  ;;  %v16844_v60 = vpack.c.bf16 %v13540_v21, %v13540_v21  ;;  %v25626_v21 = vld [vmem:[#allocation62_spill] sm:$0xff] }
 0x62b   : > { %v15132_v16 = vrot.slane %v15130_v48, 4  ;;  %v12593_v55 = vmax.f32 %v12457_v18, 0.0  ;;  %v12312_v46 = vmul.f32 %v24810_v39, %v18849_v49  ;;  %v12315_v56 = vmul.f32 %v24810_v39, %v18850_v42  ;;  %v25627_v18 = vld [vmem:[#allocation63_spill] sm:$0xff] }
 0x62c   : > { %v15106_v31 = vrot.slane %v15104_v23, 6  ;;  %v15109_v4 = vrot.slane %v15107_v47, 7  ;;  %v15134_v3 = vshrl.u32 %v16846_v62, 16  ;;  %v15137_v17 = vshll.u32 %v16846_v62, 16  ;;  %v13345_v38 = vpop.permute.xlu0 %13344 }
 0x62d   : > { %v15114_v33 = vshrl.u32 %v16844_v60, 16  ;;  %v15117_v52 = vshll.u32 %v16844_v60, 16  ;;  %v13545_v61 = vmul.f32 %v13340_v6, %v12593_v55  ;;  %v12455_v29 = vadd.f32 %v24796_v28, %v12312_v46  ;;  %v25628_v55 = vld [vmem:[#allocation35_spill] sm:$0xff]  ;;  %v25630_v6 = vld [vmem:[#allocation65_spill] sm:$0xff] }
 0x62e   : > { %v15110_v20 = vor.u32 %v15109_v4, %v15106_v31  ;;  %v15136_v45 = vrot.slane %v15134_v3, 6  ;;  %v15139_v59 = vrot.slane %v15137_v17, 7  ;;  %v12458_v9 = vadd.f32 %v24796_v28, %v12315_v56  ;;  %v25629_v56 = vld [vmem:[#allocation64_spill] sm:$0xff] }
 0x62f   : > { %v15116_v12 = vrot.slane %v15114_v33, 6  ;;  %v15119_v10 = vrot.slane %v15117_v52, 7  ;;  %v16849_v43 = vpack.c.bf16 %v13545_v61, %v13545_v61  ;;  %v12591_v40 = vmax.f32 %v12455_v29, 0.0 }
 0x630   : > { %v15111_v13 = vsel %vm23435_vm1, %v15102_v63, %v15110_v20  ;;  %v15112_v36 = vrot.slane %v15110_v20, 4  ;;  %v15140_v32 = vor.u32 %v15139_v59, %v15136_v45  ;;  %v12594_v19 = vmax.f32 %v12458_v9, 0.0  ;;  %v13350_v63 = vpop.permute.xlu1 %13349  ;;  %v13355_v59 = vpop.permute.xlu0 %13354 }
 0x631   : > { %15597 = vst.msk [vmem:[%s21698_s27 + $0x1d0] sm:$0xf] %vm13563_vm6, %v15111_v13  ;;  %v15120_v7 = vor.u32 %v15119_v10, %v15116_v12  ;;  %v15164_v58 = vshrl.u32 %v16849_v43, 16  ;;  %v15167_v37 = vshll.u32 %v16849_v43, 16  ;;  %v13543_v35 = vmul.f32 %v13330_v27, %v12591_v40 }
 0x632   : > { %v15141_v22 = vsel %vm23435_vm1, %v15132_v16, %v15140_v32  ;;  %v15142_v1 = vrot.slane %v15140_v32, 4  ;;  %v13546_v50 = vmul.f32 %v13345_v38, %v12594_v19  ;;  %v18851_v26 = vadd.f32 %v25627_v18, %v25626_v21  ;;  %v25632_v32 = vld [vmem:[#allocation67_spill] sm:$0xff] }
 0x633   : > { %15600 = vst.msk [vmem:[%s21698_s27 + $0x1dc] sm:$0xf] %vm13563_vm6, %v15141_v22  ;;  %v15121_v11 = vsel %vm23435_vm1, %v15112_v36, %v15120_v7  ;;  %v15122_v15 = vrot.slane %v15120_v7, 4  ;;  %v15166_v49 = vrot.slane %v15164_v58, 6  ;;  %v15169_v42 = vrot.slane %v15167_v37, 7  ;;  %v25631_v36 = vld [vmem:[#allocation66_spill] sm:$0xff] }
 0x634   : > { %15598 = vst.msk [vmem:[%s21698_s27 + $0x1d4] sm:$0xf] %vm13563_vm6, %v15121_v11  ;;  %v16847_v27 = vpack.c.bf16 %v13543_v35, %v13543_v35  ;;  %v16850_v23 = vpack.c.bf16 %v13546_v50, %v13546_v50  ;;  %v12313_v47 = vmul.f32 %v24810_v39, %v18851_v26  ;;  %v18852_v62 = vadd.f32 %v24611_v2, %v24609_v25  ;;  %v13360_v45 = vpop.permute.xlu1 %13359 }
 0x635   : > { %v15131_v60 = vsel %vm23435_vm1, %v15122_v15, %v15130_v48  ;;  %v25059_v16 = vor.u32 %v15169_v42, %v15166_v49  ;;  %v18853_v46 = vadd.f32 %v25628_v55, %v24615_v53  ;;  %v18854_v31 = vadd.f32 %v25630_v6, %v25629_v56  ;;  %v25633_v49 = vld [vmem:[#allocation68_spill] sm:$0xff]  ;;  %v25634_v42 = vld [vmem:[#allocation69_spill] sm:$0xff] }
 0x636   : > { %15599 = vst.msk [vmem:[%s21698_s27 + $0x1d8] sm:$0xf] %vm13563_vm6, %v15131_v60  ;;  %v15144_v4 = vshrl.u32 %v16847_v27, 16  ;;  %v15147_v3 = vshll.u32 %v16847_v27, 16  ;;  %v15174_v17 = vshrl.u32 %v16850_v23, 16  ;;  %v15177_v33 = vshll.u32 %v16850_v23, 16 }
 0x637   : > { %v15172_v52 = vrot.slane %v25059_v16, 4  ;;  %v12456_v25 = vadd.f32 %v24796_v28, %v12313_v47  ;;  %v12318_v2 = vmul.f32 %v24810_v39, %v18852_v62  ;;  %v12316_v48 = vmul.f32 %v24810_v39, %v18853_v46  ;;  %v13365_v47 = vpop.permute.xlu0 %13364 }
 0x638   : > { %v15146_v61 = vrot.slane %v15144_v4, 6  ;;  %v15149_v29 = vrot.slane %v15147_v3, 7  ;;  %v15176_v53 = vrot.slane %v15174_v17, 6  ;;  %v15179_v20 = vrot.slane %v15177_v33, 7  ;;  %v13370_v23 = vpop.permute.xlu1 %13369 }
 0x639   : > { %v12592_v9 = vmax.f32 %v12456_v25, 0.0  ;;  %v12461_v12 = vadd.f32 %v24796_v28, %v12318_v2  ;;  %v12459_v10 = vadd.f32 %v24796_v28, %v12316_v48  ;;  %v12319_v43 = vmul.f32 %v24810_v39, %v18854_v31 }
 0x63a   : > { %v15150_v40 = vor.u32 %v15149_v29, %v15146_v61  ;;  %v25074_v13 = vor.u32 %v15179_v20, %v15176_v53  ;;  %v18855_v19 = vadd.f32 %v25632_v32, %v25631_v36  ;;  %v18856_v38 = vadd.f32 %v24648_v57, %v24646_v5 }
 0x63b   : > { %v13544_v7 = vmul.f32 %v25034_v24, %v12592_v9  ;;  %v12597_v58 = vmax.f32 %v12461_v12, 0.0  ;;  %v12595_v37 = vmax.f32 %v12459_v10, 0.0  ;;  %v12462_v35 = vadd.f32 %v24796_v28, %v12319_v43  ;;  %v25103_v36 = vpop.permute.xlu0 %13374 }
 0x63c   : > { %v15151_v22 = vsel %vm23435_vm1, %v15142_v1, %v15150_v40  ;;  %v15152_v50 = vrot.slane %v15150_v40, 4  ;;  %v15181_v21 = vsel %vm23435_vm1, %v15172_v52, %v25074_v13  ;;  %v15182_v18 = vrot.slane %v25074_v13, 4  ;;  %v13380_v12 = vpop.permute.xlu1 %13379 }
 0x63d   : > { %15601 = vst.msk [vmem:[%s21698_s27 + $0x1e0] sm:$0xf] %vm13563_vm6, %v15151_v22  ;;  %15604 = vst.msk [vmem:[%s21698_s27 + $0x1ec] sm:$0xf] %vm13563_vm6, %v15181_v21  ;;  %v16848_v5 = vpack.c.bf16 %v13544_v7, %v13544_v7  ;;  %v13549_v57 = vmul.f32 %v13360_v45, %v12597_v58  ;;  %v13547_v24 = vmul.f32 %v13350_v63, %v12595_v37  ;;  %v12598_v26 = vmax.f32 %v12462_v35, 0.0 }
 0x63e   : > { %v12317_v11 = vmul.f32 %v24810_v39, %v18855_v19  ;;  %v12322_v15 = vmul.f32 %v24810_v39, %v18856_v38  ;;  %v18857_v1 = vadd.f32 %v24655_v0, %v24653_v51  ;;  %v18858_v27 = vadd.f32 %v25634_v42, %v25633_v49 }
 0x63f   : > { %v15154_v62 = vshrl.u32 %v16848_v5, 16  ;;  %v15157_v60 = vshll.u32 %v16848_v5, 16  ;;  %v16853_v55 = vpack.c.bf16 %v13549_v57, %v13549_v57  ;;  %v16851_v46 = vpack.c.bf16 %v13547_v24, %v13547_v24 }
 0x640   : > { %v13550_v56 = vmul.f32 %v13365_v47, %v12598_v26  ;;  %v12460_v63 = vadd.f32 %v24796_v28, %v12317_v11  ;;  %v12465_v6 = vadd.f32 %v24796_v28, %v12322_v15  ;;  %v12320_v31 = vmul.f32 %v24810_v39, %v18857_v1 }
 0x641   : > { %v15156_v4 = vrot.slane %v15154_v62, 6  ;;  %v15159_v3 = vrot.slane %v15157_v60, 7  ;;  %v15204_v17 = vshrl.u32 %v16853_v55, 16  ;;  %v15207_v51 = vshll.u32 %v16853_v55, 16  ;;  %v13385_v60 = vpop.permute.xlu0 %13384 }
 0x642   : > { %v15184_v0 = vshrl.u32 %v16851_v46, 16  ;;  %v15187_v33 = vshll.u32 %v16851_v46, 16  ;;  %v16854_v52 = vpack.c.bf16 %v13550_v56, %v13550_v56  ;;  %v12596_v25 = vmax.f32 %v12460_v63, 0.0  ;;  %v13390_v63 = vpop.permute.xlu1 %13389 }
 0x643   : > { %v15160_v2 = vor.u32 %v15159_v3, %v15156_v4  ;;  %v15206_v48 = vrot.slane %v15204_v17, 6  ;;  %v15209_v61 = vrot.slane %v15207_v51, 7  ;;  %v12601_v29 = vmax.f32 %v12465_v6, 0.0  ;;  %v25635_v3 = vld [vmem:[#allocation70_spill] sm:$0xff]  ;;  %v25636_v17 = vld [vmem:[#allocation71_spill] sm:$0xff] }
 0x644   : > { %v15186_v53 = vrot.slane %v15184_v0, 6  ;;  %v15189_v20 = vrot.slane %v15187_v33, 7  ;;  %v15214_v45 = vshrl.u32 %v16854_v52, 16  ;;  %v15217_v9 = vshll.u32 %v16854_v52, 16  ;;  %v25637_v33 = vld [vmem:[#allocation72_spill] sm:$0xff]  ;;  %v25638_v52 = vld [vmem:[#allocation73_spill] sm:$0xff] }
 0x645   : > { %v15161_v10 = vsel %vm23435_vm1, %v15152_v50, %v15160_v2  ;;  %v15162_v43 = vrot.slane %v15160_v2, 4  ;;  %v15210_v40 = vor.u32 %v15209_v61, %v15206_v48  ;;  %v13548_v13 = vmul.f32 %v13355_v59, %v12596_v25  ;;  %v25143_v61 = vld [vmem:[%s25251_s3] ss:$0 sm:$0xff] }
 0x646   : > { %15602 = vst.msk [vmem:[%s21698_s27 + $0x1e4] sm:$0xf] %vm13563_vm6, %v15161_v10  ;;  %v15190_v32 = vor.u32 %v15189_v20, %v15186_v53  ;;  %v15216_v19 = vrot.slane %v15214_v45, 6  ;;  %v15219_v38 = vrot.slane %v15217_v9, 7  ;;  %v13553_v7 = vmul.f32 %v13380_v12, %v12601_v29  ;;  %v25152_v9 = vld [vmem:[%s25250_s2] ss:$0 sm:$0xff]  ;;  %v13395_v10 = vpop.permute.xlu0 %13394 }
 0x647   : > { %v15171_v58 = vsel %vm23435_vm1, %v15162_v43, %v25059_v16  ;;  %v15212_v37 = vrot.slane %v15210_v40, 4  ;;  %v16852_v35 = vpack.c.bf16 %v13548_v13, %v13548_v13  ;;  %v12463_v22 = vadd.f32 %v24796_v28, %v12320_v31 }
 0x648   : > { %15603 = vst.msk [vmem:[%s21698_s27 + $0x1e8] sm:$0xf] %vm13563_vm6, %v15171_v58  ;;  %v15191_v59 = vsel %vm23435_vm1, %v15182_v18, %v15190_v32  ;;  %v15192_v50 = vrot.slane %v15190_v32, 4  ;;  %v15220_v21 = vor.u32 %v15219_v38, %v15216_v19  ;;  %v16857_v5 = vpack.c.bf16 %v13553_v7, %v13553_v7  ;;  %v13400_v38 = vpop.permute.xlu1 %13399  ;;  %v25639_v58 = vld [vmem:[#allocation74_spill] sm:$0xff] }
 0x649   : > { %15605 = vst.msk [vmem:[%s21698_s27 + $0x1f0] sm:$0xf] %vm13563_vm6, %v15191_v59  ;;  %v15194_v57 = vshrl.u32 %v16852_v35, 16  ;;  %v15197_v24 = vshll.u32 %v16852_v35, 16  ;;  %v12599_v26 = vmax.f32 %v12463_v22, 0.0  ;;  %v12323_v16 = vmul.f32 %v24810_v39, %v18858_v27  ;;  %v25641_v22 = vld [vmem:[#allocation76_spill] sm:$0xff] }
 0x64a   : > { %v15221_v11 = vsel %vm23435_vm1, %v15212_v37, %v15220_v21  ;;  %v15222_v15 = vrot.slane %v15220_v21, 4  ;;  %v15244_v1 = vshrl.u32 %v16857_v5, 16  ;;  %v15247_v49 = vshll.u32 %v16857_v5, 16  ;;  %v25640_v37 = vld [vmem:[#allocation75_spill] sm:$0xff] }
 0x64b   : > { %15608 = vst.msk [vmem:[%s21698_s27 + $0x1fc] sm:$0xf] %vm13563_vm6, %v15221_v11  ;;  %v15196_v42 = vrot.slane %v15194_v57, 6  ;;  %v15199_v18 = vrot.slane %v15197_v24, 7  ;;  %v13551_v47 = vmul.f32 %v13370_v23, %v12599_v26  ;;  %v12466_v62 = vadd.f32 %v24796_v28, %v12323_v16 }
 0x64c   : > { %v15246_v55 = vrot.slane %v15244_v1, 6  ;;  %v15249_v46 = vrot.slane %v15247_v49, 7  ;;  %v18859_v27 = vadd.f32 %v24686_v34, %v24684_v30  ;;  %v18860_v56 = vadd.f32 %v24725_v44, %v24723_v14 }
 0x64d   : > { %v15200_v6 = vor.u32 %v15199_v18, %v15196_v42  ;;  %v16855_v31 = vpack.c.bf16 %v13551_v47, %v13551_v47  ;;  %v12602_v4 = vmax.f32 %v12466_v62, 0.0  ;;  %v18861_v51 = vadd.f32 %v25636_v17, %v25635_v3  ;;  %v13410_v3 = vpop.permute.xlu1 %13409 }
 0x64e   : > { %v25129_v23 = vor.u32 %v15249_v46, %v15246_v55  ;;  %v12321_v28 = vmul.f32 %v24810_v39, %v18859_v27  ;;  %v12326_v0 = vmul.f32 %v24810_v39, %v18860_v56  ;;  %v18862_v25 = vadd.f32 %v25638_v52, %v25637_v33 }
 0x64f   : > { %v15201_v30 = vsel %vm23435_vm1, %v15192_v50, %v15200_v6  ;;  %v15202_v34 = vrot.slane %v15200_v6, 4  ;;  %v15224_v14 = vshrl.u32 %v16855_v31, 16  ;;  %v15227_v44 = vshll.u32 %v16855_v31, 16 }
 0x650   : > { %15606 = vst.msk [vmem:[%s21698_s27 + $0x1f4] sm:$0xf] %vm13563_vm6, %v15201_v30  ;;  %v15252_v2 = vrot.slane %v25129_v23, 4  ;;  %v13554_v48 = vmul.f32 %v13385_v60, %v12602_v4  ;;  %v12464_v39 = vadd.f32 %v25143_v61, %v12321_v28  ;;  %v12469_v29 = vadd.f32 %v25143_v61, %v12326_v0  ;;  %v13405_v60 = vpop.permute.xlu0 %13404 }
 0x651   : > { %v15211_v53 = vsel %vm23435_vm1, %v15202_v34, %v15210_v40  ;;  %v15226_v20 = vrot.slane %v15224_v14, 6  ;;  %v15229_v45 = vrot.slane %v15227_v44, 7  ;;  %v12324_v12 = vmul.f32 %v25152_v9, %v18861_v51 }
 0x652   : > { %15607 = vst.msk [vmem:[%s21698_s27 + $0x1f8] sm:$0xf] %vm13563_vm6, %v15211_v53  ;;  %v16858_v43 = vpack.c.bf16 %v13554_v48, %v13554_v48  ;;  %v12600_v13 = vmax.f32 %v12464_v39, 0.0  ;;  %v12605_v32 = vmax.f32 %v12469_v29, 0.0  ;;  %v12327_v19 = vmul.f32 %v25152_v9, %v18862_v25  ;;  %v25642_v53 = vld [vmem:[#allocation77_spill] sm:$0xff] }
 0x653   : > { %v15230_v40 = vor.u32 %v15229_v45, %v15226_v20  ;;  %v12467_v7 = vadd.f32 %v25143_v61, %v12324_v12  ;;  %v18863_v35 = vadd.f32 %v25640_v37, %v25639_v58  ;;  %v18864_v59 = vadd.f32 %v25641_v22, %v24763_v41 }
 0x654   : > { %v15254_v50 = vshrl.u32 %v16858_v43, 16  ;;  %v15257_v21 = vshll.u32 %v16858_v43, 16  ;;  %v13552_v5 = vmul.f32 %v25103_v36, %v12600_v13  ;;  %v13557_v57 = vmul.f32 %v13400_v38, %v12605_v32 }
 0x655   : > { %v15231_v24 = vsel %vm23435_vm1, %v15222_v15, %v15230_v40  ;;  %v15232_v26 = vrot.slane %v15230_v40, 4  ;;  %v12603_v16 = vmax.f32 %v12467_v7, 0.0  ;;  %v12470_v11 = vadd.f32 %v25143_v61, %v12327_v19  ;;  %v13420_v7 = vpop.permute.xlu1 %13419 }
 0x656   : > { %15609 = vst.msk [vmem:[%s21698_s27 + $0x200] sm:$0xf] %vm13563_vm6, %v15231_v24  ;;  %v15256_v1 = vrot.slane %v15254_v50, 6  ;;  %v15259_v49 = vrot.slane %v15257_v21, 7  ;;  %v16856_v42 = vpack.c.bf16 %v13552_v5, %v13552_v5  ;;  %v16861_v18 = vpack.c.bf16 %v13557_v57, %v13557_v57  ;;  %v25644_v57 = vld [vmem:[#allocation79_spill] sm:$0xff]  ;;  %v25645_v24 = vld [vmem:[#allocation80_spill] sm:$0xff] }
 0x657   : > { %v13555_v47 = vmul.f32 %v13390_v63, %v12603_v16  ;;  %v12606_v41 = vmax.f32 %v12470_v11, 0.0  ;;  %v12325_v62 = vmul.f32 %v25152_v9, %v18863_v35  ;;  %v12330_v36 = vmul.f32 %v25152_v9, %v18864_v59  ;;  %v25647_v16 = vld [vmem:[#allocation82_spill] sm:$0xff] }
 0x658   : > { %v15260_v55 = vor.u32 %v15259_v49, %v15256_v1  ;;  %v15234_v15 = vshrl.u32 %v16856_v42, 16  ;;  %v15237_v46 = vshll.u32 %v16856_v42, 16  ;;  %v15284_v27 = vshrl.u32 %v16861_v18, 16 }
 0x659   : > { %v15287_v56 = vshll.u32 %v16861_v18, 16  ;;  %v16859_v6 = vpack.c.bf16 %v13555_v47, %v13555_v47  ;;  %v13558_v31 = vmul.f32 %v13405_v60, %v12606_v41  ;;  %v12468_v4 = vadd.f32 %v25143_v61, %v12325_v62 }
 0x65a   : > { %v15261_v63 = vsel %vm23435_vm1, %v15252_v2, %v15260_v55  ;;  %v15262_v17 = vrot.slane %v15260_v55, 4  ;;  %v15236_v51 = vrot.slane %v15234_v15, 6  ;;  %v15239_v28 = vrot.slane %v15237_v46, 7  ;;  %v25643_v2 = vld [vmem:[#allocation78_spill] sm:$0xff] }
 0x65b   : > { %15612 = vst.msk [vmem:[%s21698_s27 + $0x20c] sm:$0xf] %vm13563_vm6, %v15261_v63  ;;  %v15286_v0 = vrot.slane %v15284_v27, 6  ;;  %v15289_v33 = vrot.slane %v15287_v56, 7  ;;  %v15264_v52 = vshrl.u32 %v16859_v6, 16  ;;  %v15267_v25 = vshll.u32 %v16859_v6, 16 }
 0x65c   : > { %v15240_v30 = vor.u32 %v15239_v28, %v15236_v51  ;;  %v16862_v34 = vpack.c.bf16 %v13558_v31, %v13558_v31  ;;  %v12604_v14 = vmax.f32 %v12468_v4, 0.0  ;;  %v12473_v44 = vadd.f32 %v25143_v61, %v12330_v36 }
 0x65d   : > { %v15290_v48 = vor.u32 %v15289_v33, %v15286_v0  ;;  %v15266_v39 = vrot.slane %v15264_v52, 6  ;;  %v15269_v29 = vrot.slane %v15267_v25, 7  ;;  %v18865_v20 = vadd.f32 %v25643_v2, %v25642_v53 }
 0x65e   : > { %v15241_v45 = vsel %vm23435_vm1, %v15232_v26, %v15240_v30  ;;  %v15242_v12 = vrot.slane %v15240_v30, 4  ;;  %v15294_v43 = vshrl.u32 %v16862_v34, 16  ;;  %v15297_v13 = vshll.u32 %v16862_v34, 16  ;;  %v25646_v26 = vld [vmem:[#allocation81_spill] sm:$0xff] }
 0x65f   : > { %15610 = vst.msk [vmem:[%s21698_s27 + $0x204] sm:$0xf] %vm13563_vm6, %v15241_v45  ;;  %v15292_v32 = vrot.slane %v15290_v48, 4  ;;  %v15270_v19 = vor.u32 %v15269_v29, %v15266_v39  ;;  %v13556_v38 = vmul.f32 %v13395_v10, %v12604_v14  ;;  %v12609_v40 = vmax.f32 %v12473_v44, 0.0 }
 0x660   : > { %v15251_v58 = vsel %vm23435_vm1, %v15242_v12, %v25129_v23  ;;  %v15296_v37 = vrot.slane %v15294_v43, 6  ;;  %v15299_v35 = vrot.slane %v15297_v13, 7  ;;  %v12328_v22 = vmul.f32 %v25152_v9, %v18865_v20 }
 0x661   : > { %15611 = vst.msk [vmem:[%s21698_s27 + $0x208] sm:$0xf] %vm13563_vm6, %v15251_v58  ;;  %v15271_v59 = vsel %vm23435_vm1, %v15262_v17, %v15270_v19  ;;  %v16860_v50 = vpack.c.bf16 %v13556_v38, %v13556_v38  ;;  %v13561_v21 = vmul.f32 %v13420_v7, %v12609_v40  ;;  %v18866_v23 = vadd.f32 %v25645_v24, %v25644_v57  ;;  %v15621_v40 = vld [vmem:[%s21698_s27 + $0x230] sm:$0x3] }
 0x662   : > { %15613 = vst.msk [vmem:[%s21698_s27 + $0x210] sm:$0xf] %vm13563_vm6, %v15271_v59  ;;  %v15300_v10 = vor.u32 %v15299_v35, %v15296_v37  ;;  %v12471_v5 = vadd.f32 %v25143_v61, %v12328_v22  ;;  %v18867_v11 = vadd.f32 %v25647_v16, %v25646_v26  ;;  %v15272_v18 = vrot.slane %v15270_v19, 4 }
 0x663   : > { %v15274_v1 = vshrl.u32 %v16860_v50, 16  ;;  %v15277_v49 = vshll.u32 %v16860_v50, 16  ;;  %v16865_v42 = vpack.c.bf16 %v13561_v21, %v13561_v21  ;;  %v12331_v62 = vmul.f32 %v25152_v9, %v18866_v23 }
 0x664   : > { %v15301_v47 = vsel %vm23435_vm1, %v15292_v32, %v15300_v10  ;;  %v12607_v41 = vmax.f32 %v12471_v5, 0.0  ;;  %v12329_v56 = vmul.f32 %v25152_v9, %v18867_v11  ;;  %v13415_v9 = vpop.permute.xlu0 %13414  ;;  %v15302_v29 = vrot.slane %v15300_v10, 4 }
 0x665   : > { %15616 = vst.msk [vmem:[%s21698_s27 + $0x21c] sm:$0xf] %vm13563_vm6, %v15301_v47  ;;  %v15276_v36 = vrot.slane %v15274_v1, 6  ;;  %v15279_v60 = vrot.slane %v15277_v49, 7  ;;  %v15324_v55 = vshrl.u32 %v16865_v42, 16  ;;  %v15327_v15 = vshll.u32 %v16865_v42, 16 }
 0x666   : > { %v13559_v46 = vmul.f32 %v13410_v3, %v12607_v41  ;;  %v12474_v27 = vadd.f32 %v25143_v61, %v12331_v62  ;;  %v12472_v51 = vadd.f32 %v25143_v61, %v12329_v56 }
 0x667   : > { %v15280_v6 = vor.u32 %v15279_v60, %v15276_v36  ;;  %v15326_v31 = vrot.slane %v15324_v55, 6  ;;  %v15329_v4 = vrot.slane %v15327_v15, 7 }
 0x668   : > { %v16863_v63 = vpack.c.bf16 %v13559_v46, %v13559_v46  ;;  %v12610_v17 = vmax.f32 %v12474_v27, 0.0  ;;  %v12608_v25 = vmax.f32 %v12472_v51, 0.0 }
 0x669   : > { %v15281_v28 = vsel %vm23435_vm1, %v15272_v18, %v15280_v6  ;;  %v15282_v0 = vrot.slane %v15280_v6, 4  ;;  %v15330_v34 = vor.u32 %v15329_v4, %v15326_v31 }
 0x66a   : > { %15614 = vst.msk [vmem:[%s21698_s27 + $0x214] sm:$0xf] %vm13563_vm6, %v15281_v28  ;;  %v15304_v33 = vshrl.u32 %v16863_v63, 16  ;;  %v15307_v3 = vshll.u32 %v16863_v63, 16  ;;  %v13562_v52 = vmul.f32 %v25003_v54, %v12610_v17  ;;  %v13560_v39 = vmul.f32 %v13415_v9, %v12608_v25 }
 0x66b   : > { %v15291_v30 = vsel %vm23435_vm1, %v15282_v0, %v15290_v48  ;;  %v15332_v45 = vrot.slane %v15330_v34, 4 }
 0x66c   : > { %15615 = vst.msk [vmem:[%s21698_s27 + $0x218] sm:$0xf] %vm13563_vm6, %v15291_v30  ;;  %v15306_v61 = vrot.slane %v15304_v33, 6  ;;  %v15309_v14 = vrot.slane %v15307_v3, 7  ;;  %v16866_v44 = vpack.c.bf16 %v13562_v52, %v13562_v52  ;;  %v16864_v54 = vpack.c.bf16 %v13560_v39, %v13560_v39 }
 0x66e   : > { %v15310_v53 = vor.u32 %v15309_v14, %v15306_v61  ;;  %v15334_v2 = vshrl.u32 %v16866_v44, 16  ;;  %v15337_v20 = vshll.u32 %v16866_v44, 16  ;;  %v15314_v13 = vshrl.u32 %v16864_v54, 16 }
 0x66f   : > { %v15317_v32 = vshll.u32 %v16864_v54, 16 }
 0x670   : > { %v15311_v12 = vsel %vm23435_vm1, %v15302_v29, %v15310_v53  ;;  %v15336_v48 = vrot.slane %v15334_v2, 6  ;;  %v15339_v43 = vrot.slane %v15337_v20, 7  ;;  %v15312_v38 = vrot.slane %v15310_v53, 4 }
 0x671   : > { %15617 = vst.msk [vmem:[%s21698_s27 + $0x220] sm:$0xf] %vm13563_vm6, %v15311_v12  ;;  %v15316_v7 = vrot.slane %v15314_v13, 6  ;;  %v15319_v58 = vrot.slane %v15317_v32, 7 }
 0x672   : > { %v15340_v19 = vor.u32 %v15339_v43, %v15336_v48 }
 0x673   : > { %v15320_v22 = vor.u32 %v15319_v58, %v15316_v7 }
 0x674   : > { %v15341_v37 = vsel %vm23435_vm1, %v15332_v45, %v15340_v19  ;;  %v15342_v35 = vrot.slane %v15340_v19, 4 }
 0x675   : > { %15620 = vst.msk [vmem:[%s21698_s27 + $0x22c] sm:$0xf] %vm13563_vm6, %v15341_v37  ;;  %v15321_v21 = vsel %vm23435_vm1, %v15312_v38, %v15320_v22  ;;  %v15322_v10 = vrot.slane %v15320_v22, 4 }
 0x676   : > { %v15622_v50 = vsel %vm22924_vm12, %v15342_v35, %v15621_v40  ;;  %15618 = vst.msk [vmem:[%s21698_s27 + $0x224] sm:$0xf] %vm13563_vm6, %v15321_v21 }
 0x677   : > { %15623 = vst [vmem:[%s21698_s27 + $0x230] sm:$0x3] %v15622_v50  ;;  %v15331_v5 = vsel %vm23435_vm1, %v15322_v10, %v15330_v34 }
 0x678   : > { %15619 = vst.msk [vmem:[%s21698_s27 + $0x228] sm:$0xf] %vm13563_vm6, %v15331_v5 }
 0x67e   : > { %v15624_v57 = vld [vmem:[%s21698_s27 + $0x230] sm:$0xe] }
 0x67f   : > { %v15625_v23 = vsel %vm23426_vm0, 0, %v15624_v57 }
 0x680   : > { %15626 = vst [vmem:[%s21698_s27 + $0x230] sm:$0xe] %v15625_v23 }
 0x681 PF: > { %s15_s20 = sadd.s32 1, %s20413_s20   ;;  %s25650_s18 = smov %s20409_s19 }
 0x682   : > { %p12_p5 = scmp.ge.s32.totalorder %s15_s20, 4   ;;  %s25651_s19 = smov %s25653_s21 }
 0x684   :  { %14 = sbr.rel (!%p12_p5) target bundleno = 2 (0x2), region = 87 }

</bundles_post_ra>
